<compile_context>
chip_gen: v5e
topology: v5e:2x2
jax: 0.10.0
libtpu: 0.0.40
codegen_flags: <defaults>
</compile_context>

<pallas_src>
import functools

import numpy as np

import jax
import jax.numpy as jnp
from jax.experimental import pallas as pl
from jax.experimental.pallas import tpu as pltpu


_VMEM = pl.BlockSpec(memory_space=pltpu.MemorySpace.VMEM)

_CONV_SPECS = ((2, 32), (32, 64), (64, 128), (128, 64), (64, 32))
_NUM_ORIENT = 72


# ------------------------- init-time weight folding ------------------------- #

def _fold_conv(w_hwio, wout, pooled):
    """Fold a 3x3 / pad=1 conv (HWIO weights) into 3 slab matrices M[dy].

    The input slab has rows (b, y) and lanes (x_pre, cin).  When `pooled`, x_pre
    is the pre-pool column and the 2x2-pool column selection is folded in here
    (only even pre-pool columns carry data; odd ones get zero rows).  Horizontal
    padding=1 is handled by dropping out-of-range taps.
    """
    cin, cout = w_hwio.shape[2], w_hwio.shape[3]
    stride = 2 if pooled else 1
    win = wout * stride
    m = np.zeros((3, win * cin, wout * cout), np.float32)
    for dy in range(3):
        for x in range(wout):
            for dx in range(3):
                xin = x + dx - 1
                if 0 <= xin < wout:
                    l0 = stride * xin * cin
                    m[dy, l0:l0 + cin, x * cout:(x + 1) * cout] = w_hwio[dy, dx]
    return m


@functools.lru_cache(maxsize=None)
def _pool_row_select(batch, hin):
    """0/1 matrices picking even / odd image rows (2x2-pool row halves)."""
    r = batch * hin // 2
    re = np.zeros((r, batch * hin), np.float32)
    ro = np.zeros_like(re)
    idx = np.arange(r)
    re[idx, 2 * idx] = 1.0
    ro[idx, 2 * idx + 1] = 1.0
    return np.stack([re, ro])


@functools.lru_cache(maxsize=None)
def _row_shift(batch, h):
    """0/1 matrices shifting image rows up / down with zero rows per batch."""
    n = batch * h
    up = np.zeros((n, n), np.float32)
    dn = np.zeros_like(up)
    for b in range(batch):
        for y in range(h):
            if y > 0:
                up[b * h + y, b * h + y - 1] = 1.0
            if y + 1 < h:
                dn[b * h + y, b * h + y + 1] = 1.0
    return np.stack([up, dn])


@functools.lru_cache(maxsize=None)
def _head_row_select(batch, hf):
    s = np.zeros((hf, batch, batch * hf), np.float32)
    for y in range(hf):
        for b in range(batch):
            s[y, b, b * hf + y] = 1.0
    return s


# ------------------------------ fused kernel -------------------------------- #

def _make_kernel(batch, hf, cin_list):
    f32, bf16 = jnp.float32, jnp.bfloat16

    def conv_block(z, ud_ref, m_ref, br_ref):
        # 3x3 conv, pad=1: vertical taps via row-shift matmuls, horizontal taps
        # (and, for pooled stages, the pool column selection) folded into m_ref.
        zu = jnp.dot(ud_ref[0], z, preferred_element_type=f32).astype(bf16)
        zd = jnp.dot(ud_ref[1], z, preferred_element_type=f32).astype(bf16)
        acc = (jnp.dot(zu, m_ref[0], preferred_element_type=f32)
               + jnp.dot(z, m_ref[1], preferred_element_type=f32)
               + jnp.dot(zd, m_ref[2], preferred_element_type=f32))
        return jnp.maximum(acc + br_ref[...], 0.0).astype(bf16)

    def kernel(*refs):
        it = iter(refs)
        x_ref, ex_ref = next(it), next(it)
        stages = [tuple(next(it) for _ in range(4)) for _ in range(len(cin_list))]
        ud5_ref, m5_ref, br5_ref = next(it), next(it), next(it)
        sel_ref, w1a_ref, embw_ref, b1_ref = next(it), next(it), next(it), next(it)
        w2_ref, b2_ref, wc_ref, bc_ref = next(it), next(it), next(it), next(it)
        val_ref, feat_ref = next(it), next(it)

        a = x_ref[...].astype(bf16)                 # (B*H, W*Cin) row slab

        # ---- 4x (MaxPool2d(2) -> Conv3x3 -> ReLU), all VMEM-resident ---- #
        for (rr_ref, ud_ref, m_ref, br_ref), cin in zip(stages, cin_list):
            # pool rows: max of even / odd image rows (0/1 selection matmuls)
            y_e = jnp.dot(rr_ref[0], a, preferred_element_type=f32)
            y_o = jnp.dot(rr_ref[1], a, preferred_element_type=f32)
            y = jnp.maximum(y_e, y_o)
            # pool cols: compare column block x with x+1 (lane shift by cin).
            # Odd-x blocks hold garbage afterwards, but the folded conv matrix
            # has zero rows there, so they never contribute.
            y_sh = jnp.concatenate([y[:, cin:], y[:, :cin]], axis=1)
            z = jnp.maximum(y, y_sh).astype(bf16)
            a = conv_block(z, ud_ref, m_ref, br_ref)

        # ---- Conv3x3 -> ReLU (no pool) ---- #
        a5 = conv_block(a, ud5_ref, m5_ref, br5_ref)   # (B*Hf, Wf*32)

        # ---- head: Flatten (folded into w1a) + embedding + MLP ---- #
        h1 = b1_ref[...]                               # (1, hidden) f32
        for yy in range(hf):
            ay = jnp.dot(sel_ref[yy], a5, preferred_element_type=f32).astype(bf16)
            h1 = h1 + jnp.dot(ay, w1a_ref[yy], preferred_element_type=f32)
        # orientation embedding: in-kernel one-hot (iota compare) against the
        # pre-folded (72, hidden) = Embedding @ linear1[:, -8:] matrix.
        ids = ex_ref[...]                              # (B, 1) int32
        iota = jax.lax.broadcasted_iota(jnp.int32, (batch, _NUM_ORIENT), 1)
        onehot = (iota == ids).astype(bf16)
        h1 = h1 + jnp.dot(onehot, embw_ref[...], preferred_element_type=f32)
        h1 = jnp.maximum(h1, 0.0).astype(bf16)

        h2 = jnp.dot(h1, w2_ref[...], preferred_element_type=f32) + b2_ref[...]
        h2 = jnp.maximum(h2, 0.0)                      # (B, 256) f32

        v = jnp.dot(h2.astype(bf16), wc_ref[...],
                    preferred_element_type=f32) + bc_ref[...]
        val_ref[...] = v.astype(val_ref.dtype)
        feat_ref[...] = h2.astype(feat_ref.dtype)

    return kernel


# --------------------------- forward-pass builder --------------------------- #

def _make_forward(cfg):
    H, W, hidden, cin0 = cfg["H"], cfg["W"], cfg["hidden"], cfg["cin0"]
    hf, wf = H // 16, W // 16
    pooled_specs = _CONV_SPECS[:4]
    cin_list = tuple(c for c, _ in pooled_specs)

    def forward(prm, inputs, rnn_hxs, masks, extras):
        del masks                                   # non-recurrent: unused
        batch = inputs.shape[0]

        # NCHW -> row slab (B*H, W*Cin), lane = x*Cin + c  (one XLA layout op)
        x = jnp.transpose(inputs, (0, 2, 3, 1)).astype(jnp.float32)
        x = x.reshape(batch * H, W * cin0)
        ids = extras.reshape(batch, 1).astype(jnp.int32)

        # batch-dependent 0/1 structural matrices (trace-time constants, tiny)
        rr = [jnp.asarray(_pool_row_select(batch, H >> i), jnp.bfloat16)
              for i in range(4)]
        ud = [jnp.asarray(_row_shift(batch, H >> (i + 1)), jnp.bfloat16)
              for i in range(4)]
        ud5 = jnp.asarray(_row_shift(batch, hf), jnp.bfloat16)
        sel = jnp.asarray(_head_row_select(batch, hf), jnp.bfloat16)

        in_arrays = [x, ids]
        for i in range(4):
            in_arrays += [rr[i], ud[i], prm[f"m{i + 1}"], prm[f"br{i + 1}"]]
        in_arrays += [ud5, prm["m5"], prm["br5"]]
        in_arrays += [sel, prm["w1a"], prm["embw"], prm["b1"],
                      prm["w2"], prm["b2"], prm["wc"], prm["bc"]]

        # advisory cost estimate so XLA schedules around the custom call
        flops = 0
        for i, (cin, cout) in enumerate(pooled_specs):
            hin, win = H >> i, W >> i
            r_in, r_out = batch * hin, batch * (hin // 2)
            wout = win // 2
            flops += 2 * 2 * r_out * r_in * (win * cin)            # pool rows
            flops += 2 * 2 * r_out * r_out * (win * cin)           # row shifts
            flops += 2 * 3 * r_out * (win * cin) * (wout * cout)   # conv
        r5 = batch * hf
        flops += 2 * 2 * r5 * r5 * (wf * 64) + 2 * 3 * r5 * (wf * 64) * (wf * 32)
        flops += hf * (2 * batch * r5 * (wf * 32) + 2 * batch * (wf * 32) * hidden)
        flops += 2 * batch * _NUM_ORIENT * hidden
        flops += 2 * batch * hidden * 256 + 2 * batch * 256
        bytes_accessed = sum(int(np.prod(a.shape)) * a.dtype.itemsize
                             for a in in_arrays) + batch * (1 + 256) * 4

        kernel = _make_kernel(batch, hf, cin_list)
        value, feat = pl.pallas_call(
            kernel,
            out_shape=(jax.ShapeDtypeStruct((batch, 1), jnp.float32),
                       jax.ShapeDtypeStruct((batch, 256), jnp.float32)),
            in_specs=[_VMEM] * len(in_arrays),
            out_specs=(_VMEM, _VMEM),
            cost_estimate=pl.CostEstimate(flops=int(flops), transcendentals=0,
                                          bytes_accessed=int(bytes_accessed)),
        )(*in_arrays)
        return value[:, 0], feat, rnn_hxs

    return jax.jit(forward)


# --------------------------- model (JAX wrapper) ----------------------------- #

class GlobalPolicyPallas:
    """JAX/Pallas re-implementation of Global_Policy.forward (non-recurrent)."""
    # TODO(synk): the recurrent GRU branch (is_recurrent=True) is not implemented.

    def __init__(self, input_shape, hidden_size=128, input_channels=2, key=None):
        if key is None:
            key = jax.random.PRNGKey(0)
        c, h, w = input_shape
        assert c == input_channels and h % 16 == 0 and w % 16 == 0
        self.hidden_size = hidden_size
        hf, wf = h // 16, w // 16
        flat_dim = hf * wf * 32

        keys = jax.random.split(key, 2 * len(_CONV_SPECS) + 7)
        ki = iter(range(len(keys)))
        params = {}

        # conv stack (PyTorch Conv2d-style init), folded into slab matrices
        for i, (cin, cout) in enumerate(_CONV_SPECS):
            bound = 1.0 / np.sqrt(9 * cin)
            wgt = jax.random.uniform(keys[next(ki)], (3, 3, cin, cout),
                                     jnp.float32, -bound, bound)        # HWIO
            bias = jax.random.uniform(keys[next(ki)], (cout,),
                                      jnp.float32, -bound, bound)
            pooled = i < 4
            wout = (w >> (i + 1)) if pooled else wf
            m = _fold_conv(np.asarray(wgt), wout, pooled)
            params[f"m{i + 1}"] = jnp.asarray(m, jnp.bfloat16)
            params[f"br{i + 1}"] = jnp.asarray(
                np.tile(np.asarray(bias), wout)[None, :], jnp.float32)

        # head (linear weights uniform(+-0.003) as in the reference RL code)
        def unif(k, shape, bound):
            return np.asarray(
                jax.random.uniform(k, shape, jnp.float32, -bound, bound))

        l1w = unif(keys[next(ki)], (hidden_size, flat_dim + 8), 0.003)
        l1b = unif(keys[next(ki)], (hidden_size,), 1.0 / np.sqrt(flat_dim + 8))
        l2w = unif(keys[next(ki)], (256, hidden_size), 0.003)
        l2b = unif(keys[next(ki)], (256,), 1.0 / np.sqrt(hidden_size))
        lcw = unif(keys[next(ki)], (1, 256), 0.003)
        lcb = unif(keys[next(ki)], (1,), 1.0 / np.sqrt(256.0))
        emb = np.asarray(jax.random.normal(keys[next(ki)], (_NUM_ORIENT, 8),
                                           jnp.float32))

        w1t = l1w.T                                  # (flat_dim + 8, hidden)
        # fold the PyTorch NCHW Flatten() permutation into linear1's conv part
        w1a = (w1t[:flat_dim].reshape(32, hf, wf, hidden_size)
               .transpose(1, 2, 0, 3).reshape(hf, wf * 32, hidden_size))
        params["w1a"] = jnp.asarray(w1a, jnp.bfloat16)
        # fold Embedding @ linear1[:, -8:] into one (72, hidden) matrix
        params["embw"] = jnp.asarray(emb @ w1t[flat_dim:], jnp.bfloat16)
        params["b1"] = jnp.asarray(l1b[None, :], jnp.float32)
        params["w2"] = jnp.asarray(l2w.T, jnp.bfloat16)
        params["b2"] = jnp.asarray(l2b[None, :], jnp.float32)
        params["wc"] = jnp.asarray(lcw.T, jnp.bfloat16)
        params["bc"] = jnp.asarray(lcb[None, :], jnp.float32)

        self._params = params
        self._fwd = _make_forward(
            dict(H=h, W=w, hidden=hidden_size, cin0=input_channels))

    def __call__(self, inputs, rnn_hxs, masks, extras):
        return self._fwd(self._params, inputs, rnn_hxs, masks, extras)


class RLPolicyPallas:
    """Mirror of RL_Policy.forward (model_type=0 -> 2 input channels)."""
    # TODO(synk): act()/evaluate_actions() use a Categorical dist head that is
    # not part of forward(); only forward() is implemented here.

    def __init__(self, obs_shape, num_actions=4, model_type=0, hidden_size=128,
                 key=None):
        assert model_type == 0
        self.network = GlobalPolicyPallas(obs_shape, hidden_size=hidden_size,
                                          input_channels=2, key=key)

    def __call__(self, inputs, rnn_hxs, masks, extras):
        return self.network(inputs, rnn_hxs, masks, extras)


# ---------------------------------- main ------------------------------------ #

if __name__ == "__main__":
    key = jax.random.PRNGKey(0)
    k_in, k_ex, k_model = jax.random.split(key, 3)

    B = 2
    obs_shape = (2, 32, 32)            # (C, H, W); out_size = 32/16 * 32/16 = 4
    hidden_size = 128

    inputs = jax.random.uniform(k_in, (B,) + obs_shape, jnp.float32)      # NCHW
    rnn_hxs = jnp.zeros((B, hidden_size), jnp.float32)
    masks = jnp.ones((B, 1), jnp.float32)
    extras = jax.random.randint(k_ex, (B, 1), 0, 72, jnp.int32)

    policy = RLPolicyPallas(obs_shape, model_type=0, hidden_size=hidden_size,
                            key=k_model)

    value, actor_features, rnn_hxs_out = policy(inputs, rnn_hxs, masks, extras)
    value = jax.block_until_ready(value)
    actor_features = jax.block_until_ready(actor_features)
    rnn_hxs_out = jax.block_until_ready(rnn_hxs_out)

    assert value.shape == (B,)
    assert actor_features.shape == (B, 256)
    assert rnn_hxs_out.shape == (B, hidden_size)
    assert bool(jnp.all(jnp.isfinite(value)))
    assert bool(jnp.all(jnp.isfinite(actor_features)))

    print("KERNEL_OK")
</pallas_src>

<mosaic_0001>
module attributes {stable_mosaic.version = 11 : i64} {
  func.func @kernel(%arg0: memref<64x64xf32, #tpu.memory_space<vmem>>, %arg1: memref<2x1xi32, #tpu.memory_space<vmem>>, %arg2: memref<2x32x64xbf16, #tpu.memory_space<vmem>>, %arg3: memref<2x32x32xbf16, #tpu.memory_space<vmem>>, %arg4: memref<3x64x512xbf16, #tpu.memory_space<vmem>>, %arg5: memref<1x512xf32, #tpu.memory_space<vmem>>, %arg6: memref<2x16x32xbf16, #tpu.memory_space<vmem>>, %arg7: memref<2x16x16xbf16, #tpu.memory_space<vmem>>, %arg8: memref<3x512x512xbf16, #tpu.memory_space<vmem>>, %arg9: memref<1x512xf32, #tpu.memory_space<vmem>>, %arg10: memref<2x8x16xbf16, #tpu.memory_space<vmem>>, %arg11: memref<2x8x8xbf16, #tpu.memory_space<vmem>>, %arg12: memref<3x512x512xbf16, #tpu.memory_space<vmem>>, %arg13: memref<1x512xf32, #tpu.memory_space<vmem>>, %arg14: memref<2x4x8xbf16, #tpu.memory_space<vmem>>, %arg15: memref<2x4x4xbf16, #tpu.memory_space<vmem>>, %arg16: memref<3x512x128xbf16, #tpu.memory_space<vmem>>, %arg17: memref<1x128xf32, #tpu.memory_space<vmem>>, %arg18: memref<2x4x4xbf16, #tpu.memory_space<vmem>>, %arg19: memref<3x128x64xbf16, #tpu.memory_space<vmem>>, %arg20: memref<1x64xf32, #tpu.memory_space<vmem>>, %arg21: memref<2x2x4xbf16, #tpu.memory_space<vmem>>, %arg22: memref<2x64x128xbf16, #tpu.memory_space<vmem>>, %arg23: memref<72x128xbf16, #tpu.memory_space<vmem>>, %arg24: memref<1x128xf32, #tpu.memory_space<vmem>>, %arg25: memref<128x256xbf16, #tpu.memory_space<vmem>>, %arg26: memref<1x256xf32, #tpu.memory_space<vmem>>, %arg27: memref<256x1xbf16, #tpu.memory_space<vmem>>, %arg28: memref<1x1xf32, #tpu.memory_space<vmem>>, %arg29: memref<2x1xf32, #tpu.memory_space<vmem>>, %arg30: memref<2x256xf32, #tpu.memory_space<vmem>>) attributes {dimension_semantics = [], scalar_prefetch = 0 : i64, scratch_operands = 0 : i64, tpu.core_type = #tpu.core_type<tc>} {
    %c0 = arith.constant 0 : index
    %c0_0 = arith.constant 0 : index
    %0 = vector.load %arg0[%c0, %c0_0] : memref<64x64xf32, #tpu.memory_space<vmem>>, vector<64x64xf32>
    %1 = arith.truncf %0 : vector<64x64xf32> to vector<64x64xbf16>
    %c0_1 = arith.constant 0 : index
    %c0_2 = arith.constant 0 : index
    %c0_3 = arith.constant 0 : index
    %2 = vector.load %arg2[%c0_1, %c0_2, %c0_3] : memref<2x32x64xbf16, #tpu.memory_space<vmem>>, vector<1x32x64xbf16>
    %3 = vector.shape_cast %2 : vector<1x32x64xbf16> to vector<32x64xbf16>
    %cst = arith.constant dense<0.000000e+00> : vector<32x64xf32>
    %4 = tpu.matmul %3, %1, %cst {dimension_numbers = #tpu.dot_dimension_numbers<[1], [0], [0], [1], [0, 0, 1, 1], [], []>} : vector<32x64xbf16>, vector<64x64xbf16>, vector<32x64xf32> -> vector<32x64xf32>
    %c1 = arith.constant 1 : index
    %c0_4 = arith.constant 0 : index
    %c0_5 = arith.constant 0 : index
    %5 = vector.load %arg2[%c1, %c0_4, %c0_5] : memref<2x32x64xbf16, #tpu.memory_space<vmem>>, vector<1x32x64xbf16>
    %6 = vector.shape_cast %5 : vector<1x32x64xbf16> to vector<32x64xbf16>
    %cst_6 = arith.constant dense<0.000000e+00> : vector<32x64xf32>
    %7 = tpu.matmul %6, %1, %cst_6 {dimension_numbers = #tpu.dot_dimension_numbers<[1], [0], [0], [1], [0, 0, 1, 1], [], []>} : vector<32x64xbf16>, vector<64x64xbf16>, vector<32x64xf32> -> vector<32x64xf32>
    %8 = arith.maximumf %4, %7 : vector<32x64xf32>
    %9 = vector.extract_strided_slice %8 {offsets = [0, 2], sizes = [32, 62], strides = [1, 1]} : vector<32x64xf32> to vector<32x62xf32>
    %10 = vector.extract_strided_slice %8 {offsets = [0, 0], sizes = [32, 2], strides = [1, 1]} : vector<32x64xf32> to vector<32x2xf32>
    %11 = tpu.concatenate %9, %10 in 1 : vector<32x62xf32>, vector<32x2xf32> -> vector<32x64xf32>
    %12 = arith.maximumf %8, %11 : vector<32x64xf32>
    %13 = arith.truncf %12 : vector<32x64xf32> to vector<32x64xbf16>
    %c0_7 = arith.constant 0 : index
    %c0_8 = arith.constant 0 : index
    %c0_9 = arith.constant 0 : index
    %14 = vector.load %arg3[%c0_7, %c0_8, %c0_9] : memref<2x32x32xbf16, #tpu.memory_space<vmem>>, vector<1x32x32xbf16>
    %15 = vector.shape_cast %14 : vector<1x32x32xbf16> to vector<32x32xbf16>
    %cst_10 = arith.constant dense<0.000000e+00> : vector<32x64xf32>
    %16 = tpu.matmul %15, %13, %cst_10 {dimension_numbers = #tpu.dot_dimension_numbers<[1], [0], [0], [1], [0, 0, 1, 1], [], []>} : vector<32x32xbf16>, vector<32x64xbf16>, vector<32x64xf32> -> vector<32x64xf32>
    %17 = arith.truncf %16 : vector<32x64xf32> to vector<32x64xbf16>
    %c1_11 = arith.constant 1 : index
    %c0_12 = arith.constant 0 : index
    %c0_13 = arith.constant 0 : index
    %18 = vector.load %arg3[%c1_11, %c0_12, %c0_13] : memref<2x32x32xbf16, #tpu.memory_space<vmem>>, vector<1x32x32xbf16>
    %19 = vector.shape_cast %18 : vector<1x32x32xbf16> to vector<32x32xbf16>
    %cst_14 = arith.constant dense<0.000000e+00> : vector<32x64xf32>
    %20 = tpu.matmul %19, %13, %cst_14 {dimension_numbers = #tpu.dot_dimension_numbers<[1], [0], [0], [1], [0, 0, 1, 1], [], []>} : vector<32x32xbf16>, vector<32x64xbf16>, vector<32x64xf32> -> vector<32x64xf32>
    %21 = arith.truncf %20 : vector<32x64xf32> to vector<32x64xbf16>
    %c0_15 = arith.constant 0 : index
    %c0_16 = arith.constant 0 : index
    %c0_17 = arith.constant 0 : index
    %22 = vector.load %arg4[%c0_15, %c0_16, %c0_17] : memref<3x64x512xbf16, #tpu.memory_space<vmem>>, vector<1x64x512xbf16>
    %23 = vector.shape_cast %22 : vector<1x64x512xbf16> to vector<64x512xbf16>
    %cst_18 = arith.constant dense<0.000000e+00> : vector<32x512xf32>
    %24 = tpu.matmul %17, %23, %cst_18 {dimension_numbers = #tpu.dot_dimension_numbers<[1], [0], [0], [1], [0, 0, 1, 1], [], []>} : vector<32x64xbf16>, vector<64x512xbf16>, vector<32x512xf32> -> vector<32x512xf32>
    %c1_19 = arith.constant 1 : index
    %c0_20 = arith.constant 0 : index
    %c0_21 = arith.constant 0 : index
    %25 = vector.load %arg4[%c1_19, %c0_20, %c0_21] : memref<3x64x512xbf16, #tpu.memory_space<vmem>>, vector<1x64x512xbf16>
    %26 = vector.shape_cast %25 : vector<1x64x512xbf16> to vector<64x512xbf16>
    %cst_22 = arith.constant dense<0.000000e+00> : vector<32x512xf32>
    %27 = tpu.matmul %13, %26, %cst_22 {dimension_numbers = #tpu.dot_dimension_numbers<[1], [0], [0], [1], [0, 0, 1, 1], [], []>} : vector<32x64xbf16>, vector<64x512xbf16>, vector<32x512xf32> -> vector<32x512xf32>
    %28 = arith.addf %24, %27 : vector<32x512xf32>
    %c2 = arith.constant 2 : index
    %c0_23 = arith.constant 0 : index
    %c0_24 = arith.constant 0 : index
    %29 = vector.load %arg4[%c2, %c0_23, %c0_24] : memref<3x64x512xbf16, #tpu.memory_space<vmem>>, vector<1x64x512xbf16>
    %30 = vector.shape_cast %29 : vector<1x64x512xbf16> to vector<64x512xbf16>
    %cst_25 = arith.constant dense<0.000000e+00> : vector<32x512xf32>
    %31 = tpu.matmul %21, %30, %cst_25 {dimension_numbers = #tpu.dot_dimension_numbers<[1], [0], [0], [1], [0, 0, 1, 1], [], []>} : vector<32x64xbf16>, vector<64x512xbf16>, vector<32x512xf32> -> vector<32x512xf32>
    %32 = arith.addf %28, %31 : vector<32x512xf32>
    %c0_26 = arith.constant 0 : index
    %c0_27 = arith.constant 0 : index
    %33 = vector.load %arg5[%c0_26, %c0_27] : memref<1x512xf32, #tpu.memory_space<vmem>>, vector<1x512xf32>
    %34 = vector.broadcast %33 : vector<1x512xf32> to vector<32x512xf32>
    %35 = arith.addf %32, %34 : vector<32x512xf32>
    %cst_28 = arith.constant 0.000000e+00 : f32
    %36 = vector.broadcast %cst_28 : f32 to vector<32x512xf32>
    %37 = arith.maximumf %35, %36 : vector<32x512xf32>
    %38 = arith.truncf %37 : vector<32x512xf32> to vector<32x512xbf16>
    %c0_29 = arith.constant 0 : index
    %c0_30 = arith.constant 0 : index
    %c0_31 = arith.constant 0 : index
    %39 = vector.load %arg6[%c0_29, %c0_30, %c0_31] : memref<2x16x32xbf16, #tpu.memory_space<vmem>>, vector<1x16x32xbf16>
    %40 = vector.shape_cast %39 : vector<1x16x32xbf16> to vector<16x32xbf16>
    %cst_32 = arith.constant dense<0.000000e+00> : vector<16x512xf32>
    %41 = tpu.matmul %40, %38, %cst_32 {dimension_numbers = #tpu.dot_dimension_numbers<[1], [0], [0], [1], [0, 0, 1, 1], [], []>} : vector<16x32xbf16>, vector<32x512xbf16>, vector<16x512xf32> -> vector<16x512xf32>
    %c1_33 = arith.constant 1 : index
    %c0_34 = arith.constant 0 : index
    %c0_35 = arith.constant 0 : index
    %42 = vector.load %arg6[%c1_33, %c0_34, %c0_35] : memref<2x16x32xbf16, #tpu.memory_space<vmem>>, vector<1x16x32xbf16>
    %43 = vector.shape_cast %42 : vector<1x16x32xbf16> to vector<16x32xbf16>
    %cst_36 = arith.constant dense<0.000000e+00> : vector<16x512xf32>
    %44 = tpu.matmul %43, %38, %cst_36 {dimension_numbers = #tpu.dot_dimension_numbers<[1], [0], [0], [1], [0, 0, 1, 1], [], []>} : vector<16x32xbf16>, vector<32x512xbf16>, vector<16x512xf32> -> vector<16x512xf32>
    %45 = arith.maximumf %41, %44 : vector<16x512xf32>
    %46 = vector.extract_strided_slice %45 {offsets = [0, 32], sizes = [16, 480], strides = [1, 1]} : vector<16x512xf32> to vector<16x480xf32>
    %47 = vector.extract_strided_slice %45 {offsets = [0, 0], sizes = [16, 32], strides = [1, 1]} : vector<16x512xf32> to vector<16x32xf32>
    %48 = tpu.concatenate %46, %47 in 1 : vector<16x480xf32>, vector<16x32xf32> -> vector<16x512xf32>
    %49 = arith.maximumf %45, %48 : vector<16x512xf32>
    %50 = arith.truncf %49 : vector<16x512xf32> to vector<16x512xbf16>
    %c0_37 = arith.constant 0 : index
    %c0_38 = arith.constant 0 : index
    %c0_39 = arith.constant 0 : index
    %51 = vector.load %arg7[%c0_37, %c0_38, %c0_39] : memref<2x16x16xbf16, #tpu.memory_space<vmem>>, vector<1x16x16xbf16>
    %52 = vector.shape_cast %51 : vector<1x16x16xbf16> to vector<16x16xbf16>
    %cst_40 = arith.constant dense<0.000000e+00> : vector<16x512xf32>
    %53 = tpu.matmul %52, %50, %cst_40 {dimension_numbers = #tpu.dot_dimension_numbers<[1], [0], [0], [1], [0, 0, 1, 1], [], []>} : vector<16x16xbf16>, vector<16x512xbf16>, vector<16x512xf32> -> vector<16x512xf32>
    %54 = arith.truncf %53 : vector<16x512xf32> to vector<16x512xbf16>
    %c1_41 = arith.constant 1 : index
    %c0_42 = arith.constant 0 : index
    %c0_43 = arith.constant 0 : index
    %55 = vector.load %arg7[%c1_41, %c0_42, %c0_43] : memref<2x16x16xbf16, #tpu.memory_space<vmem>>, vector<1x16x16xbf16>
    %56 = vector.shape_cast %55 : vector<1x16x16xbf16> to vector<16x16xbf16>
    %cst_44 = arith.constant dense<0.000000e+00> : vector<16x512xf32>
    %57 = tpu.matmul %56, %50, %cst_44 {dimension_numbers = #tpu.dot_dimension_numbers<[1], [0], [0], [1], [0, 0, 1, 1], [], []>} : vector<16x16xbf16>, vector<16x512xbf16>, vector<16x512xf32> -> vector<16x512xf32>
    %58 = arith.truncf %57 : vector<16x512xf32> to vector<16x512xbf16>
    %c0_45 = arith.constant 0 : index
    %c0_46 = arith.constant 0 : index
    %c0_47 = arith.constant 0 : index
    %59 = vector.load %arg8[%c0_45, %c0_46, %c0_47] : memref<3x512x512xbf16, #tpu.memory_space<vmem>>, vector<1x512x512xbf16>
    %60 = vector.shape_cast %59 : vector<1x512x512xbf16> to vector<512x512xbf16>
    %cst_48 = arith.constant dense<0.000000e+00> : vector<16x512xf32>
    %61 = tpu.matmul %54, %60, %cst_48 {dimension_numbers = #tpu.dot_dimension_numbers<[1], [0], [0], [1], [0, 0, 1, 1], [], []>} : vector<16x512xbf16>, vector<512x512xbf16>, vector<16x512xf32> -> vector<16x512xf32>
    %c1_49 = arith.constant 1 : index
    %c0_50 = arith.constant 0 : index
    %c0_51 = arith.constant 0 : index
    %62 = vector.load %arg8[%c1_49, %c0_50, %c0_51] : memref<3x512x512xbf16, #tpu.memory_space<vmem>>, vector<1x512x512xbf16>
    %63 = vector.shape_cast %62 : vector<1x512x512xbf16> to vector<512x512xbf16>
    %cst_52 = arith.constant dense<0.000000e+00> : vector<16x512xf32>
    %64 = tpu.matmul %50, %63, %cst_52 {dimension_numbers = #tpu.dot_dimension_numbers<[1], [0], [0], [1], [0, 0, 1, 1], [], []>} : vector<16x512xbf16>, vector<512x512xbf16>, vector<16x512xf32> -> vector<16x512xf32>
    %65 = arith.addf %61, %64 : vector<16x512xf32>
    %c2_53 = arith.constant 2 : index
    %c0_54 = arith.constant 0 : index
    %c0_55 = arith.constant 0 : index
    %66 = vector.load %arg8[%c2_53, %c0_54, %c0_55] : memref<3x512x512xbf16, #tpu.memory_space<vmem>>, vector<1x512x512xbf16>
    %67 = vector.shape_cast %66 : vector<1x512x512xbf16> to vector<512x512xbf16>
    %cst_56 = arith.constant dense<0.000000e+00> : vector<16x512xf32>
    %68 = tpu.matmul %58, %67, %cst_56 {dimension_numbers = #tpu.dot_dimension_numbers<[1], [0], [0], [1], [0, 0, 1, 1], [], []>} : vector<16x512xbf16>, vector<512x512xbf16>, vector<16x512xf32> -> vector<16x512xf32>
    %69 = arith.addf %65, %68 : vector<16x512xf32>
    %c0_57 = arith.constant 0 : index
    %c0_58 = arith.constant 0 : index
    %70 = vector.load %arg9[%c0_57, %c0_58] : memref<1x512xf32, #tpu.memory_space<vmem>>, vector<1x512xf32>
    %71 = vector.broadcast %70 : vector<1x512xf32> to vector<16x512xf32>
    %72 = arith.addf %69, %71 : vector<16x512xf32>
    %cst_59 = arith.constant 0.000000e+00 : f32
    %73 = vector.broadcast %cst_59 : f32 to vector<16x512xf32>
    %74 = arith.maximumf %72, %73 : vector<16x512xf32>
    %75 = arith.truncf %74 : vector<16x512xf32> to vector<16x512xbf16>
    %c0_60 = arith.constant 0 : index
    %c0_61 = arith.constant 0 : index
    %c0_62 = arith.constant 0 : index
    %76 = vector.load %arg10[%c0_60, %c0_61, %c0_62] : memref<2x8x16xbf16, #tpu.memory_space<vmem>>, vector<1x8x16xbf16>
    %77 = vector.shape_cast %76 : vector<1x8x16xbf16> to vector<8x16xbf16>
    %cst_63 = arith.constant dense<0.000000e+00> : vector<8x512xf32>
    %78 = tpu.matmul %77, %75, %cst_63 {dimension_numbers = #tpu.dot_dimension_numbers<[1], [0], [0], [1], [0, 0, 1, 1], [], []>} : vector<8x16xbf16>, vector<16x512xbf16>, vector<8x512xf32> -> vector<8x512xf32>
    %c1_64 = arith.constant 1 : index
    %c0_65 = arith.constant 0 : index
    %c0_66 = arith.constant 0 : index
    %79 = vector.load %arg10[%c1_64, %c0_65, %c0_66] : memref<2x8x16xbf16, #tpu.memory_space<vmem>>, vector<1x8x16xbf16>
    %80 = vector.shape_cast %79 : vector<1x8x16xbf16> to vector<8x16xbf16>
    %cst_67 = arith.constant dense<0.000000e+00> : vector<8x512xf32>
    %81 = tpu.matmul %80, %75, %cst_67 {dimension_numbers = #tpu.dot_dimension_numbers<[1], [0], [0], [1], [0, 0, 1, 1], [], []>} : vector<8x16xbf16>, vector<16x512xbf16>, vector<8x512xf32> -> vector<8x512xf32>
    %82 = arith.maximumf %78, %81 : vector<8x512xf32>
    %83 = vector.extract_strided_slice %82 {offsets = [0, 64], sizes = [8, 448], strides = [1, 1]} : vector<8x512xf32> to vector<8x448xf32>
    %84 = vector.extract_strided_slice %82 {offsets = [0, 0], sizes = [8, 64], strides = [1, 1]} : vector<8x512xf32> to vector<8x64xf32>
    %85 = tpu.concatenate %83, %84 in 1 : vector<8x448xf32>, vector<8x64xf32> -> vector<8x512xf32>
    %86 = arith.maximumf %82, %85 : vector<8x512xf32>
    %87 = arith.truncf %86 : vector<8x512xf32> to vector<8x512xbf16>
    %c0_68 = arith.constant 0 : index
    %c0_69 = arith.constant 0 : index
    %c0_70 = arith.constant 0 : index
    %88 = vector.load %arg11[%c0_68, %c0_69, %c0_70] : memref<2x8x8xbf16, #tpu.memory_space<vmem>>, vector<1x8x8xbf16>
    %89 = vector.shape_cast %88 : vector<1x8x8xbf16> to vector<8x8xbf16>
    %cst_71 = arith.constant dense<0.000000e+00> : vector<8x512xf32>
    %90 = tpu.matmul %89, %87, %cst_71 {dimension_numbers = #tpu.dot_dimension_numbers<[1], [0], [0], [1], [0, 0, 1, 1], [], []>} : vector<8x8xbf16>, vector<8x512xbf16>, vector<8x512xf32> -> vector<8x512xf32>
    %91 = arith.truncf %90 : vector<8x512xf32> to vector<8x512xbf16>
    %c1_72 = arith.constant 1 : index
    %c0_73 = arith.constant 0 : index
    %c0_74 = arith.constant 0 : index
    %92 = vector.load %arg11[%c1_72, %c0_73, %c0_74] : memref<2x8x8xbf16, #tpu.memory_space<vmem>>, vector<1x8x8xbf16>
    %93 = vector.shape_cast %92 : vector<1x8x8xbf16> to vector<8x8xbf16>
    %cst_75 = arith.constant dense<0.000000e+00> : vector<8x512xf32>
    %94 = tpu.matmul %93, %87, %cst_75 {dimension_numbers = #tpu.dot_dimension_numbers<[1], [0], [0], [1], [0, 0, 1, 1], [], []>} : vector<8x8xbf16>, vector<8x512xbf16>, vector<8x512xf32> -> vector<8x512xf32>
    %95 = arith.truncf %94 : vector<8x512xf32> to vector<8x512xbf16>
    %c0_76 = arith.constant 0 : index
    %c0_77 = arith.constant 0 : index
    %c0_78 = arith.constant 0 : index
    %96 = vector.load %arg12[%c0_76, %c0_77, %c0_78] : memref<3x512x512xbf16, #tpu.memory_space<vmem>>, vector<1x512x512xbf16>
    %97 = vector.shape_cast %96 : vector<1x512x512xbf16> to vector<512x512xbf16>
    %cst_79 = arith.constant dense<0.000000e+00> : vector<8x512xf32>
    %98 = tpu.matmul %91, %97, %cst_79 {dimension_numbers = #tpu.dot_dimension_numbers<[1], [0], [0], [1], [0, 0, 1, 1], [], []>} : vector<8x512xbf16>, vector<512x512xbf16>, vector<8x512xf32> -> vector<8x512xf32>
    %c1_80 = arith.constant 1 : index
    %c0_81 = arith.constant 0 : index
    %c0_82 = arith.constant 0 : index
    %99 = vector.load %arg12[%c1_80, %c0_81, %c0_82] : memref<3x512x512xbf16, #tpu.memory_space<vmem>>, vector<1x512x512xbf16>
    %100 = vector.shape_cast %99 : vector<1x512x512xbf16> to vector<512x512xbf16>
    %cst_83 = arith.constant dense<0.000000e+00> : vector<8x512xf32>
    %101 = tpu.matmul %87, %100, %cst_83 {dimension_numbers = #tpu.dot_dimension_numbers<[1], [0], [0], [1], [0, 0, 1, 1], [], []>} : vector<8x512xbf16>, vector<512x512xbf16>, vector<8x512xf32> -> vector<8x512xf32>
    %102 = arith.addf %98, %101 : vector<8x512xf32>
    %c2_84 = arith.constant 2 : index
    %c0_85 = arith.constant 0 : index
    %c0_86 = arith.constant 0 : index
    %103 = vector.load %arg12[%c2_84, %c0_85, %c0_86] : memref<3x512x512xbf16, #tpu.memory_space<vmem>>, vector<1x512x512xbf16>
    %104 = vector.shape_cast %103 : vector<1x512x512xbf16> to vector<512x512xbf16>
    %cst_87 = arith.constant dense<0.000000e+00> : vector<8x512xf32>
    %105 = tpu.matmul %95, %104, %cst_87 {dimension_numbers = #tpu.dot_dimension_numbers<[1], [0], [0], [1], [0, 0, 1, 1], [], []>} : vector<8x512xbf16>, vector<512x512xbf16>, vector<8x512xf32> -> vector<8x512xf32>
    %106 = arith.addf %102, %105 : vector<8x512xf32>
    %c0_88 = arith.constant 0 : index
    %c0_89 = arith.constant 0 : index
    %107 = vector.load %arg13[%c0_88, %c0_89] : memref<1x512xf32, #tpu.memory_space<vmem>>, vector<1x512xf32>
    %108 = vector.broadcast %107 : vector<1x512xf32> to vector<8x512xf32>
    %109 = arith.addf %106, %108 : vector<8x512xf32>
    %cst_90 = arith.constant 0.000000e+00 : f32
    %110 = vector.broadcast %cst_90 : f32 to vector<8x512xf32>
    %111 = arith.maximumf %109, %110 : vector<8x512xf32>
    %112 = arith.truncf %111 : vector<8x512xf32> to vector<8x512xbf16>
    %c0_91 = arith.constant 0 : index
    %c0_92 = arith.constant 0 : index
    %c0_93 = arith.constant 0 : index
    %113 = vector.load %arg14[%c0_91, %c0_92, %c0_93] : memref<2x4x8xbf16, #tpu.memory_space<vmem>>, vector<1x4x8xbf16>
    %114 = vector.shape_cast %113 : vector<1x4x8xbf16> to vector<4x8xbf16>
    %cst_94 = arith.constant dense<0.000000e+00> : vector<4x512xf32>
    %115 = tpu.matmul %114, %112, %cst_94 {dimension_numbers = #tpu.dot_dimension_numbers<[1], [0], [0], [1], [0, 0, 1, 1], [], []>} : vector<4x8xbf16>, vector<8x512xbf16>, vector<4x512xf32> -> vector<4x512xf32>
    %c1_95 = arith.constant 1 : index
    %c0_96 = arith.constant 0 : index
    %c0_97 = arith.constant 0 : index
    %116 = vector.load %arg14[%c1_95, %c0_96, %c0_97] : memref<2x4x8xbf16, #tpu.memory_space<vmem>>, vector<1x4x8xbf16>
    %117 = vector.shape_cast %116 : vector<1x4x8xbf16> to vector<4x8xbf16>
    %cst_98 = arith.constant dense<0.000000e+00> : vector<4x512xf32>
    %118 = tpu.matmul %117, %112, %cst_98 {dimension_numbers = #tpu.dot_dimension_numbers<[1], [0], [0], [1], [0, 0, 1, 1], [], []>} : vector<4x8xbf16>, vector<8x512xbf16>, vector<4x512xf32> -> vector<4x512xf32>
    %119 = arith.maximumf %115, %118 : vector<4x512xf32>
    %120 = vector.extract_strided_slice %119 {offsets = [0, 128], sizes = [4, 384], strides = [1, 1]} : vector<4x512xf32> to vector<4x384xf32>
    %121 = vector.extract_strided_slice %119 {offsets = [0, 0], sizes = [4, 128], strides = [1, 1]} : vector<4x512xf32> to vector<4x128xf32>
    %122 = tpu.concatenate %120, %121 in 1 : vector<4x384xf32>, vector<4x128xf32> -> vector<4x512xf32>
    %123 = arith.maximumf %119, %122 : vector<4x512xf32>
    %124 = arith.truncf %123 : vector<4x512xf32> to vector<4x512xbf16>
    %c0_99 = arith.constant 0 : index
    %c0_100 = arith.constant 0 : index
    %c0_101 = arith.constant 0 : index
    %125 = vector.load %arg15[%c0_99, %c0_100, %c0_101] : memref<2x4x4xbf16, #tpu.memory_space<vmem>>, vector<1x4x4xbf16>
    %126 = vector.shape_cast %125 : vector<1x4x4xbf16> to vector<4x4xbf16>
    %cst_102 = arith.constant dense<0.000000e+00> : vector<4x512xf32>
    %127 = tpu.matmul %126, %124, %cst_102 {dimension_numbers = #tpu.dot_dimension_numbers<[1], [0], [0], [1], [0, 0, 1, 1], [], []>} : vector<4x4xbf16>, vector<4x512xbf16>, vector<4x512xf32> -> vector<4x512xf32>
    %128 = arith.truncf %127 : vector<4x512xf32> to vector<4x512xbf16>
    %c1_103 = arith.constant 1 : index
    %c0_104 = arith.constant 0 : index
    %c0_105 = arith.constant 0 : index
    %129 = vector.load %arg15[%c1_103, %c0_104, %c0_105] : memref<2x4x4xbf16, #tpu.memory_space<vmem>>, vector<1x4x4xbf16>
    %130 = vector.shape_cast %129 : vector<1x4x4xbf16> to vector<4x4xbf16>
    %cst_106 = arith.constant dense<0.000000e+00> : vector<4x512xf32>
    %131 = tpu.matmul %130, %124, %cst_106 {dimension_numbers = #tpu.dot_dimension_numbers<[1], [0], [0], [1], [0, 0, 1, 1], [], []>} : vector<4x4xbf16>, vector<4x512xbf16>, vector<4x512xf32> -> vector<4x512xf32>
    %132 = arith.truncf %131 : vector<4x512xf32> to vector<4x512xbf16>
    %c0_107 = arith.constant 0 : index
    %c0_108 = arith.constant 0 : index
    %c0_109 = arith.constant 0 : index
    %133 = vector.load %arg16[%c0_107, %c0_108, %c0_109] : memref<3x512x128xbf16, #tpu.memory_space<vmem>>, vector<1x512x128xbf16>
    %134 = vector.shape_cast %133 : vector<1x512x128xbf16> to vector<512x128xbf16>
    %cst_110 = arith.constant dense<0.000000e+00> : vector<4x128xf32>
    %135 = tpu.matmul %128, %134, %cst_110 {dimension_numbers = #tpu.dot_dimension_numbers<[1], [0], [0], [1], [0, 0, 1, 1], [], []>} : vector<4x512xbf16>, vector<512x128xbf16>, vector<4x128xf32> -> vector<4x128xf32>
    %c1_111 = arith.constant 1 : index
    %c0_112 = arith.constant 0 : index
    %c0_113 = arith.constant 0 : index
    %136 = vector.load %arg16[%c1_111, %c0_112, %c0_113] : memref<3x512x128xbf16, #tpu.memory_space<vmem>>, vector<1x512x128xbf16>
    %137 = vector.shape_cast %136 : vector<1x512x128xbf16> to vector<512x128xbf16>
    %cst_114 = arith.constant dense<0.000000e+00> : vector<4x128xf32>
    %138 = tpu.matmul %124, %137, %cst_114 {dimension_numbers = #tpu.dot_dimension_numbers<[1], [0], [0], [1], [0, 0, 1, 1], [], []>} : vector<4x512xbf16>, vector<512x128xbf16>, vector<4x128xf32> -> vector<4x128xf32>
    %139 = arith.addf %135, %138 : vector<4x128xf32>
    %c2_115 = arith.constant 2 : index
    %c0_116 = arith.constant 0 : index
    %c0_117 = arith.constant 0 : index
    %140 = vector.load %arg16[%c2_115, %c0_116, %c0_117] : memref<3x512x128xbf16, #tpu.memory_space<vmem>>, vector<1x512x128xbf16>
    %141 = vector.shape_cast %140 : vector<1x512x128xbf16> to vector<512x128xbf16>
    %cst_118 = arith.constant dense<0.000000e+00> : vector<4x128xf32>
    %142 = tpu.matmul %132, %141, %cst_118 {dimension_numbers = #tpu.dot_dimension_numbers<[1], [0], [0], [1], [0, 0, 1, 1], [], []>} : vector<4x512xbf16>, vector<512x128xbf16>, vector<4x128xf32> -> vector<4x128xf32>
    %143 = arith.addf %139, %142 : vector<4x128xf32>
    %c0_119 = arith.constant 0 : index
    %c0_120 = arith.constant 0 : index
    %144 = vector.load %arg17[%c0_119, %c0_120] : memref<1x128xf32, #tpu.memory_space<vmem>>, vector<1x128xf32>
    %145 = vector.broadcast %144 : vector<1x128xf32> to vector<4x128xf32>
    %146 = arith.addf %143, %145 : vector<4x128xf32>
    %cst_121 = arith.constant 0.000000e+00 : f32
    %147 = vector.broadcast %cst_121 : f32 to vector<4x128xf32>
    %148 = arith.maximumf %146, %147 : vector<4x128xf32>
    %149 = arith.truncf %148 : vector<4x128xf32> to vector<4x128xbf16>
    %c0_122 = arith.constant 0 : index
    %c0_123 = arith.constant 0 : index
    %c0_124 = arith.constant 0 : index
    %150 = vector.load %arg18[%c0_122, %c0_123, %c0_124] : memref<2x4x4xbf16, #tpu.memory_space<vmem>>, vector<1x4x4xbf16>
    %151 = vector.shape_cast %150 : vector<1x4x4xbf16> to vector<4x4xbf16>
    %cst_125 = arith.constant dense<0.000000e+00> : vector<4x128xf32>
    %152 = tpu.matmul %151, %149, %cst_125 {dimension_numbers = #tpu.dot_dimension_numbers<[1], [0], [0], [1], [0, 0, 1, 1], [], []>} : vector<4x4xbf16>, vector<4x128xbf16>, vector<4x128xf32> -> vector<4x128xf32>
    %153 = arith.truncf %152 : vector<4x128xf32> to vector<4x128xbf16>
    %c1_126 = arith.constant 1 : index
    %c0_127 = arith.constant 0 : index
    %c0_128 = arith.constant 0 : index
    %154 = vector.load %arg18[%c1_126, %c0_127, %c0_128] : memref<2x4x4xbf16, #tpu.memory_space<vmem>>, vector<1x4x4xbf16>
    %155 = vector.shape_cast %154 : vector<1x4x4xbf16> to vector<4x4xbf16>
    %cst_129 = arith.constant dense<0.000000e+00> : vector<4x128xf32>
    %156 = tpu.matmul %155, %149, %cst_129 {dimension_numbers = #tpu.dot_dimension_numbers<[1], [0], [0], [1], [0, 0, 1, 1], [], []>} : vector<4x4xbf16>, vector<4x128xbf16>, vector<4x128xf32> -> vector<4x128xf32>
    %157 = arith.truncf %156 : vector<4x128xf32> to vector<4x128xbf16>
    %c0_130 = arith.constant 0 : index
    %c0_131 = arith.constant 0 : index
    %c0_132 = arith.constant 0 : index
    %158 = vector.load %arg19[%c0_130, %c0_131, %c0_132] : memref<3x128x64xbf16, #tpu.memory_space<vmem>>, vector<1x128x64xbf16>
    %159 = vector.shape_cast %158 : vector<1x128x64xbf16> to vector<128x64xbf16>
    %cst_133 = arith.constant dense<0.000000e+00> : vector<4x64xf32>
    %160 = tpu.matmul %153, %159, %cst_133 {dimension_numbers = #tpu.dot_dimension_numbers<[1], [0], [0], [1], [0, 0, 1, 1], [], []>} : vector<4x128xbf16>, vector<128x64xbf16>, vector<4x64xf32> -> vector<4x64xf32>
    %c1_134 = arith.constant 1 : index
    %c0_135 = arith.constant 0 : index
    %c0_136 = arith.constant 0 : index
    %161 = vector.load %arg19[%c1_134, %c0_135, %c0_136] : memref<3x128x64xbf16, #tpu.memory_space<vmem>>, vector<1x128x64xbf16>
    %162 = vector.shape_cast %161 : vector<1x128x64xbf16> to vector<128x64xbf16>
    %cst_137 = arith.constant dense<0.000000e+00> : vector<4x64xf32>
    %163 = tpu.matmul %149, %162, %cst_137 {dimension_numbers = #tpu.dot_dimension_numbers<[1], [0], [0], [1], [0, 0, 1, 1], [], []>} : vector<4x128xbf16>, vector<128x64xbf16>, vector<4x64xf32> -> vector<4x64xf32>
    %164 = arith.addf %160, %163 : vector<4x64xf32>
    %c2_138 = arith.constant 2 : index
    %c0_139 = arith.constant 0 : index
    %c0_140 = arith.constant 0 : index
    %165 = vector.load %arg19[%c2_138, %c0_139, %c0_140] : memref<3x128x64xbf16, #tpu.memory_space<vmem>>, vector<1x128x64xbf16>
    %166 = vector.shape_cast %165 : vector<1x128x64xbf16> to vector<128x64xbf16>
    %cst_141 = arith.constant dense<0.000000e+00> : vector<4x64xf32>
    %167 = tpu.matmul %157, %166, %cst_141 {dimension_numbers = #tpu.dot_dimension_numbers<[1], [0], [0], [1], [0, 0, 1, 1], [], []>} : vector<4x128xbf16>, vector<128x64xbf16>, vector<4x64xf32> -> vector<4x64xf32>
    %168 = arith.addf %164, %167 : vector<4x64xf32>
    %c0_142 = arith.constant 0 : index
    %c0_143 = arith.constant 0 : index
    %169 = vector.load %arg20[%c0_142, %c0_143] : memref<1x64xf32, #tpu.memory_space<vmem>>, vector<1x64xf32>
    %170 = vector.broadcast %169 : vector<1x64xf32> to vector<4x64xf32>
    %171 = arith.addf %168, %170 : vector<4x64xf32>
    %cst_144 = arith.constant 0.000000e+00 : f32
    %172 = vector.broadcast %cst_144 : f32 to vector<4x64xf32>
    %173 = arith.maximumf %171, %172 : vector<4x64xf32>
    %174 = arith.truncf %173 : vector<4x64xf32> to vector<4x64xbf16>
    %c0_145 = arith.constant 0 : index
    %c0_146 = arith.constant 0 : index
    %175 = vector.load %arg24[%c0_145, %c0_146] : memref<1x128xf32, #tpu.memory_space<vmem>>, vector<1x128xf32>
    %c0_147 = arith.constant 0 : index
    %c0_148 = arith.constant 0 : index
    %c0_149 = arith.constant 0 : index
    %176 = vector.load %arg21[%c0_147, %c0_148, %c0_149] : memref<2x2x4xbf16, #tpu.memory_space<vmem>>, vector<1x2x4xbf16>
    %177 = vector.shape_cast %176 : vector<1x2x4xbf16> to vector<2x4xbf16>
    %cst_150 = arith.constant dense<0.000000e+00> : vector<2x64xf32>
    %178 = tpu.matmul %177, %174, %cst_150 {dimension_numbers = #tpu.dot_dimension_numbers<[1], [0], [0], [1], [0, 0, 1, 1], [], []>} : vector<2x4xbf16>, vector<4x64xbf16>, vector<2x64xf32> -> vector<2x64xf32>
    %179 = arith.truncf %178 : vector<2x64xf32> to vector<2x64xbf16>
    %c0_151 = arith.constant 0 : index
    %c0_152 = arith.constant 0 : index
    %c0_153 = arith.constant 0 : index
    %180 = vector.load %arg22[%c0_151, %c0_152, %c0_153] : memref<2x64x128xbf16, #tpu.memory_space<vmem>>, vector<1x64x128xbf16>
    %181 = vector.shape_cast %180 : vector<1x64x128xbf16> to vector<64x128xbf16>
    %cst_154 = arith.constant dense<0.000000e+00> : vector<2x128xf32>
    %182 = tpu.matmul %179, %181, %cst_154 {dimension_numbers = #tpu.dot_dimension_numbers<[1], [0], [0], [1], [0, 0, 1, 1], [], []>} : vector<2x64xbf16>, vector<64x128xbf16>, vector<2x128xf32> -> vector<2x128xf32>
    %183 = vector.broadcast %175 : vector<1x128xf32> to vector<2x128xf32>
    %184 = arith.addf %183, %182 : vector<2x128xf32>
    %c1_155 = arith.constant 1 : index
    %c0_156 = arith.constant 0 : index
    %c0_157 = arith.constant 0 : index
    %185 = vector.load %arg21[%c1_155, %c0_156, %c0_157] : memref<2x2x4xbf16, #tpu.memory_space<vmem>>, vector<1x2x4xbf16>
    %186 = vector.shape_cast %185 : vector<1x2x4xbf16> to vector<2x4xbf16>
    %cst_158 = arith.constant dense<0.000000e+00> : vector<2x64xf32>
    %187 = tpu.matmul %186, %174, %cst_158 {dimension_numbers = #tpu.dot_dimension_numbers<[1], [0], [0], [1], [0, 0, 1, 1], [], []>} : vector<2x4xbf16>, vector<4x64xbf16>, vector<2x64xf32> -> vector<2x64xf32>
    %188 = arith.truncf %187 : vector<2x64xf32> to vector<2x64xbf16>
    %c1_159 = arith.constant 1 : index
    %c0_160 = arith.constant 0 : index
    %c0_161 = arith.constant 0 : index
    %189 = vector.load %arg22[%c1_159, %c0_160, %c0_161] : memref<2x64x128xbf16, #tpu.memory_space<vmem>>, vector<1x64x128xbf16>
    %190 = vector.shape_cast %189 : vector<1x64x128xbf16> to vector<64x128xbf16>
    %cst_162 = arith.constant dense<0.000000e+00> : vector<2x128xf32>
    %191 = tpu.matmul %188, %190, %cst_162 {dimension_numbers = #tpu.dot_dimension_numbers<[1], [0], [0], [1], [0, 0, 1, 1], [], []>} : vector<2x64xbf16>, vector<64x128xbf16>, vector<2x128xf32> -> vector<2x128xf32>
    %192 = arith.addf %184, %191 : vector<2x128xf32>
    %c0_163 = arith.constant 0 : index
    %c0_164 = arith.constant 0 : index
    %193 = vector.load %arg1[%c0_163, %c0_164] : memref<2x1xi32, #tpu.memory_space<vmem>>, vector<2x1xi32>
    %194 = tpu.iota {dimensions = array<i32: 1>} : vector<2x72xi32>
    %195 = vector.broadcast %193 : vector<2x1xi32> to vector<2x72xi32>
    %196 = arith.cmpi eq, %194, %195 : vector<2x72xi32>
    %197 = arith.extui %196 : vector<2x72xi1> to vector<2x72xi32>
    %198 = arith.sitofp %197 : vector<2x72xi32> to vector<2x72xf32>
    %199 = arith.truncf %198 : vector<2x72xf32> to vector<2x72xbf16>
    %c0_165 = arith.constant 0 : index
    %c0_166 = arith.constant 0 : index
    %200 = vector.load %arg23[%c0_165, %c0_166] : memref<72x128xbf16, #tpu.memory_space<vmem>>, vector<72x128xbf16>
    %cst_167 = arith.constant dense<0.000000e+00> : vector<2x128xf32>
    %201 = tpu.matmul %199, %200, %cst_167 {dimension_numbers = #tpu.dot_dimension_numbers<[1], [0], [0], [1], [0, 0, 1, 1], [], []>} : vector<2x72xbf16>, vector<72x128xbf16>, vector<2x128xf32> -> vector<2x128xf32>
    %202 = arith.addf %192, %201 : vector<2x128xf32>
    %cst_168 = arith.constant 0.000000e+00 : f32
    %203 = vector.broadcast %cst_168 : f32 to vector<2x128xf32>
    %204 = arith.maximumf %202, %203 : vector<2x128xf32>
    %205 = arith.truncf %204 : vector<2x128xf32> to vector<2x128xbf16>
    %c0_169 = arith.constant 0 : index
    %c0_170 = arith.constant 0 : index
    %206 = vector.load %arg25[%c0_169, %c0_170] : memref<128x256xbf16, #tpu.memory_space<vmem>>, vector<128x256xbf16>
    %cst_171 = arith.constant dense<0.000000e+00> : vector<2x256xf32>
    %207 = tpu.matmul %205, %206, %cst_171 {dimension_numbers = #tpu.dot_dimension_numbers<[1], [0], [0], [1], [0, 0, 1, 1], [], []>} : vector<2x128xbf16>, vector<128x256xbf16>, vector<2x256xf32> -> vector<2x256xf32>
    %c0_172 = arith.constant 0 : index
    %c0_173 = arith.constant 0 : index
    %208 = vector.load %arg26[%c0_172, %c0_173] : memref<1x256xf32, #tpu.memory_space<vmem>>, vector<1x256xf32>
    %209 = vector.broadcast %208 : vector<1x256xf32> to vector<2x256xf32>
    %210 = arith.addf %207, %209 : vector<2x256xf32>
    %cst_174 = arith.constant 0.000000e+00 : f32
    %211 = vector.broadcast %cst_174 : f32 to vector<2x256xf32>
    %212 = arith.maximumf %210, %211 : vector<2x256xf32>
    %213 = arith.truncf %212 : vector<2x256xf32> to vector<2x256xbf16>
    %c0_175 = arith.constant 0 : index
    %c0_176 = arith.constant 0 : index
    %214 = vector.load %arg27[%c0_175, %c0_176] : memref<256x1xbf16, #tpu.memory_space<vmem>>, vector<256x1xbf16>
    %cst_177 = arith.constant dense<0.000000e+00> : vector<2x1xf32>
    %215 = tpu.matmul %213, %214, %cst_177 {dimension_numbers = #tpu.dot_dimension_numbers<[1], [0], [0], [1], [0, 0, 1, 1], [], []>} : vector<2x256xbf16>, vector<256x1xbf16>, vector<2x1xf32> -> vector<2x1xf32>
    %c0_178 = arith.constant 0 : index
    %c0_179 = arith.constant 0 : index
    %216 = vector.load %arg28[%c0_178, %c0_179] : memref<1x1xf32, #tpu.memory_space<vmem>>, vector<1x1xf32>
    %217 = vector.broadcast %216 : vector<1x1xf32> to vector<2x1xf32>
    %218 = arith.addf %215, %217 : vector<2x1xf32>
    %c0_180 = arith.constant 0 : index
    %c0_181 = arith.constant 0 : index
    %219 = vector.load %arg29[%c0_180, %c0_181] : memref<2x1xf32, #tpu.memory_space<vmem>>, vector<2x1xf32>
    tpu.vector_store %arg29[%c0_180, %c0_181], %218 {strides = array<i32>} : memref<2x1xf32, #tpu.memory_space<vmem>>, vector<2x1xf32>,
    %c0_182 = arith.constant 0 : index
    %c0_183 = arith.constant 0 : index
    %220 = vector.load %arg30[%c0_182, %c0_183] : memref<2x256xf32, #tpu.memory_space<vmem>>, vector<2x256xf32>
    tpu.vector_store %arg30[%c0_182, %c0_183], %212 {strides = array<i32>} : memref<2x256xf32, #tpu.memory_space<vmem>>, vector<2x256xf32>,
    return
  }
}

</mosaic_0001>

<bundles_post_ra>
// kernel: forward.1
= control target key start
LH: loop header
LB: loop body
LE: loop exit
PB: predicated region body
PF: predicated region fallthrough
CT: control target
= control target key end

     0   :  { %s15790_s6 = smov 1   ;;  %s15791_s10 = smov 2   ;;  %s16903_s0 = inlined_call_operand.smem [shape: u32[31], index: -1, kind: input, shape index: {}] }
   0x1   :  { %s15867_s5 = sld [smem:[%s16903_s0]]   ;;  %s15792_s14 = smov 3  }
   0x2   :  { %s15872_s9 = sld [smem:[%s16903_s0 + %s15790_s6]]   ;;  %s15793_s18 = smov 4  }
   0x3   :  { %s15877_s13 = sld [smem:[%s16903_s0 + %s15791_s10]]   ;;  %s15794_s22 = smov 5  }
   0x4   :  { %s15882_s17 = sld [smem:[%s16903_s0 + %s15792_s14]]   ;;  %s15795_s26 = smov 6  }
   0x5   :  { %s15887_s21 = sld [smem:[%s16903_s0 + %s15793_s18]]   ;;  %s15796_s30 = smov 7  }
   0x6   :  { %s15892_s25 = sld [smem:[%s16903_s0 + %s15794_s22]]   ;;  %s15797_s4 = smov 8  }
   0x7   :  { %16916 = sst [smem:[#allocation56_spill]] %s15867_s5  ;;  %s15798_s10 = smov 9  }
   0x8   :  { %16917 = sst [smem:[#allocation57_spill]] %s15872_s9  ;;  %s15799_s15 = smov 10  }
   0x9   :  { %s15897_s29 = sld [smem:[%s16903_s0 + %s15795_s26]]   ;;  %s15800_s20 = smov 11  }
   0xa   :  { %s15902_s3 = sld [smem:[%s16903_s0 + %s15796_s30]]   ;;  %s15801_s26 = smov 12  }
   0xb   :  { %s15907_s8 = sld [smem:[%s16903_s0 + %s15797_s4]]   ;;  %s15802_s1 = smov 13  }
   0xc   :  { %s15912_s14 = sld [smem:[%s16903_s0 + %s15798_s10]]   ;;  %s15803_s7 = smov 14  }
   0xd   :  { %s15917_s19 = sld [smem:[%s16903_s0 + %s15799_s15]]   ;;  %s15804_s15 = smov 15  }
   0xe   :  { %s15922_s24 = sld [smem:[%s16903_s0 + %s15800_s20]]   ;;  %s15805_s22 = smov 16  }
   0xf   :  { %s15927_s30 = sld [smem:[%s16903_s0 + %s15801_s26]]   ;;  %s15806_s28 = smov 17  }
  0x10   :  { %s15932_s6 = sld [smem:[%s16903_s0 + %s15802_s1]]   ;;  %s15818_s1 = smov 29  }
  0x11   :  { %16918 = sst [smem:[#allocation58_spill]] %s15907_s8  ;;  %s15819_s10 = smov 30  }
  0x12   :  { %s15937_s12 = sld [smem:[%s16903_s0 + %s15803_s7]]   ;;  %s15807_s7 = smov 18  }
  0x13   :  { %16919 = sst [smem:[#allocation59_spill]] %s15917_s19 }
  0x14   :  { %s15942_s20 = sld [smem:[%s16903_s0 + %s15804_s15]]   ;;  %s15808_s15 = smov 19  }
  0x15   :  { %16920 = sst [smem:[#allocation60_spill]] %s15927_s30 }
  0x16   :  { %s15947_s27 = sld [smem:[%s16903_s0 + %s15805_s22]]   ;;  %s15809_s22 = smov 20  }
  0x17   :  { %s15952_s4 = sld [smem:[%s16903_s0 + %s15806_s28]]   ;;  %s15810_s28 = smov 21  }
  0x18   :  { %16921 = sst [smem:[#allocation61_spill]] %s15937_s12 }
  0x19   :  { %s15957_s9 = sld [smem:[%s16903_s0 + %s15807_s7]]   ;;  %s15811_s7 = smov 22  }
  0x1a   :  { %s15962_s5 = sld [smem:[%s16903_s0 + %s15808_s15]]   ;;  %s15812_s15 = smov 23  }
  0x1b   :  { %s15972_s12 = sld [smem:[%s16903_s0 + %s15810_s28]]   ;;  %s15814_s28 = smov 25  }
  0x1c   :  { %16922 = sst [smem:[#allocation62_spill]] %s15947_s27 }
  0x1d   :  { %s15967_s27 = sld [smem:[%s16903_s0 + %s15809_s22]]   ;;  %s15813_s22 = smov 24  }
  0x1e   :  { %s15987_s30 = sld [smem:[%s16903_s0 + %s15813_s22]]   ;;  %s15817_s22 = smov 28  }
  0x1f   :  { %16923 = sst [smem:[#allocation63_spill]] %s15957_s9 }
  0x20   :  { %16924 = sst [smem:[#allocation64_spill]] %s15962_s5 }
  0x21   :  { %16925 = sst [smem:[#allocation65_spill]] %s15972_s12 }
  0x22   :  { %s15977_s9 = sld [smem:[%s16903_s0 + %s15811_s7]]   ;;  %s15815_s7 = smov 26  }
  0x23   :  { %s15982_s5 = sld [smem:[%s16903_s0 + %s15812_s15]]   ;;  %s15816_s15 = smov 27  }
  0x24   :  { %s15992_s12 = sld [smem:[%s16903_s0 + %s15814_s28]]  }
  0x25   :  { %s15997_s19 = sld [smem:[%s16903_s0 + %s15815_s7]]  }
  0x26   :  { %s9957_s8 = sld [smem:[%s16903_s0 + %s15817_s22]]  }
  0x29   :  { %16926 = sst [smem:[#allocation66_spill]] %s15982_s5 }
  0x2a   :  { %16927 = sst [smem:[#allocation67_spill]] %s15992_s12 }
  0x2b   :  { %16928 = sst [smem:[#allocation68_spill]] %s15997_s19 }
  0x2c   :  { %s16002_s5 = sld [smem:[%s16903_s0 + %s15816_s15]]   ;;  %v67_v0 = vstv %s9957_s8 }
  0x2d   :  { %s16010_s12 = sld [smem:[%s16903_s0 + %s15818_s1]]   ;;  %68 = vst [vmem:[#allocation2] sm:$0x1] %v67_v0 }
  0x2e   :  { %s16015_s19 = sld [smem:[%s16903_s0 + %s15819_s10]]  }
  0x2f   :  { %69 = vsyncpa [#allocation4], 0 }
  0x30   :  { %70 = vsyncpa [#allocation7], 0 }
  0x31   :  { %71 = vsyncpa [#allocation10], 0 }
  0x32   :  { %72 = vsyncpa [#allocation13], 0 }
  0x33   :  { %73 = vsyncpa [#allocation16], 0 }
  0x34   :  { %74 = vsyncpa [#allocation19], 0 }
  0x35   :  { %75 = vsyncpa [#allocation22], 0 }
  0x36   :  { %76 = vsyncpa [#allocation25], 0 }
  0x37   :  { %77 = vsyncpa [#allocation28], 0 }
  0x38   :  { %78 = vsyncpa [#allocation31], 0 }
  0x39   :  { %79 = vsyncpa [#allocation34], 0 }
  0x3a   :  { %80 = vsyncpa [#allocation37], 0 }
  0x3b   :  { %81 = vsyncpa [#allocation40], 0 }
  0x3c   :  { %82 = vsyncpa [#allocation5], 0  ;;  %s104_s0 = sshll.u32 %s15882_s17, 4  ;;  %s15820_s8 = smov [#allocation6]   ;;  %s105_s0 = int_to_ptr.hbm [resolvable:$true] %s104_s0 }
  0x3d   :  { %s106_s15 = sshll.u32 %s15820_s8, 4  ;;  %s131_s16 = sshll.u32 %s15892_s25, 4  ;;  %s107_s15 = int_to_ptr.vmem [resolvable:$true] %s106_s15  ;;  %s132_s16 = int_to_ptr.hbm [resolvable:$true] %s131_s16 }
  0x3e   :  { %s15162_s18 = sshra.s32 %s105_s0, 4  ;;  %s15166_s23 = scalar_lea.hbm %s15882_s17, 32  ;;  %s15163_s18 = int_to_ptr.hbm [resolvable:$true] %s15162_s18 }
  0x3f   :  { %s15164_s22 = scalar_lea.hbm %s15163_s18, 32  ;;  %p15167_p1 = scmp.lt.s32.totalorder %s15163_s18, %s15882_s17 }
  0x40   :  { %p15165_p0 = scmp.ne.s32.totalorder %s15163_s18, %s15164_s22  ;;  %p15168_p2 = scmp.lt.s32.totalorder %s15166_s23, %s15164_s22 }
  0x42   :  { %p15169_p3 = por %p15168_p2, %p15167_p1 }
  0x44   :  { %p15170_p4 = pnand %p15169_p3, %p15165_p0 }
  0x46   :  { %15173 = shalt.err (!%p15170_p4)
}
  0x47   :  { %s15821_s26 = smov 64   ;;  %s15822_s1 = smov 4  }
  0x48   :  { %112 = dma.hbm_to_vmem [thread:$0]  %s105_s0, 512, %s107_s15, [#allocation7], %s15821_s26, %s15821_s26, %s15822_s1  }
  0x49   :  { %s15823_s28 = smov [#allocation9]   ;;  %s154_s10 = sshll.u32 %s15902_s3, 4  ;;  %s16025_s10 = int_to_ptr.hbm [resolvable:$true] %s154_s10 }
  0x4a   :  { %s133_s2 = sshll.u32 %s15823_s28, 4  ;;  %s15186_s17 = sshra.s32 %s132_s16, 4  ;;  %s134_s2 = int_to_ptr.vmem [resolvable:$true] %s133_s2  ;;  %s15187_s17 = int_to_ptr.hbm [resolvable:$true] %s15186_s17 }
  0x4b   :  { %s15188_s7 = scalar_lea.hbm %s15187_s17, 4  ;;  %s15190_s11 = scalar_lea.hbm %s15892_s25, 4 }
  0x4c   :  { %p15189_p5 = scmp.ne.s32.totalorder %s15187_s17, %s15188_s7  ;;  %p15191_p6 = scmp.lt.s32.totalorder %s15187_s17, %s15892_s25 }
  0x4d   :  { %p15192_p7 = scmp.lt.s32.totalorder %s15190_s11, %s15188_s7 }
  0x4f   :  { %p15193_p8 = por %p15192_p7, %p15191_p6 }
  0x51   :  { %p15194_p9 = pnand %p15193_p8, %p15189_p5 }
  0x53   :  { %15197 = shalt.err (!%p15194_p9)
}
  0x54   :  { %136 = dma.hbm_to_vmem [thread:$0]  %s132_s16, 64, %s134_s2, [#allocation10]  }
  0x55   :  { %s181_s0 = sshll.u32 %s15912_s14, 4  ;;  %s15824_s8 = smov [#allocation12]   ;;  %s182_s0 = int_to_ptr.hbm [resolvable:$true] %s181_s0 }
  0x56   :  { %s156_s15 = sshll.u32 %s15824_s8, 4  ;;  %s15210_s18 = sshra.s32 %s16025_s10, 4  ;;  %s157_s15 = int_to_ptr.vmem [resolvable:$true] %s156_s15  ;;  %s15211_s18 = int_to_ptr.hbm [resolvable:$true] %s15210_s18 }
  0x57   :  { %s15212_s22 = scalar_lea.hbm %s15211_s18, 16  ;;  %s15214_s23 = scalar_lea.hbm %s15902_s3, 16 }
  0x58   :  { %p15213_p10 = scmp.ne.s32.totalorder %s15211_s18, %s15212_s22  ;;  %p15215_p11 = scmp.lt.s32.totalorder %s15211_s18, %s15902_s3 }
  0x59   :  { %p15216_p12 = scmp.lt.s32.totalorder %s15214_s23, %s15212_s22 }
  0x5b   :  { %p15217_p13 = por %p15216_p12, %p15215_p11 }
  0x5d   :  { %p15218_p0 = pnand %p15217_p13, %p15213_p10 }
  0x5f   :  { %15221 = shalt.err (!%p15218_p0)
}
  0x60   :  { %162 = dma.hbm_to_vmem [thread:$0]  %s16025_s10, 256, %s157_s15, [#allocation13], %s15821_s26, %s15821_s26, %s15822_s1  }
  0x61   :  { %s15825_s25 = smov [#allocation15]   ;;  %s204_s28 = sshll.u32 %s15922_s24, 4  ;;  %s16038_s28 = int_to_ptr.hbm [resolvable:$true] %s204_s28 }
  0x62   :  { %s183_s16 = sshll.u32 %s15825_s25, 4  ;;  %s15234_s2 = sshra.s32 %s182_s0, 4  ;;  %s184_s16 = int_to_ptr.vmem [resolvable:$true] %s183_s16  ;;  %s15235_s2 = int_to_ptr.hbm [resolvable:$true] %s15234_s2 }
  0x63   :  { %s15236_s3 = scalar_lea.hbm %s15235_s2, 4  ;;  %s15238_s17 = scalar_lea.hbm %s15912_s14, 4 }
  0x64   :  { %p15237_p1 = scmp.ne.s32.totalorder %s15235_s2, %s15236_s3  ;;  %p15239_p2 = scmp.lt.s32.totalorder %s15235_s2, %s15912_s14 }
  0x65   :  { %p15240_p3 = scmp.lt.s32.totalorder %s15238_s17, %s15236_s3 }
  0x67   :  { %p15241_p4 = por %p15240_p3, %p15239_p2 }
  0x69   :  { %p15242_p5 = pnand %p15241_p4, %p15237_p1 }
  0x6b   :  { %15245 = shalt.err (!%p15242_p5)
}
  0x6c   :  { %186 = dma.hbm_to_vmem [thread:$0]  %s182_s0, 64, %s184_s16, [#allocation16]  }
  0x6d   :  { %s231_s10 = sshll.u32 %s15932_s6, 4  ;;  %s15826_s7 = smov [#allocation18]   ;;  %s232_s10 = int_to_ptr.hbm [resolvable:$true] %s231_s10 }
  0x6e   :  { %s206_s11 = sshll.u32 %s15826_s7, 4  ;;  %s15258_s8 = sshra.s32 %s16038_s28, 4  ;;  %s207_s11 = int_to_ptr.vmem [resolvable:$true] %s206_s11  ;;  %s15259_s8 = int_to_ptr.hbm [resolvable:$true] %s15258_s8 }
  0x6f   :  { %s15260_s15 = scalar_lea.hbm %s15259_s8, 8  ;;  %s15262_s18 = scalar_lea.hbm %s15922_s24, 8 }
  0x70   :  { %p15261_p6 = scmp.ne.s32.totalorder %s15259_s8, %s15260_s15  ;;  %p15263_p7 = scmp.lt.s32.totalorder %s15259_s8, %s15922_s24 }
  0x71   :  { %p15264_p8 = scmp.lt.s32.totalorder %s15262_s18, %s15260_s15 }
  0x73   :  { %p15265_p9 = por %p15264_p8, %p15263_p7 }
  0x75   :  { %p15266_p10 = pnand %p15265_p9, %p15261_p6 }
  0x77   :  { %15269 = shalt.err (!%p15266_p10)
}
  0x78   :  { %212 = dma.hbm_to_vmem [thread:$0]  %s16038_s28, 128, %s207_s11, [#allocation19], %s15821_s26, %s15821_s26, %s15822_s1  }
  0x79   :  { %s15827_s14 = smov [#allocation21]   ;;  %s15282_s22 = sshra.s32 %s232_s10, 4  ;;  %s15283_s22 = int_to_ptr.hbm [resolvable:$true] %s15282_s22 }
  0x7a   :  { %s233_s0 = sshll.u32 %s15827_s14, 4  ;;  %s15284_s23 = scalar_lea.hbm %s15283_s22, 4  ;;  %s234_s0 = int_to_ptr.vmem [resolvable:$true] %s233_s0 }
  0x7b   :  { %p15285_p11 = scmp.ne.s32.totalorder %s15283_s22, %s15284_s23  ;;  %s15286_s25 = scalar_lea.hbm %s15932_s6, 4 }
  0x7c   :  { %p15287_p12 = scmp.lt.s32.totalorder %s15283_s22, %s15932_s6  ;;  %p15288_p13 = scmp.lt.s32.totalorder %s15286_s25, %s15284_s23 }
  0x7e   :  { %p15289_p0 = por %p15288_p13, %p15287_p12 }
  0x80   :  { %p15290_p1 = pnand %p15289_p0, %p15285_p11 }
  0x82   :  { %15293 = shalt.err (!%p15290_p1)
}
  0x83   :  { %236 = dma.hbm_to_vmem [thread:$0]  %s232_s10, 64, %s234_s0, [#allocation22]  }
  0x84   :  { %s254_s24 = sshll.u32 %s15942_s20, 4  ;;  %s15828_s16 = smov [#allocation24]   ;;  %s255_s24 = int_to_ptr.hbm [resolvable:$true] %s254_s24 }
  0x85   :  { %s256_s28 = sshll.u32 %s15828_s16, 4  ;;  %s281_s2 = sshll.u32 %s15952_s4, 4  ;;  %s257_s28 = int_to_ptr.vmem [resolvable:$true] %s256_s28  ;;  %s282_s2 = int_to_ptr.hbm [resolvable:$true] %s281_s2 }
  0x86   :  { %s15306_s3 = sshra.s32 %s255_s24, 4  ;;  %s15310_s6 = scalar_lea.hbm %s15942_s20, 4  ;;  %s15307_s3 = int_to_ptr.hbm [resolvable:$true] %s15306_s3 }
  0x87   :  { %s15308_s17 = scalar_lea.hbm %s15307_s3, 4  ;;  %p15311_p3 = scmp.lt.s32.totalorder %s15307_s3, %s15942_s20 }
  0x88   :  { %p15309_p2 = scmp.ne.s32.totalorder %s15307_s3, %s15308_s17  ;;  %p15312_p4 = scmp.lt.s32.totalorder %s15310_s6, %s15308_s17 }
  0x8a   :  { %p15313_p5 = por %p15312_p4, %p15311_p3 }
  0x8c   :  { %p15314_p6 = pnand %p15313_p5, %p15309_p2 }
  0x8e   :  { %15317 = shalt.err (!%p15314_p6)
}
  0x8f   :  { %s15829_s10 = smov 32   ;;  %s15830_s7 = smov 2  }
  0x90   :  { %262 = dma.hbm_to_vmem [thread:$0]  %s255_s24, 64, %s257_s28, [#allocation25], %s15829_s10, %s15829_s10, %s15830_s7  }
  0x91   :  { %s15831_s11 = smov [#allocation27]   ;;  %s307_s15 = sshll.u32 %s15967_s27, 4  ;;  %s308_s15 = int_to_ptr.hbm [resolvable:$true] %s307_s15 }
  0x92   :  { %s283_s8 = sshll.u32 %s15831_s11, 4  ;;  %s15330_s20 = sshra.s32 %s282_s2, 4  ;;  %s284_s8 = int_to_ptr.vmem [resolvable:$true] %s283_s8  ;;  %s15331_s20 = int_to_ptr.hbm [resolvable:$true] %s15330_s20 }
  0x93   :  { %s15332_s18 = scalar_lea.hbm %s15331_s20, 1  ;;  %s15334_s14 = scalar_lea.hbm %s15952_s4, 1 }
  0x94   :  { %p15333_p7 = scmp.ne.s32.totalorder %s15331_s20, %s15332_s18  ;;  %p15335_p8 = scmp.lt.s32.totalorder %s15331_s20, %s15952_s4 }
  0x95   :  { %p15336_p9 = scmp.lt.s32.totalorder %s15334_s14, %s15332_s18 }
  0x97   :  { %p15337_p10 = por %p15336_p9, %p15335_p8 }
  0x99   :  { %p15338_p11 = pnand %p15337_p10, %p15333_p7 }
  0x9b   :  { %15341 = shalt.err (!%p15338_p11)
}
  0x9c   :  { %286 = dma.hbm_to_vmem [thread:$0]  %s282_s2, 16, %s284_s8, [#allocation28]  }
  0x9d   :  { %s330_s0 = sshll.u32 %s15977_s9, 4  ;;  %s15832_s22 = smov [#allocation30]   ;;  %s16063_s0 = int_to_ptr.hbm [resolvable:$true] %s330_s0 }
  0x9e   :  { %s309_s23 = sshll.u32 %s15832_s22, 4  ;;  %s15354_s25 = sshra.s32 %s308_s15, 4  ;;  %s310_s23 = int_to_ptr.vmem [resolvable:$true] %s309_s23  ;;  %s15355_s25 = int_to_ptr.hbm [resolvable:$true] %s15354_s25 }
  0x9f   :  { %s15356_s24 = scalar_lea.hbm %s15355_s25, 1  ;;  %s15358_s16 = scalar_lea.hbm %s15967_s27, 1 }
  0xa0   :  { %p15357_p12 = scmp.ne.s32.totalorder %s15355_s25, %s15356_s24  ;;  %p15359_p13 = scmp.lt.s32.totalorder %s15355_s25, %s15967_s27 }
  0xa1   :  { %p15360_p0 = scmp.lt.s32.totalorder %s15358_s16, %s15356_s24 }
  0xa3   :  { %p15361_p1 = por %p15360_p0, %p15359_p13 }
  0xa5   :  { %p15362_p2 = pnand %p15361_p1, %p15357_p12 }
  0xa7   :  { %15365 = shalt.err (!%p15362_p2)
}
  0xa8   :  { %312 = dma.hbm_to_vmem [thread:$0]  %s308_s15, 16, %s310_s23, [#allocation31]  }
  0xa9   :  { %s15833_s4 = smov [#allocation33]   ;;  %s357_s2 = sshll.u32 %s15987_s30, 4  ;;  %s358_s2 = int_to_ptr.hbm [resolvable:$true] %s357_s2 }
  0xaa   :  { %s332_s28 = sshll.u32 %s15833_s4, 4  ;;  %s15378_s3 = sshra.s32 %s16063_s0, 4  ;;  %s333_s28 = int_to_ptr.vmem [resolvable:$true] %s332_s28  ;;  %s15379_s3 = int_to_ptr.hbm [resolvable:$true] %s15378_s3 }
  0xab   :  { %s15380_s17 = scalar_lea.hbm %s15379_s3, 64  ;;  %s15382_s6 = scalar_lea.hbm %s15977_s9, 64 }
  0xac   :  { %p15381_p3 = scmp.ne.s32.totalorder %s15379_s3, %s15380_s17  ;;  %p15383_p4 = scmp.lt.s32.totalorder %s15379_s3, %s15977_s9 }
  0xad   :  { %p15384_p5 = scmp.lt.s32.totalorder %s15382_s6, %s15380_s17 }
  0xaf   :  { %p15385_p6 = por %p15384_p5, %p15383_p4 }
  0xb1   :  { %p15386_p7 = pnand %p15385_p6, %p15381_p3 }
  0xb3   :  { %15389 = shalt.err (!%p15386_p7)
}
  0xb4   :  { %338 = dma.hbm_to_vmem [thread:$0]  %s16063_s0, 1024, %s333_s28, [#allocation34], %s15821_s26, %s15821_s26, %s15822_s1  }
  0xb5   :  { %s91_s27 = sshll.u32 %s15877_s13, 4  ;;  %s15834_s11 = smov [#allocation36]   ;;  %s16076_s27 = int_to_ptr.hbm [resolvable:$true] %s91_s27 }
  0xb6   :  { %s359_s8 = sshll.u32 %s15834_s11, 4  ;;  %s15402_s15 = sshra.s32 %s358_s2, 4  ;;  %s360_s8 = int_to_ptr.vmem [resolvable:$true] %s359_s8  ;;  %s15403_s15 = int_to_ptr.hbm [resolvable:$true] %s15402_s15 }
  0xb7   :  { %s15404_s9 = scalar_lea.hbm %s15403_s15, 1  ;;  %s15406_s20 = scalar_lea.hbm %s15987_s30, 1 }
  0xb8   :  { %p15405_p8 = scmp.ne.s32.totalorder %s15403_s15, %s15404_s9  ;;  %p15407_p9 = scmp.lt.s32.totalorder %s15403_s15, %s15987_s30 }
  0xb9   :  { %p15408_p10 = scmp.lt.s32.totalorder %s15406_s20, %s15404_s9 }
  0xbb   :  { %p15409_p11 = por %p15408_p10, %p15407_p9 }
  0xbd   :  { %p15410_p12 = pnand %p15409_p11, %p15405_p8 }
  0xbf   :  { %15413 = shalt.err (!%p15410_p12)
}
  0xc0   :  { %362 = dma.hbm_to_vmem [thread:$0]  %s358_s2, 16, %s360_s8, [#allocation37]  }
  0xc1   :  { %s15835_s18 = smov [#allocation3]   ;;  %s117_s0 = sshll.u32 %s15887_s21, 4  ;;  %s16081_s0 = int_to_ptr.hbm [resolvable:$true] %s117_s0 }
  0xc2   :  { %s93_s14 = sshll.u32 %s15835_s18, 4  ;;  %s15426_s22 = sshra.s32 %s16076_s27, 4  ;;  %s94_s14 = int_to_ptr.vmem [resolvable:$true] %s93_s14  ;;  %s15427_s22 = int_to_ptr.hbm [resolvable:$true] %s15426_s22 }
  0xc3   :  { %s15428_s23 = scalar_lea.hbm %s15427_s22, 32  ;;  %s15430_s30 = scalar_lea.hbm %s15877_s13, 32 }
  0xc4   :  { %p15429_p13 = scmp.ne.s32.totalorder %s15427_s22, %s15428_s23  ;;  %p15431_p0 = scmp.lt.s32.totalorder %s15427_s22, %s15877_s13 }
  0xc5   :  { %p15432_p1 = scmp.lt.s32.totalorder %s15430_s30, %s15428_s23 }
  0xc7   :  { %p15433_p2 = por %p15432_p1, %p15431_p0 }
  0xc9   :  { %p15434_p3 = pnand %p15433_p2, %p15429_p13 }
  0xcb   :  { %15437 = shalt.err (!%p15434_p3)
}
  0xcc   :  { %99 = dma.hbm_to_vmem [thread:$0]  %s16076_s27, 512, %s94_s14, [#allocation4], %s15821_s26, %s15821_s26, %s15822_s1  }
  0xcd   :  { %s15836_s25 = smov [#allocation8]   ;;  %s141_s16 = sshll.u32 %s15897_s29, 4  ;;  %s142_s16 = int_to_ptr.hbm [resolvable:$true] %s141_s16 }
  0xce   :  { %s119_s24 = sshll.u32 %s15836_s25, 4  ;;  %s15450_s4 = sshra.s32 %s16081_s0, 4  ;;  %s120_s24 = int_to_ptr.vmem [resolvable:$true] %s119_s24  ;;  %s15451_s4 = int_to_ptr.hbm [resolvable:$true] %s15450_s4 }
  0xcf   :  { %s15452_s13 = scalar_lea.hbm %s15451_s4, 384  ;;  %s15454_s28 = scalar_lea.hbm %s15887_s21, 384 }
  0xd0   :  { %p15453_p4 = scmp.ne.s32.totalorder %s15451_s4, %s15452_s13  ;;  %p15455_p5 = scmp.lt.s32.totalorder %s15451_s4, %s15887_s21 }
  0xd1   :  { %p15456_p6 = scmp.lt.s32.totalorder %s15454_s28, %s15452_s13 }
  0xd3   :  { %p15457_p7 = por %p15456_p6, %p15455_p5 }
  0xd5   :  { %p15458_p8 = pnand %p15457_p7, %p15453_p4 }
  0xd7   :  { %15461 = shalt.err (!%p15458_p8)
}
  0xd8   :  { %s15837_s2 = smov 256   ;;  %s16929_s3 = sld [smem:[#allocation58_spill]] }
  0xd9   :  { %s15838_s17 = smov 16   ;;  %s15839_s6 = smov [#allocation11]  }
  0xda   :  { %125 = dma.hbm_to_vmem [thread:$0]  %s16081_s0, 6144, %s120_s24, [#allocation7], %s15837_s2, %s15837_s2, %s15838_s17  }
  0xdb   :  { %s143_s27 = sshll.u32 %s15839_s6, 4  ;;  %s15474_s21 = sshra.s32 %s142_s16, 4  ;;  %s144_s27 = int_to_ptr.vmem [resolvable:$true] %s143_s27  ;;  %s15475_s21 = int_to_ptr.hbm [resolvable:$true] %s15474_s21 }
  0xdc   :  { %s15476_s8 = scalar_lea.hbm %s15475_s21, 16  ;;  %s15478_s15 = scalar_lea.hbm %s15897_s29, 16 }
  0xdd   :  { %p15477_p9 = scmp.ne.s32.totalorder %s15475_s21, %s15476_s8  ;;  %p15479_p10 = scmp.lt.s32.totalorder %s15475_s21, %s15897_s29 }
  0xde   :  { %s167_s11 = sshll.u32 %s16929_s3, 4  ;;  %p15480_p11 = scmp.lt.s32.totalorder %s15478_s15, %s15476_s8  ;;  %s16099_s11 = int_to_ptr.hbm [resolvable:$true] %s167_s11 }
  0xe0   :  { %p15481_p12 = por %p15480_p11, %p15479_p10 }
  0xe2   :  { %p15482_p13 = pnand %p15481_p12, %p15477_p9 }
  0xe4   :  { %15485 = shalt.err (!%p15482_p13)
}
  0xe5   :  { %s16930_s9 = sld [smem:[#allocation59_spill]]  ;;  %s15840_s18 = smov [#allocation14]  }
  0xe6   :  { %149 = dma.hbm_to_vmem [thread:$0]  %s142_s16, 256, %s144_s27, [#allocation10], %s15821_s26, %s15821_s26, %s15822_s1  }
  0xe7   :  { %s169_s14 = sshll.u32 %s15840_s18, 4  ;;  %s15498_s0 = sshra.s32 %s16099_s11, 4  ;;  %s170_s14 = int_to_ptr.vmem [resolvable:$true] %s169_s14  ;;  %s15499_s0 = int_to_ptr.hbm [resolvable:$true] %s15498_s0 }
  0xe8   :  { %s15500_s29 = scalar_lea.hbm %s15499_s0, 3072  ;;  %s15502_s22 = scalar_lea.hbm %s16929_s3, 3072 }
  0xe9   :  { %p15501_p0 = scmp.ne.s32.totalorder %s15499_s0, %s15500_s29  ;;  %p15503_p1 = scmp.lt.s32.totalorder %s15499_s0, %s16929_s3 }
  0xea   :  { %p15504_p2 = scmp.lt.s32.totalorder %s15502_s22, %s15500_s29 }
  0xeb   :  { %s191_s20 = sshll.u32 %s16930_s9, 4  ;;  %s16107_s20 = int_to_ptr.hbm [resolvable:$true] %s191_s20 }
  0xec   :  { %p15505_p3 = por %p15504_p2, %p15503_p1 }
  0xee   :  { %p15506_p4 = pnand %p15505_p3, %p15501_p0 }
  0xf0   :  { %15509 = shalt.err (!%p15506_p4)
}
  0xf1   :  { %s16931_s23 = sld [smem:[#allocation60_spill]]  ;;  %s15841_s30 = smov [#allocation17]  }
  0xf2   :  { %175 = dma.hbm_to_vmem [thread:$0]  %s16099_s11, 49152, %s170_s14, [#allocation13], %s15837_s2, %s15837_s2, %s15838_s17  }
  0xf3   :  { %s193_s25 = sshll.u32 %s15841_s30, 4  ;;  %s15522_s16 = sshra.s32 %s16107_s20, 4  ;;  %s194_s25 = int_to_ptr.vmem [resolvable:$true] %s193_s25  ;;  %s15523_s16 = int_to_ptr.hbm [resolvable:$true] %s15522_s16 }
  0xf4   :  { %s15524_s4 = scalar_lea.hbm %s15523_s16, 8  ;;  %s15526_s13 = scalar_lea.hbm %s16930_s9, 8 }
  0xf5   :  { %p15525_p5 = scmp.ne.s32.totalorder %s15523_s16, %s15524_s4  ;;  %p15527_p6 = scmp.lt.s32.totalorder %s15523_s16, %s16930_s9 }
  0xf6   :  { %p15528_p7 = scmp.lt.s32.totalorder %s15526_s13, %s15524_s4 }
  0xf7   :  { %s217_s24 = sshll.u32 %s16931_s23, 4  ;;  %s16117_s24 = int_to_ptr.hbm [resolvable:$true] %s217_s24 }
  0xf8   :  { %p15529_p8 = por %p15528_p7, %p15527_p6 }
  0xfa   :  { %p15530_p9 = pnand %p15529_p8, %p15525_p5 }
  0xfc   :  { %15533 = shalt.err (!%p15530_p9)
}
  0xfd   :  { %s16932_s28 = sld [smem:[#allocation61_spill]]  ;;  %s15842_s6 = smov [#allocation20]  }
  0xfe   :  { %199 = dma.hbm_to_vmem [thread:$0]  %s16107_s20, 128, %s194_s25, [#allocation16], %s15821_s26, %s15821_s26, %s15822_s1  }
  0xff   :  { %s219_s27 = sshll.u32 %s15842_s6, 4  ;;  %s15546_s11 = sshra.s32 %s16117_s24, 4  ;;  %s220_s27 = int_to_ptr.vmem [resolvable:$true] %s219_s27  ;;  %s15547_s11 = int_to_ptr.hbm [resolvable:$true] %s15546_s11 }
 0x100   :  { %s15548_s21 = scalar_lea.hbm %s15547_s11, 3072  ;;  %s15550_s8 = scalar_lea.hbm %s16931_s23, 3072 }
 0x101   :  { %p15549_p10 = scmp.ne.s32.totalorder %s15547_s11, %s15548_s21  ;;  %p15551_p11 = scmp.lt.s32.totalorder %s15547_s11, %s16931_s23 }
 0x102   :  { %p15552_p12 = scmp.lt.s32.totalorder %s15550_s8, %s15548_s21 }
 0x103   :  { %s241_s3 = sshll.u32 %s16932_s28, 4  ;;  %s16127_s3 = int_to_ptr.hbm [resolvable:$true] %s241_s3 }
 0x104   :  { %p15553_p13 = por %p15552_p12, %p15551_p11 }
 0x106   :  { %p15554_p0 = pnand %p15553_p13, %p15549_p10 }
 0x108   :  { %15557 = shalt.err (!%p15554_p0)
}
 0x109   :  { %s16933_s15 = sld [smem:[#allocation62_spill]]  ;;  %s15843_s9 = smov [#allocation23]  }
 0x10a   :  { %225 = dma.hbm_to_vmem [thread:$0]  %s16117_s24, 49152, %s220_s27, [#allocation19], %s15837_s2, %s15837_s2, %s15838_s17  }
 0x10b   :  { %s243_s20 = sshll.u32 %s15843_s9, 4  ;;  %s15570_s14 = sshra.s32 %s16127_s3, 4  ;;  %s244_s20 = int_to_ptr.vmem [resolvable:$true] %s243_s20  ;;  %s15571_s14 = int_to_ptr.hbm [resolvable:$true] %s15570_s14 }
 0x10c   :  { %s15572_s0 = scalar_lea.hbm %s15571_s14, 4  ;;  %s15574_s29 = scalar_lea.hbm %s16932_s28, 4 }
 0x10d   :  { %p15573_p1 = scmp.ne.s32.totalorder %s15571_s14, %s15572_s0  ;;  %p15575_p2 = scmp.lt.s32.totalorder %s15571_s14, %s16932_s28 }
 0x10e   :  { %p15576_p3 = scmp.lt.s32.totalorder %s15574_s29, %s15572_s0 }
 0x10f   :  { %s267_s18 = sshll.u32 %s16933_s15, 4  ;;  %s16137_s18 = int_to_ptr.hbm [resolvable:$true] %s267_s18 }
 0x110   :  { %p15577_p4 = por %p15576_p3, %p15575_p2 }
 0x112   :  { %p15578_p5 = pnand %p15577_p4, %p15573_p1 }
 0x114   :  { %15581 = shalt.err (!%p15578_p5)
}
 0x115   :  { %s16934_s2 = sld [smem:[#allocation63_spill]]  ;;  %s15844_s23 = smov [#allocation26]  }
 0x116   :  { %249 = dma.hbm_to_vmem [thread:$0]  %s16127_s3, 64, %s244_s20, [#allocation22], %s15829_s10, %s15829_s10, %s15830_s7  }
 0x117   :  { %s269_s30 = sshll.u32 %s15844_s23, 4  ;;  %s15594_s25 = sshra.s32 %s16137_s18, 4  ;;  %s270_s30 = int_to_ptr.vmem [resolvable:$true] %s269_s30  ;;  %s15595_s25 = int_to_ptr.hbm [resolvable:$true] %s15594_s25 }
 0x118   :  { %s15596_s24 = scalar_lea.hbm %s15595_s25, 768  ;;  %s15598_s16 = scalar_lea.hbm %s16933_s15, 768 }
 0x119   :  { %p15597_p6 = scmp.ne.s32.totalorder %s15595_s25, %s15596_s24  ;;  %p15599_p7 = scmp.lt.s32.totalorder %s15595_s25, %s16933_s15 }
 0x11a   :  { %p15600_p8 = scmp.lt.s32.totalorder %s15598_s16, %s15596_s24 }
 0x11b   :  { %s291_s22 = sshll.u32 %s16934_s2, 4  ;;  %s16147_s22 = int_to_ptr.hbm [resolvable:$true] %s291_s22 }
 0x11c   :  { %p15601_p9 = por %p15600_p8, %p15599_p7 }
 0x11e   :  { %p15602_p10 = pnand %p15601_p9, %p15597_p6 }
 0x120   :  { %15605 = shalt.err (!%p15602_p10)
}
 0x121   :  { %s16935_s4 = sld [smem:[#allocation65_spill]]  ;;  %s15845_s13 = smov [#allocation29]  }
 0x122   :  { %275 = dma.hbm_to_vmem [thread:$0]  %s16137_s18, 12288, %s270_s30, [#allocation25], %s15821_s26, %s15821_s26, %s15822_s1  }
 0x123   :  { %s293_s28 = sshll.u32 %s15845_s13, 4  ;;  %s15618_s6 = sshra.s32 %s16147_s22, 4  ;;  %s294_s28 = int_to_ptr.vmem [resolvable:$true] %s293_s28  ;;  %s15619_s6 = int_to_ptr.hbm [resolvable:$true] %s15618_s6 }
 0x124   :  { %s15620_s27 = scalar_lea.hbm %s15619_s6, 4  ;;  %s15622_s11 = scalar_lea.hbm %s16934_s2, 4 }
 0x125   :  { %p15621_p11 = scmp.ne.s32.totalorder %s15619_s6, %s15620_s27  ;;  %p15623_p12 = scmp.lt.s32.totalorder %s15619_s6, %s16934_s2 }
 0x126   :  { %p15624_p13 = scmp.lt.s32.totalorder %s15622_s11, %s15620_s27 }
 0x127   :  { %s317_s3 = sshll.u32 %s16935_s4, 4  ;;  %s16157_s3 = int_to_ptr.hbm [resolvable:$true] %s317_s3 }
 0x128   :  { %p15625_p0 = por %p15624_p13, %p15623_p12 }
 0x12a   :  { %p15626_p1 = pnand %p15625_p0, %p15621_p11 }
 0x12c   :  { %15629 = shalt.err (!%p15626_p1)
}
 0x12d   :  { %s16936_s21 = sld [smem:[#allocation66_spill]]  ;;  %s15846_s8 = smov [#allocation32]  }
 0x12e   :  { %299 = dma.hbm_to_vmem [thread:$0]  %s16147_s22, 64, %s294_s28, [#allocation28], %s15829_s10, %s15829_s10, %s15830_s7  }
 0x12f   :  { %s319_s15 = sshll.u32 %s15846_s8, 4  ;;  %s15642_s20 = sshra.s32 %s16157_s3, 4  ;;  %s320_s15 = int_to_ptr.vmem [resolvable:$true] %s319_s15  ;;  %s15643_s20 = int_to_ptr.hbm [resolvable:$true] %s15642_s20 }
 0x130   :  { %s15644_s18 = scalar_lea.hbm %s15643_s20, 2  ;;  %s15646_s14 = scalar_lea.hbm %s16935_s4, 2 }
 0x131   :  { %p15645_p2 = scmp.ne.s32.totalorder %s15643_s20, %s15644_s18  ;;  %p15647_p3 = scmp.lt.s32.totalorder %s15643_s20, %s16935_s4 }
 0x132   :  { %p15648_p4 = scmp.lt.s32.totalorder %s15646_s14, %s15644_s18 }
 0x133   :  { %s343_s9 = sshll.u32 %s16936_s21, 4  ;;  %s16167_s9 = int_to_ptr.hbm [resolvable:$true] %s343_s9 }
 0x134   :  { %p15649_p5 = por %p15648_p4, %p15647_p3 }
 0x136   :  { %p15650_p6 = pnand %p15649_p5, %p15645_p2 }
 0x138   :  { %15653 = shalt.err (!%p15650_p6)
}
 0x139   :  { %s15847_s0 = smov 1   ;;  %s16937_s10 = sld [smem:[#allocation67_spill]] }
 0x13a   :  { %325 = dma.hbm_to_vmem [thread:$0]  %s16157_s3, 32, %s320_s15, [#allocation31], %s15838_s17, %s15838_s17, %s15847_s0  }
 0x13b   :  { %s15848_s29 = smov [#allocation35]   ;;  %s15666_s22 = sshra.s32 %s16167_s9, 4  ;;  %s15667_s22 = int_to_ptr.hbm [resolvable:$true] %s15666_s22 }
 0x13c   :  { %s345_s2 = sshll.u32 %s15848_s29, 4  ;;  %s15668_s23 = scalar_lea.hbm %s15667_s22, 36  ;;  %s346_s2 = int_to_ptr.vmem [resolvable:$true] %s345_s2 }
 0x13d   :  { %p15669_p7 = scmp.ne.s32.totalorder %s15667_s22, %s15668_s23  ;;  %s15670_s30 = scalar_lea.hbm %s16936_s21, 36 }
 0x13e   :  { %p15671_p8 = scmp.lt.s32.totalorder %s15667_s22, %s16936_s21  ;;  %p15672_p9 = scmp.lt.s32.totalorder %s15670_s30, %s15668_s23 }
 0x13f   :  { %s367_s7 = sshll.u32 %s16937_s10, 4  ;;  %s16176_s7 = int_to_ptr.hbm [resolvable:$true] %s367_s7 }
 0x140   :  { %p15673_p10 = por %p15672_p9, %p15671_p8 }
 0x142   :  { %p15674_p11 = pnand %p15673_p10, %p15669_p7 }
 0x144   :  { %15677 = shalt.err (!%p15674_p11)
}
 0x145   :  { %351 = dma.hbm_to_vmem [thread:$0]  %s16167_s9, 576, %s346_s2, [#allocation34], %s15821_s26, %s15821_s26, %s15822_s1  }
 0x146   :  { %s15849_s17 = smov [#allocation38]   ;;  %s15690_s24 = sshra.s32 %s16176_s7, 4  ;;  %s15691_s24 = int_to_ptr.hbm [resolvable:$true] %s15690_s24 }
 0x147   :  { %s369_s25 = sshll.u32 %s15849_s17, 4  ;;  %s15692_s16 = scalar_lea.hbm %s15691_s24, 128  ;;  %s370_s25 = int_to_ptr.vmem [resolvable:$true] %s369_s25 }
 0x148   :  { %p15693_p12 = scmp.ne.s32.totalorder %s15691_s24, %s15692_s16  ;;  %s15694_s4 = scalar_lea.hbm %s16937_s10, 128 }
 0x149   :  { %p15695_p13 = scmp.lt.s32.totalorder %s15691_s24, %s16937_s10  ;;  %p15696_p0 = scmp.lt.s32.totalorder %s15694_s4, %s15692_s16 }
 0x14b   :  { %p15697_p1 = por %p15696_p0, %p15695_p13 }
 0x14d   :  { %p15698_p2 = pnand %p15697_p1, %p15693_p12 }
 0x14f   :  { %15701 = shalt.err (!%p15698_p2)
}
 0x150   :  { %s15850_s13 = smov 128   ;;  %s16938_s28 = sld [smem:[#allocation68_spill]] }
 0x151   :  { %s15851_s3 = smov 8   ;;  %s15852_s6 = smov [#allocation39]  }
 0x152   :  { %375 = dma.hbm_to_vmem [thread:$0]  %s16176_s7, 2048, %s370_s25, [#allocation37], %s15850_s13, %s15850_s13, %s15851_s3  }
 0x153   :  { %s383_s27 = sshll.u32 %s15852_s6, 4  ;;  %s384_s27 = int_to_ptr.vmem [resolvable:$true] %s383_s27 }
 0x156   :  { %s381_s1 = sshll.u32 %s16938_s28, 4  ;;  %s15718_s8 = scalar_lea.hbm %s16938_s28, 2  ;;  %s382_s1 = int_to_ptr.hbm [resolvable:$true] %s381_s1 }
 0x157   :  { %s15714_s11 = sshra.s32 %s382_s1, 4  ;;  %s15715_s11 = int_to_ptr.hbm [resolvable:$true] %s15714_s11 }
 0x158   :  { %s15716_s21 = scalar_lea.hbm %s15715_s11, 2  ;;  %p15719_p4 = scmp.lt.s32.totalorder %s15715_s11, %s16938_s28 }
 0x159   :  { %p15717_p3 = scmp.ne.s32.totalorder %s15715_s11, %s15716_s21  ;;  %p15720_p5 = scmp.lt.s32.totalorder %s15718_s8, %s15716_s21 }
 0x15b   :  { %p15721_p6 = por %p15720_p5, %p15719_p4 }
 0x15d   :  { %p15722_p7 = pnand %p15721_p6, %p15717_p3 }
 0x15f   :  { %15725 = shalt.err (!%p15722_p7)
}
 0x160   :  { %386 = dma.hbm_to_vmem [thread:$0]  %s382_s1, 32, %s384_s27, [#allocation40]  }
 0x161   :  { %15762 = dma.done.wait [#allocation4], 512  }
 0x162   :  { %15763 = vsyncadd [#allocation4], 4294966784 }
 0x163   :  { %15764 = dma.done.wait [#allocation7], 6656  }
 0x164   :  { %15765 = vsyncadd [#allocation7], 4294960640 }
 0x165   :  { %15766 = dma.done.wait [#allocation10], 320  }
 0x166   :  { %15767 = vsyncadd [#allocation10], 4294966976 }
 0x167   :  { %15768 = dma.done.wait [#allocation13], 49408  }
 0x168   :  { %15769 = vsyncadd [#allocation13], 4294917888 }
 0x169   :  { %15770 = dma.done.wait [#allocation16], 192  }
 0x16a   :  { %15771 = vsyncadd [#allocation16], 4294967104 }
 0x16b   :  { %15772 = dma.done.wait [#allocation19], 49280  }
 0x16c   :  { %15773 = vsyncadd [#allocation19], 4294918016 }
 0x16d   :  { %15774 = dma.done.wait [#allocation22], 128  }
 0x16e   :  { %15775 = vsyncadd [#allocation22], 4294967168 }
 0x16f   :  { %15776 = dma.done.wait [#allocation25], 12352  }
 0x170   :  { %15777 = vsyncadd [#allocation25], 4294954944 }
 0x171   :  { %15778 = dma.done.wait [#allocation28], 80  }
 0x172   :  { %15779 = vsyncadd [#allocation28], 4294967216 }
 0x173   :  { %15780 = dma.done.wait [#allocation31], 48  }
 0x174   :  { %15781 = vsyncadd [#allocation31], 4294967248 }
 0x175   :  { %15782 = dma.done.wait [#allocation34], 1600  }
 0x176   :  { %15783 = vsyncadd [#allocation34], 4294965696 }
 0x177   :  { %15784 = dma.done.wait [#allocation37], 2064  }
 0x178   :  { %15785 = vsyncadd [#allocation37], 4294965232 }
 0x179   :  { %15786 = dma.done.wait [#allocation40], 32  }
 0x17a   :  { %15787 = vsyncadd [#allocation40], 4294967264  ;;  %s16939_s15 = sld [smem:[#allocation56_spill]]  ;;  %v14048_v13 = vld [vmem:[#allocation3] sm:$0xff]  ;;  %v14050_v14 = vld [vmem:[#allocation3 + $0x10] sm:$0xff]  ;;  %vm514_vm0 = vcmask 523264  }
 0x17b   :  { %v14049_v15 = vld [vmem:[#allocation3 + $0x8] sm:$0xff]  ;;  %v14051_v16 = vld [vmem:[#allocation3 + $0x18] sm:$0xff]  ;;  %s15853_s9 = smov 126   ;;  %s15854_s20 = smov 62   ;;  %vm612_vm1 = vcmask 506880   ;;  %vm637_vm2 = vcmask 261120  }
 0x17c   :  { %v10058_v31 = vld [vmem:[#allocation8 + $0xe8] sm:$0xf]  ;;  %v14087_v32 = vld [vmem:[#allocation8 + $0xf4] sm:$0xf0]  ;;  %v14085_v33 = vld [vmem:[#allocation8 + $0xec] sm:$0xf] }
 0x17d   :  { %v10059_v34 = vor.u32 %v14087_v32, %v10058_v31  ;;  %v10060_v35 = vld [vmem:[#allocation8 + $0xf8] sm:$0xf0]  ;;  %v10042_v37 = vld [vmem:[#allocation8 + $0xc8] sm:$0xf]  ;;  %v14083_v38 = vld [vmem:[#allocation8 + $0xd4] sm:$0xf0] }
 0x17e   :  { %v10063_v36 = vor.u32 %v14085_v33, %v10060_v35  ;;  %v14081_v39 = vld [vmem:[#allocation8 + $0xcc] sm:$0xf]  ;;  %v10043_v40 = vor.u32 %v14083_v38, %v10042_v37  ;;  %v10044_v41 = vld [vmem:[#allocation8 + $0xd8] sm:$0xf0]  ;;  %v10026_v43 = vld [vmem:[#allocation8 + $0xa8] sm:$0xf] }
 0x17f   :  { %v10047_v42 = vor.u32 %v14081_v39, %v10044_v41  ;;  %v14079_v44 = vld [vmem:[#allocation8 + $0xb4] sm:$0xf0]  ;;  %v14077_v45 = vld [vmem:[#allocation8 + $0xac] sm:$0xf]  ;;  %v10028_v47 = vld [vmem:[#allocation8 + $0xb8] sm:$0xf0] }
 0x180   :  { %v494_v1 = vld [vmem:[%s16939_s15 + $0x30] sm:$0xff]  ;;  %v495_v2 = vld [vmem:[%s16939_s15 + $0x38] sm:$0xff]  ;;  %v492_v3 = vld [vmem:[%s16939_s15 + $0x20] sm:$0xff]  ;;  %v10027_v46 = vor.u32 %v14079_v44, %v10026_v43  ;;  %v10031_v48 = vor.u32 %v14077_v45, %v10028_v47  ;;  %s15855_s18 = smov 96   ;;  %vm1474_vm3 = vcmask 785408   ;;  %vm1512_vm4 = vcmask 130048  }
 0x181   :  { %v499_v4 = vpack.c.bf16 %v495_v2, %v494_v1  ;;  %v493_v5 = vld [vmem:[%s16939_s15 + $0x28] sm:$0xff]  ;;  %v490_v7 = vld [vmem:[%s16939_s15 + $0x10] sm:$0xff]  ;;  %v491_v8 = vld [vmem:[%s16939_s15 + $0x18] sm:$0xff]  ;;  %vm4814_vm5 = vcmask 1043456   ;;  %vm4810_vm6 = vcmask 64512   ;;  %vm8042_vm7 = vcmask 1041408  }
 0x182   :  { %v498_v6 = vpack.c.bf16 %v493_v5, %v492_v3  ;;  %v497_v9 = vpack.c.bf16 %v491_v8, %v490_v7  ;;  %v488_v10 = vld [vmem:[%s16939_s15] sm:$0xff]  ;;  %v489_v11 = vld [vmem:[%s16939_s15 + $0x8] sm:$0xff]  ;;  %v14075_v50 = vld [vmem:[#allocation8 + $0x94] sm:$0xf0]  ;;  %vm8038_vm8 = vcmask 31744   ;;  %s16941_s14 = sld [smem:[#allocation57_spill]] }
 0x183   :  { %525 = vmatpush.bf16.msra.mxu0 %v499_v4  ;;  %565 = vmatpush.bf16.msra.mxu1 %v499_v4  ;;  %v496_v12 = vpack.c.bf16 %v489_v11, %v488_v10  ;;  %v10010_v49 = vld [vmem:[#allocation8 + $0x88] sm:$0xf]  ;;  %v14073_v51 = vld [vmem:[#allocation8 + $0x8c] sm:$0xf]  ;;  %v10012_v53 = vld [vmem:[#allocation8 + $0x98] sm:$0xf0] }
 0x184   :  { %v10011_v52 = vor.u32 %v14075_v50, %v10010_v49  ;;  %v10015_v54 = vor.u32 %v14073_v51, %v10012_v53  ;;  %v14076_v32 = vld [vmem:[#allocation8 + $0xa4] sm:$0xf]  ;;  %v10020_v33 = vld [vmem:[#allocation8 + $0xb0] sm:$0xf0]  ;;  %v10122_v41 = vld [vmem:[#allocation8 + $0x60] sm:$0xf] }
 0x185   :  { %v10023_v35 = vor.u32 %v14076_v32, %v10020_v33  ;;  %v10004_v37 = vld [vmem:[#allocation8 + $0x90] sm:$0xf0]  ;;  %v14068_v43 = vld [vmem:[#allocation8 + $0x64] sm:$0xf]  ;;  %v14071_v47 = vld [vmem:[#allocation8 + $0x74] sm:$0xf0] }
 0x186   :  { %v14054_v39 = vld [vmem:[#allocation6 + $0x10] sm:$0xff]  ;;  %v14069_v50 = vld [vmem:[#allocation8 + $0x6c] sm:$0xf]  ;;  %v10132_v51 = vld [vmem:[#allocation8 + $0x78] sm:$0xf0]  ;;  %vm9576_vm10 = vcmask 588800  }
 0x187   :  { %526 = vmatpush.bf16.msra.mxu0 %v498_v6  ;;  %566 = vmatpush.bf16.msra.mxu1 %v498_v6  ;;  %v10124_v45 = vld [vmem:[#allocation8 + $0x70] sm:$0xf0]  ;;  %v10106_v53 = vld [vmem:[#allocation8 + $0x40] sm:$0xf]  ;;  %s9906_s10 = sshll.u32 %s16015_s19, 4  ;;  %s15754_s2 = scalar_lea.hbm %s16015_s19, 4  ;;  %s9907_s10 = int_to_ptr.hbm [resolvable:$true] %s9906_s10 }
 0x188   :  { %s15750_s7 = sshra.s32 %s9907_s10, 4  ;;  %s15751_s7 = int_to_ptr.hbm [resolvable:$true] %s15750_s7 }
 0x189   :  { %s15752_s29 = scalar_lea.hbm %s15751_s7, 4  ;;  %p15755_p9 = scmp.lt.s32.totalorder %s15751_s7, %s16015_s19 }
 0x18a   :  { %p15753_p8 = scmp.ne.s32.totalorder %s15751_s7, %s15752_s29  ;;  %p15756_p10 = scmp.lt.s32.totalorder %s15754_s2, %s15752_s29 }
 0x18b   :  { %527 = vmatpush.bf16.msra.mxu0 %v497_v9  ;;  %567 = vmatpush.bf16.msra.mxu1 %v497_v9 }
 0x18c   :  { %p15757_p11 = por %p15756_p10, %p15755_p9 }
 0x18e   :  { %p15758_p12 = pnand %p15757_p11, %p15753_p8 }
 0x18f   :  { %528 = vmatpush.bf16.msra.mxu0 %v496_v12  ;;  %568 = vmatpush.bf16.msra.mxu1 %v496_v12 }
 0x192   :  { %9968 = vmatmul.msk.bf16.vlgmr.msra.gmra.mxu0 %vm514_vm0, %v14048_v13  ;;  %9978 = vmatmul.msk.bf16.vlgmr.msra.gmra.mxu1 %vm514_vm0, %v14050_v14  ;;  %v10050_v13 = vld [vmem:[#allocation8 + $0xe0] sm:$0xf]  ;;  %v14086_v14 = vld [vmem:[#allocation8 + $0xec] sm:$0xf0] }
 0x193   :  { %868 = vmatpush.bf16.msrb.mxu0 %v10059_v34  ;;  %887 = vmatpush.bf16.msrb.mxu1 %v10063_v36  ;;  %v14072_v36 = vld [vmem:[#allocation8 + $0x84] sm:$0xf] }
 0x194   :  { %v10007_v38 = vor.u32 %v14072_v36, %v10004_v37  ;;  %v10178_v37 = vld [vmem:[#allocation8 + $0x140] sm:$0xf] }
 0x197   :  { %869 = vmatpush.bf16.msrb.mxu0 %v10043_v40  ;;  %888 = vmatpush.bf16.msrb.mxu1 %v10047_v42  ;;  %v14055_v40 = vld [vmem:[#allocation6 + $0x18] sm:$0xff]  ;;  %v14070_v42 = vld [vmem:[#allocation8 + $0x6c] sm:$0xf0] }
 0x198   :  { %v10123_v44 = vor.u32 %v14070_v42, %v10122_v41  ;;  %v10180_v41 = vld [vmem:[#allocation8 + $0x150] sm:$0xf0]  ;;  %v10186_v42 = vld [vmem:[#allocation8 + $0x148] sm:$0xf] }
 0x19b   :  { %870 = vmatpush.bf16.msrb.mxu0 %v10027_v46  ;;  %889 = vmatpush.bf16.msrb.mxu1 %v10031_v48  ;;  %v10130_v46 = vld [vmem:[#allocation8 + $0x68] sm:$0xf]  ;;  %v10127_v48 = vor.u32 %v14068_v43, %v10124_v45  ;;  %v14099_v43 = vld [vmem:[#allocation8 + $0x154] sm:$0xf0] }
 0x19c   :  { %v10131_v49 = vor.u32 %v14071_v47, %v10130_v46  ;;  %v10187_v46 = vor.u32 %v14099_v43, %v10186_v42  ;;  %v14097_v47 = vld [vmem:[#allocation8 + $0x14c] sm:$0xf] }
 0x19f   :  { %871 = vmatpush.bf16.msrb.mxu0 %v10011_v52  ;;  %890 = vmatpush.bf16.msrb.mxu1 %v10015_v54  ;;  %v10135_v52 = vor.u32 %v14069_v50, %v10132_v51  ;;  %v14066_v54 = vld [vmem:[#allocation8 + $0x4c] sm:$0xf0] }
 0x1a0   :  { %v14094_v51 = vld [vmem:[#allocation8 + $0x12c] sm:$0xf0] }
 0x1a2   :  { %9969 = vmatmul.msk.bf16.gmra.mxu0 %vm514_vm0, %v14049_v15  ;;  %9979 = vmatmul.msk.bf16.gmra.mxu1 %vm514_vm0, %v14051_v16  ;;  %v10051_v15 = vor.u32 %v14086_v14, %v10050_v13  ;;  %v10034_v16 = vld [vmem:[#allocation8 + $0xc0] sm:$0xf]  ;;  %v14058_v14 = vld [vmem:[#allocation8 + $0xc] sm:$0xf0] }
 0x1a3   :  { %1030 = vmatpush.bf16.msra.mxu0 %v10131_v49  ;;  %1049 = vmatpush.bf16.msra.mxu1 %v10135_v52  ;;  %v10074_v13 = vld [vmem:[#allocation8] sm:$0xf]  ;;  %v14092_v52 = vld [vmem:[#allocation8 + $0x124] sm:$0xf] }
 0x1a4   :  { %v10162_v49 = vld [vmem:[#allocation8 + $0x120] sm:$0xf] }
 0x20f   :  { %v530_v17 = vpop.f32.mrf.mxu0  ;;  %v570_v18 = vpop.f32.mrf.mxu1 }
 0x210   :  { %v580_v21 = vmax.f32 %v530_v17, %v570_v18  ;;  %v14082_v17 = vld [vmem:[#allocation8 + $0xcc] sm:$0xf0]  ;;  %v14052_v18 = vld [vmem:[#allocation6] sm:$0xff] }
 0x217   :  { %v532_v19 = vpop.f32.mrf.mxu0  ;;  %v572_v20 = vpop.f32.mrf.mxu1 }
 0x218   :  { %v581_v22 = vmax.f32 %v532_v19, %v572_v20  ;;  %v14053_v19 = vld [vmem:[#allocation6 + $0x8] sm:$0xff]  ;;  %v10035_v20 = vor.u32 %v14082_v17, %v10034_v16  ;;  %v10075_v16 = vor.u32 %v14058_v14, %v10074_v13  ;;  %v10076_v17 = vld [vmem:[#allocation8 + $0x10] sm:$0xf0] }
 0x21a   :  { %v15121_v23 = vpack.i.bf16 %v581_v22, %v580_v21 }
 0x21c   :  { %15122 = vrot.lane.b32.xlu1 %v15121_v23, %s15853_s9 }
 0x21f   :  { %v535_v24 = vpop.f32.mrf.mxu0  ;;  %v575_v25 = vpop.f32.mrf.mxu1 }
 0x220   :  { %v582_v28 = vmax.f32 %v535_v24, %v575_v25  ;;  %v10052_v24 = vld [vmem:[#allocation8 + $0xf0] sm:$0xf0] }
 0x224   :  { %15127 = vrot.lane.b32.xlu1 %v15121_v23, %s15854_s20  ;;  %v14084_v23 = vld [vmem:[#allocation8 + $0xe4] sm:$0xf] }
 0x225   :  { %v10055_v25 = vor.u32 %v14084_v23, %v10052_v24  ;;  %v10084_v23 = vld [vmem:[#allocation8 + $0x18] sm:$0xf0] }
 0x227   :  { %v537_v26 = vpop.f32.mrf.mxu0  ;;  %v577_v27 = vpop.f32.mrf.mxu1 }
 0x228   :  { %v583_v29 = vmax.f32 %v537_v26, %v577_v27  ;;  %v14080_v26 = vld [vmem:[#allocation8 + $0xc4] sm:$0xf]  ;;  %v10036_v27 = vld [vmem:[#allocation8 + $0xd0] sm:$0xf0] }
 0x229   :  { %v10039_v31 = vor.u32 %v14080_v26, %v10036_v27  ;;  %v14102_v26 = vld [vmem:[#allocation8 + $0x16c] sm:$0xf0]  ;;  %v14100_v27 = vld [vmem:[#allocation8 + $0x164] sm:$0xf] }
 0x22a   :  { %v15111_v30 = vpack.i.bf16 %v583_v29, %v582_v28 }
 0x22c   :  { %15112 = vrot.lane.b32.xlu0 %v15111_v30, %s15853_s9 }
 0x234   :  { %15117 = vrot.lane.b32.xlu0 %v15111_v30, %s15854_s20  ;;  %v14074_v30 = vld [vmem:[#allocation8 + $0x8c] sm:$0xf0] }
 0x28e   :  { %v15123_v55 = vpop.permute.xlu1 %15122 }
 0x28f   :  { %v15125_v57 = vunpack.i.h.bf16 %v15123_v55  ;;  %v15124_v58 = vunpack.i.l.bf16 %v15123_v55  ;;  %v14064_v55 = vld [vmem:[#allocation8 + $0x44] sm:$0xf] }
 0x296   :  { %v15128_v56 = vpop.permute.xlu1 %15127 }
 0x297   :  { %v15130_v59 = vunpack.i.h.bf16 %v15128_v56  ;;  %v15129_v60 = vunpack.i.l.bf16 %v15128_v56  ;;  %v10107_v56 = vor.u32 %v14066_v54, %v10106_v53  ;;  %v10164_v53 = vld [vmem:[#allocation8 + $0x130] sm:$0xf0]  ;;  %v10163_v54 = vor.u32 %v14094_v51, %v10162_v49 }
 0x299   :  { %v613_v61 = vsel %vm612_vm1, %v15124_v58, %v15129_v60  ;;  %v614_v62 = vsel %vm612_vm1, %v15125_v57, %v15130_v59  ;;  %v10108_v57 = vld [vmem:[#allocation8 + $0x50] sm:$0xf0]  ;;  %v10114_v58 = vld [vmem:[#allocation8 + $0x48] sm:$0xf]  ;;  %v14067_v59 = vld [vmem:[#allocation8 + $0x54] sm:$0xf0] }
 0x29a   :  { %v617_v63 = vmax.f32 %v580_v21, %v613_v61  ;;  %v618_v0 = vmax.f32 %v581_v22, %v614_v62  ;;  %v10018_v21 = vld [vmem:[#allocation8 + $0xa0] sm:$0xf]  ;;  %v14078_v22 = vld [vmem:[#allocation8 + $0xac] sm:$0xf0]  ;;  %v10111_v60 = vor.u32 %v14064_v55, %v10108_v57  ;;  %v10115_v61 = vor.u32 %v14067_v59, %v10114_v58  ;;  %v14065_v62 = vld [vmem:[#allocation8 + $0x4c] sm:$0xf] }
 0x29b   :  { %v10167_v55 = vor.u32 %v14092_v52, %v10164_v53  ;;  %v14095_v57 = vld [vmem:[#allocation8 + $0x134] sm:$0xf0]  ;;  %v14093_v58 = vld [vmem:[#allocation8 + $0x12c] sm:$0xf] }
 0x29c   :  { %v16206_v1 = vpack.c.bf16 %v618_v0, %v617_v63  ;;  %v10116_v63 = vld [vmem:[#allocation8 + $0x58] sm:$0xf0]  ;;  %v10090_v0 = vld [vmem:[#allocation8 + $0x20] sm:$0xf]  ;;  %1031 = vmatpush.bf16.msra.mxu0 %v10115_v61 }
 0x29e   :  { %10068 = vmatmul.msk.bf16.vlgmr.msrb.gmra.mxu0 %vm514_vm0, %v16206_v1  ;;  %10070 = vmatmul.msk.bf16.vlgmr.msrb.gmra.mxu1 %vm514_vm0, %v16206_v1  ;;  %v15113_v2 = vpop.permute.xlu0 %15112 }
 0x29f   :  { %v15115_v4 = vunpack.i.h.bf16 %v15113_v2  ;;  %v15114_v5 = vunpack.i.l.bf16 %v15113_v2  ;;  %v14062_v2 = vld [vmem:[#allocation8 + $0x2c] sm:$0xf0] }
 0x2a6   :  { %v15118_v3 = vpop.permute.xlu0 %15117 }
 0x2a7   :  { %v15120_v6 = vunpack.i.h.bf16 %v15118_v3  ;;  %v15119_v7 = vunpack.i.l.bf16 %v15118_v3  ;;  %v14060_v3 = vld [vmem:[#allocation8 + $0x24] sm:$0xf] }
 0x2a9   :  { %v615_v8 = vsel %vm612_vm1, %v15114_v5, %v15119_v7  ;;  %v616_v9 = vsel %vm612_vm1, %v15115_v4, %v15120_v6  ;;  %v10092_v4 = vld [vmem:[#allocation8 + $0x30] sm:$0xf0]  ;;  %v10091_v5 = vor.u32 %v14062_v2, %v10090_v0  ;;  %v10098_v7 = vld [vmem:[#allocation8 + $0x28] sm:$0xf]  ;;  %v14090_v0 = vld [vmem:[#allocation8 + $0x10c] sm:$0xf0] }
 0x2aa   :  { %v619_v10 = vmax.f32 %v582_v28, %v615_v8  ;;  %v620_v11 = vmax.f32 %v583_v29, %v616_v9  ;;  %v10019_v28 = vor.u32 %v14078_v22, %v10018_v21  ;;  %v10002_v29 = vld [vmem:[#allocation8 + $0x80] sm:$0xf]  ;;  %v10095_v6 = vor.u32 %v14060_v3, %v10092_v4  ;;  %v14063_v8 = vld [vmem:[#allocation8 + $0x34] sm:$0xf0]  ;;  %v14061_v9 = vld [vmem:[#allocation8 + $0x2c] sm:$0xf] }
 0x2ab   :  { %v10003_v34 = vor.u32 %v14074_v30, %v10002_v29  ;;  %v14057_v22 = vld [vmem:[#allocation8 + $0xc] sm:$0xf]  ;;  %v10196_v29 = vld [vmem:[#allocation8 + $0x170] sm:$0xf0]  ;;  %v10202_v30 = vld [vmem:[#allocation8 + $0x168] sm:$0xf] }
 0x2ac   :  { %v622_v12 = vpack.c.bf16 %v620_v11, %v619_v10  ;;  %v10099_v10 = vor.u32 %v14063_v8, %v10098_v7  ;;  %v10100_v11 = vld [vmem:[#allocation8 + $0x38] sm:$0xf0]  ;;  %v10087_v24 = vor.u32 %v14057_v22, %v10084_v23  ;;  %v10199_v32 = vor.u32 %v14100_v27, %v10196_v29  ;;  %v10148_v3 = vld [vmem:[#allocation8 + $0x110] sm:$0xf0]  ;;  %v10154_v4 = vld [vmem:[#allocation8 + $0x108] sm:$0xf] }
 0x2ae   :  { %650 = vmatpush.bf16.msra.mxu2 %v622_v12  ;;  %15040 = vmatpush.bf16.msra.mxu3 %v622_v12 }
 0x2af   :  { %10069 = vmatmul.msk.bf16.gmra.mxu0 %vm514_vm0, %v622_v12  ;;  %10071 = vmatmul.msk.bf16.gmra.mxu1 %vm514_vm0, %v622_v12 }
 0x2b0   :  { %1032 = vmatpush.bf16.msra.mxu0 %v10099_v10  ;;  %v10156_v10 = vld [vmem:[#allocation8 + $0x118] sm:$0xf0] }
 0x2b2   :  { %651 = vmatpush.bf16.msra.mxu2 %v16206_v1  ;;  %15041 = vmatpush.bf16.msra.mxu3 %v16206_v1 }
 0x2b5   :  { %9988 = vmatmul.msk.bf16.vlgmr.msra.gmra.mxu2 %vm637_vm2, %v14052_v18  ;;  %9989 = vmatmul.msk.bf16.vlgmr.msra.gmra.mxu3 %vm637_vm2, %v14053_v19  ;;  %v10082_v18 = vld [vmem:[#allocation8 + $0x8] sm:$0xf]  ;;  %v14059_v19 = vld [vmem:[#allocation8 + $0x14] sm:$0xf0] }
 0x2b6   :  { %692 = vmatpush.bf16.msrb.mxu3 %v622_v12  ;;  %830 = vmatpush.bf16.msrb.mxu2 %v10051_v15  ;;  %v14056_v15 = vld [vmem:[#allocation8 + $0x4] sm:$0xf]  ;;  %v10083_v21 = vor.u32 %v14059_v19, %v10082_v18 }
 0x2b8   :  { %1033 = vmatpush.bf16.msra.mxu0 %v10083_v21 }
 0x2ba   :  { %693 = vmatpush.bf16.msrb.mxu3 %v16206_v1  ;;  %831 = vmatpush.bf16.msrb.mxu2 %v10035_v20  ;;  %v10079_v20 = vor.u32 %v14056_v15, %v10076_v17 }
 0x2be   :  { %849 = vmatpush.bf16.msra.mxu3 %v10055_v25  ;;  %832 = vmatpush.bf16.msrb.mxu2 %v10019_v28  ;;  %v10194_v25 = vld [vmem:[#allocation8 + $0x160] sm:$0xf] }
 0x2bf   :  { %v10195_v28 = vor.u32 %v14102_v26, %v10194_v25 }
 0x2c2   :  { %850 = vmatpush.bf16.msra.mxu3 %v10039_v31  ;;  %833 = vmatpush.bf16.msrb.mxu2 %v10003_v34  ;;  %v14103_v31 = vld [vmem:[#allocation8 + $0x174] sm:$0xf0]  ;;  %v14101_v34 = vld [vmem:[#allocation8 + $0x16c] sm:$0xf] }
 0x2c3   :  { %v10203_v33 = vor.u32 %v14103_v31, %v10202_v30 }
 0x2c5   :  { %9998 = vmatmul.msk.bf16.vlgmr.msrb.gmra.mxu3 %vm637_vm2, %v14054_v39  ;;  %10064 = vmatmul.msk.bf16.vlgmr.msrb.gmra.mxu2 %vm514_vm0, %v16206_v1  ;;  %v14096_v39 = vld [vmem:[#allocation8 + $0x144] sm:$0xf] }
 0x2c6   :  { %851 = vmatpush.bf16.msra.mxu3 %v10023_v35  ;;  %992 = vmatpush.bf16.msra.mxu2 %v10123_v44  ;;  %v10204_v35 = vld [vmem:[#allocation8 + $0x178] sm:$0xf0]  ;;  %v10183_v45 = vor.u32 %v14096_v39, %v10180_v41 }
 0x2c7   :  { %v10207_v36 = vor.u32 %v14101_v34, %v10204_v35  ;;  %1209 = vmatpush.bf16.msrb.mxu0 %v10203_v33 }
 0x2ca   :  { %852 = vmatpush.bf16.msra.mxu3 %v10007_v38  ;;  %993 = vmatpush.bf16.msra.mxu2 %v10107_v56  ;;  %v14098_v38 = vld [vmem:[#allocation8 + $0x14c] sm:$0xf0]  ;;  %v10170_v56 = vld [vmem:[#allocation8 + $0x128] sm:$0xf] }
 0x2cb   :  { %1210 = vmatpush.bf16.msrb.mxu0 %v10187_v46  ;;  %v10171_v59 = vor.u32 %v14095_v57, %v10170_v56 }
 0x2ce   :  { %1011 = vmatpush.bf16.msrb.mxu3 %v10127_v48  ;;  %994 = vmatpush.bf16.msra.mxu2 %v10091_v5  ;;  %v10188_v48 = vld [vmem:[#allocation8 + $0x158] sm:$0xf0]  ;;  %v14091_v5 = vld [vmem:[#allocation8 + $0x114] sm:$0xf0] }
 0x2cf   :  { %v10191_v50 = vor.u32 %v14097_v47, %v10188_v48  ;;  %1211 = vmatpush.bf16.msrb.mxu0 %v10171_v59  ;;  %v10155_v8 = vor.u32 %v14091_v5, %v10154_v4 }
 0x2d2   :  { %1012 = vmatpush.bf16.msrb.mxu3 %v10111_v60  ;;  %995 = vmatpush.bf16.msra.mxu2 %v10075_v16  ;;  %v10172_v60 = vld [vmem:[#allocation8 + $0x138] sm:$0xf0] }
 0x2d3   :  { %v10175_v61 = vor.u32 %v14093_v58, %v10172_v60  ;;  %1212 = vmatpush.bf16.msrb.mxu0 %v10155_v8 }
 0x2d5   :  { %9999 = vmatmul.msk.bf16.gmra.mxu3 %vm637_vm2, %v14055_v40  ;;  %10065 = vmatmul.msk.bf16.gmra.mxu2 %vm514_vm0, %v622_v12  ;;  %v10179_v40 = vor.u32 %v14098_v38, %v10178_v37 }
 0x2d6   :  { %1013 = vmatpush.bf16.msrb.mxu3 %v10095_v6  ;;  %1171 = vmatpush.bf16.msrb.mxu2 %v10195_v28 }
 0x2da   :  { %1014 = vmatpush.bf16.msrb.mxu3 %v10079_v20  ;;  %1172 = vmatpush.bf16.msrb.mxu2 %v10179_v40 }
 0x2de   :  { %1173 = vmatpush.bf16.msrb.mxu2 %v10163_v54 }
 0x2e5   :  { %10066 = vmatmul.msk.bf16.vlgmr.msra.gmra.mxu3 %vm514_vm0, %v16206_v1  ;;  %v10119_v1 = vor.u32 %v14065_v62, %v10116_v63  ;;  %v10146_v63 = vld [vmem:[#allocation8 + $0x100] sm:$0xf] }
 0x2e6   :  { %1190 = vmatpush.bf16.msra.mxu3 %v10199_v32  ;;  %v10147_v2 = vor.u32 %v14090_v0, %v10146_v63 }
 0x2e7   :  { %1050 = vmatpush.bf16.msra.mxu1 %v10119_v1  ;;  %v14088_v1 = vld [vmem:[#allocation8 + $0x104] sm:$0xf] }
 0x2e8   :  { %v10151_v7 = vor.u32 %v14088_v1, %v10148_v3  ;;  %1174 = vmatpush.bf16.msrb.mxu2 %v10147_v2 }
 0x2ea   :  { %1191 = vmatpush.bf16.msra.mxu3 %v10183_v45 }
 0x2ee   :  { %1192 = vmatpush.bf16.msra.mxu3 %v10167_v55 }
 0x2f2   :  { %1193 = vmatpush.bf16.msra.mxu3 %v10151_v7 }
 0x2f5   :  { %10067 = vmatmul.msk.bf16.gmra.mxu3 %vm514_vm0, %v622_v12  ;;  %v10103_v12 = vor.u32 %v14061_v9, %v10100_v11  ;;  %v14089_v9 = vld [vmem:[#allocation8 + $0x10c] sm:$0xf] }
 0x2f7   :  { %1051 = vmatpush.bf16.msra.mxu1 %v10103_v12  ;;  %v10159_v12 = vor.u32 %v14089_v9, %v10156_v10 }
 0x2fb   :  { %1052 = vmatpush.bf16.msra.mxu1 %v10087_v24 }
 0x2ff   :  { %1228 = vmatpush.bf16.msrb.mxu1 %v10207_v36 }
 0x303   :  { %1229 = vmatpush.bf16.msrb.mxu1 %v10191_v50 }
 0x307   :  { %1230 = vmatpush.bf16.msrb.mxu1 %v10175_v61  ;;  %v1259_v61 = vld [vmem:[#allocation9] sm:$0xf] }
 0x308   :  { %v1263_v4 = vperm.slane %v1259_v61, 2  ;;  %v1264_v5 = vperm.slane %v1259_v61, 3  ;;  %v16245_v8 = vperm.slane %v1259_v61, 0  ;;  %v16247_v9 = vperm.slane %v1259_v61, 1 }
 0x30b   :  { %1231 = vmatpush.bf16.msrb.mxu1 %v10159_v12 }
 0x31b   :  { %v873_v21 = vpop.f32.mrf.mxu0  ;;  %v892_v22 = vpop.f32.mrf.mxu1 }
 0x323   :  { %v875_v25 = vpop.f32.mrf.mxu0  ;;  %v894_v26 = vpop.f32.mrf.mxu1 }
 0x32c   :  { %v878_v29 = vpop.f32.mrf.mxu0  ;;  %v897_v30 = vpop.f32.mrf.mxu1 }
 0x334   :  { %v880_v33 = vpop.f32.mrf.mxu0  ;;  %v899_v34 = vpop.f32.mrf.mxu1 }
 0x338   :  { %v653_v44 = vpop.f32.mrf.mxu2  ;;  %v658_v62 = vpop.f32.mrf.mxu3 }
 0x340   :  { %v655_v6 = vpop.f32.mrf.mxu2  ;;  %v660_v13 = vpop.f32.mrf.mxu3 }
 0x341   :  { %v663_v11 = vpack.c.bf16 %v655_v6, %v653_v44  ;;  %v664_v14 = vpack.c.bf16 %v660_v13, %v658_v62 }
 0x343   :  { %10136 = vmatmul.msk.bf16.vlgmr.msra.gmra.mxu2 %vm514_vm0, %v663_v11  ;;  %10138 = vmatmul.msk.bf16.vlgmr.msrb.gmra.mxu3 %vm514_vm0, %v663_v11 }
 0x344   :  { %10140 = vmatmul.msk.bf16.vlgmr.msra.gmra.mxu0 %vm514_vm0, %v663_v11  ;;  %10142 = vmatmul.msk.bf16.vlgmr.msra.gmra.mxu1 %vm514_vm0, %v663_v11 }
 0x348   :  { %v695_v15 = vpop.f32.mrf.mxu3  ;;  %v835_v23 = vpop.f32.mrf.mxu2 }
 0x350   :  { %v697_v16 = vpop.f32.mrf.mxu3  ;;  %v837_v27 = vpop.f32.mrf.mxu2 }
 0x351   :  { %v705_v17 = vpack.c.bf16 %v697_v16, %v695_v15 }
 0x353   :  { %10137 = vmatmul.msk.bf16.gmra.mxu2 %vm514_vm0, %v664_v14  ;;  %10139 = vmatmul.msk.bf16.gmra.mxu3 %vm514_vm0, %v664_v14 }
 0x354   :  { %10141 = vmatmul.msk.bf16.gmra.mxu0 %vm514_vm0, %v664_v14  ;;  %10143 = vmatmul.msk.bf16.gmra.mxu1 %vm514_vm0, %v664_v14 }
 0x358   :  { %v700_v18 = vpop.f32.mrf.mxu3  ;;  %v840_v31 = vpop.f32.mrf.mxu2 }
 0x360   :  { %v702_v19 = vpop.f32.mrf.mxu3  ;;  %v842_v35 = vpop.f32.mrf.mxu2 }
 0x361   :  { %v706_v20 = vpack.c.bf16 %v702_v19, %v700_v18 }
 0x363   :  { %10208 = vmatmul.msk.bf16.vlgmr.msrb.gmra.mxu2 %vm514_vm0, %v705_v17  ;;  %10210 = vmatmul.msk.bf16.vlgmr.msra.gmra.mxu3 %vm514_vm0, %v705_v17 }
 0x364   :  { %10212 = vmatmul.msk.bf16.vlgmr.msrb.gmra.mxu0 %vm514_vm0, %v705_v17  ;;  %10214 = vmatmul.msk.bf16.vlgmr.msrb.gmra.mxu1 %vm514_vm0, %v705_v17 }
 0x368   :  { %v854_v24 = vpop.f32.mrf.mxu3 }
 0x370   :  { %v856_v28 = vpop.f32.mrf.mxu3 }
 0x373   :  { %10209 = vmatmul.msk.bf16.gmra.mxu2 %vm514_vm0, %v706_v20  ;;  %10211 = vmatmul.msk.bf16.gmra.mxu3 %vm514_vm0, %v706_v20 }
 0x374   :  { %10213 = vmatmul.msk.bf16.gmra.mxu0 %vm514_vm0, %v706_v20  ;;  %10215 = vmatmul.msk.bf16.gmra.mxu1 %vm514_vm0, %v706_v20 }
 0x378   :  { %v859_v32 = vpop.f32.mrf.mxu3 }
 0x380   :  { %v861_v36 = vpop.f32.mrf.mxu3 }
 0x3c1   :  { %v1035_v37 = vpop.f32.mrf.mxu0  ;;  %v1054_v38 = vpop.f32.mrf.mxu1 }
 0x3c2   :  { %v1036_v0 = vadd.f32 %v1035_v37, %v873_v21  ;;  %v1055_v1 = vadd.f32 %v1054_v38, %v892_v22 }
 0x3c6   :  { %v997_v39 = vpop.f32.mrf.mxu2  ;;  %v1016_v40 = vpop.f32.mrf.mxu3 }
 0x3c7   :  { %v998_v6 = vadd.f32 %v997_v39, %v835_v23  ;;  %v1017_v7 = vadd.f32 %v1016_v40, %v854_v24 }
 0x3c9   :  { %v1037_v41 = vpop.f32.mrf.mxu0  ;;  %v1056_v42 = vpop.f32.mrf.mxu1 }
 0x3ca   :  { %v1038_v10 = vadd.f32 %v1037_v41, %v875_v25  ;;  %v1057_v11 = vadd.f32 %v1056_v42, %v894_v26 }
 0x3ce   :  { %v999_v43 = vpop.f32.mrf.mxu2  ;;  %v1018_v44 = vpop.f32.mrf.mxu3 }
 0x3cf   :  { %v1000_v16 = vadd.f32 %v999_v43, %v837_v27  ;;  %v1019_v17 = vadd.f32 %v1018_v44, %v856_v28 }
 0x3d1   :  { %v1040_v45 = vpop.f32.mrf.mxu0  ;;  %v1059_v46 = vpop.f32.mrf.mxu1 }
 0x3d2   :  { %v1041_v2 = vadd.f32 %v1040_v45, %v878_v29  ;;  %v1060_v3 = vadd.f32 %v1059_v46, %v897_v30 }
 0x3d6   :  { %v1002_v47 = vpop.f32.mrf.mxu2  ;;  %v1021_v48 = vpop.f32.mrf.mxu3 }
 0x3d7   :  { %v1003_v23 = vadd.f32 %v1002_v47, %v840_v31  ;;  %v1022_v24 = vadd.f32 %v1021_v48, %v859_v32 }
 0x3d9   :  { %v1042_v49 = vpop.f32.mrf.mxu0  ;;  %v1061_v50 = vpop.f32.mrf.mxu1 }
 0x3da   :  { %v1043_v20 = vadd.f32 %v1042_v49, %v880_v33  ;;  %v1062_v21 = vadd.f32 %v1061_v50, %v899_v34 }
 0x3de   :  { %v1004_v51 = vpop.f32.mrf.mxu2  ;;  %v1023_v52 = vpop.f32.mrf.mxu3 }
 0x3df   :  { %v1005_v30 = vadd.f32 %v1004_v51, %v842_v35  ;;  %v1024_v37 = vadd.f32 %v1023_v52, %v861_v36 }
 0x3e1   :  { %v1214_v53 = vpop.f32.mrf.mxu0  ;;  %v1233_v54 = vpop.f32.mrf.mxu1 }
 0x3e2   :  { %v1245_v18 = vadd.f32 %v1214_v53, %v1036_v0  ;;  %v1246_v19 = vadd.f32 %v1233_v54, %v1055_v1 }
 0x3e4   :  { %v1271_v42 = vadd.f32 %v1263_v4, %v1245_v18  ;;  %v1272_v45 = vadd.f32 %v1264_v5, %v1246_v19  ;;  %v14105_v19 = vld [vmem:[#allocation11 + $0x8] sm:$0xff] }
 0x3e6   :  { %v1176_v55 = vpop.f32.mrf.mxu2  ;;  %v1195_v56 = vpop.f32.mrf.mxu3 }
 0x3e7   :  { %v1243_v46 = vadd.f32 %v1176_v55, %v998_v6  ;;  %v1244_v49 = vadd.f32 %v1195_v56, %v1017_v7 }
 0x3e9   :  { %v1216_v57 = vpop.f32.mrf.mxu0  ;;  %v1235_v58 = vpop.f32.mrf.mxu1  ;;  %v1269_v6 = vadd.f32 %v16245_v8, %v1243_v46  ;;  %v1270_v7 = vadd.f32 %v16247_v9, %v1244_v49 }
 0x3ea   :  { %v1249_v22 = vadd.f32 %v1216_v57, %v1038_v10  ;;  %v1250_v29 = vadd.f32 %v1235_v58, %v1057_v11 }
 0x3eb   :  { %v1286_v18 = vmax.f32 %v1270_v7, 0.0 }
 0x3ec   :  { %v1275_v43 = vadd.f32 %v1263_v4, %v1249_v22  ;;  %v1276_v44 = vadd.f32 %v1264_v5, %v1250_v29 }
 0x3ee   :  { %v1178_v59 = vpop.f32.mrf.mxu2  ;;  %v1197_v60 = vpop.f32.mrf.mxu3  ;;  %v1291_v58 = vmax.f32 %v1275_v43, 0.0  ;;  %v1292_v61 = vmax.f32 %v1276_v44, 0.0 }
 0x3ef   :  { %v1247_v31 = vadd.f32 %v1178_v59, %v1000_v16  ;;  %v1248_v32 = vadd.f32 %v1197_v60, %v1019_v17  ;;  %v1287_v59 = vmax.f32 %v1271_v42, 0.0  ;;  %v1288_v60 = vmax.f32 %v1272_v45, 0.0 }
 0x3f0   :  { %v1285_v17 = vmax.f32 %v1269_v6, 0.0 }
 0x3f1   :  { %v1219_v62 = vpop.f32.mrf.mxu0  ;;  %v1238_v63 = vpop.f32.mrf.mxu1  ;;  %v1273_v0 = vadd.f32 %v16245_v8, %v1247_v31  ;;  %v1274_v1 = vadd.f32 %v16247_v9, %v1248_v32  ;;  %v1303_v10 = vpack.c.bf16 %v1291_v58, %v1287_v59  ;;  %v1304_v11 = vpack.c.bf16 %v1292_v61, %v1288_v60  ;;  %v16275_v60 = vld [vmem:[#allocation12] sm:$0xff] }
 0x3f2   :  { %v1253_v12 = vadd.f32 %v1219_v62, %v1041_v2  ;;  %v1254_v13 = vadd.f32 %v1238_v63, %v1060_v3 }
 0x3f3   :  { %v1290_v16 = vmax.f32 %v1274_v1, 0.0 }
 0x3f4   :  { %v1279_v25 = vadd.f32 %v1263_v4, %v1253_v12  ;;  %v1280_v26 = vadd.f32 %v1264_v5, %v1254_v13 }
 0x3f6   :  { %v1181_v14 = vpop.f32.mrf.mxu2  ;;  %v1200_v15 = vpop.f32.mrf.mxu3  ;;  %v1295_v35 = vmax.f32 %v1279_v25, 0.0  ;;  %v1296_v36 = vmax.f32 %v1280_v26, 0.0 }
 0x3f7   :  { %v1251_v27 = vadd.f32 %v1181_v14, %v1003_v23  ;;  %v1252_v28 = vadd.f32 %v1200_v15, %v1022_v24  ;;  %v14104_v14 = vld [vmem:[#allocation11] sm:$0xff]  ;;  %v1289_v15 = vmax.f32 %v1273_v0, 0.0 }
 0x3f9   :  { %v1221_v38 = vpop.f32.mrf.mxu0  ;;  %v1240_v39 = vpop.f32.mrf.mxu1  ;;  %v1277_v52 = vadd.f32 %v16245_v8, %v1251_v27  ;;  %v1278_v53 = vadd.f32 %v16247_v9, %v1252_v28 }
 0x3fa   :  { %v1257_v40 = vadd.f32 %v1221_v38, %v1043_v20  ;;  %v1258_v41 = vadd.f32 %v1240_v39, %v1062_v21 }
 0x3fb   :  { %v1293_v2 = vmax.f32 %v1277_v52, 0.0  ;;  %v1294_v3 = vmax.f32 %v1278_v53, 0.0 }
 0x3fc   :  { %v1283_v33 = vadd.f32 %v1263_v4, %v1257_v40  ;;  %v1284_v34 = vadd.f32 %v1264_v5, %v1258_v41 }
 0x3fe   :  { %v1299_v47 = vmax.f32 %v1283_v33, 0.0  ;;  %v1300_v48 = vmax.f32 %v1284_v34, 0.0  ;;  %v1183_v50 = vpop.f32.mrf.mxu2  ;;  %v1202_v51 = vpop.f32.mrf.mxu3 }
 0x3ff   :  { %v1255_v54 = vadd.f32 %v1183_v50, %v1005_v30  ;;  %v1256_v57 = vadd.f32 %v1202_v51, %v1024_v37 }
 0x400   :  { %v1307_v62 = vpack.c.bf16 %v1299_v47, %v1295_v35  ;;  %v1308_v63 = vpack.c.bf16 %v1300_v48, %v1296_v36 }
 0x401   :  { %v1281_v55 = vadd.f32 %v16245_v8, %v1255_v54  ;;  %v1282_v56 = vadd.f32 %v16247_v9, %v1256_v57  ;;  %v1301_v8 = vpack.c.bf16 %v1289_v15, %v1285_v17  ;;  %v1302_v9 = vpack.c.bf16 %v1290_v16, %v1286_v18  ;;  %v14354_v15 = vld [vmem:[#allocation14 + $0x7ac] sm:$0xf0] }
 0x402   :  { %1353 = vmatpush.bf16.msra.mxu0 %v1307_v62  ;;  %1367 = vmatpush.bf16.msra.mxu1 %v1308_v63 }
 0x403   :  { %v1297_v4 = vmax.f32 %v1281_v55, 0.0  ;;  %v1298_v5 = vmax.f32 %v1282_v56, 0.0  ;;  %v14362_v55 = vld [vmem:[#allocation14 + $0x7ec] sm:$0xf0] }
 0x405   :  { %v1305_v12 = vpack.c.bf16 %v1297_v4, %v1293_v2  ;;  %v1306_v13 = vpack.c.bf16 %v1298_v5, %v1294_v3  ;;  %v10730_v2 = vld [vmem:[#allocation14 + $0x7c0] sm:$0xf]  ;;  %v14358_v3 = vld [vmem:[#allocation14 + $0x7cc] sm:$0xf0] }
 0x406   :  { %1354 = vmatpush.bf16.msra.mxu0 %v1303_v10  ;;  %1368 = vmatpush.bf16.msra.mxu1 %v1304_v11  ;;  %v10731_v7 = vor.u32 %v14358_v3, %v10730_v2  ;;  %v10442_v2 = vld [vmem:[#allocation14 + $0x580] sm:$0xf]  ;;  %v14286_v3 = vld [vmem:[#allocation14 + $0x58c] sm:$0xf0] }
 0x407   :  { %1325 = vmatpush.bf16.msra.mxu2 %v1305_v12  ;;  %1339 = vmatpush.bf16.msrb.mxu3 %v1306_v13 }
 0x409   :  { %10222 = vmatmul.msk.bf16.vlgmr.msra.gmra.mxu0 %vm637_vm2, %v14104_v14  ;;  %10223 = vmatmul.msk.bf16.vlgmr.msra.gmra.mxu1 %vm637_vm2, %v14104_v14 }
 0x40a   :  { %1420 = vmatpush.bf16.msrb.mxu0 %v1307_v62  ;;  %1434 = vmatpush.bf16.msrb.mxu1 %v1308_v63  ;;  %v10746_v63 = vld [vmem:[#allocation14 + $0x7e0] sm:$0xf] }
 0x40b   :  { %1326 = vmatpush.bf16.msra.mxu2 %v1301_v8  ;;  %1340 = vmatpush.bf16.msrb.mxu3 %v1302_v9  ;;  %v10747_v1 = vor.u32 %v14362_v55, %v10746_v63 }
 0x40e   :  { %1421 = vmatpush.bf16.msrb.mxu0 %v1303_v10  ;;  %1435 = vmatpush.bf16.msrb.mxu1 %v1304_v11 }
 0x40f   :  { %1392 = vmatpush.bf16.msrb.mxu2 %v1305_v12  ;;  %1406 = vmatpush.bf16.msra.mxu3 %v1306_v13 }
 0x410   :  { %10220 = vmatmul.msk.bf16.vlgmr.msra.gmra.mxu2 %vm637_vm2, %v14104_v14  ;;  %10221 = vmatmul.msk.bf16.vlgmr.msrb.gmra.mxu3 %vm637_vm2, %v14104_v14  ;;  %v10714_v14 = vld [vmem:[#allocation14 + $0x7a0] sm:$0xf] }
 0x413   :  { %1393 = vmatpush.bf16.msrb.mxu2 %v1301_v8  ;;  %1407 = vmatpush.bf16.msra.mxu3 %v1302_v9 }
 0x419   :  { %10230 = vmatmul.msk.bf16.vlgmr.msrb.gmra.mxu0 %vm637_vm2, %v14105_v19  ;;  %10231 = vmatmul.msk.bf16.vlgmr.msrb.gmra.mxu1 %vm637_vm2, %v14105_v19 }
 0x420   :  { %10228 = vmatmul.msk.bf16.vlgmr.msrb.gmra.mxu2 %vm637_vm2, %v14105_v19  ;;  %10229 = vmatmul.msk.bf16.vlgmr.msra.gmra.mxu3 %vm637_vm2, %v14105_v19 }
 0x486   :  { %v1370_v20 = vpop.f32.mrf.mxu1  ;;  %v1356_v21 = vpop.f32.mrf.mxu0 }
 0x48e   :  { %v1372_v22 = vpop.f32.mrf.mxu1  ;;  %v1358_v24 = vpop.f32.mrf.mxu0 }
 0x493   :  { %v1328_v29 = vpop.f32.mrf.mxu2  ;;  %v1342_v23 = vpop.f32.mrf.mxu3 }
 0x496   :  { %v1437_v30 = vpop.f32.mrf.mxu1  ;;  %v1423_v39 = vpop.f32.mrf.mxu0 }
 0x497   :  { %v1445_v26 = vmax.f32 %v1370_v20, %v1437_v30  ;;  %v1444_v46 = vmax.f32 %v1356_v21, %v1423_v39  ;;  %v14298_v39 = vld [vmem:[#allocation14 + $0x5ec] sm:$0xf0] }
 0x49b   :  { %v1330_v37 = vpop.f32.mrf.mxu2  ;;  %v1344_v38 = vpop.f32.mrf.mxu3 }
 0x49e   :  { %v1439_v25 = vpop.f32.mrf.mxu1  ;;  %v1425_v44 = vpop.f32.mrf.mxu0 }
 0x49f   :  { %v1449_v40 = vmax.f32 %v1372_v22, %v1439_v25  ;;  %v1448_v49 = vmax.f32 %v1358_v24, %v1425_v44  ;;  %v10715_v22 = vor.u32 %v14354_v15, %v10714_v14  ;;  %v10618_v25 = vld [vmem:[#allocation14 + $0x6e0] sm:$0xf] }
 0x4a1   :  { %v15146_v41 = vpack.i.bf16 %v1449_v40, %v1445_v26 }
 0x4a3   :  { %v1395_v42 = vpop.f32.mrf.mxu2  ;;  %v1409_v45 = vpop.f32.mrf.mxu3  ;;  %15147 = vrot.lane.b32.xlu1 %v15146_v41, %s15855_s18  ;;  %v14350_v41 = vld [vmem:[#allocation14 + $0x78c] sm:$0xf0] }
 0x4a4   :  { %v16265_v27 = vmax.f32 %v1328_v29, %v1395_v42  ;;  %v16267_v28 = vmax.f32 %v1342_v23, %v1409_v45  ;;  %v10362_v29 = vld [vmem:[#allocation14 + $0x4e0] sm:$0xf]  ;;  %v14266_v23 = vld [vmem:[#allocation14 + $0x4ec] sm:$0xf0] }
 0x4a5   :  { %v10363_v42 = vor.u32 %v14266_v23, %v10362_v29 }
 0x4a6   :  { %v15131_v43 = vpack.i.bf16 %v16267_v28, %v16265_v27 }
 0x4a8   :  { %15132 = vrot.lane.b32.xlu2 %v15131_v43, %s15855_s18  ;;  %v14262_v43 = vld [vmem:[#allocation14 + $0x4cc] sm:$0xf0] }
 0x4ab   :  { %v1397_v33 = vpop.f32.mrf.mxu2  ;;  %v1411_v34 = vpop.f32.mrf.mxu3 }
 0x4ac   :  { %v1446_v31 = vmax.f32 %v1330_v37, %v1397_v33  ;;  %v1447_v32 = vmax.f32 %v1344_v38, %v1411_v34  ;;  %v10490_v38 = vld [vmem:[#allocation14 + $0x5e0] sm:$0xf] }
 0x4ad   :  { %v10491_v45 = vor.u32 %v14298_v39, %v10490_v38  ;;  %v10474_v34 = vld [vmem:[#allocation14 + $0x5c0] sm:$0xf] }
 0x4ae   :  { %v15136_v35 = vpack.i.bf16 %v1446_v31, %v1444_v46  ;;  %v15141_v36 = vpack.i.bf16 %v1448_v49, %v1447_v32  ;;  %v10282_v39 = vld [vmem:[#allocation14 + $0x440] sm:$0xf] }
 0x4b0   :  { %15142 = vrot.lane.b32.xlu0 %v15141_v36, %s15855_s18  ;;  %15137 = vrot.lane.b32.xlu2 %v15136_v35, %s15855_s18  ;;  %v14346_v35 = vld [vmem:[#allocation14 + $0x76c] sm:$0xf0] }
 0x502   :  { %v15133_v47 = vpop.permute.xlu2 %15132 }
 0x503   :  { %v15134_v51 = vunpack.i.l.bf16 %v15133_v47  ;;  %v15135_v59 = vunpack.i.h.bf16 %v15133_v47 }
 0x505   :  { %v1475_v4 = vsel %vm1474_vm3, %v15134_v51, %v15135_v59 }
 0x506   :  { %v1493_v13 = vmax.f32 %v16265_v27, %v1475_v4  ;;  %v16298_v27 = vld [vmem:[#allocation12 + $0x8] sm:$0xff]  ;;  %v10570_v4 = vld [vmem:[#allocation14 + $0x680] sm:$0xf] }
 0x50a   :  { %v15138_v48 = vpop.permute.xlu2 %15137 }
 0x50b   :  { %v15140_v52 = vunpack.i.h.bf16 %v15138_v48  ;;  %v15139_v0 = vunpack.i.l.bf16 %v15138_v48  ;;  %v10330_v48 = vld [vmem:[#allocation14 + $0x4a0] sm:$0xf] }
 0x50d   :  { %v1476_v5 = vsel %vm1474_vm3, %v15135_v59, %v15139_v0  ;;  %v10314_v59 = vld [vmem:[#allocation14 + $0x480] sm:$0xf] }
 0x50e   :  { %v1494_v16 = vmax.f32 %v16267_v28, %v1476_v5  ;;  %v10346_v28 = vld [vmem:[#allocation14 + $0x4c0] sm:$0xf]  ;;  %v14318_v5 = vld [vmem:[#allocation14 + $0x68c] sm:$0xf0] }
 0x50f   :  { %v10347_v36 = vor.u32 %v14262_v43, %v10346_v28  ;;  %v10571_v14 = vor.u32 %v14318_v5, %v10570_v4  ;;  %v14356_v28 = vld [vmem:[#allocation14 + $0x7c4] sm:$0xf]  ;;  %v10732_v43 = vld [vmem:[#allocation14 + $0x7d0] sm:$0xf0] }
 0x510   :  { %v14348_v4 = vld [vmem:[#allocation14 + $0x784] sm:$0xf]  ;;  %v10700_v5 = vld [vmem:[#allocation14 + $0x790] sm:$0xf0] }
 0x515   :  { %v15148_v50 = vpop.permute.xlu1 %15147 }
 0x516   :  { %v15150_v53 = vunpack.i.h.bf16 %v15148_v50  ;;  %v15149_v54 = vunpack.i.l.bf16 %v15148_v50  ;;  %v14258_v50 = vld [vmem:[#allocation14 + $0x4ac] sm:$0xf0] }
 0x517   :  { %v10331_v63 = vor.u32 %v14258_v50, %v10330_v48  ;;  %v14352_v48 = vld [vmem:[#allocation14 + $0x7a4] sm:$0xf]  ;;  %v10716_v50 = vld [vmem:[#allocation14 + $0x7b0] sm:$0xf0] }
 0x518   :  { %v1491_v57 = vsel %vm1474_vm3, %v15149_v54, %v15134_v51  ;;  %v1492_v58 = vsel %vm1474_vm3, %v15150_v53, %v15140_v52  ;;  %v1477_v10 = vsel %vm1474_vm3, %v15139_v0, %v15149_v54  ;;  %v14290_v54 = vld [vmem:[#allocation14 + $0x5ac] sm:$0xf0] }
 0x519   :  { %v1496_v61 = vmax.f32 %v1445_v26, %v1491_v57  ;;  %v1500_v62 = vmax.f32 %v1449_v40, %v1492_v58  ;;  %v1495_v9 = vmax.f32 %v1444_v46, %v1477_v10  ;;  %v14330_v26 = vld [vmem:[#allocation14 + $0x6ec] sm:$0xf0]  ;;  %v10698_v40 = vld [vmem:[#allocation14 + $0x780] sm:$0xf] }
 0x51a   :  { %v10619_v44 = vor.u32 %v14330_v26, %v10618_v25  ;;  %v10699_v33 = vor.u32 %v14350_v41, %v10698_v40  ;;  %v14294_v46 = vld [vmem:[#allocation14 + $0x5cc] sm:$0xf0]  ;;  %v10586_v57 = vld [vmem:[#allocation14 + $0x6a0] sm:$0xf] }
 0x51b   :  { %v16273_v56 = vpack.c.bf16 %v1500_v62, %v1496_v61  ;;  %v10475_v47 = vor.u32 %v14294_v46, %v10474_v34  ;;  %v14322_v58 = vld [vmem:[#allocation14 + $0x6ac] sm:$0xf0]  ;;  %v10666_v61 = vld [vmem:[#allocation14 + $0x740] sm:$0xf] }
 0x51c   :  { %v14342_v62 = vld [vmem:[#allocation14 + $0x74c] sm:$0xf0]  ;;  %v10587_v0 = vor.u32 %v14322_v58, %v10586_v57  ;;  %v10410_v26 = vld [vmem:[#allocation14 + $0x540] sm:$0xf] }
 0x51d   :  { %1565 = vmatpush.bf16.msra.mxu1 %v16273_v56  ;;  %v14246_v25 = vld [vmem:[#allocation14 + $0x44c] sm:$0xf0]  ;;  %v10266_v46 = vld [vmem:[#allocation14 + $0x420] sm:$0xf] }
 0x51e   :  { %v14278_v41 = vld [vmem:[#allocation14 + $0x54c] sm:$0xf0]  ;;  %v10378_v57 = vld [vmem:[#allocation14 + $0x500] sm:$0xf] }
 0x51f   :  { %v14270_v58 = vld [vmem:[#allocation14 + $0x50c] sm:$0xf0] }
 0x520   :  { %10239 = vmatmul.msk.bf16.vlgmr.msra.gmra.mxu1 %vm1512_vm4, %v16275_v60 }
 0x521   :  { %1636 = vmatpush.bf16.msrb.mxu1 %v16273_v56 }
 0x522   :  { %v15143_v6 = vpop.permute.xlu0 %15142 }
 0x523   :  { %v15145_v11 = vunpack.i.h.bf16 %v15143_v6  ;;  %v15144_v12 = vunpack.i.l.bf16 %v15143_v6  ;;  %v10650_v6 = vld [vmem:[#allocation14 + $0x720] sm:$0xf] }
 0x525   :  { %2586 = vmatpush.bf16.msra.mxu1 %v10747_v1  ;;  %v1480_v17 = vsel %vm1474_vm3, %v15145_v11, %v15150_v53  ;;  %v1478_v18 = vsel %vm1474_vm3, %v15140_v52, %v15144_v12  ;;  %v1479_v8 = vsel %vm1474_vm3, %v15144_v12, %v15145_v11  ;;  %v10458_v53 = vld [vmem:[#allocation14 + $0x5a0] sm:$0xf]  ;;  %v10667_v1 = vor.u32 %v14342_v62, %v10666_v61 }
 0x526   :  { %v1499_v19 = vmax.f32 %v1448_v49, %v1480_v17  ;;  %v1497_v20 = vmax.f32 %v1446_v31, %v1478_v18  ;;  %v1498_v21 = vmax.f32 %v1447_v32, %v1479_v8  ;;  %v10602_v49 = vld [vmem:[#allocation14 + $0x6c0] sm:$0xf]  ;;  %v14326_v31 = vld [vmem:[#allocation14 + $0x6cc] sm:$0xf0]  ;;  %v10459_v55 = vor.u32 %v14290_v54, %v10458_v53 }
 0x527   :  { %v10682_v32 = vld [vmem:[#allocation14 + $0x760] sm:$0xf]  ;;  %v10603_v51 = vor.u32 %v14326_v31, %v10602_v49  ;;  %v10443_v11 = vor.u32 %v14286_v3, %v10442_v2  ;;  %v14282_v17 = vld [vmem:[#allocation14 + $0x56c] sm:$0xf0]  ;;  %v10719_v62 = vor.u32 %v14352_v48, %v10716_v50  ;;  %v10620_v3 = vld [vmem:[#allocation14 + $0x6f0] sm:$0xf0] }
 0x528   :  { %v16289_v24 = vpack.c.bf16 %v1497_v20, %v1493_v13  ;;  %v16291_v30 = vpack.c.bf16 %v1498_v21, %v1494_v16  ;;  %v16293_v37 = vpack.c.bf16 %v1499_v19, %v1495_v9  ;;  %v10683_v52 = vor.u32 %v14346_v35, %v10682_v32  ;;  %v10298_v12 = vld [vmem:[#allocation14 + $0x460] sm:$0xf]  ;;  %v14250_v13 = vld [vmem:[#allocation14 + $0x46c] sm:$0xf0]  ;;  %v14360_v20 = vld [vmem:[#allocation14 + $0x7e4] sm:$0xf] }
 0x529   :  { %2587 = vmatpush.bf16.msra.mxu1 %v10731_v7  ;;  %v14338_v7 = vld [vmem:[#allocation14 + $0x72c] sm:$0xf0]  ;;  %v10426_v16 = vld [vmem:[#allocation14 + $0x560] sm:$0xf]  ;;  %v10748_v21 = vld [vmem:[#allocation14 + $0x7f0] sm:$0xf0]  ;;  %v10735_v32 = vor.u32 %v14356_v28, %v10732_v43 }
 0x52a   :  { %1523 = vmatpush.bf16.msra.mxu2 %v16289_v24  ;;  %1537 = vmatpush.bf16.msrb.mxu3 %v16291_v30  ;;  %v10651_v15 = vor.u32 %v14338_v7, %v10650_v6  ;;  %v10554_v18 = vld [vmem:[#allocation14 + $0x660] sm:$0xf]  ;;  %v14314_v8 = vld [vmem:[#allocation14 + $0x66c] sm:$0xf0]  ;;  %v10427_v29 = vor.u32 %v14282_v17, %v10426_v16  ;;  %v10751_v40 = vor.u32 %v14360_v20, %v10748_v21  ;;  %v14292_v16 = vld [vmem:[#allocation14 + $0x5c4] sm:$0xf] }
 0x52b   :  { %1551 = vmatpush.bf16.msra.mxu0 %v16293_v37  ;;  %v10634_v9 = vld [vmem:[#allocation14 + $0x700] sm:$0xf]  ;;  %v14334_v19 = vld [vmem:[#allocation14 + $0x70c] sm:$0xf0]  ;;  %v10555_v23 = vor.u32 %v14314_v8, %v10554_v18  ;;  %v10379_v6 = vor.u32 %v14270_v58, %v10378_v57  ;;  %v10476_v17 = vld [vmem:[#allocation14 + $0x5d0] sm:$0xf0] }
 0x52c   :  { %v10635_v38 = vor.u32 %v14334_v19, %v10634_v9  ;;  %v14242_v49 = vld [vmem:[#allocation14 + $0x42c] sm:$0xf0]  ;;  %v10394_v31 = vld [vmem:[#allocation14 + $0x520] sm:$0xf]  ;;  %v14324_v18 = vld [vmem:[#allocation14 + $0x6c4] sm:$0xf]  ;;  %v10479_v21 = vor.u32 %v14292_v16, %v10476_v17 }
 0x52d   :  { %2588 = vmatpush.bf16.msra.mxu1 %v10715_v22  ;;  %10236 = vmatmul.msk.bf16.vlgmr.msra.gmra.mxu2 %vm1512_vm4, %v16275_v60  ;;  %v10299_v22 = vor.u32 %v14250_v13, %v10298_v12  ;;  %v14274_v35 = vld [vmem:[#allocation14 + $0x52c] sm:$0xf0]  ;;  %v10506_v61 = vld [vmem:[#allocation14 + $0x600] sm:$0xf]  ;;  %v14260_v12 = vld [vmem:[#allocation14 + $0x4c4] sm:$0xf] }
 0x52e   :  { %1594 = vmatpush.bf16.msrb.mxu2 %v16289_v24  ;;  %1608 = vmatpush.bf16.msra.mxu3 %v16291_v30  ;;  %v10395_v53 = vor.u32 %v14274_v35, %v10394_v31  ;;  %v10348_v13 = vld [vmem:[#allocation14 + $0x4d0] sm:$0xf0]  ;;  %v14344_v9 = vld [vmem:[#allocation14 + $0x764] sm:$0xf] }
 0x52f   :  { %1622 = vmatpush.bf16.msrb.mxu0 %v16293_v37  ;;  %10237 = vmatmul.msk.bf16.vlgmr.msrb.gmra.mxu3 %vm1512_vm4, %v16275_v60  ;;  %v10604_v8 = vld [vmem:[#allocation14 + $0x6d0] sm:$0xf0]  ;;  %v10351_v20 = vor.u32 %v14260_v12, %v10348_v13  ;;  %v14252_v43 = vld [vmem:[#allocation14 + $0x484] sm:$0xf]  ;;  %v14359_v12 = vld [vmem:[#allocation14 + $0x7d4] sm:$0xf0] }
 0x530   :  { %10238 = vmatmul.msk.bf16.vlgmr.msra.gmra.mxu0 %vm1512_vm4, %v16275_v60  ;;  %10247 = vmatmul.msk.bf16.vlgmr.msrb.gmra.mxu1 %vm1512_vm4, %v16298_v27  ;;  %v14254_v60 = vld [vmem:[#allocation14 + $0x48c] sm:$0xf0]  ;;  %v10684_v19 = vld [vmem:[#allocation14 + $0x770] sm:$0xf0]  ;;  %v14316_v31 = vld [vmem:[#allocation14 + $0x684] sm:$0xf] }
 0x531   :  { %2589 = vmatpush.bf16.msra.mxu1 %v10699_v33  ;;  %v10315_v10 = vor.u32 %v14254_v60, %v10314_v59  ;;  %v10411_v33 = vor.u32 %v14278_v41, %v10410_v26  ;;  %v10364_v59 = vld [vmem:[#allocation14 + $0x4f0] sm:$0xf0]  ;;  %v14296_v60 = vld [vmem:[#allocation14 + $0x5e4] sm:$0xf] }
 0x532   :  { %2544 = vmatpush.bf16.msra.mxu2 %v10363_v42  ;;  %2558 = vmatpush.bf16.msrb.mxu3 %v10491_v45  ;;  %v10538_v42 = vld [vmem:[#allocation14 + $0x640] sm:$0xf]  ;;  %v14310_v45 = vld [vmem:[#allocation14 + $0x64c] sm:$0xf0]  ;;  %v14320_v26 = vld [vmem:[#allocation14 + $0x6a4] sm:$0xf] }
 0x533   :  { %2572 = vmatpush.bf16.msra.mxu0 %v10619_v44  ;;  %v10283_v44 = vor.u32 %v14246_v25, %v10282_v39  ;;  %v10539_v34 = vor.u32 %v14310_v45, %v10538_v42  ;;  %v14288_v39 = vld [vmem:[#allocation14 + $0x5a4] sm:$0xf]  ;;  %v10460_v25 = vld [vmem:[#allocation14 + $0x5b0] sm:$0xf0] }
 0x534   :  { %v14340_v41 = vld [vmem:[#allocation14 + $0x744] sm:$0xf]  ;;  %v10668_v42 = vld [vmem:[#allocation14 + $0x750] sm:$0xf0]  ;;  %v10463_v28 = vor.u32 %v14288_v39, %v10460_v25 }
 0x535   :  { %2590 = vmatpush.bf16.msra.mxu1 %v10683_v52  ;;  %v14238_v52 = vld [vmem:[#allocation14 + $0x40c] sm:$0xf0]  ;;  %v14336_v35 = vld [vmem:[#allocation14 + $0x724] sm:$0xf]  ;;  %v10556_v58 = vld [vmem:[#allocation14 + $0x670] sm:$0xf0] }
 0x536   :  { %2545 = vmatpush.bf16.msra.mxu2 %v10347_v36  ;;  %2559 = vmatpush.bf16.msrb.mxu3 %v10475_v47  ;;  %v10522_v36 = vld [vmem:[#allocation14 + $0x620] sm:$0xf]  ;;  %v14306_v47 = vld [vmem:[#allocation14 + $0x62c] sm:$0xf0]  ;;  %v14248_v50 = vld [vmem:[#allocation14 + $0x464] sm:$0xf] }
 0x537   :  { %2573 = vmatpush.bf16.msra.mxu0 %v10603_v51  ;;  %v10250_v51 = vld [vmem:[#allocation14 + $0x400] sm:$0xf]  ;;  %v10523_v54 = vor.u32 %v14306_v47, %v10522_v36  ;;  %v10652_v36 = vld [vmem:[#allocation14 + $0x730] sm:$0xf0]  ;;  %v14312_v57 = vld [vmem:[#allocation14 + $0x664] sm:$0xf] }
 0x538   :  { %v10251_v2 = vor.u32 %v14238_v52, %v10250_v51  ;;  %v10655_v52 = vor.u32 %v14336_v35, %v10652_v36  ;;  %v14240_v16 = vld [vmem:[#allocation14 + $0x424] sm:$0xf]  ;;  %v10268_v17 = vld [vmem:[#allocation14 + $0x430] sm:$0xf0] }
 0x539   :  { %2591 = vmatpush.bf16.msra.mxu1 %v10667_v1  ;;  %v14328_v1 = vld [vmem:[#allocation14 + $0x6e4] sm:$0xf] }
 0x53a   :  { %2546 = vmatpush.bf16.msra.mxu2 %v10331_v63  ;;  %2560 = vmatpush.bf16.msrb.mxu3 %v10459_v55  ;;  %v14302_v63 = vld [vmem:[#allocation14 + $0x60c] sm:$0xf0]  ;;  %v14264_v55 = vld [vmem:[#allocation14 + $0x4e4] sm:$0xf] }
 0x53b   :  { %2574 = vmatpush.bf16.msra.mxu0 %v10587_v0  ;;  %v10492_v0 = vld [vmem:[#allocation14 + $0x5f0] sm:$0xf0]  ;;  %v10507_v7 = vor.u32 %v14302_v63, %v10506_v61  ;;  %v14332_v61 = vld [vmem:[#allocation14 + $0x704] sm:$0xf]  ;;  %v10754_v63 = vld [vmem:[#allocation14 + $0x7e8] sm:$0xf] }
 0x53d   :  { %2592 = vmatpush.bf16.msra.mxu1 %v10651_v15  ;;  %10244 = vmatmul.msk.bf16.vlgmr.msrb.gmra.mxu2 %vm1512_vm4, %v16298_v27  ;;  %v10703_v15 = vor.u32 %v14348_v4, %v10700_v5  ;;  %v14276_v4 = vld [vmem:[#allocation14 + $0x544] sm:$0xf] }
 0x53e   :  { %2547 = vmatpush.bf16.msra.mxu2 %v10315_v10  ;;  %2561 = vmatpush.bf16.msrb.mxu3 %v10443_v11  ;;  %v10367_v10 = vor.u32 %v14264_v55, %v10364_v59  ;;  %v10495_v11 = vor.u32 %v14296_v60, %v10492_v0  ;;  %v14363_v55 = vld [vmem:[#allocation14 + $0x7f4] sm:$0xf0]  ;;  %v10559_v0 = vor.u32 %v14312_v57, %v10556_v58  ;;  %v10610_v57 = vld [vmem:[#allocation14 + $0x6c8] sm:$0xf] }
 0x53f   :  { %2575 = vmatpush.bf16.msra.mxu0 %v10571_v14  ;;  %10245 = vmatmul.msk.bf16.vlgmr.msra.gmra.mxu3 %vm1512_vm4, %v16298_v27  ;;  %v10623_v14 = vor.u32 %v14328_v1, %v10620_v3  ;;  %v10284_v3 = vld [vmem:[#allocation14 + $0x450] sm:$0xf0]  ;;  %v10755_v5 = vor.u32 %v14363_v55, %v10754_v63  ;;  %v14327_v58 = vld [vmem:[#allocation14 + $0x6d4] sm:$0xf0] }
 0x540   :  { %10246 = vmatmul.msk.bf16.vlgmr.msrb.gmra.mxu0 %vm1512_vm4, %v16298_v27  ;;  %v10267_v27 = vor.u32 %v14242_v49, %v10266_v46  ;;  %v14284_v46 = vld [vmem:[#allocation14 + $0x584] sm:$0xf]  ;;  %v10444_v49 = vld [vmem:[#allocation14 + $0x590] sm:$0xf0] }
 0x541   :  { %2593 = vmatpush.bf16.msra.mxu1 %v10635_v38  ;;  %v10687_v38 = vor.u32 %v14344_v9, %v10684_v19  ;;  %v10447_v48 = vor.u32 %v14284_v46, %v10444_v49  ;;  %v10396_v9 = vld [vmem:[#allocation14 + $0x530] sm:$0xf0]  ;;  %v14304_v19 = vld [vmem:[#allocation14 + $0x624] sm:$0xf]  ;;  %v14331_v49 = vld [vmem:[#allocation14 + $0x6f4] sm:$0xf0] }
 0x542   :  { %2548 = vmatpush.bf16.msra.mxu2 %v10299_v22  ;;  %2562 = vmatpush.bf16.msrb.mxu3 %v10427_v29  ;;  %v14256_v22 = vld [vmem:[#allocation14 + $0x4a4] sm:$0xf]  ;;  %v10332_v29 = vld [vmem:[#allocation14 + $0x4b0] sm:$0xf0] }
 0x543   :  { %2576 = vmatpush.bf16.msra.mxu0 %v10555_v23  ;;  %v10607_v23 = vor.u32 %v14324_v18, %v10604_v8  ;;  %v10335_v45 = vor.u32 %v14256_v22, %v10332_v29  ;;  %v14272_v18 = vld [vmem:[#allocation14 + $0x524] sm:$0xf]  ;;  %v14355_v22 = vld [vmem:[#allocation14 + $0x7b4] sm:$0xf0]  ;;  %v10271_v29 = vor.u32 %v14240_v16, %v10268_v17  ;;  %v10450_v16 = vld [vmem:[#allocation14 + $0x588] sm:$0xf] }
 0x544   :  { %2594 = vmatmul.bf16.vlgmr.msra.gmra.mxu1 %v16273_v56  ;;  %v10399_v39 = vor.u32 %v14272_v18, %v10396_v9  ;;  %v14287_v17 = vld [vmem:[#allocation14 + $0x594] sm:$0xf0]  ;;  %v10578_v18 = vld [vmem:[#allocation14 + $0x688] sm:$0xf] }
 0x545   :  { %2642 = vmatpush.bf16.msrb.mxu1 %v10751_v40  ;;  %v10588_v40 = vld [vmem:[#allocation14 + $0x6b0] sm:$0xf0]  ;;  %v10658_v9 = vld [vmem:[#allocation14 + $0x728] sm:$0xf] }
 0x546   :  { %2549 = vmatpush.bf16.msra.mxu2 %v10283_v44  ;;  %2563 = vmatpush.bf16.msrb.mxu3 %v10411_v33  ;;  %v10316_v44 = vld [vmem:[#allocation14 + $0x490] sm:$0xf0]  ;;  %v10591_v33 = vor.u32 %v14320_v26, %v10588_v40  ;;  %v14268_v26 = vld [vmem:[#allocation14 + $0x504] sm:$0xf] }
 0x547   :  { %2577 = vmatpush.bf16.msra.mxu0 %v10539_v34  ;;  %v10671_v34 = vor.u32 %v14340_v41, %v10668_v42  ;;  %v10319_v47 = vor.u32 %v14252_v43, %v10316_v44  ;;  %v10380_v40 = vld [vmem:[#allocation14 + $0x510] sm:$0xf0]  ;;  %v14300_v41 = vld [vmem:[#allocation14 + $0x604] sm:$0xf]  ;;  %v14267_v43 = vld [vmem:[#allocation14 + $0x4f4] sm:$0xf0] }
 0x548   :  { %v10498_v44 = vld [vmem:[#allocation14 + $0x5e8] sm:$0xf]  ;;  %v10383_v35 = vor.u32 %v14268_v26, %v10380_v40  ;;  %v14315_v40 = vld [vmem:[#allocation14 + $0x674] sm:$0xf0] }
 0x549   :  { %2643 = vmatpush.bf16.msrb.mxu1 %v10735_v32  ;;  %v10572_v32 = vld [vmem:[#allocation14 + $0x690] sm:$0xf0]  ;;  %v10562_v26 = vld [vmem:[#allocation14 + $0x668] sm:$0xf] }
 0x54a   :  { %2550 = vmatpush.bf16.msra.mxu2 %v10267_v27  ;;  %2564 = vmatpush.bf16.msrb.mxu3 %v10395_v53  ;;  %v10300_v27 = vld [vmem:[#allocation14 + $0x470] sm:$0xf0]  ;;  %v10575_v51 = vor.u32 %v14316_v31, %v10572_v32  ;;  %v14280_v53 = vld [vmem:[#allocation14 + $0x564] sm:$0xf]  ;;  %v10706_v31 = vld [vmem:[#allocation14 + $0x788] sm:$0xf] }
 0x54b   :  { %2578 = vmatpush.bf16.msra.mxu0 %v10523_v54  ;;  %v10428_v54 = vld [vmem:[#allocation14 + $0x570] sm:$0xf0]  ;;  %v10303_v59 = vor.u32 %v14248_v50, %v10300_v27  ;;  %v14351_v32 = vld [vmem:[#allocation14 + $0x794] sm:$0xf0]  ;;  %v10354_v50 = vld [vmem:[#allocation14 + $0x4c8] sm:$0xf] }
 0x54c   :  { %v10431_v60 = vor.u32 %v14280_v53, %v10428_v54  ;;  %v14263_v27 = vld [vmem:[#allocation14 + $0x4d4] sm:$0xf0]  ;;  %v10482_v53 = vld [vmem:[#allocation14 + $0x5c8] sm:$0xf] }
 0x54d   :  { %2644 = vmatpush.bf16.msrb.mxu1 %v10719_v62  ;;  %v10636_v62 = vld [vmem:[#allocation14 + $0x710] sm:$0xf0]  ;;  %v14295_v54 = vld [vmem:[#allocation14 + $0x5d4] sm:$0xf0]  ;;  %v10355_v63 = vor.u32 %v14263_v27, %v10354_v50  ;;  %v10740_v50 = vld [vmem:[#allocation14 + $0x7d8] sm:$0xf0] }
 0x54e   :  { %2551 = vmatpush.bf16.msra.mxu2 %v10251_v2  ;;  %2565 = vmatpush.bf16.msrb.mxu3 %v10379_v6  ;;  %v10639_v1 = vor.u32 %v14332_v61, %v10636_v62  ;;  %v14244_v2 = vld [vmem:[#allocation14 + $0x444] sm:$0xf]  ;;  %v10412_v6 = vld [vmem:[#allocation14 + $0x550] sm:$0xf0]  ;;  %v10690_v61 = vld [vmem:[#allocation14 + $0x768] sm:$0xf]  ;;  %v10483_v55 = vor.u32 %v14295_v54, %v10482_v53 }
 0x54f   :  { %2579 = vmatpush.bf16.msra.mxu0 %v10507_v7  ;;  %v14308_v7 = vld [vmem:[#allocation14 + $0x644] sm:$0xf]  ;;  %v10287_v13 = vor.u32 %v14244_v2, %v10284_v3  ;;  %v14347_v62 = vld [vmem:[#allocation14 + $0x774] sm:$0xf0]  ;;  %v10466_v2 = vld [vmem:[#allocation14 + $0x5a8] sm:$0xf] }
 0x550   :  { %v14291_v3 = vld [vmem:[#allocation14 + $0x5b4] sm:$0xf0]  ;;  %v10274_v53 = vld [vmem:[#allocation14 + $0x428] sm:$0xf] }
 0x551   :  { %2645 = vmatpush.bf16.msrb.mxu1 %v10703_v15  ;;  %2552 = vmatmul.bf16.vlgmr.msra.gmra.mxu2 %v16289_v24  ;;  %v14243_v54 = vld [vmem:[#allocation14 + $0x434] sm:$0xf0] }
 0x552   :  { %2600 = vmatpush.bf16.msrb.mxu2 %v10367_v10  ;;  %2614 = vmatpush.bf16.msra.mxu3 %v10495_v11  ;;  %v10540_v10 = vld [vmem:[#allocation14 + $0x650] sm:$0xf0]  ;;  %v10738_v11 = vld [vmem:[#allocation14 + $0x7c8] sm:$0xf] }
 0x553   :  { %2628 = vmatpush.bf16.msrb.mxu0 %v10623_v14  ;;  %2566 = vmatmul.bf16.vlgmr.msrb.gmra.mxu3 %v16291_v30  ;;  %v10415_v14 = vor.u32 %v14276_v4, %v10412_v6  ;;  %v10543_v15 = vor.u32 %v14308_v7, %v10540_v10  ;;  %v10739_v8 = vor.u32 %v14359_v12, %v10738_v11  ;;  %v10594_v4 = vld [vmem:[#allocation14 + $0x6a8] sm:$0xf]  ;;  %v14343_v7 = vld [vmem:[#allocation14 + $0x754] sm:$0xf0] }
 0x554   :  { %2580 = vmatmul.bf16.vlgmr.msra.gmra.mxu0 %v16293_v37  ;;  %v10674_v6 = vld [vmem:[#allocation14 + $0x748] sm:$0xf]  ;;  %v10467_v11 = vor.u32 %v14291_v3, %v10466_v2 }
 0x555   :  { %2646 = vmatpush.bf16.msrb.mxu1 %v10687_v38  ;;  %v10252_v38 = vld [vmem:[#allocation14 + $0x410] sm:$0xf0]  ;;  %v10322_v12 = vld [vmem:[#allocation14 + $0x488] sm:$0xf] }
 0x556   :  { %2601 = vmatpush.bf16.msrb.mxu2 %v10351_v20  ;;  %2615 = vmatpush.bf16.msra.mxu3 %v10479_v21  ;;  %v10524_v20 = vld [vmem:[#allocation14 + $0x630] sm:$0xf0]  ;;  %v10722_v21 = vld [vmem:[#allocation14 + $0x7a8] sm:$0xf] }
 0x557   :  { %2629 = vmatpush.bf16.msrb.mxu0 %v10607_v23  ;;  %v14236_v23 = vld [vmem:[#allocation14 + $0x404] sm:$0xf]  ;;  %v10527_v25 = vor.u32 %v14304_v19, %v10524_v20  ;;  %v10723_v42 = vor.u32 %v14355_v22, %v10722_v21  ;;  %v14339_v19 = vld [vmem:[#allocation14 + $0x734] sm:$0xf0]  ;;  %v10451_v21 = vor.u32 %v14287_v17, %v10450_v16  ;;  %v10306_v22 = vld [vmem:[#allocation14 + $0x468] sm:$0xf] }
 0x558   :  { %v10255_v46 = vor.u32 %v14236_v23, %v10252_v38  ;;  %v10659_v38 = vor.u32 %v14339_v19, %v10658_v9  ;;  %v10628_v17 = vld [vmem:[#allocation14 + $0x6f8] sm:$0xf0] }
 0x559   :  { %2647 = vmatpush.bf16.msrb.mxu1 %v10671_v34  ;;  %v10626_v34 = vld [vmem:[#allocation14 + $0x6e8] sm:$0xf] }
 0x55a   :  { %2602 = vmatpush.bf16.msrb.mxu2 %v10335_v45  ;;  %2616 = vmatpush.bf16.msra.mxu3 %v10463_v28  ;;  %v10508_v45 = vld [vmem:[#allocation14 + $0x610] sm:$0xf0]  ;;  %v10370_v28 = vld [vmem:[#allocation14 + $0x4e8] sm:$0xf] }
 0x55b   :  { %2630 = vmatpush.bf16.msrb.mxu0 %v10591_v33  ;;  %v14299_v33 = vld [vmem:[#allocation14 + $0x5f4] sm:$0xf0]  ;;  %v10511_v36 = vor.u32 %v14300_v41, %v10508_v45  ;;  %v10642_v41 = vld [vmem:[#allocation14 + $0x708] sm:$0xf]  ;;  %v14361_v45 = vld [vmem:[#allocation14 + $0x7ec] sm:$0xf] }
 0x55d   :  { %2648 = vmatpush.bf16.msrb.mxu1 %v10655_v52  ;;  %v10707_v52 = vor.u32 %v14351_v32, %v10706_v31  ;;  %v10418_v31 = vld [vmem:[#allocation14 + $0x548] sm:$0xf] }
 0x55e   :  { %2603 = vmatpush.bf16.msrb.mxu2 %v10319_v47  ;;  %2617 = vmatpush.bf16.msra.mxu3 %v10447_v48  ;;  %v10371_v47 = vor.u32 %v14267_v43, %v10370_v28  ;;  %v10499_v48 = vor.u32 %v14299_v33, %v10498_v44  ;;  %v10756_v28 = vld [vmem:[#allocation14 + $0x7f8] sm:$0xf0]  ;;  %v10563_v33 = vor.u32 %v14315_v40, %v10562_v26  ;;  %v14325_v26 = vld [vmem:[#allocation14 + $0x6cc] sm:$0xf] }
 0x55f   :  { %2631 = vmatpush.bf16.msrb.mxu0 %v10575_v51  ;;  %v10627_v51 = vor.u32 %v14331_v49, %v10626_v34  ;;  %v14247_v49 = vld [vmem:[#allocation14 + $0x454] sm:$0xf0]  ;;  %v10759_v32 = vor.u32 %v14361_v45, %v10756_v28  ;;  %v10612_v40 = vld [vmem:[#allocation14 + $0x6d8] sm:$0xf0] }
 0x561   :  { %2649 = vmatpush.bf16.msrb.mxu1 %v10639_v1  ;;  %v10691_v1 = vor.u32 %v14347_v62, %v10690_v61  ;;  %v14275_v61 = vld [vmem:[#allocation14 + $0x534] sm:$0xf0]  ;;  %v10530_v62 = vld [vmem:[#allocation14 + $0x628] sm:$0xf] }
 0x562   :  { %2604 = vmatpush.bf16.msrb.mxu2 %v10303_v59  ;;  %2618 = vmatpush.bf16.msra.mxu3 %v10431_v60  ;;  %v10338_v59 = vld [vmem:[#allocation14 + $0x4a8] sm:$0xf]  ;;  %v14259_v60 = vld [vmem:[#allocation14 + $0x4b4] sm:$0xf0] }
 0x563   :  { %2632 = vmatpush.bf16.msrb.mxu0 %v10559_v0  ;;  %v10611_v0 = vor.u32 %v14327_v58, %v10610_v57  ;;  %v10339_v10 = vor.u32 %v14259_v60, %v10338_v59  ;;  %v10402_v57 = vld [vmem:[#allocation14 + $0x528] sm:$0xf]  ;;  %v10724_v59 = vld [vmem:[#allocation14 + $0x7b8] sm:$0xf0]  ;;  %v10275_v60 = vor.u32 %v14243_v54, %v10274_v53  ;;  %v14285_v53 = vld [vmem:[#allocation14 + $0x58c] sm:$0xf] }
 0x564   :  { %2650 = vmatmul.bf16.vlgmr.msrb.gmra.mxu1 %v16273_v56  ;;  %v10403_v2 = vor.u32 %v14275_v61, %v10402_v57  ;;  %v10452_v54 = vld [vmem:[#allocation14 + $0x598] sm:$0xf0]  ;;  %v14317_v57 = vld [vmem:[#allocation14 + $0x68c] sm:$0xf] }
 0x565   :  { %2698 = vmatpush.bf16.msra.mxu1 %v10755_v5  ;;  %v14323_v5 = vld [vmem:[#allocation14 + $0x6b4] sm:$0xf0]  ;;  %v14337_v61 = vld [vmem:[#allocation14 + $0x72c] sm:$0xf] }
 0x566   :  { %2605 = vmatpush.bf16.msrb.mxu2 %v10287_v13  ;;  %2619 = vmatpush.bf16.msra.mxu3 %v10415_v14  ;;  %v14255_v13 = vld [vmem:[#allocation14 + $0x494] sm:$0xf0]  ;;  %v10595_v14 = vor.u32 %v14323_v5, %v10594_v4  ;;  %v10386_v4 = vld [vmem:[#allocation14 + $0x508] sm:$0xf] }
 0x567   :  { %2633 = vmatpush.bf16.msrb.mxu0 %v10543_v15  ;;  %v10675_v15 = vor.u32 %v14343_v7, %v10674_v6  ;;  %v10323_v20 = vor.u32 %v14255_v13, %v10322_v12  ;;  %v14271_v5 = vld [vmem:[#allocation14 + $0x514] sm:$0xf0]  ;;  %v10514_v6 = vld [vmem:[#allocation14 + $0x608] sm:$0xf]  ;;  %v10372_v12 = vld [vmem:[#allocation14 + $0x4f8] sm:$0xf0] }
 0x568   :  { %v14297_v13 = vld [vmem:[#allocation14 + $0x5ec] sm:$0xf]  ;;  %v10387_v9 = vor.u32 %v14271_v5, %v10386_v4  ;;  %v10564_v5 = vld [vmem:[#allocation14 + $0x678] sm:$0xf0] }
 0x569   :  { %2699 = vmatpush.bf16.msra.mxu1 %v10739_v8  ;;  %v14319_v8 = vld [vmem:[#allocation14 + $0x694] sm:$0xf0]  ;;  %v14313_v4 = vld [vmem:[#allocation14 + $0x66c] sm:$0xf] }
 0x56a   :  { %2606 = vmatpush.bf16.msrb.mxu2 %v10271_v29  ;;  %2620 = vmatpush.bf16.msra.mxu3 %v10399_v39  ;;  %v14251_v29 = vld [vmem:[#allocation14 + $0x474] sm:$0xf0]  ;;  %v10579_v23 = vor.u32 %v14319_v8, %v10578_v18  ;;  %v10434_v39 = vld [vmem:[#allocation14 + $0x568] sm:$0xf]  ;;  %v14349_v18 = vld [vmem:[#allocation14 + $0x78c] sm:$0xf] }
 0x56b   :  { %2634 = vmatpush.bf16.msrb.mxu0 %v10527_v25  ;;  %v14283_v25 = vld [vmem:[#allocation14 + $0x574] sm:$0xf0]  ;;  %v10307_v43 = vor.u32 %v14251_v29, %v10306_v22  ;;  %v10708_v8 = vld [vmem:[#allocation14 + $0x798] sm:$0xf0]  ;;  %v14261_v22 = vld [vmem:[#allocation14 + $0x4cc] sm:$0xf] }
 0x56c   :  { %v10435_v44 = vor.u32 %v14283_v25, %v10434_v39  ;;  %v10356_v29 = vld [vmem:[#allocation14 + $0x4d8] sm:$0xf0]  ;;  %v14293_v39 = vld [vmem:[#allocation14 + $0x5cc] sm:$0xf] }
 0x56d   :  { %2700 = vmatpush.bf16.msra.mxu1 %v10723_v42  ;;  %v14335_v42 = vld [vmem:[#allocation14 + $0x714] sm:$0xf0]  ;;  %v10484_v25 = vld [vmem:[#allocation14 + $0x5d8] sm:$0xf0]  ;;  %v10359_v45 = vor.u32 %v14261_v22, %v10356_v29  ;;  %v14230_v22 = vld [vmem:[#allocation14 + $0x3cc] sm:$0xf0] }
 0x56e   :  { %2607 = vmatpush.bf16.msrb.mxu2 %v10255_v46  ;;  %2621 = vmatpush.bf16.msra.mxu3 %v10383_v35  ;;  %v10643_v34 = vor.u32 %v14335_v42, %v10642_v41  ;;  %v10290_v46 = vld [vmem:[#allocation14 + $0x448] sm:$0xf]  ;;  %v14279_v35 = vld [vmem:[#allocation14 + $0x554] sm:$0xf0]  ;;  %v14345_v41 = vld [vmem:[#allocation14 + $0x76c] sm:$0xf]  ;;  %v10487_v28 = vor.u32 %v14293_v39, %v10484_v25 }
 0x56f   :  { %2635 = vmatpush.bf16.msrb.mxu0 %v10511_v36  ;;  %v10546_v36 = vld [vmem:[#allocation14 + $0x648] sm:$0xf]  ;;  %v10291_v27 = vor.u32 %v14247_v49, %v10290_v46  ;;  %v10692_v42 = vld [vmem:[#allocation14 + $0x778] sm:$0xf0]  ;;  %v14289_v46 = vld [vmem:[#allocation14 + $0x5ac] sm:$0xf] }
 0x570   :  { %v10468_v49 = vld [vmem:[#allocation14 + $0x5b8] sm:$0xf0]  ;;  %v14241_v39 = vld [vmem:[#allocation14 + $0x42c] sm:$0xf] }
 0x571   :  { %2701 = vmatpush.bf16.msra.mxu1 %v10707_v52  ;;  %2608 = vmatmul.bf16.vlgmr.msrb.gmra.mxu2 %v16289_v24  ;;  %v10276_v25 = vld [vmem:[#allocation14 + $0x438] sm:$0xf0] }
 0x572   :  { %2656 = vmatpush.bf16.msra.mxu2 %v10371_v47  ;;  %2670 = vmatpush.bf16.msrb.mxu3 %v10499_v48  ;;  %v14311_v47 = vld [vmem:[#allocation14 + $0x654] sm:$0xf0]  ;;  %v14357_v48 = vld [vmem:[#allocation14 + $0x7cc] sm:$0xf] }
 0x573   :  { %2684 = vmatpush.bf16.msra.mxu0 %v10627_v51  ;;  %2622 = vmatmul.bf16.vlgmr.msra.gmra.mxu3 %v16291_v30  ;;  %v10419_v51 = vor.u32 %v14279_v35, %v10418_v31  ;;  %v10547_v52 = vor.u32 %v14311_v47, %v10546_v36  ;;  %v10743_v58 = vor.u32 %v14357_v48, %v10740_v50  ;;  %v14321_v31 = vld [vmem:[#allocation14 + $0x6ac] sm:$0xf]  ;;  %v10676_v36 = vld [vmem:[#allocation14 + $0x758] sm:$0xf0] }
 0x574   :  { %2636 = vmatmul.bf16.vlgmr.msrb.gmra.mxu0 %v16293_v37  ;;  %v14341_v35 = vld [vmem:[#allocation14 + $0x74c] sm:$0xf]  ;;  %v10471_v48 = vor.u32 %v14289_v46, %v10468_v49 }
 0x575   :  { %2702 = vmatpush.bf16.msra.mxu1 %v10691_v1  ;;  %v14239_v1 = vld [vmem:[#allocation14 + $0x414] sm:$0xf0]  ;;  %v14253_v50 = vld [vmem:[#allocation14 + $0x48c] sm:$0xf] }
 0x576   :  { %2657 = vmatpush.bf16.msra.mxu2 %v10355_v63  ;;  %2671 = vmatpush.bf16.msrb.mxu3 %v10483_v55  ;;  %v14307_v63 = vld [vmem:[#allocation14 + $0x634] sm:$0xf0]  ;;  %v14353_v55 = vld [vmem:[#allocation14 + $0x7ac] sm:$0xf] }
 0x577   :  { %2685 = vmatpush.bf16.msra.mxu0 %v10611_v0  ;;  %v10258_v0 = vld [vmem:[#allocation14 + $0x408] sm:$0xf]  ;;  %v10531_v3 = vor.u32 %v14307_v63, %v10530_v62  ;;  %v10727_v7 = vor.u32 %v14353_v55, %v10724_v59  ;;  %v10660_v62 = vld [vmem:[#allocation14 + $0x738] sm:$0xf0]  ;;  %v10455_v55 = vor.u32 %v14285_v53, %v10452_v54  ;;  %v14249_v59 = vld [vmem:[#allocation14 + $0x46c] sm:$0xf] }
 0x578   :  { %v10259_v16 = vor.u32 %v14239_v1, %v10258_v0  ;;  %v10663_v1 = vor.u32 %v14337_v61, %v10660_v62  ;;  %v14202_v53 = vld [vmem:[#allocation14 + $0x2ec] sm:$0xf0]  ;;  %v11210_v54 = vld [vmem:[#allocation14 + $0x380] sm:$0xf] }
 0x579   :  { %2703 = vmatpush.bf16.msra.mxu1 %v10675_v15  ;;  %v14329_v15 = vld [vmem:[#allocation14 + $0x6ec] sm:$0xf] }
 0x57a   :  { %2658 = vmatpush.bf16.msra.mxu2 %v10339_v10  ;;  %2672 = vmatpush.bf16.msrb.mxu3 %v10467_v11  ;;  %v14303_v10 = vld [vmem:[#allocation14 + $0x614] sm:$0xf0]  ;;  %v14265_v11 = vld [vmem:[#allocation14 + $0x4ec] sm:$0xf] }
 0x57b   :  { %2686 = vmatpush.bf16.msra.mxu0 %v10595_v14  ;;  %v10500_v14 = vld [vmem:[#allocation14 + $0x5f8] sm:$0xf0]  ;;  %v10515_v19 = vor.u32 %v14303_v10, %v10514_v6  ;;  %v14333_v6 = vld [vmem:[#allocation14 + $0x70c] sm:$0xf]  ;;  %v11258_v10 = vld [vmem:[#allocation14 + $0x3e0] sm:$0xf] }
 0x57d   :  { %2704 = vmatpush.bf16.msra.mxu1 %v10659_v38  ;;  %v10711_v38 = vor.u32 %v14349_v18, %v10708_v8  ;;  %v14277_v18 = vld [vmem:[#allocation14 + $0x54c] sm:$0xf] }
 0x57e   :  { %2659 = vmatpush.bf16.msra.mxu2 %v10323_v20  ;;  %2673 = vmatpush.bf16.msrb.mxu3 %v10451_v21  ;;  %v10375_v20 = vor.u32 %v14265_v11, %v10372_v12  ;;  %v10503_v21 = vor.u32 %v14297_v13, %v10500_v14  ;;  %v14234_v11 = vld [vmem:[#allocation14 + $0x3ec] sm:$0xf0]  ;;  %v10567_v14 = vor.u32 %v14313_v4, %v10564_v5  ;;  %v11194_v5 = vld [vmem:[#allocation14 + $0x360] sm:$0xf] }
 0x57f   :  { %2687 = vmatpush.bf16.msra.mxu0 %v10579_v23  ;;  %v10631_v23 = vor.u32 %v14329_v15, %v10628_v17  ;;  %v10292_v17 = vld [vmem:[#allocation14 + $0x458] sm:$0xf0]  ;;  %v11259_v8 = vor.u32 %v14234_v11, %v11258_v10  ;;  %v14198_v4 = vld [vmem:[#allocation14 + $0x2cc] sm:$0xf0]  ;;  %v10842_v11 = vld [vmem:[#allocation14 + $0xa0] sm:$0xf] }
 0x581   :  { %2705 = vmatpush.bf16.msra.mxu1 %v10643_v34  ;;  %v10695_v34 = vor.u32 %v14345_v41, %v10692_v42  ;;  %v10404_v41 = vld [vmem:[#allocation14 + $0x538] sm:$0xf0]  ;;  %v14305_v42 = vld [vmem:[#allocation14 + $0x62c] sm:$0xf] }
 0x582   :  { %2660 = vmatpush.bf16.msra.mxu2 %v10307_v43  ;;  %2674 = vmatpush.bf16.msrb.mxu3 %v10435_v44  ;;  %v14257_v43 = vld [vmem:[#allocation14 + $0x4ac] sm:$0xf]  ;;  %v10340_v44 = vld [vmem:[#allocation14 + $0x4b8] sm:$0xf0] }
 0x583   :  { %2688 = vmatpush.bf16.msra.mxu0 %v10563_v33  ;;  %v10615_v33 = vor.u32 %v14325_v26, %v10612_v40  ;;  %v10343_v47 = vor.u32 %v14257_v43, %v10340_v44  ;;  %v14273_v26 = vld [vmem:[#allocation14 + $0x52c] sm:$0xf]  ;;  %v14226_v43 = vld [vmem:[#allocation14 + $0x3ac] sm:$0xf0]  ;;  %v10279_v44 = vor.u32 %v14241_v39, %v10276_v25  ;;  %v10954_v39 = vld [vmem:[#allocation14 + $0x180] sm:$0xf] }
 0x584   :  { %2706 = vmatmul.bf16.vlgmr.msra.gmra.mxu1 %v16273_v56  ;;  %v10407_v46 = vor.u32 %v14273_v26, %v10404_v41  ;;  %v11082_v25 = vld [vmem:[#allocation14 + $0x280] sm:$0xf]  ;;  %v14190_v26 = vld [vmem:[#allocation14 + $0x28c] sm:$0xf0] }
 0x585   :  { %2754 = vmatpush.bf16.msrb.mxu1 %v10759_v32  ;;  %v10596_v32 = vld [vmem:[#allocation14 + $0x6b8] sm:$0xf0]  ;;  %v14210_v41 = vld [vmem:[#allocation14 + $0x32c] sm:$0xf0] }
 0x586   :  { %2661 = vmatpush.bf16.msra.mxu2 %v10291_v27  ;;  %2675 = vmatpush.bf16.msrb.mxu3 %v10419_v51  ;;  %v10324_v27 = vld [vmem:[#allocation14 + $0x498] sm:$0xf0]  ;;  %v10599_v51 = vor.u32 %v14321_v31, %v10596_v32  ;;  %v14269_v31 = vld [vmem:[#allocation14 + $0x50c] sm:$0xf] }
 0x587   :  { %2689 = vmatpush.bf16.msra.mxu0 %v10547_v52  ;;  %v10679_v52 = vor.u32 %v14341_v35, %v10676_v36  ;;  %v10327_v63 = vor.u32 %v14253_v50, %v10324_v27  ;;  %v10388_v32 = vld [vmem:[#allocation14 + $0x518] sm:$0xf0]  ;;  %v14301_v35 = vld [vmem:[#allocation14 + $0x60c] sm:$0xf]  ;;  %v14138_v50 = vld [vmem:[#allocation14 + $0xec] sm:$0xf0] }
 0x588   :  { %v11002_v27 = vld [vmem:[#allocation14 + $0x1e0] sm:$0xf] }
 0x589   :  { %2755 = vmatpush.bf16.msrb.mxu1 %v10743_v58  ;;  %v10580_v58 = vld [vmem:[#allocation14 + $0x698] sm:$0xf0] }
 0x58a   :  { %2662 = vmatpush.bf16.msra.mxu2 %v10275_v60  ;;  %2676 = vmatpush.bf16.msrb.mxu3 %v10403_v2  ;;  %v10308_v60 = vld [vmem:[#allocation14 + $0x478] sm:$0xf0]  ;;  %v10583_v0 = vor.u32 %v14317_v57, %v10580_v58  ;;  %v14281_v2 = vld [vmem:[#allocation14 + $0x56c] sm:$0xf]  ;;  %v14222_v57 = vld [vmem:[#allocation14 + $0x38c] sm:$0xf0]  ;;  %v10391_v58 = vor.u32 %v14269_v31, %v10388_v32 }
 0x58b   :  { %2690 = vmatpush.bf16.msra.mxu0 %v10531_v3  ;;  %v10436_v3 = vld [vmem:[#allocation14 + $0x578] sm:$0xf0]  ;;  %v10311_v12 = vor.u32 %v14249_v59, %v10308_v60  ;;  %v14134_v59 = vld [vmem:[#allocation14 + $0xcc] sm:$0xf0] }
 0x58c   :  { %v10439_v13 = vor.u32 %v14281_v2, %v10436_v3  ;;  %v14166_v2 = vld [vmem:[#allocation14 + $0x1cc] sm:$0xf0]  ;;  %v11114_v3 = vld [vmem:[#allocation14 + $0x2c0] sm:$0xf] }
 0x58d   :  { %2756 = vmatpush.bf16.msrb.mxu1 %v10727_v7  ;;  %v10644_v7 = vld [vmem:[#allocation14 + $0x718] sm:$0xf0]  ;;  %v14186_v32 = vld [vmem:[#allocation14 + $0x26c] sm:$0xf0] }
 0x58e   :  { %2663 = vmatpush.bf16.msra.mxu2 %v10259_v16  ;;  %2677 = vmatpush.bf16.msrb.mxu3 %v10387_v9  ;;  %v10647_v15 = vor.u32 %v14333_v6, %v10644_v7  ;;  %v14245_v16 = vld [vmem:[#allocation14 + $0x44c] sm:$0xf]  ;;  %v10420_v9 = vld [vmem:[#allocation14 + $0x558] sm:$0xf0]  ;;  %v14218_v6 = vld [vmem:[#allocation14 + $0x36c] sm:$0xf0] }
 0x58f   :  { %2691 = vmatpush.bf16.msra.mxu0 %v10515_v19  ;;  %v14309_v19 = vld [vmem:[#allocation14 + $0x64c] sm:$0xf]  ;;  %v10295_v29 = vor.u32 %v14245_v16, %v10292_v17  ;;  %v14162_v16 = vld [vmem:[#allocation14 + $0x1ac] sm:$0xf0]  ;;  %v11098_v17 = vld [vmem:[#allocation14 + $0x2a0] sm:$0xf] }
 0x591   :  { %2757 = vmatpush.bf16.msrb.mxu1 %v10711_v38  ;;  %2664 = vmatmul.bf16.vlgmr.msra.gmra.mxu2 %v16289_v24 }
 0x592   :  { %2712 = vmatpush.bf16.msrb.mxu2 %v10375_v20  ;;  %2726 = vmatpush.bf16.msra.mxu3 %v10503_v21  ;;  %v10548_v20 = vld [vmem:[#allocation14 + $0x658] sm:$0xf0]  ;;  %v11242_v21 = vld [vmem:[#allocation14 + $0x3c0] sm:$0xf] }
 0x593   :  { %2740 = vmatpush.bf16.msrb.mxu0 %v10631_v23  ;;  %2678 = vmatmul.bf16.vlgmr.msrb.gmra.mxu3 %v16291_v30  ;;  %v10423_v23 = vor.u32 %v14277_v18, %v10420_v9  ;;  %v10551_v38 = vor.u32 %v14309_v19, %v10548_v20  ;;  %v11243_v40 = vor.u32 %v14230_v22, %v11242_v21  ;;  %v14194_v18 = vld [vmem:[#allocation14 + $0x2ac] sm:$0xf0]  ;;  %v10826_v21 = vld [vmem:[#allocation14 + $0x80] sm:$0xf] }
 0x594   :  { %2692 = vmatmul.bf16.vlgmr.msra.gmra.mxu0 %v16293_v37  ;;  %v14214_v9 = vld [vmem:[#allocation14 + $0x34c] sm:$0xf0] }
 0x595   :  { %2758 = vmatpush.bf16.msrb.mxu1 %v10695_v34  ;;  %v10260_v34 = vld [vmem:[#allocation14 + $0x418] sm:$0xf0]  ;;  %v14126_v22 = vld [vmem:[#allocation14 + $0x8c] sm:$0xf0] }
 0x596   :  { %2713 = vmatpush.bf16.msrb.mxu2 %v10359_v45  ;;  %2727 = vmatpush.bf16.msra.mxu3 %v10487_v28  ;;  %v10532_v45 = vld [vmem:[#allocation14 + $0x638] sm:$0xf0]  ;;  %v11226_v28 = vld [vmem:[#allocation14 + $0x3a0] sm:$0xf] }
 0x597   :  { %2741 = vmatpush.bf16.msrb.mxu0 %v10615_v33  ;;  %v14237_v33 = vld [vmem:[#allocation14 + $0x40c] sm:$0xf]  ;;  %v10535_v49 = vor.u32 %v14305_v42, %v10532_v45  ;;  %v11227_v36 = vor.u32 %v14226_v43, %v11226_v28  ;;  %v10810_v45 = vld [vmem:[#allocation14 + $0x60] sm:$0xf]  ;;  %v14122_v28 = vld [vmem:[#allocation14 + $0x6c] sm:$0xf0]  ;;  %v11083_v43 = vor.u32 %v14190_v26, %v11082_v25 }
 0x598   :  { %v11004_v25 = vld [vmem:[#allocation14 + $0x1f0] sm:$0xf0]  ;;  %v14200_v26 = vld [vmem:[#allocation14 + $0x2e4] sm:$0xf] }
 0x599   :  { %2759 = vmatpush.bf16.msrb.mxu1 %v10679_v52  ;;  %v11130_v52 = vld [vmem:[#allocation14 + $0x2e0] sm:$0xf] }
 0x59a   :  { %2714 = vmatpush.bf16.msrb.mxu2 %v10343_v47  ;;  %2728 = vmatpush.bf16.msra.mxu3 %v10471_v48  ;;  %v10516_v47 = vld [vmem:[#allocation14 + $0x618] sm:$0xf0]  ;;  %v10874_v48 = vld [vmem:[#allocation14 + $0xe0] sm:$0xf]  ;;  %v11131_v60 = vor.u32 %v14202_v53, %v11130_v52  ;;  %v14118_v53 = vld [vmem:[#allocation14 + $0x4c] sm:$0xf0] }
 0x59b   :  { %2742 = vmatpush.bf16.msrb.mxu0 %v10599_v51  ;;  %v14170_v51 = vld [vmem:[#allocation14 + $0x1ec] sm:$0xf0]  ;;  %v10519_v61 = vor.u32 %v14301_v35, %v10516_v47  ;;  %v10875_v62 = vor.u32 %v14138_v50, %v10874_v48  ;;  %v11146_v35 = vld [vmem:[#allocation14 + $0x300] sm:$0xf]  ;;  %v14232_v47 = vld [vmem:[#allocation14 + $0x3e4] sm:$0xf]  ;;  %v10811_v50 = vor.u32 %v14122_v28, %v10810_v45 }
 0x59c   :  { %v11260_v48 = vld [vmem:[#allocation14 + $0x3f0] sm:$0xf0] }
 0x59d   :  { %2760 = vmatpush.bf16.msrb.mxu1 %v10663_v1  ;;  %v10986_v1 = vld [vmem:[#allocation14 + $0x1c0] sm:$0xf] }
 0x59e   :  { %2715 = vmatpush.bf16.msrb.mxu2 %v10327_v63  ;;  %2729 = vmatpush.bf16.msra.mxu3 %v10455_v55  ;;  %v11003_v63 = vor.u32 %v14170_v51, %v11002_v27  ;;  %v10858_v55 = vld [vmem:[#allocation14 + $0xc0] sm:$0xf]  ;;  %v10987_v10 = vor.u32 %v14166_v2, %v10986_v1 }
 0x59f   :  { %2743 = vmatpush.bf16.msrb.mxu0 %v10583_v0  ;;  %v11211_v0 = vor.u32 %v14222_v57, %v11210_v54  ;;  %v10859_v7 = vor.u32 %v14134_v59, %v10858_v55  ;;  %v10922_v54 = vld [vmem:[#allocation14 + $0x140] sm:$0xf]  ;;  %v11263_v57 = vor.u32 %v14232_v47, %v11260_v48  ;;  %v14228_v59 = vld [vmem:[#allocation14 + $0x3c4] sm:$0xf] }
 0x5a1   :  { %2761 = vmatpush.bf16.msrb.mxu1 %v10647_v15  ;;  %v10970_v15 = vld [vmem:[#allocation14 + $0x1a0] sm:$0xf] }
 0x5a2   :  { %2716 = vmatpush.bf16.msrb.mxu2 %v10311_v12  ;;  %2730 = vmatpush.bf16.msra.mxu3 %v10439_v13  ;;  %v14130_v12 = vld [vmem:[#allocation14 + $0xac] sm:$0xf0]  ;;  %v11115_v13 = vor.u32 %v14198_v4, %v11114_v3  ;;  %v10971_v20 = vor.u32 %v14162_v16, %v10970_v15  ;;  %v14224_v15 = vld [vmem:[#allocation14 + $0x3a4] sm:$0xf]  ;;  %v11228_v16 = vld [vmem:[#allocation14 + $0x3b0] sm:$0xf0] }
 0x5a3   :  { %2744 = vmatpush.bf16.msrb.mxu0 %v10567_v14  ;;  %v11195_v14 = vor.u32 %v14218_v6, %v11194_v5  ;;  %v10843_v19 = vor.u32 %v14130_v12, %v10842_v11  ;;  %v10778_v5 = vld [vmem:[#allocation14 + $0x20] sm:$0xf]  ;;  %v14114_v6 = vld [vmem:[#allocation14 + $0x2c] sm:$0xf0] }
 0x5a4   :  { %2762 = vmatmul.bf16.vlgmr.msrb.gmra.mxu1 %v16273_v56  ;;  %v10263_v56 = vor.u32 %v14237_v33, %v10260_v34  ;;  %v10938_v34 = vld [vmem:[#allocation14 + $0x160] sm:$0xf]  ;;  %v14146_v12 = vld [vmem:[#allocation14 + $0x12c] sm:$0xf0] }
 0x5a5   :  { %3450 = vmatpush.bf16.msra.mxu1 %v11259_v8  ;;  %v11178_v8 = vld [vmem:[#allocation14 + $0x340] sm:$0xf] }
 0x5a6   :  { %2717 = vmatpush.bf16.msrb.mxu2 %v10295_v29  ;;  %2731 = vmatpush.bf16.msra.mxu3 %v10423_v23  ;;  %v1567_v29 = vpop.f32.mrf.mxu1 }
 0x5a7   :  { %2745 = vmatpush.bf16.msrb.mxu0 %v10551_v38  ;;  %v11099_v38 = vor.u32 %v14194_v18, %v11098_v17  ;;  %v10779_v17 = vor.u32 %v14114_v6, %v10778_v5  ;;  %v10762_v18 = vld [vmem:[#allocation14] sm:$0xf]  ;;  %v11180_v5 = vld [vmem:[#allocation14 + $0x350] sm:$0xf0] }
 0x5a9   :  { %3451 = vmatpush.bf16.msra.mxu1 %v11243_v40  ;;  %v11162_v40 = vld [vmem:[#allocation14 + $0x320] sm:$0xf] }
 0x5aa   :  { %2718 = vmatpush.bf16.msrb.mxu2 %v10279_v44  ;;  %2732 = vmatpush.bf16.msra.mxu3 %v10407_v46  ;;  %v11163_v44 = vor.u32 %v14210_v41, %v11162_v40  ;;  %v14154_v46 = vld [vmem:[#allocation14 + $0x16c] sm:$0xf0]  ;;  %v11132_v41 = vld [vmem:[#allocation14 + $0x2f0] sm:$0xf0] }
 0x5ab   :  { %2746 = vmatpush.bf16.msrb.mxu0 %v10535_v49  ;;  %v11066_v49 = vld [vmem:[#allocation14 + $0x260] sm:$0xf]  ;;  %v10939_v27 = vor.u32 %v14154_v46, %v10938_v34  ;;  %v11135_v47 = vor.u32 %v14200_v26, %v11132_v41  ;;  %v11068_v26 = vld [vmem:[#allocation14 + $0x270] sm:$0xf0] }
 0x5ac   :  { %v11067_v51 = vor.u32 %v14186_v32, %v11066_v49  ;;  %v14132_v32 = vld [vmem:[#allocation14 + $0xc4] sm:$0xf]  ;;  %v11148_v41 = vld [vmem:[#allocation14 + $0x310] sm:$0xf0] }
 0x5ad   :  { %3452 = vmatpush.bf16.msra.mxu1 %v11227_v36  ;;  %v16333_v23 = vpop.f32.mrf.mxu0  ;;  %v14206_v36 = vld [vmem:[#allocation14 + $0x30c] sm:$0xf0] }
 0x5ae   :  { %2719 = vmatpush.bf16.msrb.mxu2 %v10263_v56  ;;  %2733 = vmatpush.bf16.msra.mxu3 %v10391_v58  ;;  %v11147_v52 = vor.u32 %v14206_v36, %v11146_v35  ;;  %v10794_v56 = vld [vmem:[#allocation14 + $0x40] sm:$0xf]  ;;  %v14150_v58 = vld [vmem:[#allocation14 + $0x14c] sm:$0xf0]  ;;  %v10860_v35 = vld [vmem:[#allocation14 + $0xd0] sm:$0xf0] }
 0x5af   :  { %2747 = vmatpush.bf16.msrb.mxu0 %v10519_v61  ;;  %v11050_v61 = vld [vmem:[#allocation14 + $0x240] sm:$0xf]  ;;  %v10795_v1 = vor.u32 %v14118_v53, %v10794_v56  ;;  %v10923_v2 = vor.u32 %v14150_v58, %v10922_v54  ;;  %v14216_v56 = vld [vmem:[#allocation14 + $0x364] sm:$0xf]  ;;  %v11196_v53 = vld [vmem:[#allocation14 + $0x370] sm:$0xf0]  ;;  %v10863_v54 = vor.u32 %v14132_v32, %v10860_v35 }
 0x5b0   :  { %v16335_v33 = vpop.f32.mrf.mxu2 }
 0x5b1   :  { %3453 = vmatpush.bf16.msra.mxu1 %v11211_v0  ;;  %2720 = vmatmul.bf16.vlgmr.msrb.gmra.mxu2 %v16289_v24  ;;  %v11179_v24 = vor.u32 %v14214_v9, %v11178_v8  ;;  %v14110_v8 = vld [vmem:[#allocation14 + $0xc] sm:$0xf0] }
 0x5b2   :  { %3408 = vmatpush.bf16.msra.mxu2 %v10875_v62  ;;  %3422 = vmatpush.bf16.msrb.mxu3 %v11003_v63  ;;  %v16337_v31 = vpop.f32.mrf.mxu3  ;;  %v14182_v62 = vld [vmem:[#allocation14 + $0x24c] sm:$0xf0]  ;;  %v1569_v63 = vpop.f32.mrf.mxu1  ;;  %v10763_v40 = vor.u32 %v14110_v8, %v10762_v18  ;;  %v11084_v18 = vld [vmem:[#allocation14 + $0x290] sm:$0xf0]  ;;  %v14208_v8 = vld [vmem:[#allocation14 + $0x324] sm:$0xf] }
 0x5b3   :  { %3436 = vmatpush.bf16.msra.mxu0 %v11131_v60  ;;  %2734 = vmatmul.bf16.vlgmr.msra.gmra.mxu3 %v16291_v30  ;;  %v14158_v30 = vld [vmem:[#allocation14 + $0x18c] sm:$0xf0]  ;;  %v11244_v60 = vld [vmem:[#allocation14 + $0x3d0] sm:$0xf0]  ;;  %v16341_v0 = vpack.c.bf16 %v1569_v63, %v1567_v29  ;;  %v11051_v3 = vor.u32 %v14182_v62, %v11050_v61  ;;  %v11231_v29 = vor.u32 %v14224_v15, %v11228_v16  ;;  %v14128_v62 = vld [vmem:[#allocation14 + $0xa4] sm:$0xf] }
 0x5b4   :  { %2748 = vmatmul.bf16.vlgmr.msrb.gmra.mxu0 %v16293_v37  ;;  %v10827_v37 = vor.u32 %v14126_v22, %v10826_v21  ;;  %v10955_v42 = vor.u32 %v14158_v30, %v10954_v39  ;;  %v14142_v21 = vld [vmem:[#allocation14 + $0x10c] sm:$0xf0]  ;;  %v11018_v22 = vld [vmem:[#allocation14 + $0x200] sm:$0xf]  ;;  %v10876_v39 = vld [vmem:[#allocation14 + $0xf0] sm:$0xf0] }
 0x5b5   :  { %3454 = vmatpush.bf16.msra.mxu1 %v11195_v14  ;;  %v16339_v55 = vpop.f32.mrf.mxu0  ;;  %v14178_v14 = vld [vmem:[#allocation14 + $0x22c] sm:$0xf0]  ;;  %v14168_v30 = vld [vmem:[#allocation14 + $0x1e4] sm:$0xf]  ;;  %v10844_v63 = vld [vmem:[#allocation14 + $0xb0] sm:$0xf0] }
 0x5b6   :  { %3409 = vmatpush.bf16.msra.mxu2 %v10859_v7  ;;  %3423 = vmatpush.bf16.msrb.mxu3 %v10987_v10  ;;  %v10906_v7 = vld [vmem:[#allocation14 + $0x120] sm:$0xf]  ;;  %v11247_v10 = vor.u32 %v14228_v59, %v11244_v60  ;;  %v11007_v46 = vor.u32 %v14168_v30, %v11004_v25  ;;  %v16360_v59 = vpack.c.bf16 %v16339_v55, %v16333_v23  ;;  %v14156_v15 = vld [vmem:[#allocation14 + $0x184] sm:$0xf]  ;;  %v10956_v16 = vld [vmem:[#allocation14 + $0x190] sm:$0xf0] }
 0x5b7   :  { %3437 = vmatpush.bf16.msra.mxu0 %v11115_v13  ;;  %v11034_v13 = vld [vmem:[#allocation14 + $0x220] sm:$0xf]  ;;  %v10907_v9 = vor.u32 %v14146_v12, %v10906_v7  ;;  %v10847_v23 = vor.u32 %v14128_v62, %v10844_v63  ;;  %v10940_v30 = vld [vmem:[#allocation14 + $0x170] sm:$0xf0]  ;;  %v14184_v25 = vld [vmem:[#allocation14 + $0x264] sm:$0xf] }
 0x5b8   :  { %v1527_v4 = vpop.f32.mrf.mxu2  ;;  %v14231_v62 = vld [vmem:[#allocation14 + $0x3d4] sm:$0xf0] }
 0x5b9   :  { %3455 = vmatpush.bf16.msra.mxu1 %v11179_v24  ;;  %v14136_v24 = vld [vmem:[#allocation14 + $0xe4] sm:$0xf] }
 0x5ba   :  { %3410 = vmatpush.bf16.msra.mxu2 %v10843_v19  ;;  %3424 = vmatpush.bf16.msrb.mxu3 %v10971_v20  ;;  %v1541_v11 = vpop.f32.mrf.mxu3  ;;  %v11035_v19 = vor.u32 %v14178_v14, %v11034_v13  ;;  %v10890_v20 = vld [vmem:[#allocation14 + $0x100] sm:$0xf]  ;;  %v10879_v34 = vor.u32 %v14136_v24, %v10876_v39  ;;  %v16350_v36 = vpop.f32.mrf.mxu1  ;;  %v14152_v39 = vld [vmem:[#allocation14 + $0x164] sm:$0xf] }
 0x5bb   :  { %3438 = vmatpush.bf16.msra.mxu0 %v11099_v38  ;;  %v14174_v38 = vld [vmem:[#allocation14 + $0x20c] sm:$0xf0]  ;;  %v10891_v28 = vor.u32 %v14142_v21, %v10890_v20  ;;  %v16356_v58 = vpack.c.bf16 %v1541_v11, %v16337_v31  ;;  %v11100_v31 = vld [vmem:[#allocation14 + $0x2b0] sm:$0xf0]  ;;  %v10959_v21 = vor.u32 %v14156_v15, %v10956_v16  ;;  %v14108_v16 = vld [vmem:[#allocation14 + $0x4] sm:$0xf] }
 0x5bc   :  { %v10828_v11 = vld [vmem:[#allocation14 + $0x90] sm:$0xf0] }
 0x5bd   :  { %3456 = vmatpush.bf16.msra.mxu1 %v11163_v44  ;;  %v16344_v45 = vpop.f32.mrf.mxu0 }
 0x5be   :  { %3411 = vmatpush.bf16.msra.mxu2 %v10827_v37  ;;  %3425 = vmatpush.bf16.msrb.mxu3 %v10955_v42  ;;  %v14220_v37 = vld [vmem:[#allocation14 + $0x384] sm:$0xf]  ;;  %v11212_v42 = vld [vmem:[#allocation14 + $0x390] sm:$0xf0] }
 0x5bf   :  { %3439 = vmatpush.bf16.msra.mxu0 %v11083_v43  ;;  %v11019_v43 = vor.u32 %v14174_v38, %v11018_v22  ;;  %v11215_v48 = vor.u32 %v14220_v37, %v11212_v42  ;;  %v14120_v22 = vld [vmem:[#allocation14 + $0x64] sm:$0xf]  ;;  %v11266_v37 = vld [vmem:[#allocation14 + $0x3e8] sm:$0xf]  ;;  %v14235_v42 = vld [vmem:[#allocation14 + $0x3f4] sm:$0xf0] }
 0x5c0   :  { %v16346_v44 = vpop.f32.mrf.mxu2 }
 0x5c1   :  { %3457 = vmatpush.bf16.msra.mxu1 %v11147_v52  ;;  %v11116_v52 = vld [vmem:[#allocation14 + $0x2d0] sm:$0xf0] }
 0x5c2   :  { %3412 = vmatpush.bf16.msra.mxu2 %v10811_v50  ;;  %3426 = vmatpush.bf16.msrb.mxu3 %v10939_v27  ;;  %v16348_v49 = vpop.f32.mrf.mxu3  ;;  %v14164_v50 = vld [vmem:[#allocation14 + $0x1c4] sm:$0xf]  ;;  %v10988_v27 = vld [vmem:[#allocation14 + $0x1d0] sm:$0xf0] }
 0x5c3   :  { %3440 = vmatpush.bf16.msra.mxu0 %v11067_v51  ;;  %v14196_v51 = vld [vmem:[#allocation14 + $0x2c4] sm:$0xf]  ;;  %v10991_v61 = vor.u32 %v14164_v50, %v10988_v27 }
 0x5c4   :  { %3458 = vmatmul.bf16.vlgmr.msra.gmra.mxu1 %v16341_v0  ;;  %v11119_v60 = vor.u32 %v14196_v51, %v11116_v52  ;;  %v14148_v50 = vld [vmem:[#allocation14 + $0x144] sm:$0xf]  ;;  %v11267_v51 = vor.u32 %v14235_v42, %v11266_v37  ;;  %v10924_v52 = vld [vmem:[#allocation14 + $0x150] sm:$0xf0]  ;;  %v14223_v37 = vld [vmem:[#allocation14 + $0x394] sm:$0xf0] }
 0x5c5   :  { %3506 = vmatpush.bf16.msrb.mxu1 %v11263_v57  ;;  %v16353_v57 = vpack.c.bf16 %v1527_v4, %v16335_v33  ;;  %v14192_v33 = vld [vmem:[#allocation14 + $0x2a4] sm:$0xf]  ;;  %v16369_v12 = vpop.f32.mrf.mxu0 }
 0x5c6   :  { %3413 = vmatpush.bf16.msra.mxu2 %v10795_v1  ;;  %3427 = vmatpush.bf16.msrb.mxu3 %v10923_v2  ;;  %v11199_v1 = vor.u32 %v14216_v56, %v11196_v53  ;;  %v14160_v2 = vld [vmem:[#allocation14 + $0x1a4] sm:$0xf]  ;;  %v11103_v13 = vor.u32 %v14192_v33, %v11100_v31  ;;  %v11052_v53 = vld [vmem:[#allocation14 + $0x250] sm:$0xf0] }
 0x5c7   :  { %3441 = vmatpush.bf16.msra.mxu0 %v11051_v3  ;;  %v10972_v3 = vld [vmem:[#allocation14 + $0x1b0] sm:$0xf0]  ;;  %v14212_v4 = vld [vmem:[#allocation14 + $0x344] sm:$0xf] }
 0x5c8   :  { %v16365_v6 = vpop.f32.mrf.mxu2  ;;  %v10975_v55 = vor.u32 %v14160_v2, %v10972_v3  ;;  %v11183_v14 = vor.u32 %v14212_v4, %v11180_v5  ;;  %v14180_v56 = vld [vmem:[#allocation14 + $0x244] sm:$0xf]  ;;  %v10927_v2 = vor.u32 %v14148_v50, %v10924_v52  ;;  %v10780_v31 = vld [vmem:[#allocation14 + $0x30] sm:$0xf0]  ;;  %v14167_v50 = vld [vmem:[#allocation14 + $0x1d4] sm:$0xf0] }
 0x5c9   :  { %3507 = vmatpush.bf16.msrb.mxu1 %v11247_v10  ;;  %v14124_v10 = vld [vmem:[#allocation14 + $0x84] sm:$0xf]  ;;  %v11055_v3 = vor.u32 %v14180_v56, %v11052_v53  ;;  %v11202_v52 = vld [vmem:[#allocation14 + $0x368] sm:$0xf]  ;;  %v14219_v56 = vld [vmem:[#allocation14 + $0x374] sm:$0xf0] }
 0x5ca   :  { %3414 = vmatpush.bf16.msra.mxu2 %v10779_v17  ;;  %3428 = vmatpush.bf16.msrb.mxu3 %v10907_v9  ;;  %v16367_v7 = vpop.f32.mrf.mxu3  ;;  %v14188_v17 = vld [vmem:[#allocation14 + $0x284] sm:$0xf]  ;;  %v11164_v9 = vld [vmem:[#allocation14 + $0x330] sm:$0xf0]  ;;  %v10831_v20 = vor.u32 %v14124_v10, %v10828_v11 }
 0x5cb   :  { %3442 = vmatpush.bf16.msra.mxu0 %v11035_v19  ;;  %v16371_v19 = vpop.f32.mrf.mxu1  ;;  %v11087_v38 = vor.u32 %v14188_v17, %v11084_v18  ;;  %v11167_v24 = vor.u32 %v14208_v8, %v11164_v9  ;;  %v14112_v33 = vld [vmem:[#allocation14 + $0x24] sm:$0xf]  ;;  %v11036_v10 = vld [vmem:[#allocation14 + $0x230] sm:$0xf0] }
 0x5cc   :  { %v14144_v4 = vld [vmem:[#allocation14 + $0x124] sm:$0xf]  ;;  %v10783_v15 = vor.u32 %v14112_v33, %v10780_v31  ;;  %v10764_v17 = vld [vmem:[#allocation14 + $0x10] sm:$0xf0]  ;;  %v14195_v33 = vld [vmem:[#allocation14 + $0x2b4] sm:$0xf0] }
 0x5cd   :  { %3508 = vmatpush.bf16.msrb.mxu1 %v11231_v29  ;;  %v10812_v29 = vld [vmem:[#allocation14 + $0x70] sm:$0xf0]  ;;  %v14140_v9 = vld [vmem:[#allocation14 + $0x104] sm:$0xf]  ;;  %v11186_v31 = vld [vmem:[#allocation14 + $0x348] sm:$0xf] }
 0x5ce   :  { %3415 = vmatpush.bf16.msra.mxu2 %v10763_v40  ;;  %3429 = vmatpush.bf16.msrb.mxu3 %v10891_v28  ;;  %v14204_v40 = vld [vmem:[#allocation14 + $0x304] sm:$0xf]  ;;  %v10815_v28 = vor.u32 %v14120_v22, %v10812_v29  ;;  %v11020_v29 = vld [vmem:[#allocation14 + $0x210] sm:$0xf0] }
 0x5cf   :  { %3443 = vmatpush.bf16.msra.mxu0 %v11019_v43  ;;  %v10943_v43 = vor.u32 %v14152_v39, %v10940_v30  ;;  %v11010_v39 = vld [vmem:[#allocation14 + $0x1e8] sm:$0xf]  ;;  %v14171_v30 = vld [vmem:[#allocation14 + $0x1f4] sm:$0xf0] }
 0x5d1   :  { %3509 = vmatpush.bf16.msrb.mxu1 %v11215_v48  ;;  %3416 = vmatmul.bf16.vlgmr.msra.gmra.mxu2 %v16353_v57  ;;  %v10796_v48 = vld [vmem:[#allocation14 + $0x50] sm:$0xf0] }
 0x5d2   :  { %3464 = vmatpush.bf16.msrb.mxu2 %v10879_v34  ;;  %3478 = vmatpush.bf16.msra.mxu3 %v11007_v46  ;;  %v11071_v34 = vor.u32 %v14184_v25, %v11068_v26  ;;  %v11151_v46 = vor.u32 %v14204_v40, %v11148_v41  ;;  %v11138_v25 = vld [vmem:[#allocation14 + $0x2e8] sm:$0xf]  ;;  %v10767_v26 = vor.u32 %v14108_v16, %v10764_v17  ;;  %v14203_v40 = vld [vmem:[#allocation14 + $0x2f4] sm:$0xf0] }
 0x5d3   :  { %3492 = vmatpush.bf16.msrb.mxu0 %v11135_v47  ;;  %3430 = vmatmul.bf16.vlgmr.msrb.gmra.mxu3 %v16356_v58  ;;  %v14116_v47 = vld [vmem:[#allocation14 + $0x44] sm:$0xf]  ;;  %v11218_v41 = vld [vmem:[#allocation14 + $0x388] sm:$0xf] }
 0x5d4   :  { %3444 = vmatmul.bf16.vlgmr.msra.gmra.mxu0 %v16360_v59  ;;  %v2553_v32 = vpop.f32.mrf.mxu2  ;;  %v10962_v17 = vld [vmem:[#allocation14 + $0x188] sm:$0xf] }
 0x5d5   :  { %3510 = vmatpush.bf16.msrb.mxu1 %v11199_v1  ;;  %v2595_v1 = vpop.f32.mrf.mxu1 }
 0x5d6   :  { %3465 = vmatpush.bf16.msrb.mxu2 %v10863_v54  ;;  %3479 = vmatpush.bf16.msra.mxu3 %v10991_v61  ;;  %v2567_v35 = vpop.f32.mrf.mxu3  ;;  %v2581_v54 = vpop.f32.mrf.mxu0  ;;  %v11250_v61 = vld [vmem:[#allocation14 + $0x3c8] sm:$0xf] }
 0x5d7   :  { %3493 = vmatpush.bf16.msrb.mxu0 %v11119_v60  ;;  %v2568_v27 = vadd.f32 %v2567_v35, %v2553_v32  ;;  %v10799_v60 = vor.u32 %v14116_v47, %v10796_v48  ;;  %v11251_v5 = vor.u32 %v14231_v62, %v11250_v61  ;;  %v14135_v32 = vld [vmem:[#allocation14 + $0xd4] sm:$0xf0]  ;;  %v11139_v35 = vor.u32 %v14203_v40, %v11138_v25  ;;  %v10994_v48 = vld [vmem:[#allocation14 + $0x1c8] sm:$0xf] }
 0x5d8   :  { %v11219_v47 = vor.u32 %v14223_v37, %v11218_v41  ;;  %v10850_v61 = vld [vmem:[#allocation14 + $0xa8] sm:$0xf]  ;;  %v14131_v62 = vld [vmem:[#allocation14 + $0xb4] sm:$0xf0] }
 0x5d9   :  { %3511 = vmatpush.bf16.msrb.mxu1 %v11183_v14  ;;  %v2582_v63 = vadd.f32 %v2581_v54, %v2568_v27  ;;  %v14227_v14 = vld [vmem:[#allocation14 + $0x3b4] sm:$0xf0]  ;;  %v11122_v27 = vld [vmem:[#allocation14 + $0x2c8] sm:$0xf]  ;;  %v10995_v54 = vor.u32 %v14167_v50, %v10994_v48 }
 0x5da   :  { %3466 = vmatpush.bf16.msrb.mxu2 %v10847_v23  ;;  %3480 = vmatpush.bf16.msra.mxu3 %v10975_v55  ;;  %v10908_v23 = vld [vmem:[#allocation14 + $0x130] sm:$0xf0]  ;;  %v14176_v55 = vld [vmem:[#allocation14 + $0x224] sm:$0xf]  ;;  %v10946_v40 = vld [vmem:[#allocation14 + $0x168] sm:$0xf] }
 0x5db   :  { %3494 = vmatpush.bf16.msrb.mxu0 %v11103_v13  ;;  %v16373_v11 = vadd.f32 %v2595_v1, %v2582_v63  ;;  %v11234_v13 = vld [vmem:[#allocation14 + $0x3a8] sm:$0xf]  ;;  %v10911_v18 = vor.u32 %v14144_v4, %v10908_v23  ;;  %v11039_v8 = vor.u32 %v14176_v55, %v11036_v10  ;;  %v14215_v4 = vld [vmem:[#allocation14 + $0x354] sm:$0xf0] }
 0x5dc   :  { %v11235_v22 = vor.u32 %v14227_v14, %v11234_v13  ;;  %v10978_v1 = vld [vmem:[#allocation14 + $0x1a8] sm:$0xf]  ;;  %v14127_v10 = vld [vmem:[#allocation14 + $0x94] sm:$0xf0]  ;;  %v16379_v13 = vpop.f32.mrf.mxu2  ;;  %v11187_v16 = vor.u32 %v14215_v4, %v11186_v31 }
 0x5dd   :  { %3512 = vmatpush.bf16.msrb.mxu1 %v11167_v24  ;;  %v14139_v24 = vld [vmem:[#allocation14 + $0xf4] sm:$0xf0]  ;;  %v10834_v55 = vld [vmem:[#allocation14 + $0x88] sm:$0xf] }
 0x5de   :  { %3467 = vmatpush.bf16.msrb.mxu2 %v10831_v20  ;;  %3481 = vmatpush.bf16.msra.mxu3 %v10959_v21  ;;  %v10892_v20 = vld [vmem:[#allocation14 + $0x110] sm:$0xf0]  ;;  %v14172_v21 = vld [vmem:[#allocation14 + $0x204] sm:$0xf]  ;;  %v16381_v14 = vpop.f32.mrf.mxu3  ;;  %v14155_v41 = vld [vmem:[#allocation14 + $0x174] sm:$0xf0] }
 0x5df   :  { %3495 = vmatpush.bf16.msrb.mxu0 %v11087_v38  ;;  %v10882_v38 = vld [vmem:[#allocation14 + $0xe8] sm:$0xf]  ;;  %v10895_v42 = vor.u32 %v14140_v9, %v10892_v20  ;;  %v14191_v9 = vld [vmem:[#allocation14 + $0x294] sm:$0xf0] }
 0x5e0   :  { %v11170_v20 = vld [vmem:[#allocation14 + $0x328] sm:$0xf] }
 0x5e1   :  { %3513 = vmatpush.bf16.msrb.mxu1 %v11151_v46  ;;  %v10866_v46 = vld [vmem:[#allocation14 + $0xc8] sm:$0xf] }
 0x5e2   :  { %3468 = vmatpush.bf16.msrb.mxu2 %v10815_v28  ;;  %3482 = vmatpush.bf16.msra.mxu3 %v10943_v43  ;;  %v11023_v28 = vor.u32 %v14172_v21, %v11020_v29  ;;  %v10883_v43 = vor.u32 %v14139_v24, %v10882_v38  ;;  %v10867_v53 = vor.u32 %v14135_v32, %v10866_v46  ;;  %v14211_v21 = vld [vmem:[#allocation14 + $0x334] sm:$0xf0]  ;;  %v10818_v24 = vld [vmem:[#allocation14 + $0x68] sm:$0xf]  ;;  %v11268_v46 = vld [vmem:[#allocation14 + $0x3f8] sm:$0xf0] }
 0x5e3   :  { %3496 = vmatpush.bf16.msrb.mxu0 %v11071_v34  ;;  %v11011_v34 = vor.u32 %v14171_v30, %v11010_v39  ;;  %v10835_v29 = vor.u32 %v14127_v10, %v10834_v55  ;;  %v14123_v39 = vld [vmem:[#allocation14 + $0x74] sm:$0xf0]  ;;  %v16385_v30 = vpop.f32.mrf.mxu1  ;;  %v11074_v37 = vld [vmem:[#allocation14 + $0x268] sm:$0xf] }
 0x5e4   :  { %3514 = vmatmul.bf16.vlgmr.msrb.gmra.mxu1 %v16341_v0  ;;  %v10819_v32 = vor.u32 %v14123_v39, %v10818_v24  ;;  %v14115_v55 = vld [vmem:[#allocation14 + $0x34] sm:$0xf0]  ;;  %v10914_v10 = vld [vmem:[#allocation14 + $0x128] sm:$0xf] }
 0x5e5   :  { %3562 = vmatpush.bf16.msra.mxu1 %v11267_v51  ;;  %v14199_v51 = vld [vmem:[#allocation14 + $0x2d4] sm:$0xf0] }
 0x5e6   :  { %3469 = vmatpush.bf16.msrb.mxu2 %v10799_v60  ;;  %3483 = vmatpush.bf16.msra.mxu3 %v10927_v2  ;;  %v11123_v63 = vor.u32 %v14199_v51, %v11122_v27  ;;  %v11203_v60 = vor.u32 %v14219_v56, %v11202_v52  ;;  %v14163_v2 = vld [vmem:[#allocation14 + $0x1b4] sm:$0xf0]  ;;  %v10802_v51 = vld [vmem:[#allocation14 + $0x48] sm:$0xf] }
 0x5e7   :  { %3497 = vmatpush.bf16.msrb.mxu0 %v11055_v3  ;;  %v11106_v3 = vld [vmem:[#allocation14 + $0x2a8] sm:$0xf]  ;;  %v10979_v23 = vor.u32 %v14163_v2, %v10978_v1  ;;  %v14119_v52 = vld [vmem:[#allocation14 + $0x54] sm:$0xf0]  ;;  %v14229_v1 = vld [vmem:[#allocation14 + $0x3cc] sm:$0xf] }
 0x5e8   :  { %v10930_v56 = vld [vmem:[#allocation14 + $0x148] sm:$0xf]  ;;  %v11252_v2 = vld [vmem:[#allocation14 + $0x3d8] sm:$0xf0] }
 0x5e9   :  { %3563 = vmatpush.bf16.msra.mxu1 %v11251_v5  ;;  %v10851_v5 = vor.u32 %v14131_v62, %v10850_v61  ;;  %v14151_v61 = vld [vmem:[#allocation14 + $0x154] sm:$0xf0]  ;;  %v11058_v62 = vld [vmem:[#allocation14 + $0x248] sm:$0xf] }
 0x5ea   :  { %3470 = vmatpush.bf16.msrb.mxu2 %v10783_v15  ;;  %3484 = vmatpush.bf16.msra.mxu3 %v10911_v18  ;;  %v11107_v15 = vor.u32 %v14195_v33, %v11106_v3  ;;  %v14159_v18 = vld [vmem:[#allocation14 + $0x194] sm:$0xf0]  ;;  %v10803_v33 = vor.u32 %v14119_v52, %v10802_v51  ;;  %v10931_v4 = vor.u32 %v14151_v61, %v10930_v56  ;;  %v14133_v56 = vld [vmem:[#allocation14 + $0xcc] sm:$0xf] }
 0x5eb   :  { %3498 = vmatpush.bf16.msrb.mxu0 %v11039_v8  ;;  %v11090_v8 = vld [vmem:[#allocation14 + $0x288] sm:$0xf]  ;;  %v10963_v38 = vor.u32 %v14159_v18, %v10962_v17  ;;  %v2651_v31 = vpop.f32.mrf.mxu1  ;;  %v14179_v18 = vld [vmem:[#allocation14 + $0x234] sm:$0xf0] }
 0x5ec   :  { %v11091_v25 = vor.u32 %v14191_v9, %v11090_v8  ;;  %v11042_v17 = vld [vmem:[#allocation14 + $0x228] sm:$0xf]  ;;  %v14225_v9 = vld [vmem:[#allocation14 + $0x3ac] sm:$0xf] }
 0x5ed   :  { %3564 = vmatpush.bf16.msra.mxu1 %v11235_v22  ;;  %v16383_v22 = vpop.f32.mrf.mxu0  ;;  %v11043_v39 = vor.u32 %v14179_v18, %v11042_v17  ;;  %v11108_v17 = vld [vmem:[#allocation14 + $0x2b8] sm:$0xf0]  ;;  %v14213_v18 = vld [vmem:[#allocation14 + $0x34c] sm:$0xf] }
 0x5ee   :  { %3471 = vmatpush.bf16.msrb.mxu2 %v10767_v26  ;;  %3485 = vmatpush.bf16.msra.mxu3 %v10895_v42  ;;  %v11171_v26 = vor.u32 %v14211_v21, %v11170_v20  ;;  %v14187_v42 = vld [vmem:[#allocation14 + $0x274] sm:$0xf0]  ;;  %v11236_v20 = vld [vmem:[#allocation14 + $0x3b8] sm:$0xf0] }
 0x5ef   :  { %3499 = vmatpush.bf16.msrb.mxu0 %v11023_v28  ;;  %v11154_v28 = vld [vmem:[#allocation14 + $0x308] sm:$0xf] }
 0x5f1   :  { %3565 = vmatpush.bf16.msra.mxu1 %v11219_v47  ;;  %3472 = vmatmul.bf16.vlgmr.msrb.gmra.mxu2 %v16353_v57  ;;  %v11075_v47 = vor.u32 %v14187_v42, %v11074_v37  ;;  %v14175_v37 = vld [vmem:[#allocation14 + $0x214] sm:$0xf0]  ;;  %v14137_v42 = vld [vmem:[#allocation14 + $0xec] sm:$0xf] }
 0x5f2   :  { %3520 = vmatpush.bf16.msra.mxu2 %v10883_v43  ;;  %3534 = vmatpush.bf16.msrb.mxu3 %v11011_v34  ;;  %v14207_v43 = vld [vmem:[#allocation14 + $0x314] sm:$0xf0]  ;;  %v14233_v34 = vld [vmem:[#allocation14 + $0x3ec] sm:$0xf] }
 0x5f3   :  { %3548 = vmatpush.bf16.msra.mxu0 %v11139_v35  ;;  %3486 = vmatmul.bf16.vlgmr.msra.gmra.mxu3 %v16356_v58  ;;  %v10947_v35 = vor.u32 %v14155_v41, %v10946_v40  ;;  %v11155_v48 = vor.u32 %v14207_v43, %v11154_v28  ;;  %v11026_v40 = vld [vmem:[#allocation14 + $0x208] sm:$0xf]  ;;  %v11239_v41 = vor.u32 %v14225_v9, %v11236_v20  ;;  %v10884_v28 = vld [vmem:[#allocation14 + $0xf8] sm:$0xf0]  ;;  %v14169_v43 = vld [vmem:[#allocation14 + $0x1ec] sm:$0xf] }
 0x5f4   :  { %3500 = vmatmul.bf16.vlgmr.msrb.gmra.mxu0 %v16360_v59  ;;  %v2609_v50 = vpop.f32.mrf.mxu2  ;;  %v10887_v51 = vor.u32 %v14137_v42, %v10884_v28  ;;  %v11188_v9 = vld [vmem:[#allocation14 + $0x358] sm:$0xf0]  ;;  %v14209_v28 = vld [vmem:[#allocation14 + $0x32c] sm:$0xf] }
 0x5f5   :  { %3566 = vmatpush.bf16.msra.mxu1 %v11203_v60  ;;  %v2637_v60 = vpop.f32.mrf.mxu0  ;;  %v11092_v42 = vld [vmem:[#allocation14 + $0x298] sm:$0xf0] }
 0x5f6   :  { %3521 = vmatpush.bf16.msra.mxu2 %v10867_v53  ;;  %3535 = vmatpush.bf16.msrb.mxu3 %v10995_v54  ;;  %v2623_v27 = vpop.f32.mrf.mxu3  ;;  %v11271_v54 = vor.u32 %v14233_v34, %v11268_v46  ;;  %v11012_v34 = vld [vmem:[#allocation14 + $0x1f8] sm:$0xf0]  ;;  %v14201_v46 = vld [vmem:[#allocation14 + $0x2ec] sm:$0xf] }
 0x5f7   :  { %3549 = vmatpush.bf16.msra.mxu0 %v11123_v63  ;;  %v2624_v53 = vadd.f32 %v2623_v27, %v2609_v50  ;;  %v14183_v63 = vld [vmem:[#allocation14 + $0x254] sm:$0xf0]  ;;  %v11027_v27 = vor.u32 %v14175_v37, %v11026_v40  ;;  %v11015_v52 = vor.u32 %v14169_v43, %v11012_v34  ;;  %v14157_v40 = vld [vmem:[#allocation14 + $0x18c] sm:$0xf]  ;;  %v11172_v43 = vld [vmem:[#allocation14 + $0x338] sm:$0xf0] }
 0x5f8   :  { %v14189_v37 = vld [vmem:[#allocation14 + $0x28c] sm:$0xf] }
 0x5f9   :  { %3567 = vmatpush.bf16.msra.mxu1 %v11187_v16  ;;  %v2638_v3 = vadd.f32 %v2637_v60, %v2624_v53  ;;  %v14147_v16 = vld [vmem:[#allocation14 + $0x134] sm:$0xf0]  ;;  %v10868_v53 = vld [vmem:[#allocation14 + $0xd8] sm:$0xf0]  ;;  %v14197_v60 = vld [vmem:[#allocation14 + $0x2cc] sm:$0xf] }
 0x5fa   :  { %3522 = vmatpush.bf16.msra.mxu2 %v10851_v5  ;;  %3536 = vmatpush.bf16.msrb.mxu3 %v10979_v23  ;;  %v11059_v5 = vor.u32 %v14183_v63, %v11058_v62  ;;  %v10786_v23 = vld [vmem:[#allocation14 + $0x28] sm:$0xf]  ;;  %v10915_v24 = vor.u32 %v14147_v16, %v10914_v10  ;;  %v14165_v62 = vld [vmem:[#allocation14 + $0x1cc] sm:$0xf]  ;;  %v10996_v63 = vld [vmem:[#allocation14 + $0x1d8] sm:$0xf0] }
 0x5fb   :  { %3550 = vmatpush.bf16.msra.mxu0 %v11107_v15  ;;  %v11255_v15 = vor.u32 %v14229_v1, %v11252_v2  ;;  %v16387_v8 = vadd.f32 %v2651_v31, %v2638_v3  ;;  %v10787_v21 = vor.u32 %v14115_v55, %v10786_v23  ;;  %v11124_v1 = vld [vmem:[#allocation14 + $0x2d8] sm:$0xf0]  ;;  %v14217_v2 = vld [vmem:[#allocation14 + $0x36c] sm:$0xf]  ;;  %v10999_v31 = vor.u32 %v14165_v62, %v10996_v63  ;;  %v11770_v62 = vld [vmem:[#allocation14 + $0xbe0] sm:$0xf] }
 0x5fc   :  { %v11204_v3 = vld [vmem:[#allocation14 + $0x378] sm:$0xf0]  ;;  %v11127_v23 = vor.u32 %v14197_v60, %v11124_v1  ;;  %v14161_v10 = vld [vmem:[#allocation14 + $0x1ac] sm:$0xf]  ;;  %v14490_v63 = vld [vmem:[#allocation14 + $0xbec] sm:$0xf0] }
 0x5fd   :  { %3568 = vmatpush.bf16.msra.mxu1 %v11171_v26  ;;  %v14143_v26 = vld [vmem:[#allocation14 + $0x114] sm:$0xf0]  ;;  %v11207_v55 = vor.u32 %v14217_v2, %v11204_v3  ;;  %v14193_v16 = vld [vmem:[#allocation14 + $0x2ac] sm:$0xf]  ;;  %v16397_v34 = vpop.f32.mrf.mxu0 }
 0x5fe   :  { %3523 = vmatpush.bf16.msra.mxu2 %v10835_v29  ;;  %3537 = vmatpush.bf16.msrb.mxu3 %v10963_v38  ;;  %v10770_v29 = vld [vmem:[#allocation14 + $0x8] sm:$0xf]  ;;  %v14111_v38 = vld [vmem:[#allocation14 + $0x14] sm:$0xf0] }
 0x5ff   :  { %3551 = vmatpush.bf16.msra.mxu0 %v11091_v25  ;;  %v10898_v25 = vld [vmem:[#allocation14 + $0x108] sm:$0xf] }
 0x600   :  { %v10899_v50 = vor.u32 %v14143_v26, %v10898_v25  ;;  %v11111_v25 = vor.u32 %v14193_v16, %v11108_v17  ;;  %v11191_v26 = vor.u32 %v14213_v18, %v11188_v9  ;;  %v14181_v16 = vld [vmem:[#allocation14 + $0x24c] sm:$0xf]  ;;  %v11060_v17 = vld [vmem:[#allocation14 + $0x258] sm:$0xf0]  ;;  %v11754_v9 = vld [vmem:[#allocation14 + $0xbc0] sm:$0xf] }
 0x601   :  { %3569 = vmatpush.bf16.msra.mxu1 %v11155_v48  ;;  %v11220_v48 = vld [vmem:[#allocation14 + $0x398] sm:$0xf0] }
 0x602   :  { %3524 = vmatpush.bf16.msra.mxu2 %v10819_v32  ;;  %3538 = vmatpush.bf16.msrb.mxu3 %v10947_v35  ;;  %v10771_v32 = vor.u32 %v14111_v38, %v10770_v29  ;;  %v11140_v35 = vld [vmem:[#allocation14 + $0x2f8] sm:$0xf0]  ;;  %v14125_v29 = vld [vmem:[#allocation14 + $0x8c] sm:$0xf] }
 0x603   :  { %3552 = vmatpush.bf16.msra.mxu0 %v11075_v47  ;;  %v14221_v47 = vld [vmem:[#allocation14 + $0x38c] sm:$0xf]  ;;  %v10836_v38 = vld [vmem:[#allocation14 + $0x98] sm:$0xf0] }
 0x604   :  { %3570 = vmatmul.bf16.vlgmr.msra.gmra.mxu1 %v16341_v0  ;;  %v11223_v61 = vor.u32 %v14221_v47, %v11220_v48  ;;  %v10820_v47 = vld [vmem:[#allocation14 + $0x78] sm:$0xf0]  ;;  %v16399_v48 = vpop.f32.mrf.mxu1 }
 0x605   :  { %3618 = vmatpush.bf16.msrb.mxu1 %v11271_v54  ;;  %v11143_v54 = vor.u32 %v14201_v46, %v11140_v35  ;;  %v10839_v46 = vor.u32 %v14125_v29, %v10836_v38  ;;  %v14121_v35 = vld [vmem:[#allocation14 + $0x6c] sm:$0xf] }
 0x606   :  { %3525 = vmatpush.bf16.msra.mxu2 %v10803_v33  ;;  %3539 = vmatpush.bf16.msrb.mxu3 %v10931_v4  ;;  %v10871_v33 = vor.u32 %v14133_v56, %v10868_v53  ;;  %v14129_v4 = vld [vmem:[#allocation14 + $0xac] sm:$0xf]  ;;  %v11076_v53 = vld [vmem:[#allocation14 + $0x278] sm:$0xf0]  ;;  %v10823_v60 = vor.u32 %v14121_v35, %v10820_v47  ;;  %v11738_v35 = vld [vmem:[#allocation14 + $0xba0] sm:$0xf] }
 0x607   :  { %3553 = vmatpush.bf16.msra.mxu0 %v11059_v5  ;;  %v10852_v5 = vld [vmem:[#allocation14 + $0xb8] sm:$0xf0]  ;;  %v14185_v56 = vld [vmem:[#allocation14 + $0x26c] sm:$0xf]  ;;  %v14482_v47 = vld [vmem:[#allocation14 + $0xbac] sm:$0xf0] }
 0x608   :  { %v10855_v20 = vor.u32 %v14129_v4, %v10852_v5  ;;  %v11079_v2 = vor.u32 %v14185_v56, %v11076_v53  ;;  %v14117_v4 = vld [vmem:[#allocation14 + $0x4c] sm:$0xf]  ;;  %v10804_v5 = vld [vmem:[#allocation14 + $0x58] sm:$0xf0] }
 0x609   :  { %3619 = vmatpush.bf16.msrb.mxu1 %v11255_v15  ;;  %v10980_v15 = vld [vmem:[#allocation14 + $0x1b8] sm:$0xf0]  ;;  %v10807_v29 = vor.u32 %v14117_v4, %v10804_v5  ;;  %v14141_v53 = vld [vmem:[#allocation14 + $0x10c] sm:$0xf]  ;;  %v11722_v4 = vld [vmem:[#allocation14 + $0xb80] sm:$0xf] }
 0x60a   :  { %3526 = vmatpush.bf16.msra.mxu2 %v10787_v21  ;;  %3540 = vmatpush.bf16.msrb.mxu3 %v10915_v24  ;;  %v10983_v21 = vor.u32 %v14161_v10, %v10980_v15  ;;  %v16393_v24 = vpop.f32.mrf.mxu2  ;;  %v11771_v10 = vor.u32 %v14490_v63, %v11770_v62  ;;  %v10932_v15 = vld [vmem:[#allocation14 + $0x158] sm:$0xf0]  ;;  %v11739_v62 = vor.u32 %v14482_v47, %v11738_v35  ;;  %v14478_v5 = vld [vmem:[#allocation14 + $0xb8c] sm:$0xf0]  ;;  %v11610_v47 = vld [vmem:[#allocation14 + $0xaa0] sm:$0xf] }
 0x60b   :  { %3554 = vmatpush.bf16.msra.mxu0 %v11043_v39  ;;  %v16395_v39 = vpop.f32.mrf.mxu3  ;;  %v11028_v63 = vld [vmem:[#allocation14 + $0x218] sm:$0xf0]  ;;  %v14418_v35 = vld [vmem:[#allocation14 + $0x9ac] sm:$0xf0] }
 0x60c   :  { %v2707_v38 = vpop.f32.mrf.mxu1 }
 0x60d   :  { %3620 = vmatpush.bf16.msrb.mxu1 %v11239_v41  ;;  %v10964_v41 = vld [vmem:[#allocation14 + $0x198] sm:$0xf0] }
 0x60e   :  { %3527 = vmatpush.bf16.msra.mxu2 %v10771_v32  ;;  %3541 = vmatpush.bf16.msrb.mxu3 %v10899_v50  ;;  %v10967_v32 = vor.u32 %v14157_v40, %v10964_v41  ;;  %v11095_v50 = vor.u32 %v14189_v37, %v11092_v42  ;;  %v14113_v40 = vld [vmem:[#allocation14 + $0x2c] sm:$0xf]  ;;  %v10788_v41 = vld [vmem:[#allocation14 + $0x38] sm:$0xf0] }
 0x60f   :  { %3555 = vmatpush.bf16.msra.mxu0 %v11027_v27  ;;  %v11175_v27 = vor.u32 %v14209_v28, %v11172_v43  ;;  %v14145_v37 = vld [vmem:[#allocation14 + $0x12c] sm:$0xf]  ;;  %v10916_v28 = vld [vmem:[#allocation14 + $0x138] sm:$0xf0] }
 0x610   :  { %v14177_v43 = vld [vmem:[#allocation14 + $0x22c] sm:$0xf] }
 0x611   :  { %3621 = vmatpush.bf16.msrb.mxu1 %v11223_v61  ;;  %3528 = vmatmul.bf16.vlgmr.msra.gmra.mxu2 %v16353_v57  ;;  %v11156_v61 = vld [vmem:[#allocation14 + $0x318] sm:$0xf0]  ;;  %v2693_v18 = vpop.f32.mrf.mxu0 }
 0x612   :  { %3576 = vmatpush.bf16.msrb.mxu2 %v10887_v51  ;;  %3590 = vmatpush.bf16.msra.mxu3 %v11015_v52  ;;  %v14153_v51 = vld [vmem:[#allocation14 + $0x16c] sm:$0xf]  ;;  %v10948_v52 = vld [vmem:[#allocation14 + $0x178] sm:$0xf0] }
 0x613   :  { %3604 = vmatpush.bf16.msrb.mxu0 %v11143_v54  ;;  %3542 = vmatmul.bf16.vlgmr.msrb.gmra.mxu3 %v16356_v58  ;;  %v14205_v54 = vld [vmem:[#allocation14 + $0x30c] sm:$0xf]  ;;  %v10951_v1 = vor.u32 %v14153_v51, %v10948_v52  ;;  %v10772_v51 = vld [vmem:[#allocation14 + $0x18] sm:$0xf0]  ;;  %v10919_v52 = vor.u32 %v14145_v37, %v10916_v28  ;;  %v11354_v37 = vld [vmem:[#allocation14 + $0x8a0] sm:$0xf] }
 0x614   :  { %3556 = vmatmul.bf16.vlgmr.msra.gmra.mxu0 %v16360_v59  ;;  %v11159_v3 = vor.u32 %v14205_v54, %v11156_v61  ;;  %v10900_v54 = vld [vmem:[#allocation14 + $0x118] sm:$0xf0]  ;;  %v14173_v61 = vld [vmem:[#allocation14 + $0x20c] sm:$0xf] }
 0x615   :  { %3622 = vmatpush.bf16.msrb.mxu1 %v11207_v55 }
 0x616   :  { %3577 = vmatpush.bf16.msrb.mxu2 %v10871_v33  ;;  %3591 = vmatpush.bf16.msra.mxu3 %v10999_v31  ;;  %v2665_v33 = vpop.f32.mrf.mxu2  ;;  %v2679_v31 = vpop.f32.mrf.mxu3 }
 0x617   :  { %3605 = vmatpush.bf16.msrb.mxu0 %v11127_v23  ;;  %v14149_v23 = vld [vmem:[#allocation14 + $0x14c] sm:$0xf]  ;;  %v2680_v55 = vadd.f32 %v2679_v31, %v2665_v33  ;;  %v11642_v33 = vld [vmem:[#allocation14 + $0xae0] sm:$0xf]  ;;  %v14458_v31 = vld [vmem:[#allocation14 + $0xaec] sm:$0xf0] }
 0x619   :  { %3623 = vmatpush.bf16.msrb.mxu1 %v11191_v26  ;;  %v11063_v26 = vor.u32 %v14181_v16, %v11060_v17  ;;  %v11370_v16 = vld [vmem:[#allocation14 + $0x8c0] sm:$0xf]  ;;  %v14390_v17 = vld [vmem:[#allocation14 + $0x8cc] sm:$0xf0] }
 0x61a   :  { %3578 = vmatpush.bf16.msrb.mxu2 %v10855_v20  ;;  %3592 = vmatpush.bf16.msra.mxu3 %v10983_v21  ;;  %v14486_v20 = vld [vmem:[#allocation14 + $0xbcc] sm:$0xf0]  ;;  %v2694_v21 = vadd.f32 %v2693_v18, %v2680_v55  ;;  %v11031_v55 = vor.u32 %v14173_v61, %v11028_v63  ;;  %v11643_v18 = vor.u32 %v14458_v31, %v11642_v33  ;;  %v16411_v33 = vpop.f32.mrf.mxu0 }
 0x61b   :  { %3606 = vmatpush.bf16.msrb.mxu0 %v11111_v25  ;;  %v10935_v25 = vor.u32 %v14149_v23, %v10932_v15  ;;  %v11755_v42 = vor.u32 %v14486_v20, %v11754_v9  ;;  %v10903_v23 = vor.u32 %v14141_v53, %v10900_v54  ;;  %v11723_v9 = vor.u32 %v14478_v5, %v11722_v4  ;;  %v11498_v20 = vld [vmem:[#allocation14 + $0x9c0] sm:$0xf]  ;;  %v14382_v54 = vld [vmem:[#allocation14 + $0x88c] sm:$0xf0] }
 0x61c   :  { %v11338_v53 = vld [vmem:[#allocation14 + $0x880] sm:$0xf]  ;;  %v14378_v5 = vld [vmem:[#allocation14 + $0x86c] sm:$0xf0] }
 0x61d   :  { %3624 = vmatpush.bf16.msrb.mxu1 %v11175_v27  ;;  %v14109_v27 = vld [vmem:[#allocation14 + $0xc] sm:$0xf]  ;;  %v11322_v4 = vld [vmem:[#allocation14 + $0x860] sm:$0xf] }
 0x61e   :  { %3579 = vmatpush.bf16.msrb.mxu2 %v10839_v46  ;;  %3593 = vmatpush.bf16.msra.mxu3 %v10967_v32  ;;  %v11044_v46 = vld [vmem:[#allocation14 + $0x238] sm:$0xf0]  ;;  %v16401_v32 = vadd.f32 %v2707_v38, %v2694_v21  ;;  %v14422_v21 = vld [vmem:[#allocation14 + $0x9cc] sm:$0xf0]  ;;  %v16407_v61 = vpop.f32.mrf.mxu2 }
 0x61f   :  { %3607 = vmatpush.bf16.msrb.mxu0 %v11095_v50  ;;  %v10791_v50 = vor.u32 %v14113_v40, %v10788_v41  ;;  %v11047_v56 = vor.u32 %v14177_v43, %v11044_v46  ;;  %v14454_v38 = vld [vmem:[#allocation14 + $0xacc] sm:$0xf0]  ;;  %v11371_v40 = vor.u32 %v14390_v17, %v11370_v16  ;;  %v11499_v41 = vor.u32 %v14422_v21, %v11498_v20  ;;  %v11482_v46 = vld [vmem:[#allocation14 + $0x9a0] sm:$0xf]  ;;  %v14488_v21 = vld [vmem:[#allocation14 + $0xbe4] sm:$0xf] }
 0x620   :  { %v14410_v16 = vld [vmem:[#allocation14 + $0x96c] sm:$0xf0]  ;;  %v11578_v17 = vld [vmem:[#allocation14 + $0xa60] sm:$0xf] }
 0x621   :  { %3625 = vmatpush.bf16.msrb.mxu1 %v11159_v3  ;;  %v14426_v3 = vld [vmem:[#allocation14 + $0x9ec] sm:$0xf0] }
 0x622   :  { %3580 = vmatpush.bf16.msrb.mxu2 %v10823_v60  ;;  %3594 = vmatpush.bf16.msra.mxu3 %v10951_v1  ;;  %v11386_v60 = vld [vmem:[#allocation14 + $0x8e0] sm:$0xf]  ;;  %v14394_v1 = vld [vmem:[#allocation14 + $0x8ec] sm:$0xf0] }
 0x623   :  { %3608 = vmatpush.bf16.msrb.mxu0 %v11079_v2  ;;  %v11514_v2 = vld [vmem:[#allocation14 + $0x9e0] sm:$0xf]  ;;  %v14462_v20 = vld [vmem:[#allocation14 + $0xb0c] sm:$0xf0] }
 0x624   :  { %3626 = vmatmul.bf16.vlgmr.msrb.gmra.mxu1 %v16341_v0  ;;  %v10775_v0 = vor.u32 %v14109_v27, %v10772_v51  ;;  %v11515_v15 = vor.u32 %v14426_v3, %v11514_v2  ;;  %v11690_v27 = vld [vmem:[#allocation14 + $0xb40] sm:$0xf]  ;;  %v14470_v51 = vld [vmem:[#allocation14 + $0xb4c] sm:$0xf0] }
 0x625   :  { %4443 = vmatpush.bf16.msra.mxu1 %v11771_v10  ;;  %v11387_v10 = vor.u32 %v14394_v1, %v11386_v60  ;;  %v11691_v63 = vor.u32 %v14470_v51, %v11690_v27  ;;  %v14414_v60 = vld [vmem:[#allocation14 + $0x98c] sm:$0xf0]  ;;  %v11594_v1 = vld [vmem:[#allocation14 + $0xa80] sm:$0xf] }
 0x626   :  { %3581 = vmatpush.bf16.msrb.mxu2 %v10807_v29  ;;  %3595 = vmatpush.bf16.msra.mxu3 %v10935_v25  ;;  %v11626_v29 = vld [vmem:[#allocation14 + $0xac0] sm:$0xf]  ;;  %v14446_v2 = vld [vmem:[#allocation14 + $0xa8c] sm:$0xf0] }
 0x627   :  { %3609 = vmatpush.bf16.msrb.mxu0 %v11063_v26  ;;  %v11706_v25 = vld [vmem:[#allocation14 + $0xb60] sm:$0xf]  ;;  %v14474_v26 = vld [vmem:[#allocation14 + $0xb6c] sm:$0xf0]  ;;  %v11627_v28 = vor.u32 %v14454_v38, %v11626_v29  ;;  %v11772_v29 = vld [vmem:[#allocation14 + $0xbf0] sm:$0xf0]  ;;  %v11323_v38 = vor.u32 %v14378_v5, %v11322_v4 }
 0x628   :  { %v11707_v43 = vor.u32 %v14474_v26, %v11706_v25  ;;  %v11674_v3 = vld [vmem:[#allocation14 + $0xb20] sm:$0xf]  ;;  %v14438_v27 = vld [vmem:[#allocation14 + $0xa4c] sm:$0xf0] }
 0x629   :  { %4444 = vmatpush.bf16.msra.mxu1 %v11755_v42  ;;  %v14386_v42 = vld [vmem:[#allocation14 + $0x8ac] sm:$0xf0] }
 0x62a   :  { %3582 = vmatpush.bf16.msrb.mxu2 %v10791_v50  ;;  %3596 = vmatpush.bf16.msra.mxu3 %v10919_v52  ;;  %v14450_v50 = vld [vmem:[#allocation14 + $0xaac] sm:$0xf0]  ;;  %v11355_v52 = vor.u32 %v14386_v42, %v11354_v37  ;;  %v11306_v42 = vld [vmem:[#allocation14 + $0x840] sm:$0xf] }
 0x62b   :  { %3610 = vmatpush.bf16.msrb.mxu0 %v11047_v56  ;;  %v11483_v56 = vor.u32 %v14418_v35, %v11482_v46  ;;  %v11775_v35 = vor.u32 %v14488_v21, %v11772_v29  ;;  %v14434_v4 = vld [vmem:[#allocation14 + $0xa2c] sm:$0xf0] }
 0x62c   :  { %v14430_v29 = vld [vmem:[#allocation14 + $0xa0c] sm:$0xf0] }
 0x62d   :  { %4445 = vmatpush.bf16.msra.mxu1 %v11739_v62  ;;  %v16409_v62 = vpop.f32.mrf.mxu3 }
 0x62e   :  { %3583 = vmatpush.bf16.msrb.mxu2 %v10775_v0  ;;  %3597 = vmatpush.bf16.msra.mxu3 %v10903_v23  ;;  %v11339_v0 = vor.u32 %v14382_v54, %v11338_v53  ;;  %v16413_v23 = vpop.f32.mrf.mxu1 }
 0x62f   :  { %3611 = vmatpush.bf16.msrb.mxu0 %v11031_v55  ;;  %v11595_v55 = vor.u32 %v14446_v2, %v11594_v1  ;;  %v14370_v1 = vld [vmem:[#allocation14 + $0x82c] sm:$0xf0]  ;;  %v11418_v2 = vld [vmem:[#allocation14 + $0x920] sm:$0xf] }
 0x631   :  { %4446 = vmatpush.bf16.msra.mxu1 %v11723_v9  ;;  %3584 = vmatmul.bf16.vlgmr.msrb.gmra.mxu2 %v16353_v57  ;;  %v11611_v57 = vor.u32 %v14450_v50, %v11610_v47  ;;  %v11658_v9 = vld [vmem:[#allocation14 + $0xb00] sm:$0xf]  ;;  %v14406_v47 = vld [vmem:[#allocation14 + $0x94c] sm:$0xf0]  ;;  %v2749_v51 = vpop.f32.mrf.mxu0 }
 0x632   :  { %4401 = vmatpush.bf16.msra.mxu2 %v11387_v10  ;;  %4415 = vmatpush.bf16.msrb.mxu3 %v11515_v15  ;;  %v11450_v15 = vld [vmem:[#allocation14 + $0x960] sm:$0xf] }
 0x633   :  { %4429 = vmatpush.bf16.msra.mxu0 %v11643_v18  ;;  %3598 = vmatmul.bf16.vlgmr.msra.gmra.mxu3 %v16356_v58  ;;  %v11466_v58 = vld [vmem:[#allocation14 + $0x980] sm:$0xf]  ;;  %v14442_v18 = vld [vmem:[#allocation14 + $0xa6c] sm:$0xf0]  ;;  %v11451_v25 = vor.u32 %v14410_v16, %v11450_v15 }
 0x634   :  { %3612 = vmatmul.bf16.vlgmr.msrb.gmra.mxu0 %v16360_v59  ;;  %v14466_v59 = vld [vmem:[#allocation14 + $0xb2c] sm:$0xf0]  ;;  %v11467_v31 = vor.u32 %v14414_v60, %v11466_v58  ;;  %v11579_v26 = vor.u32 %v14442_v18, %v11578_v17  ;;  %v11562_v50 = vld [vmem:[#allocation14 + $0xa40] sm:$0xf] }
 0x635   :  { %4447 = vmatpush.bf16.msra.mxu1 %v11707_v43  ;;  %v11675_v10 = vor.u32 %v14466_v59, %v11674_v3  ;;  %v11434_v43 = vld [vmem:[#allocation14 + $0x940] sm:$0xf]  ;;  %v11563_v58 = vor.u32 %v14438_v27, %v11562_v50  ;;  %v16417_v3 = vpack.c.bf16 %v16371_v19, %v16350_v36  ;;  %v14366_v17 = vld [vmem:[#allocation14 + $0x80c] sm:$0xf0]  ;;  %v14388_v27 = vld [vmem:[#allocation14 + $0x8c4] sm:$0xf] }
 0x636   :  { %4402 = vmatpush.bf16.msra.mxu2 %v11371_v40  ;;  %4416 = vmatpush.bf16.msrb.mxu3 %v11499_v41  ;;  %v11659_v40 = vor.u32 %v14462_v20, %v11658_v9  ;;  %v2721_v41 = vpop.f32.mrf.mxu2  ;;  %v2735_v37 = vpop.f32.mrf.mxu3  ;;  %v11290_v60 = vld [vmem:[#allocation14 + $0x820] sm:$0xf]  ;;  %v14398_v9 = vld [vmem:[#allocation14 + $0x90c] sm:$0xf0] }
 0x637   :  { %4430 = vmatpush.bf16.msra.mxu0 %v11627_v28  ;;  %v14374_v28 = vld [vmem:[#allocation14 + $0x84c] sm:$0xf0]  ;;  %v2736_v46 = vadd.f32 %v2735_v37, %v2721_v41  ;;  %v11291_v15 = vor.u32 %v14370_v1, %v11290_v60  ;;  %v11274_v16 = vld [vmem:[#allocation14 + $0x800] sm:$0xf]  ;;  %v14456_v41 = vld [vmem:[#allocation14 + $0xae4] sm:$0xf]  ;;  %v16424_v1 = vpack.c.bf16 %v16365_v6, %v16346_v44 }
 0x638   :  { %v11307_v54 = vor.u32 %v14374_v28, %v11306_v42  ;;  %v11402_v19 = vld [vmem:[#allocation14 + $0x900] sm:$0xf]  ;;  %v11275_v37 = vor.u32 %v14366_v17, %v11274_v16  ;;  %v11644_v42 = vld [vmem:[#allocation14 + $0xaf0] sm:$0xf0]  ;;  %v14476_v28 = vld [vmem:[#allocation14 + $0xb84] sm:$0xf] }
 0x639   :  { %4448 = vmatpush.bf16.msra.mxu1 %v11691_v63  ;;  %v2750_v53 = vadd.f32 %v2749_v51, %v2736_v46  ;;  %v11435_v63 = vor.u32 %v14406_v47, %v11434_v43  ;;  %v11530_v20 = vld [vmem:[#allocation14 + $0xa00] sm:$0xf]  ;;  %v11724_v43 = vld [vmem:[#allocation14 + $0xb90] sm:$0xf0]  ;;  %v11403_v46 = vor.u32 %v14398_v9, %v11402_v19  ;;  %v14448_v16 = vld [vmem:[#allocation14 + $0xaa4] sm:$0xf] }
 0x63a   :  { %4403 = vmatpush.bf16.msra.mxu2 %v11355_v52  ;;  %4417 = vmatpush.bf16.msrb.mxu3 %v11483_v56  ;;  %v14484_v52 = vld [vmem:[#allocation14 + $0xbc4] sm:$0xf]  ;;  %v11756_v56 = vld [vmem:[#allocation14 + $0xbd0] sm:$0xf0] }
 0x63b   :  { %4431 = vmatpush.bf16.msra.mxu0 %v11611_v57  ;;  %v2763_v57 = vpop.f32.mrf.mxu1  ;;  %v11759_v59 = vor.u32 %v14484_v52, %v11756_v56  ;;  %v11372_v51 = vld [vmem:[#allocation14 + $0x8d0] sm:$0xf0]  ;;  %v11647_v52 = vor.u32 %v14456_v41, %v11644_v42  ;;  %v11727_v56 = vor.u32 %v14476_v28, %v11724_v43  ;;  %v14376_v28 = vld [vmem:[#allocation14 + $0x864] sm:$0xf] }
 0x63c   :  { %v16419_v5 = vadd.f32 %v2763_v57, %v2750_v53  ;;  %v14420_v53 = vld [vmem:[#allocation14 + $0x9c4] sm:$0xf]  ;;  %v11708_v60 = vld [vmem:[#allocation14 + $0xb70] sm:$0xf0] }
 0x63d   :  { %4449 = vmatpush.bf16.msra.mxu1 %v11675_v10  ;;  %v11740_v10 = vld [vmem:[#allocation14 + $0xbb0] sm:$0xf0]  ;;  %v14452_v57 = vld [vmem:[#allocation14 + $0xac4] sm:$0xf] }
 0x63e   :  { %4404 = vmatpush.bf16.msra.mxu2 %v11339_v0  ;;  %4418 = vmatpush.bf16.msrb.mxu3 %v11467_v31  ;;  %v14402_v0 = vld [vmem:[#allocation14 + $0x92c] sm:$0xf0]  ;;  %v11546_v31 = vld [vmem:[#allocation14 + $0xa20] sm:$0xf]  ;;  %v11692_v17 = vld [vmem:[#allocation14 + $0xb50] sm:$0xf0]  ;;  %v16437_v19 = vpop.f32.mrf.mxu2  ;;  %v16439_v41 = vpop.f32.mrf.mxu3 }
 0x63f   :  { %4432 = vmatpush.bf16.msra.mxu0 %v11595_v55  ;;  %v14480_v55 = vld [vmem:[#allocation14 + $0xba4] sm:$0xf]  ;;  %v11419_v18 = vor.u32 %v14402_v0, %v11418_v2  ;;  %v11547_v36 = vor.u32 %v14434_v4, %v11546_v31  ;;  %v16428_v2 = vpack.c.bf16 %v16367_v7, %v16348_v49  ;;  %v11356_v4 = vld [vmem:[#allocation14 + $0x8b0] sm:$0xf0] }
 0x640   :  { %v11743_v21 = vor.u32 %v14480_v55, %v11740_v10  ;;  %v14384_v31 = vld [vmem:[#allocation14 + $0x8a4] sm:$0xf]  ;;  %v16432_v55 = vpack.c.bf16 %v16369_v12, %v16344_v45  ;;  %v11612_v49 = vld [vmem:[#allocation14 + $0xab0] sm:$0xf0] }
 0x641   :  { %4450 = vmatpush.bf16.msra.mxu1 %v11659_v40  ;;  %v11516_v40 = vld [vmem:[#allocation14 + $0x9f0] sm:$0xf0]  ;;  %v14416_v10 = vld [vmem:[#allocation14 + $0x9a4] sm:$0xf]  ;;  %v11359_v45 = vor.u32 %v14384_v31, %v11356_v4  ;;  %v11615_v9 = vor.u32 %v14448_v16, %v11612_v49 }
 0x642   :  { %4405 = vmatpush.bf16.msra.mxu2 %v11323_v38  ;;  %4419 = vmatpush.bf16.msrb.mxu3 %v11451_v25  ;;  %v14392_v38 = vld [vmem:[#allocation14 + $0x8e4] sm:$0xf]  ;;  %v11388_v25 = vld [vmem:[#allocation14 + $0x8f0] sm:$0xf0] }
 0x643   :  { %4433 = vmatpush.bf16.msra.mxu0 %v11579_v26  ;;  %v14424_v26 = vld [vmem:[#allocation14 + $0x9e4] sm:$0xf]  ;;  %v11391_v47 = vor.u32 %v14392_v38, %v11388_v25  ;;  %v11596_v25 = vld [vmem:[#allocation14 + $0xa90] sm:$0xf0] }
 0x644   :  { %4451 = vmatmul.bf16.vlgmr.msra.gmra.mxu1 %v16417_v3  ;;  %v11519_v50 = vor.u32 %v14424_v26, %v11516_v40  ;;  %v14468_v7 = vld [vmem:[#allocation14 + $0xb44] sm:$0xf]  ;;  %v11676_v40 = vld [vmem:[#allocation14 + $0xb30] sm:$0xf0] }
 0x645   :  { %4499 = vmatpush.bf16.msrb.mxu1 %v11775_v35  ;;  %v11531_v35 = vor.u32 %v14430_v29, %v11530_v20  ;;  %v11695_v20 = vor.u32 %v14468_v7, %v11692_v17  ;;  %v11468_v29 = vld [vmem:[#allocation14 + $0x990] sm:$0xf0]  ;;  %v14444_v38 = vld [vmem:[#allocation14 + $0xa84] sm:$0xf] }
 0x646   :  { %4406 = vmatpush.bf16.msra.mxu2 %v11307_v54  ;;  %4420 = vmatpush.bf16.msrb.mxu3 %v11435_v63  ;;  %v11500_v54 = vld [vmem:[#allocation14 + $0x9d0] sm:$0xf0]  ;;  %v14464_v26 = vld [vmem:[#allocation14 + $0xb24] sm:$0xf] }
 0x647   :  { %4434 = vmatpush.bf16.msra.mxu0 %v11563_v58  ;;  %v11628_v63 = vld [vmem:[#allocation14 + $0xad0] sm:$0xf0]  ;;  %v14472_v58 = vld [vmem:[#allocation14 + $0xb64] sm:$0xf]  ;;  %v11503_v0 = vor.u32 %v14420_v53, %v11500_v54  ;;  %v16443_v54 = vpop.f32.mrf.mxu1 }
 0x648   :  { %v11631_v44 = vor.u32 %v14452_v57, %v11628_v63  ;;  %v11711_v6 = vor.u32 %v14472_v58, %v11708_v60  ;;  %v11324_v43 = vld [vmem:[#allocation14 + $0x870] sm:$0xf0]  ;;  %v11778_v57 = vld [vmem:[#allocation14 + $0xbe8] sm:$0xf]  ;;  %v14491_v63 = vld [vmem:[#allocation14 + $0xbf4] sm:$0xf0] }
 0x649   :  { %4500 = vmatpush.bf16.msrb.mxu1 %v11759_v59  ;;  %v11375_v59 = vor.u32 %v14388_v27, %v11372_v51  ;;  %v11452_v27 = vld [vmem:[#allocation14 + $0x970] sm:$0xf0]  ;;  %v14440_v51 = vld [vmem:[#allocation14 + $0xa64] sm:$0xf]  ;;  %v11327_v58 = vor.u32 %v14376_v28, %v11324_v43  ;;  %v11746_v43 = vld [vmem:[#allocation14 + $0xba8] sm:$0xf] }
 0x64a   :  { %4407 = vmatpush.bf16.msra.mxu2 %v11291_v15  ;;  %4421 = vmatpush.bf16.msrb.mxu3 %v11419_v18  ;;  %v11484_v15 = vld [vmem:[#allocation14 + $0x9b0] sm:$0xf0]  ;;  %v14380_v18 = vld [vmem:[#allocation14 + $0x884] sm:$0xf] }
 0x64b   :  { %4435 = vmatpush.bf16.msra.mxu0 %v11547_v36  ;;  %v11487_v12 = vor.u32 %v14416_v10, %v11484_v15  ;;  %v11340_v36 = vld [vmem:[#allocation14 + $0x890] sm:$0xf0]  ;;  %v14372_v4 = vld [vmem:[#allocation14 + $0x844] sm:$0xf]  ;;  %v11779_v15 = vor.u32 %v14491_v63, %v11778_v57 }
 0x64c   :  { %v11660_v53 = vld [vmem:[#allocation14 + $0xb10] sm:$0xf0]  ;;  %v14436_v49 = vld [vmem:[#allocation14 + $0xa44] sm:$0xf] }
 0x64d   :  { %4501 = vmatpush.bf16.msrb.mxu1 %v11743_v21  ;;  %v14412_v21 = vld [vmem:[#allocation14 + $0x984] sm:$0xf]  ;;  %v11436_v16 = vld [vmem:[#allocation14 + $0x950] sm:$0xf0] }
 0x64e   :  { %4408 = vmatpush.bf16.msra.mxu2 %v11275_v37  ;;  %4422 = vmatpush.bf16.msrb.mxu3 %v11403_v46  ;;  %v11343_v37 = vor.u32 %v14380_v18, %v11340_v36  ;;  %v11471_v42 = vor.u32 %v14412_v21, %v11468_v29  ;;  %v16441_v46 = vpop.f32.mrf.mxu0  ;;  %v11564_v7 = vld [vmem:[#allocation14 + $0xa50] sm:$0xf0]  ;;  %v14368_v29 = vld [vmem:[#allocation14 + $0x824] sm:$0xf] }
 0x64f   :  { %4436 = vmatpush.bf16.msra.mxu0 %v11531_v35  ;;  %v11599_v35 = vor.u32 %v14444_v38, %v11596_v25  ;;  %v11567_v21 = vor.u32 %v14436_v49, %v11564_v7  ;;  %v11292_v38 = vld [vmem:[#allocation14 + $0x830] sm:$0xf0]  ;;  %v14400_v25 = vld [vmem:[#allocation14 + $0x924] sm:$0xf]  ;;  %v3459_v28 = vpop.f32.mrf.mxu1 }
 0x650   :  { %v11404_v57 = vld [vmem:[#allocation14 + $0x910] sm:$0xf0]  ;;  %v14428_v63 = vld [vmem:[#allocation14 + $0xa04] sm:$0xf] }
 0x651   :  { %4502 = vmatpush.bf16.msrb.mxu1 %v11727_v56  ;;  %4409 = vmatmul.bf16.vlgmr.msra.gmra.mxu2 %v16424_v1  ;;  %v14460_v56 = vld [vmem:[#allocation14 + $0xb04] sm:$0xf] }
 0x652   :  { %4457 = vmatpush.bf16.msrb.mxu2 %v11391_v47  ;;  %4471 = vmatpush.bf16.msra.mxu3 %v11519_v50  ;;  %v11679_v47 = vor.u32 %v14464_v26, %v11676_v40  ;;  %v14408_v50 = vld [vmem:[#allocation14 + $0x964] sm:$0xf]  ;;  %v11420_v40 = vld [vmem:[#allocation14 + $0x930] sm:$0xf0] }
 0x653   :  { %4485 = vmatpush.bf16.msrb.mxu0 %v11647_v52  ;;  %4423 = vmatmul.bf16.vlgmr.msrb.gmra.mxu3 %v16428_v2  ;;  %v11580_v52 = vld [vmem:[#allocation14 + $0xa70] sm:$0xf0]  ;;  %v11455_v60 = vor.u32 %v14408_v50, %v11452_v27  ;;  %v11295_v50 = vor.u32 %v14368_v29, %v11292_v38  ;;  %v14364_v27 = vld [vmem:[#allocation14 + $0x804] sm:$0xf]  ;;  %v11634_v29 = vld [vmem:[#allocation14 + $0xac8] sm:$0xf] }
 0x654   :  { %4437 = vmatmul.bf16.vlgmr.msra.gmra.mxu0 %v16432_v55  ;;  %v3417_v31 = vpop.f32.mrf.mxu2  ;;  %v14455_v38 = vld [vmem:[#allocation14 + $0xad4] sm:$0xf0] }
 0x655   :  { %4503 = vmatpush.bf16.msrb.mxu1 %v11711_v6  ;;  %v14404_v6 = vld [vmem:[#allocation14 + $0x944] sm:$0xf]  ;;  %v3418_v10 = vadd.f32 %v3417_v31, %v16373_v11  ;;  %v11522_v31 = vld [vmem:[#allocation14 + $0x9e8] sm:$0xf] }
 0x656   :  { %4458 = vmatpush.bf16.msrb.mxu2 %v11375_v59  ;;  %4472 = vmatpush.bf16.msra.mxu3 %v11503_v0  ;;  %v11583_v59 = vor.u32 %v14440_v51, %v11580_v52  ;;  %v11663_v0 = vor.u32 %v14460_v56, %v11660_v53  ;;  %v3431_v17 = vpop.f32.mrf.mxu3  ;;  %v11276_v51 = vld [vmem:[#allocation14 + $0x810] sm:$0xf0]  ;;  %v11423_v52 = vor.u32 %v14400_v25, %v11420_v40  ;;  %v14396_v53 = vld [vmem:[#allocation14 + $0x904] sm:$0xf]  ;;  %v11714_v25 = vld [vmem:[#allocation14 + $0xb68] sm:$0xf] }
 0x657   :  { %4486 = vmatpush.bf16.msrb.mxu0 %v11631_v44  ;;  %v11308_v44 = vld [vmem:[#allocation14 + $0x850] sm:$0xf0]  ;;  %v3432_v18 = vadd.f32 %v3431_v17, %v3418_v10  ;;  %v14459_v10 = vld [vmem:[#allocation14 + $0xaf4] sm:$0xf0]  ;;  %v11407_v49 = vor.u32 %v14396_v53, %v11404_v57 }
 0x658   :  { %v11311_v36 = vor.u32 %v14372_v4, %v11308_v44  ;;  %v14427_v4 = vld [vmem:[#allocation14 + $0x9f4] sm:$0xf0]  ;;  %v11650_v44 = vld [vmem:[#allocation14 + $0xae8] sm:$0xf] }
 0x659   :  { %4504 = vmatpush.bf16.msrb.mxu1 %v11695_v20  ;;  %v11439_v20 = vor.u32 %v14404_v6, %v11436_v16  ;;  %v11279_v6 = vor.u32 %v14364_v27, %v11276_v51  ;;  %v14479_v16 = vld [vmem:[#allocation14 + $0xb94] sm:$0xf0]  ;;  %v11618_v27 = vld [vmem:[#allocation14 + $0xaa8] sm:$0xf] }
 0x65a   :  { %4459 = vmatpush.bf16.msrb.mxu2 %v11359_v45  ;;  %4473 = vmatpush.bf16.msra.mxu3 %v11487_v12  ;;  %v11762_v45 = vld [vmem:[#allocation14 + $0xbc8] sm:$0xf]  ;;  %v14487_v12 = vld [vmem:[#allocation14 + $0xbd4] sm:$0xf0] }
 0x65b   :  { %4487 = vmatpush.bf16.msrb.mxu0 %v11615_v9  ;;  %v3445_v9 = vpop.f32.mrf.mxu0  ;;  %v11763_v26 = vor.u32 %v14487_v12, %v11762_v45  ;;  %v11523_v45 = vor.u32 %v14427_v4, %v11522_v31  ;;  %v11378_v12 = vld [vmem:[#allocation14 + $0x8c8] sm:$0xf]  ;;  %v14451_v51 = vld [vmem:[#allocation14 + $0xab4] sm:$0xf0] }
 0x65c   :  { %v3446_v11 = vadd.f32 %v3445_v9, %v3432_v18  ;;  %v14391_v18 = vld [vmem:[#allocation14 + $0x8d4] sm:$0xf0]  ;;  %v11474_v31 = vld [vmem:[#allocation14 + $0x988] sm:$0xf] }
 0x65d   :  { %4505 = vmatpush.bf16.msrb.mxu1 %v11679_v47  ;;  %v14415_v4 = vld [vmem:[#allocation14 + $0x994] sm:$0xf0] }
 0x65e   :  { %4460 = vmatpush.bf16.msrb.mxu2 %v11343_v37  ;;  %4474 = vmatpush.bf16.msra.mxu3 %v11471_v42  ;;  %v14432_v37 = vld [vmem:[#allocation14 + $0xa24] sm:$0xf]  ;;  %v11548_v42 = vld [vmem:[#allocation14 + $0xa30] sm:$0xf0]  ;;  %v16446_v47 = vadd.f32 %v3459_v28, %v3446_v11  ;;  %v14475_v11 = vld [vmem:[#allocation14 + $0xb74] sm:$0xf0]  ;;  %v11635_v28 = vor.u32 %v14455_v38, %v11634_v29 }
 0x65f   :  { %4488 = vmatpush.bf16.msrb.mxu0 %v11599_v35  ;;  %v14483_v35 = vld [vmem:[#allocation14 + $0xbb4] sm:$0xf0]  ;;  %v11551_v56 = vor.u32 %v14432_v37, %v11548_v42  ;;  %v11362_v37 = vld [vmem:[#allocation14 + $0x8a8] sm:$0xf] }
 0x660   :  { %v14387_v42 = vld [vmem:[#allocation14 + $0x8b4] sm:$0xf0]  ;;  %v11666_v38 = vld [vmem:[#allocation14 + $0xb08] sm:$0xf] }
 0x661   :  { %4506 = vmatpush.bf16.msrb.mxu1 %v11663_v0  ;;  %v14395_v0 = vld [vmem:[#allocation14 + $0x8f4] sm:$0xf0]  ;;  %v11363_v53 = vor.u32 %v14387_v42, %v11362_v37 }
 0x662   :  { %4461 = vmatpush.bf16.msrb.mxu2 %v11327_v58  ;;  %4475 = vmatpush.bf16.msra.mxu3 %v11455_v60  ;;  %v11747_v58 = vor.u32 %v14483_v35, %v11746_v43  ;;  %v11532_v60 = vld [vmem:[#allocation14 + $0xa10] sm:$0xf0]  ;;  %v11715_v43 = vor.u32 %v14475_v11, %v11714_v25  ;;  %v11490_v35 = vld [vmem:[#allocation14 + $0x9a8] sm:$0xf]  ;;  %v14443_v29 = vld [vmem:[#allocation14 + $0xa74] sm:$0xf0]  ;;  %v16458_v11 = vpop.f32.mrf.mxu1 }
 0x663   :  { %4489 = vmatpush.bf16.msrb.mxu0 %v11583_v59  ;;  %v11394_v59 = vld [vmem:[#allocation14 + $0x8e8] sm:$0xf]  ;;  %v11535_v7 = vor.u32 %v14428_v63, %v11532_v60  ;;  %v16452_v60 = vpop.f32.mrf.mxu2  ;;  %v14463_v25 = vld [vmem:[#allocation14 + $0xb14] sm:$0xf0] }
 0x664   :  { %4507 = vmatmul.bf16.vlgmr.msrb.gmra.mxu1 %v16417_v3  ;;  %v11395_v17 = vor.u32 %v14395_v0, %v11394_v59  ;;  %v11346_v63 = vld [vmem:[#allocation14 + $0x888] sm:$0xf]  ;;  %v11619_v59 = vor.u32 %v14451_v51, %v11618_v27  ;;  %v14375_v27 = vld [vmem:[#allocation14 + $0x854] sm:$0xf0] }
 0x665   :  { %4555 = vmatpush.bf16.msra.mxu1 %v11779_v15  ;;  %v11730_v15 = vld [vmem:[#allocation14 + $0xb88] sm:$0xf] }
 0x666   :  { %4462 = vmatpush.bf16.msrb.mxu2 %v11311_v36  ;;  %4476 = vmatpush.bf16.msra.mxu3 %v11439_v20  ;;  %v11651_v36 = vor.u32 %v14459_v10, %v11650_v44  ;;  %v11731_v9 = vor.u32 %v14479_v16, %v11730_v15  ;;  %v11506_v20 = vld [vmem:[#allocation14 + $0x9c8] sm:$0xf]  ;;  %v14467_v15 = vld [vmem:[#allocation14 + $0xb34] sm:$0xf0]  ;;  %v16454_v16 = vpop.f32.mrf.mxu3 }
 0x667   :  { %4490 = vmatpush.bf16.msrb.mxu0 %v11567_v21  ;;  %v14423_v21 = vld [vmem:[#allocation14 + $0x9d4] sm:$0xf0]  ;;  %v11602_v44 = vld [vmem:[#allocation14 + $0xa88] sm:$0xf] }
 0x668   :  { %v11507_v40 = vor.u32 %v14423_v21, %v11506_v20  ;;  %v11682_v10 = vld [vmem:[#allocation14 + $0xb28] sm:$0xf]  ;;  %v14411_v20 = vld [vmem:[#allocation14 + $0x974] sm:$0xf0] }
 0x669   :  { %4556 = vmatpush.bf16.msra.mxu1 %v11763_v26  ;;  %v11379_v26 = vor.u32 %v14391_v18, %v11378_v12  ;;  %v16456_v12 = vpop.f32.mrf.mxu0  ;;  %v11586_v21 = vld [vmem:[#allocation14 + $0xa68] sm:$0xf] }
 0x66a   :  { %4463 = vmatpush.bf16.msrb.mxu2 %v11295_v50  ;;  %4477 = vmatpush.bf16.msra.mxu3 %v11423_v52  ;;  %v14419_v50 = vld [vmem:[#allocation14 + $0x9b4] sm:$0xf0]  ;;  %v11698_v52 = vld [vmem:[#allocation14 + $0xb48] sm:$0xf] }
 0x66b   :  { %4491 = vmatpush.bf16.msrb.mxu0 %v11551_v56  ;;  %v14471_v56 = vld [vmem:[#allocation14 + $0xb54] sm:$0xf0]  ;;  %v11491_v57 = vor.u32 %v14419_v50, %v11490_v35  ;;  %v11314_v50 = vld [vmem:[#allocation14 + $0x848] sm:$0xf] }
 0x66c   :  { %v11699_v0 = vor.u32 %v14471_v56, %v11698_v52  ;;  %v11442_v51 = vld [vmem:[#allocation14 + $0x948] sm:$0xf] }
 0x66d   :  { %4557 = vmatpush.bf16.msra.mxu1 %v11747_v58  ;;  %v14383_v58 = vld [vmem:[#allocation14 + $0x894] sm:$0xf0] }
 0x66e   :  { %4464 = vmatpush.bf16.msrb.mxu2 %v11279_v6  ;;  %4478 = vmatpush.bf16.msra.mxu3 %v11407_v49  ;;  %v14447_v6 = vld [vmem:[#allocation14 + $0xa94] sm:$0xf0]  ;;  %v11347_v49 = vor.u32 %v14383_v58, %v11346_v63 }
 0x66f   :  { %4492 = vmatpush.bf16.msrb.mxu0 %v11535_v7  ;;  %v11475_v7 = vor.u32 %v14415_v4, %v11474_v31  ;;  %v11603_v18 = vor.u32 %v14447_v6, %v11602_v44  ;;  %v14439_v63 = vld [vmem:[#allocation14 + $0xa54] sm:$0xf0]  ;;  %v11315_v4 = vor.u32 %v14375_v27, %v11314_v50  ;;  %v14393_v27 = vld [vmem:[#allocation14 + $0x8ec] sm:$0xf] }
 0x670   :  { %v14431_v50 = vld [vmem:[#allocation14 + $0xa14] sm:$0xf0] }
 0x671   :  { %4558 = vmatpush.bf16.msra.mxu1 %v11731_v9  ;;  %4465 = vmatmul.bf16.vlgmr.msrb.gmra.mxu2 %v16424_v1  ;;  %v11458_v9 = vld [vmem:[#allocation14 + $0x968] sm:$0xf]  ;;  %v3501_v44 = vpop.f32.mrf.mxu0 }
 0x672   :  { %4513 = vmatpush.bf16.msra.mxu2 %v11395_v17  ;;  %4527 = vmatpush.bf16.msrb.mxu3 %v11523_v45  ;;  %v11330_v17 = vld [vmem:[#allocation14 + $0x868] sm:$0xf]  ;;  %v14379_v45 = vld [vmem:[#allocation14 + $0x874] sm:$0xf0]  ;;  %v11459_v42 = vor.u32 %v14411_v20, %v11458_v9  ;;  %v3515_v9 = vpop.f32.mrf.mxu1  ;;  %v14481_v20 = vld [vmem:[#allocation14 + $0xbac] sm:$0xf] }
 0x673   :  { %4541 = vmatpush.bf16.msra.mxu0 %v11651_v36  ;;  %4479 = vmatmul.bf16.vlgmr.msra.gmra.mxu3 %v16428_v2  ;;  %v11683_v36 = vor.u32 %v14467_v15, %v11682_v10  ;;  %v11331_v37 = vor.u32 %v14379_v45, %v11330_v17  ;;  %v11298_v15 = vld [vmem:[#allocation14 + $0x828] sm:$0xf]  ;;  %v14403_v45 = vld [vmem:[#allocation14 + $0x934] sm:$0xf0] }
 0x674   :  { %4493 = vmatmul.bf16.vlgmr.msrb.gmra.mxu0 %v16432_v55  ;;  %v3473_v35 = vpop.f32.mrf.mxu2 }
 0x675   :  { %4559 = vmatpush.bf16.msra.mxu1 %v11715_v43  ;;  %v11667_v43 = vor.u32 %v14463_v25, %v11666_v38  ;;  %v3474_v52 = vadd.f32 %v3473_v35, %v16387_v8  ;;  %v11282_v25 = vld [vmem:[#allocation14 + $0x808] sm:$0xf] }
 0x676   :  { %4514 = vmatpush.bf16.msra.mxu2 %v11379_v26  ;;  %4528 = vmatpush.bf16.msrb.mxu3 %v11507_v40  ;;  %v14489_v26 = vld [vmem:[#allocation14 + $0xbec] sm:$0xf]  ;;  %v11780_v40 = vld [vmem:[#allocation14 + $0xbf8] sm:$0xf0]  ;;  %v3487_v58 = vpop.f32.mrf.mxu3 }
 0x677   :  { %4542 = vmatpush.bf16.msra.mxu0 %v11635_v28  ;;  %v11587_v28 = vor.u32 %v14443_v29, %v11586_v21  ;;  %v11783_v56 = vor.u32 %v14489_v26, %v11780_v40  ;;  %v3488_v31 = vadd.f32 %v3487_v58, %v3474_v52  ;;  %v11748_v21 = vld [vmem:[#allocation14 + $0xbb8] sm:$0xf0]  ;;  %v14367_v26 = vld [vmem:[#allocation14 + $0x814] sm:$0xf0]  ;;  %v14425_v52 = vld [vmem:[#allocation14 + $0x9ec] sm:$0xf] }
 0x678   :  { %v11751_v35 = vor.u32 %v14481_v20, %v11748_v21  ;;  %v14477_v58 = vld [vmem:[#allocation14 + $0xb8c] sm:$0xf] }
 0x679   :  { %4560 = vmatpush.bf16.msra.mxu1 %v11699_v0  ;;  %v11764_v0 = vld [vmem:[#allocation14 + $0xbd8] sm:$0xf0]  ;;  %v3502_v8 = vadd.f32 %v3501_v44, %v3488_v31  ;;  %v14385_v21 = vld [vmem:[#allocation14 + $0x8ac] sm:$0xf] }
 0x67a   :  { %4515 = vmatpush.bf16.msra.mxu2 %v11363_v53  ;;  %4529 = vmatpush.bf16.msrb.mxu3 %v11491_v57  ;;  %v14407_v53 = vld [vmem:[#allocation14 + $0x954] sm:$0xf0]  ;;  %v11570_v57 = vld [vmem:[#allocation14 + $0xa48] sm:$0xf] }
 0x67b   :  { %4543 = vmatpush.bf16.msra.mxu0 %v11619_v59  ;;  %v14485_v59 = vld [vmem:[#allocation14 + $0xbcc] sm:$0xf]  ;;  %v11443_v6 = vor.u32 %v14407_v53, %v11442_v51  ;;  %v11571_v10 = vor.u32 %v14439_v63, %v11570_v57  ;;  %v16461_v29 = vadd.f32 %v3515_v9, %v3502_v8  ;;  %v11396_v51 = vld [vmem:[#allocation14 + $0x8f8] sm:$0xf0]  ;;  %v11283_v57 = vor.u32 %v14367_v26, %v11282_v25 }
 0x67c   :  { %v11767_v17 = vor.u32 %v14485_v59, %v11764_v0  ;;  %v14457_v53 = vld [vmem:[#allocation14 + $0xaec] sm:$0xf]  ;;  %v11652_v63 = vld [vmem:[#allocation14 + $0xaf8] sm:$0xf0] }
 0x67d   :  { %4561 = vmatpush.bf16.msra.mxu1 %v11683_v36  ;;  %v14435_v36 = vld [vmem:[#allocation14 + $0xa34] sm:$0xf0]  ;;  %v11732_v59 = vld [vmem:[#allocation14 + $0xb98] sm:$0xf0] }
 0x67e   :  { %4516 = vmatpush.bf16.msra.mxu2 %v11347_v49  ;;  %4530 = vmatpush.bf16.msrb.mxu3 %v11475_v7  ;;  %v14371_v49 = vld [vmem:[#allocation14 + $0x834] sm:$0xf0]  ;;  %v11426_v7 = vld [vmem:[#allocation14 + $0x928] sm:$0xf]  ;;  %v11508_v8 = vld [vmem:[#allocation14 + $0x9d8] sm:$0xf0] }
 0x67f   :  { %4544 = vmatpush.bf16.msra.mxu0 %v11603_v18  ;;  %v11554_v18 = vld [vmem:[#allocation14 + $0xa28] sm:$0xf]  ;;  %v11299_v38 = vor.u32 %v14371_v49, %v11298_v15  ;;  %v11427_v40 = vor.u32 %v14403_v45, %v11426_v7  ;;  %v11655_v15 = vor.u32 %v14457_v53, %v11652_v63  ;;  %v11735_v49 = vor.u32 %v14477_v58, %v11732_v59  ;;  %v14421_v7 = vld [vmem:[#allocation14 + $0x9cc] sm:$0xf]  ;;  %v11636_v45 = vld [vmem:[#allocation14 + $0xad8] sm:$0xf0] }
 0x680   :  { %v11511_v20 = vor.u32 %v14421_v7, %v11508_v8  ;;  %v14413_v63 = vld [vmem:[#allocation14 + $0x98c] sm:$0xf]  ;;  %v11476_v58 = vld [vmem:[#allocation14 + $0x998] sm:$0xf0]  ;;  %v16471_v7 = vpop.f32.mrf.mxu0 }
 0x681   :  { %4562 = vmatpush.bf16.msra.mxu1 %v11667_v43  ;;  %v11538_v43 = vld [vmem:[#allocation14 + $0xa08] sm:$0xf]  ;;  %v14445_v59 = vld [vmem:[#allocation14 + $0xa8c] sm:$0xf] }
 0x682   :  { %4517 = vmatpush.bf16.msra.mxu2 %v11331_v37  ;;  %4531 = vmatpush.bf16.msrb.mxu3 %v11459_v42  ;;  %v11555_v37 = vor.u32 %v14435_v36, %v11554_v18  ;;  %v11410_v42 = vld [vmem:[#allocation14 + $0x908] sm:$0xf]  ;;  %v11539_v31 = vor.u32 %v14431_v50, %v11538_v43  ;;  %v14473_v18 = vld [vmem:[#allocation14 + $0xb6c] sm:$0xf]  ;;  %v11716_v36 = vld [vmem:[#allocation14 + $0xb78] sm:$0xf0] }
 0x683   :  { %4545 = vmatpush.bf16.msra.mxu0 %v11587_v28  ;;  %v14399_v28 = vld [vmem:[#allocation14 + $0x914] sm:$0xf0]  ;;  %v11719_v26 = vor.u32 %v14473_v18, %v11716_v36  ;;  %v14469_v43 = vld [vmem:[#allocation14 + $0xb4c] sm:$0xf]  ;;  %v11460_v18 = vld [vmem:[#allocation14 + $0x978] sm:$0xf0] }
 0x684   :  { %4563 = vmatmul.bf16.vlgmr.msra.gmra.mxu1 %v16417_v3  ;;  %v11411_v0 = vor.u32 %v14399_v28, %v11410_v42  ;;  %v14449_v42 = vld [vmem:[#allocation14 + $0xaac] sm:$0xf]  ;;  %v11620_v28 = vld [vmem:[#allocation14 + $0xab8] sm:$0xf0] }
 0x685   :  { %4611 = vmatpush.bf16.msrb.mxu1 %v11783_v56  ;;  %v11524_v56 = vld [vmem:[#allocation14 + $0x9f8] sm:$0xf0]  ;;  %v11623_v53 = vor.u32 %v14449_v42, %v11620_v28  ;;  %v14441_v36 = vld [vmem:[#allocation14 + $0xa6c] sm:$0xf] }
 0x686   :  { %4518 = vmatpush.bf16.msra.mxu2 %v11315_v4  ;;  %4532 = vmatpush.bf16.msrb.mxu3 %v11443_v6  ;;  %v11399_v4 = vor.u32 %v14393_v27, %v11396_v51  ;;  %v11527_v44 = vor.u32 %v14425_v52, %v11524_v56  ;;  %v14389_v6 = vld [vmem:[#allocation14 + $0x8cc] sm:$0xf]  ;;  %v11348_v52 = vld [vmem:[#allocation14 + $0x898] sm:$0xf0]  ;;  %v16467_v56 = vpop.f32.mrf.mxu2 }
 0x687   :  { %4546 = vmatpush.bf16.msra.mxu0 %v11571_v10  ;;  %v11380_v10 = vld [vmem:[#allocation14 + $0x8d8] sm:$0xf0]  ;;  %v14381_v51 = vld [vmem:[#allocation14 + $0x88c] sm:$0xf] }
 0x688   :  { %v11383_v9 = vor.u32 %v14389_v6, %v11380_v10  ;;  %v11351_v6 = vor.u32 %v14381_v51, %v11348_v52  ;;  %v11479_v10 = vor.u32 %v14413_v63, %v11476_v58  ;;  %v14373_v28 = vld [vmem:[#allocation14 + $0x84c] sm:$0xf]  ;;  %v11572_v52 = vld [vmem:[#allocation14 + $0xa58] sm:$0xf0] }
 0x689   :  { %4612 = vmatpush.bf16.msrb.mxu1 %v11767_v17  ;;  %v14453_v17 = vld [vmem:[#allocation14 + $0xacc] sm:$0xf] }
 0x68a   :  { %4519 = vmatpush.bf16.msra.mxu2 %v11299_v38  ;;  %4533 = vmatpush.bf16.msrb.mxu3 %v11427_v40  ;;  %v11364_v38 = vld [vmem:[#allocation14 + $0x8b8] sm:$0xf0]  ;;  %v11639_v25 = vor.u32 %v14453_v17, %v11636_v45  ;;  %v14417_v40 = vld [vmem:[#allocation14 + $0x9ac] sm:$0xf] }
 0x68b   :  { %4547 = vmatpush.bf16.msra.mxu0 %v11555_v37  ;;  %v11492_v37 = vld [vmem:[#allocation14 + $0x9b8] sm:$0xf0]  ;;  %v11367_v50 = vor.u32 %v14385_v21, %v11364_v38  ;;  %v14409_v45 = vld [vmem:[#allocation14 + $0x96c] sm:$0xf]  ;;  %v16473_v38 = vpop.f32.mrf.mxu1 }
 0x68c   :  { %v11495_v27 = vor.u32 %v14417_v40, %v11492_v37  ;;  %v11668_v21 = vld [vmem:[#allocation14 + $0xb18] sm:$0xf0]  ;;  %v14437_v51 = vld [vmem:[#allocation14 + $0xa4c] sm:$0xf] }
 0x68d   :  { %4613 = vmatpush.bf16.msrb.mxu1 %v11751_v35  ;;  %v11700_v35 = vld [vmem:[#allocation14 + $0xb58] sm:$0xf0] }
 0x68e   :  { %4520 = vmatpush.bf16.msra.mxu2 %v11283_v57  ;;  %4534 = vmatpush.bf16.msrb.mxu3 %v11411_v0  ;;  %v11703_v57 = vor.u32 %v14469_v43, %v11700_v35  ;;  %v11604_v0 = vld [vmem:[#allocation14 + $0xa98] sm:$0xf0]  ;;  %v14405_v35 = vld [vmem:[#allocation14 + $0x94c] sm:$0xf] }
 0x68f   :  { %4548 = vmatpush.bf16.msra.mxu0 %v11539_v31  ;;  %v14465_v31 = vld [vmem:[#allocation14 + $0xb2c] sm:$0xf]  ;;  %v11607_v8 = vor.u32 %v14445_v59, %v11604_v0  ;;  %v11316_v43 = vld [vmem:[#allocation14 + $0x858] sm:$0xf0]  ;;  %v11575_v0 = vor.u32 %v14437_v51, %v11572_v52 }
 0x690   :  { %v11319_v63 = vor.u32 %v14373_v28, %v11316_v43 }
 0x691   :  { %4614 = vmatpush.bf16.msrb.mxu1 %v11735_v49  ;;  %4521 = vmatmul.bf16.vlgmr.msra.gmra.mxu2 %v16424_v1  ;;  %v11332_v49 = vld [vmem:[#allocation14 + $0x878] sm:$0xf0]  ;;  %v3557_v58 = vpop.f32.mrf.mxu0 }
 0x692   :  { %4569 = vmatpush.bf16.msrb.mxu2 %v11399_v4  ;;  %4583 = vmatpush.bf16.msra.mxu3 %v11527_v44  ;;  %v11684_v4 = vld [vmem:[#allocation14 + $0xb38] sm:$0xf0]  ;;  %v16469_v44 = vpop.f32.mrf.mxu3 }
 0x693   :  { %4597 = vmatpush.bf16.msrb.mxu0 %v11655_v15  ;;  %4535 = vmatmul.bf16.vlgmr.msrb.gmra.mxu3 %v16428_v2  ;;  %v14377_v15 = vld [vmem:[#allocation14 + $0x86c] sm:$0xf]  ;;  %v11687_v17 = vor.u32 %v14465_v31, %v11684_v4  ;;  %v11300_v4 = vld [vmem:[#allocation14 + $0x838] sm:$0xf0] }
 0x694   :  { %4549 = vmatmul.bf16.vlgmr.msra.gmra.mxu0 %v16432_v55  ;;  %v3529_v42 = vpop.f32.mrf.mxu2  ;;  %v14369_v31 = vld [vmem:[#allocation14 + $0x82c] sm:$0xf] }
 0x695   :  { %4615 = vmatpush.bf16.msrb.mxu1 %v11719_v26  ;;  %v11463_v26 = vor.u32 %v14409_v45, %v11460_v18  ;;  %v11303_v45 = vor.u32 %v14369_v31, %v11300_v4 }
 0x696   :  { %4570 = vmatpush.bf16.msrb.mxu2 %v11383_v9  ;;  %4584 = vmatpush.bf16.msra.mxu3 %v11511_v20  ;;  %v11588_v9 = vld [vmem:[#allocation14 + $0xa78] sm:$0xf0]  ;;  %v14461_v20 = vld [vmem:[#allocation14 + $0xb0c] sm:$0xf] }
 0x697   :  { %4598 = vmatpush.bf16.msrb.mxu0 %v11639_v25  ;;  %v11335_v25 = vor.u32 %v14377_v15, %v11332_v49  ;;  %v11591_v40 = vor.u32 %v14441_v36, %v11588_v9  ;;  %v11671_v37 = vor.u32 %v14461_v20, %v11668_v21  ;;  %v11428_v15 = vld [vmem:[#allocation14 + $0x938] sm:$0xf0]  ;;  %v14433_v49 = vld [vmem:[#allocation14 + $0xa2c] sm:$0xf] }
 0x698   :  { %v14365_v9 = vld [vmem:[#allocation14 + $0x80c] sm:$0xf]  ;;  %v11284_v20 = vld [vmem:[#allocation14 + $0x818] sm:$0xf0] }
 0x699   :  { %4616 = vmatpush.bf16.msrb.mxu1 %v11703_v57  ;;  %v14397_v21 = vld [vmem:[#allocation14 + $0x90c] sm:$0xf] }
 0x69a   :  { %4571 = vmatpush.bf16.msrb.mxu2 %v11367_v50  ;;  %4585 = vmatpush.bf16.msra.mxu3 %v11495_v27  ;;  %v3530_v50 = vadd.f32 %v3529_v42, %v16401_v32  ;;  %v11444_v27 = vld [vmem:[#allocation14 + $0x958] sm:$0xf0] }
 0x69b   :  { %4599 = vmatpush.bf16.msrb.mxu0 %v11623_v53  ;;  %v3543_v53 = vpop.f32.mrf.mxu3  ;;  %v11447_v59 = vor.u32 %v14405_v35, %v11444_v27  ;;  %v11556_v32 = vld [vmem:[#allocation14 + $0xa38] sm:$0xf0]  ;;  %v16486_v35 = vpop.f32.mrf.mxu0 }
 0x69c   :  { %v3544_v57 = vadd.f32 %v3543_v53, %v3530_v50  ;;  %v11559_v36 = vor.u32 %v14433_v49, %v11556_v32 }
 0x69d   :  { %4617 = vmatpush.bf16.msrb.mxu1 %v11687_v17 }
 0x69e   :  { %4572 = vmatpush.bf16.msrb.mxu2 %v11351_v6  ;;  %4586 = vmatpush.bf16.msra.mxu3 %v11479_v10  ;;  %v14401_v6 = vld [vmem:[#allocation14 + $0x92c] sm:$0xf]  ;;  %v3558_v10 = vadd.f32 %v3557_v58, %v3544_v57 }
 0x69f   :  { %4600 = vmatpush.bf16.msrb.mxu0 %v11607_v8  ;;  %v3571_v8 = vpop.f32.mrf.mxu1  ;;  %v11431_v18 = vor.u32 %v14401_v6, %v11428_v15 }
 0x6a0   :  { %v16476_v17 = vadd.f32 %v3571_v8, %v3558_v10 }
 0x6a1   :  { %4618 = vmatpush.bf16.msrb.mxu1 %v11671_v37  ;;  %v11287_v37 = vor.u32 %v14365_v9, %v11284_v20 }
 0x6a2   :  { %4573 = vmatpush.bf16.msrb.mxu2 %v11335_v25  ;;  %4587 = vmatpush.bf16.msra.mxu3 %v11463_v26  ;;  %v11412_v25 = vld [vmem:[#allocation14 + $0x918] sm:$0xf0]  ;;  %v14429_v26 = vld [vmem:[#allocation14 + $0xa0c] sm:$0xf] }
 0x6a3   :  { %4601 = vmatpush.bf16.msrb.mxu0 %v11591_v40  ;;  %v11540_v40 = vld [vmem:[#allocation14 + $0xa18] sm:$0xf0]  ;;  %v11415_v42 = vor.u32 %v14397_v21, %v11412_v25  ;;  %v16484_v43 = vpop.f32.mrf.mxu3 }
 0x6a4   :  { %4619 = vmatmul.bf16.vlgmr.msrb.gmra.mxu1 %v16417_v3  ;;  %v11543_v28 = vor.u32 %v14429_v26, %v11540_v40  ;;  %v16482_v3 = vpop.f32.mrf.mxu2 }
 0x6a6   :  { %4574 = vmatpush.bf16.msrb.mxu2 %v11319_v63  ;;  %4588 = vmatpush.bf16.msra.mxu3 %v11447_v59 }
 0x6a7   :  { %4602 = vmatpush.bf16.msrb.mxu0 %v11575_v0  ;;  %v16488_v50 = vpop.f32.mrf.mxu1 }
 0x6aa   :  { %4575 = vmatpush.bf16.msrb.mxu2 %v11303_v45  ;;  %4589 = vmatpush.bf16.msra.mxu3 %v11431_v18  ;;  %v16507_v18 = vld [vmem:[#allocation15] sm:$0xf] }
 0x6ab   :  { %4603 = vmatpush.bf16.msrb.mxu0 %v11559_v36  ;;  %v4635_v25 = vperm.slane %v16507_v18, 0 }
 0x6ae   :  { %4576 = vmatpush.bf16.msrb.mxu2 %v11287_v37  ;;  %4590 = vmatpush.bf16.msra.mxu3 %v11415_v42 }
 0x6af   :  { %4604 = vmatpush.bf16.msrb.mxu0 %v11543_v28 }
 0x6b1   :  { %4577 = vmatmul.bf16.vlgmr.msrb.gmra.mxu2 %v16424_v1  ;;  %4591 = vmatmul.bf16.vlgmr.msra.gmra.mxu3 %v16428_v2  ;;  %v3613_v57 = vpop.f32.mrf.mxu0  ;;  %v3627_v1 = vpop.f32.mrf.mxu1  ;;  %v2570_v2 = vadd.f32 %v16381_v14, %v16379_v13 }
 0x6b2   :  { %4605 = vmatmul.bf16.vlgmr.msrb.gmra.mxu0 %v16432_v55 }
 0x6b4   :  { %v3585_v27 = vpop.f32.mrf.mxu2 }
 0x6b5   :  { %v3586_v51 = vadd.f32 %v3585_v27, %v16419_v5  ;;  %v2584_v5 = vadd.f32 %v16383_v22, %v2570_v2 }
 0x6b6   :  { %v3599_v52 = vpop.f32.mrf.mxu3 }
 0x6b7   :  { %v3600_v53 = vadd.f32 %v3599_v52, %v3586_v51  ;;  %v2598_v4 = vadd.f32 %v16385_v30, %v2584_v5  ;;  %v2626_v52 = vadd.f32 %v16395_v39, %v16393_v24 }
 0x6b9   :  { %v3614_v63 = vadd.f32 %v3613_v57, %v3600_v53  ;;  %v16495_v55 = vpop.f32.mrf.mxu0  ;;  %v16501_v31 = vpop.f32.mrf.mxu1  ;;  %v3420_v49 = vadd.f32 %v16452_v60, %v2598_v4  ;;  %v16515_v53 = vld [vmem:[#allocation17] sm:$0xf] }
 0x6bb   :  { %v16491_v58 = vadd.f32 %v3627_v1, %v3614_v63  ;;  %v3434_v14 = vadd.f32 %v16454_v16, %v3420_v49 }
 0x6bc   :  { %v16497_v59 = vpop.f32.mrf.mxu2 }
 0x6bd   :  { %v3448_v20 = vadd.f32 %v16456_v12, %v3434_v14  ;;  %v16526_v14 = vld [vmem:[#allocation17 + $0x4] sm:$0xf] }
 0x6be   :  { %v16499_v0 = vpop.f32.mrf.mxu3 }
 0x6bf   :  { %v3462_v40 = vadd.f32 %v16458_v11, %v3448_v20 }
 0x6c1   :  { %v4452_v8 = vpop.f32.mrf.mxu1 }
 0x6c9   :  { %v4454_v60 = vpop.f32.mrf.mxu1 }
 0x6d1   :  { %v4438_v6 = vpop.f32.mrf.mxu0 }
 0x6d4   :  { %v4410_v10 = vpop.f32.mrf.mxu2 }
 0x6d6   :  { %v4424_v15 = vpop.f32.mrf.mxu3 }
 0x6d7   :  { %v4425_v32 = vadd.f32 %v4424_v15, %v4410_v10 }
 0x6d9   :  { %v4439_v13 = vadd.f32 %v4438_v6, %v4425_v32  ;;  %v4440_v21 = vpop.f32.mrf.mxu0 }
 0x6db   :  { %v4453_v45 = vadd.f32 %v4452_v8, %v4439_v13 }
 0x6dc   :  { %v4412_v36 = vpop.f32.mrf.mxu2 }
 0x6dd   :  { %v4625_v30 = vadd.f32 %v4453_v45, %v16446_v47  ;;  %v2640_v47 = vadd.f32 %v16397_v34, %v2626_v52 }
 0x6de   :  { %v4426_v9 = vpop.f32.mrf.mxu3 }
 0x6df   :  { %v4427_v22 = vadd.f32 %v4426_v9, %v4412_v36  ;;  %v4643_v42 = vadd.f32 %v4635_v25, %v4625_v30  ;;  %v2654_v11 = vadd.f32 %v16399_v48, %v2640_v47  ;;  %v4636_v48 = vperm.slane %v16507_v18, 1 }
 0x6e1   :  { %v4441_v26 = vadd.f32 %v4440_v21, %v4427_v22  ;;  %v4651_v27 = vmax.f32 %v4643_v42, 0.0  ;;  %v3476_v2 = vadd.f32 %v16467_v56, %v2654_v11  ;;  %v4508_v4 = vpop.f32.mrf.mxu1 }
 0x6e3   :  { %v4455_v37 = vadd.f32 %v4454_v60, %v4441_v26  ;;  %v3490_v39 = vadd.f32 %v16469_v44, %v3476_v2 }
 0x6e5   :  { %v4629_v16 = vadd.f32 %v4455_v37, %v3462_v40  ;;  %v3504_v34 = vadd.f32 %v16471_v7, %v3490_v39 }
 0x6e7   :  { %v4647_v28 = vadd.f32 %v4635_v25, %v4629_v16  ;;  %v3518_v44 = vadd.f32 %v16473_v38, %v3504_v34 }
 0x6e9   :  { %v4655_v51 = vmax.f32 %v4647_v28, 0.0  ;;  %v4510_v56 = vpop.f32.mrf.mxu1 }
 0x6eb   :  { %v4659_v12 = vpack.c.bf16 %v4655_v51, %v4651_v27 }
 0x6ed   :  { %4674 = vmatpush.bf16.msra.mxu2 %v4659_v12 }
 0x6f0   :  { %11784 = vmatmul.msk.bf16.vlgmr.msra.gmra.mxu2 %vm1512_vm4, %v16515_v53 }
 0x6f1   :  { %4731 = vmatpush.bf16.msrb.mxu2 %v4659_v12  ;;  %v4494_v57 = vpop.f32.mrf.mxu0 }
 0x6f4   :  { %v4466_v63 = vpop.f32.mrf.mxu2 }
 0x6f6   :  { %v4480_v1 = vpop.f32.mrf.mxu3 }
 0x6f7   :  { %v4481_v5 = vadd.f32 %v4480_v1, %v4466_v63 }
 0x6f9   :  { %v4495_v24 = vadd.f32 %v4494_v57, %v4481_v5  ;;  %v4496_v32 = vpop.f32.mrf.mxu0 }
 0x6fb   :  { %v4509_v6 = vadd.f32 %v4508_v4, %v4495_v24 }
 0x6fc   :  { %v4468_v10 = vpop.f32.mrf.mxu2 }
 0x6fd   :  { %v4626_v8 = vadd.f32 %v4509_v6, %v16461_v29  ;;  %v2682_v29 = vadd.f32 %v16409_v62, %v16407_v61 }
 0x6fe   :  { %v4482_v15 = vpop.f32.mrf.mxu3 }
 0x6ff   :  { %v4483_v49 = vadd.f32 %v4482_v15, %v4468_v10  ;;  %v4644_v36 = vadd.f32 %v4636_v48, %v4626_v8  ;;  %v2696_v30 = vadd.f32 %v16411_v33, %v2682_v29 }
 0x700   :  { %11788 = vmatmul.msk.bf16.vlgmr.msrb.gmra.mxu2 %vm1512_vm4, %v16526_v14 }
 0x701   :  { %v4497_v13 = vadd.f32 %v4496_v32, %v4483_v49  ;;  %v4652_v7 = vmax.f32 %v4644_v36, 0.0  ;;  %v2710_v25 = vadd.f32 %v16413_v23, %v2696_v30  ;;  %v4564_v42 = vpop.f32.mrf.mxu1  ;;  %v4637_v23 = vperm.slane %v16507_v18, 2 }
 0x703   :  { %v4511_v45 = vadd.f32 %v4510_v56, %v4497_v13  ;;  %v3532_v40 = vadd.f32 %v16482_v3, %v2710_v25 }
 0x705   :  { %v4630_v9 = vadd.f32 %v4511_v45, %v3518_v44  ;;  %v3546_v61 = vadd.f32 %v16484_v43, %v3532_v40 }
 0x707   :  { %v4648_v20 = vadd.f32 %v4636_v48, %v4630_v9  ;;  %v3560_v33 = vadd.f32 %v16486_v35, %v3546_v61  ;;  %v2738_v35 = vadd.f32 %v16439_v41, %v16437_v19 }
 0x709   :  { %v4656_v22 = vmax.f32 %v4648_v20, 0.0  ;;  %v4566_v11 = vpop.f32.mrf.mxu1  ;;  %v3574_v3 = vadd.f32 %v16488_v50, %v3560_v33 }
 0x70b   :  { %v4660_v21 = vpack.c.bf16 %v4656_v22, %v4652_v7 }
 0x70d   :  { %4687 = vmatpush.bf16.msrb.mxu3 %v4660_v21 }
 0x710   :  { %11785 = vmatmul.msk.bf16.vlgmr.msrb.gmra.mxu3 %vm1512_vm4, %v16515_v53 }
 0x711   :  { %4744 = vmatpush.bf16.msra.mxu3 %v4660_v21  ;;  %v4550_v38 = vpop.f32.mrf.mxu0 }
 0x714   :  { %v4522_v26 = vpop.f32.mrf.mxu2 }
 0x716   :  { %v4536_v60 = vpop.f32.mrf.mxu3 }
 0x717   :  { %v4537_v37 = vadd.f32 %v4536_v60, %v4522_v26 }
 0x719   :  { %v4551_v16 = vadd.f32 %v4550_v38, %v4537_v37  ;;  %v4552_v52 = vpop.f32.mrf.mxu0 }
 0x71b   :  { %v4565_v62 = vadd.f32 %v4564_v42, %v4551_v16 }
 0x71c   :  { %v4524_v28 = vpop.f32.mrf.mxu2 }
 0x71d   :  { %v4627_v12 = vadd.f32 %v4565_v62, %v16476_v17  ;;  %v2752_v17 = vadd.f32 %v16441_v46, %v2738_v35 }
 0x71e   :  { %v4538_v27 = vpop.f32.mrf.mxu3 }
 0x71f   :  { %v4539_v51 = vadd.f32 %v4538_v27, %v4524_v28  ;;  %v4645_v43 = vadd.f32 %v4637_v23, %v4627_v12  ;;  %v2766_v24 = vadd.f32 %v16443_v54, %v2752_v17  ;;  %v4638_v54 = vperm.slane %v16507_v18, 3  ;;  %v14642_v17 = vld [vmem:[#allocation20 + $0x4ac] sm:$0xf0] }
 0x720   :  { %11789 = vmatmul.msk.bf16.vlgmr.msra.gmra.mxu3 %vm1512_vm4, %v16526_v14 }
 0x721   :  { %v4553_v47 = vadd.f32 %v4552_v52, %v4539_v51  ;;  %v4653_v2 = vmax.f32 %v4645_v43, 0.0  ;;  %v3588_v10 = vadd.f32 %v16497_v59, %v2766_v24  ;;  %v4620_v34 = vpop.f32.mrf.mxu1 }
 0x723   :  { %v4567_v57 = vadd.f32 %v4566_v11, %v4553_v47  ;;  %v3602_v19 = vadd.f32 %v16499_v0, %v3588_v10  ;;  %v11850_v10 = vld [vmem:[#allocation20 + $0x460] sm:$0xf] }
 0x725   :  { %v4631_v63 = vadd.f32 %v4567_v57, %v3574_v3  ;;  %v3616_v46 = vadd.f32 %v16495_v55, %v3602_v19  ;;  %v11914_v3 = vld [vmem:[#allocation20 + $0x4e0] sm:$0xf]  ;;  %v14650_v57 = vld [vmem:[#allocation20 + $0x4ec] sm:$0xf0] }
 0x726   :  { %v11834_v19 = vld [vmem:[#allocation20 + $0x440] sm:$0xf] }
 0x727   :  { %v4649_v1 = vadd.f32 %v4637_v23, %v4631_v63  ;;  %v3630_v59 = vadd.f32 %v16501_v31, %v3616_v46  ;;  %v16586_v63 = vld [vmem:[#allocation18] sm:$0xf]  ;;  %v14626_v46 = vld [vmem:[#allocation20 + $0x42c] sm:$0xf0] }
 0x729   :  { %v4657_v5 = vmax.f32 %v4649_v1, 0.0  ;;  %v4622_v45 = vpop.f32.mrf.mxu1  ;;  %v11915_v1 = vor.u32 %v14650_v57, %v11914_v3  ;;  %v11820_v3 = vld [vmem:[#allocation20 + $0x430] sm:$0xf0] }
 0x72b   :  { %v4661_v4 = vpack.c.bf16 %v4657_v5, %v4653_v2  ;;  %v11898_v2 = vld [vmem:[#allocation20 + $0x4c0] sm:$0xf]  ;;  %v14646_v5 = vld [vmem:[#allocation20 + $0x4cc] sm:$0xf0] }
 0x72c   :  { %v11899_v35 = vor.u32 %v14646_v5, %v11898_v2  ;;  %v14670_v2 = vld [vmem:[#allocation20 + $0x58c] sm:$0xf0]  ;;  %v14620_v5 = vld [vmem:[#allocation20 + $0x404] sm:$0xf] }
 0x72d   :  { %4700 = vmatpush.bf16.msra.mxu0 %v4661_v4 }
 0x72f   :  { %v4606_v39 = vpop.f32.mrf.mxu0 }
 0x730   :  { %11786 = vmatmul.msk.bf16.vlgmr.msra.gmra.mxu0 %vm1512_vm4, %v16515_v53 }
 0x731   :  { %4757 = vmatpush.bf16.msrb.mxu0 %v4661_v4  ;;  %v11882_v4 = vld [vmem:[#allocation20 + $0x4a0] sm:$0xf] }
 0x732   :  { %v11883_v24 = vor.u32 %v14642_v17, %v11882_v4  ;;  %v11922_v4 = vld [vmem:[#allocation20 + $0x4e8] sm:$0xf]  ;;  %v14651_v17 = vld [vmem:[#allocation20 + $0x4f4] sm:$0xf0] }
 0x734   :  { %v4578_v50 = vpop.f32.mrf.mxu2  ;;  %v4592_v6 = vpop.f32.mrf.mxu3 }
 0x735   :  { %v4593_v15 = vadd.f32 %v4592_v6, %v4578_v50  ;;  %v11866_v50 = vld [vmem:[#allocation20 + $0x480] sm:$0xf] }
 0x737   :  { %v4607_v49 = vadd.f32 %v4606_v39, %v4593_v15  ;;  %v4608_v13 = vpop.f32.mrf.mxu0  ;;  %v14638_v39 = vld [vmem:[#allocation20 + $0x48c] sm:$0xf0] }
 0x738   :  { %v11867_v6 = vor.u32 %v14638_v39, %v11866_v50  ;;  %v14634_v15 = vld [vmem:[#allocation20 + $0x46c] sm:$0xf0]  ;;  %v11978_v39 = vld [vmem:[#allocation20 + $0x560] sm:$0xf] }
 0x739   :  { %v4621_v41 = vadd.f32 %v4620_v34, %v4607_v49  ;;  %v16590_v34 = vld [vmem:[#allocation18 + $0x4] sm:$0xf]  ;;  %v11851_v49 = vor.u32 %v14634_v15, %v11850_v10  ;;  %v11923_v10 = vor.u32 %v14651_v17, %v11922_v4  ;;  %v11906_v15 = vld [vmem:[#allocation20 + $0x4c8] sm:$0xf]  ;;  %v12266_v4 = vld [vmem:[#allocation20 + $0x7a0] sm:$0xf] }
 0x73a   :  { %v14738_v17 = vld [vmem:[#allocation20 + $0x7ac] sm:$0xf0] }
 0x73b   :  { %v4628_v56 = vadd.f32 %v4621_v41, %v16491_v58  ;;  %v14630_v41 = vld [vmem:[#allocation20 + $0x44c] sm:$0xf0] }
 0x73c   :  { %v4580_v32 = vpop.f32.mrf.mxu2  ;;  %v4594_v8 = vpop.f32.mrf.mxu3 }
 0x73d   :  { %v4595_v48 = vadd.f32 %v4594_v8, %v4580_v32  ;;  %v4646_v0 = vadd.f32 %v4638_v54, %v4628_v56  ;;  %v11835_v32 = vor.u32 %v14630_v41, %v11834_v19  ;;  %v11818_v8 = vld [vmem:[#allocation20 + $0x420] sm:$0xf]  ;;  %v14622_v56 = vld [vmem:[#allocation20 + $0x40c] sm:$0xf0] }
 0x73e   :  { %v11962_v41 = vld [vmem:[#allocation20 + $0x540] sm:$0xf] }
 0x73f   :  { %v4609_v44 = vadd.f32 %v4608_v13, %v4595_v48  ;;  %v4654_v7 = vmax.f32 %v4646_v0, 0.0  ;;  %v11819_v48 = vor.u32 %v14626_v46, %v11818_v8  ;;  %v11802_v13 = vld [vmem:[#allocation20 + $0x400] sm:$0xf]  ;;  %v11900_v0 = vld [vmem:[#allocation20 + $0x4d0] sm:$0xf0] }
 0x740   :  { %11790 = vmatmul.msk.bf16.vlgmr.msrb.gmra.mxu0 %vm1512_vm4, %v16526_v14  ;;  %v11890_v46 = vld [vmem:[#allocation20 + $0x4a8] sm:$0xf] }
 0x741   :  { %v4623_v36 = vadd.f32 %v4622_v45, %v4609_v44  ;;  %v11916_v44 = vld [vmem:[#allocation20 + $0x4f0] sm:$0xf0]  ;;  %v11803_v45 = vor.u32 %v14622_v56, %v11802_v13  ;;  %v11946_v56 = vld [vmem:[#allocation20 + $0x520] sm:$0xf] }
 0x743   :  { %v4632_v9 = vadd.f32 %v4623_v36, %v3630_v59  ;;  %v14644_v36 = vld [vmem:[#allocation20 + $0x4c4] sm:$0xf] }
 0x745   :  { %v4650_v20 = vadd.f32 %v4638_v54, %v4632_v9  ;;  %v14648_v54 = vld [vmem:[#allocation20 + $0x4e4] sm:$0xf]  ;;  %v11903_v9 = vor.u32 %v14644_v36, %v11900_v0 }
 0x746   :  { %v11919_v59 = vor.u32 %v14648_v54, %v11916_v44  ;;  %v14658_v54 = vld [vmem:[#allocation20 + $0x52c] sm:$0xf0] }
 0x747   :  { %v4658_v22 = vmax.f32 %v4650_v20, 0.0  ;;  %v14640_v20 = vld [vmem:[#allocation20 + $0x4a4] sm:$0xf]  ;;  %v11947_v0 = vor.u32 %v14658_v54, %v11946_v56  ;;  %v11810_v56 = vld [vmem:[#allocation20 + $0x408] sm:$0xf] }
 0x748   :  { %v14623_v54 = vld [vmem:[#allocation20 + $0x414] sm:$0xf0] }
 0x749   :  { %v4662_v55 = vpack.c.bf16 %v4658_v22, %v4654_v7  ;;  %v11884_v7 = vld [vmem:[#allocation20 + $0x4b0] sm:$0xf0] }
 0x74b   :  { %4713 = vmatpush.bf16.msra.mxu1 %v4662_v55 }
 0x74e   :  { %11787 = vmatmul.msk.bf16.vlgmr.msra.gmra.mxu1 %vm1512_vm4, %v16515_v53 }
 0x74f   :  { %4770 = vmatpush.bf16.msrb.mxu1 %v4662_v55  ;;  %v11887_v55 = vor.u32 %v14640_v20, %v11884_v7 }
 0x75e   :  { %11791 = vmatmul.msk.bf16.vlgmr.msrb.gmra.mxu1 %vm1512_vm4, %v16526_v14 }
 0x773   :  { %v4676_v58 = vpop.f32.mrf.mxu2 }
 0x77b   :  { %v4678_v18 = vpop.f32.mrf.mxu2 }
 0x77c   :  { %v14636_v18 = vld [vmem:[#allocation20 + $0x484] sm:$0xf] }
 0x783   :  { %v4733_v29 = vpop.f32.mrf.mxu2 }
 0x784   :  { %v4776_v25 = vmax.f32 %v4676_v58, %v4733_v29  ;;  %v11868_v29 = vld [vmem:[#allocation20 + $0x490] sm:$0xf0] }
 0x78b   :  { %v4735_v21 = vpop.f32.mrf.mxu2 }
 0x793   :  { %v4689_v31 = vpop.f32.mrf.mxu3 }
 0x79b   :  { %v4691_v30 = vpop.f32.mrf.mxu3 }
 0x79c   :  { %v11871_v30 = vor.u32 %v14636_v18, %v11868_v29  ;;  %v14654_v18 = vld [vmem:[#allocation20 + $0x50c] sm:$0xf0]  ;;  %v12170_v29 = vld [vmem:[#allocation20 + $0x6e0] sm:$0xf] }
 0x7a3   :  { %v4746_v38 = vpop.f32.mrf.mxu3 }
 0x7a4   :  { %v16563_v26 = vmax.f32 %v4689_v31, %v4746_v38  ;;  %v14682_v38 = vld [vmem:[#allocation20 + $0x5ec] sm:$0xf0] }
 0x7a6   :  { %v15151_v60 = vpack.i.bf16 %v16563_v26, %v4776_v25 }
 0x7a8   :  { %15152 = vrot.lane.b32.xlu2 %v15151_v60, %s15821_s26  ;;  %v14632_v60 = vld [vmem:[#allocation20 + $0x464] sm:$0xf] }
 0x7ab   :  { %v4748_v37 = vpop.f32.mrf.mxu3 }
 0x7ad   :  { %v4702_v40 = vpop.f32.mrf.mxu0 }
 0x7b5   :  { %v4704_v53 = vpop.f32.mrf.mxu0 }
 0x7bd   :  { %v4759_v42 = vpop.f32.mrf.mxu0 }
 0x7be   :  { %v16567_v16 = vmax.f32 %v4702_v40, %v4759_v42  ;;  %v11852_v40 = vld [vmem:[#allocation20 + $0x470] sm:$0xf0] }
 0x7bf   :  { %v11855_v42 = vor.u32 %v14632_v60, %v11852_v40  ;;  %v14680_v60 = vld [vmem:[#allocation20 + $0x5e4] sm:$0xf]  ;;  %v12044_v40 = vld [vmem:[#allocation20 + $0x5f0] sm:$0xf0] }
 0x7c0   :  { %4788 = vrot.lane.b32.xlu0 %v16567_v16, %s15821_s26 }
 0x7c5   :  { %v4761_v14 = vpop.f32.mrf.mxu0 }
 0x7c6   :  { %v12026_v14 = vld [vmem:[#allocation20 + $0x5c0] sm:$0xf] }
 0x7cb   :  { %v4715_v61 = vpop.f32.mrf.mxu1 }
 0x7d3   :  { %v4717_v62 = vpop.f32.mrf.mxu1 }
 0x7d4   :  { %v14628_v62 = vld [vmem:[#allocation20 + $0x444] sm:$0xf] }
 0x7db   :  { %v4772_v28 = vpop.f32.mrf.mxu1 }
 0x7dc   :  { %v16571_v27 = vmax.f32 %v4715_v61, %v4772_v28  ;;  %v14678_v61 = vld [vmem:[#allocation20 + $0x5cc] sm:$0xf0] }
 0x7dd   :  { %v12027_v28 = vor.u32 %v14678_v61, %v12026_v14  ;;  %v12154_v61 = vld [vmem:[#allocation20 + $0x6c0] sm:$0xf] }
 0x7de   :  { %4790 = vrot.lane.b32.xlu1 %v16571_v27, %s15821_s26  ;;  %s16940_s26 = sld [smem:[#allocation64_spill]] }
 0x7e3   :  { %v4774_v33 = vpop.f32.mrf.mxu1 }
 0x802   :  { %v16575_v51 = vpop.permute.xlu2 %15152 }
 0x803   :  { %v15155_v52 = vunpack.i.h.bf16 %v16575_v51  ;;  %v15154_v12 = vunpack.i.l.bf16 %v16575_v51  ;;  %v12298_v51 = vld [vmem:[#allocation20 + $0x7e0] sm:$0xf] }
 0x805   :  { %v4792_v23 = vsel %vm514_vm0, %v15154_v12, %v15155_v52 }
 0x806   :  { %v4801_v47 = vmax.f32 %v4776_v25, %v4792_v23  ;;  %v12042_v25 = vld [vmem:[#allocation20 + $0x5e0] sm:$0xf]  ;;  %v14674_v23 = vld [vmem:[#allocation20 + $0x5ac] sm:$0xf0] }
 0x807   :  { %v12043_v53 = vor.u32 %v14682_v38, %v12042_v25  ;;  %v14746_v25 = vld [vmem:[#allocation20 + $0x7ec] sm:$0xf0] }
 0x808   :  { %v16582_v11 = vpack.c.bf16 %v4801_v47, %v4801_v47  ;;  %v14624_v47 = vld [vmem:[#allocation20 + $0x424] sm:$0xf]  ;;  %v12299_v14 = vor.u32 %v14746_v25, %v12298_v51  ;;  %v14645_v25 = vld [vmem:[#allocation20 + $0x4cc] sm:$0xf] }
 0x80a   :  { %v4816_v43 = vsel %vm4814_vm5, %v16582_v11, 0 }
 0x80b   :  { %4834 = vmatpush.bf16.msra.mxu2 %v4816_v43 }
 0x80e   :  { %11792 = vmatmul.msk.bf16.vlgmr.msra.gmra.mxu2 %vm4810_vm6, %v16586_v63 }
 0x80f   :  { %4895 = vmatpush.bf16.msrb.mxu2 %v4816_v43  ;;  %v11823_v43 = vor.u32 %v14624_v47, %v11820_v3  ;;  %v12028_v47 = vld [vmem:[#allocation20 + $0x5d0] sm:$0xf0]  ;;  %v11842_v3 = vld [vmem:[#allocation20 + $0x448] sm:$0xf] }
 0x813   :  { %5841 = vmatpush.bf16.msra.mxu2 %v11915_v1  ;;  %v11994_v1 = vld [vmem:[#allocation20 + $0x580] sm:$0xf] }
 0x817   :  { %5842 = vmatpush.bf16.msra.mxu2 %v11899_v35  ;;  %v11804_v35 = vld [vmem:[#allocation20 + $0x410] sm:$0xf0] }
 0x818   :  { %v11807_v50 = vor.u32 %v14620_v5, %v11804_v35  ;;  %v14706_v35 = vld [vmem:[#allocation20 + $0x6ac] sm:$0xf0] }
 0x81b   :  { %5843 = vmatpush.bf16.msra.mxu2 %v11883_v24  ;;  %v11995_v24 = vor.u32 %v14670_v2, %v11994_v1  ;;  %v12138_v2 = vld [vmem:[#allocation20 + $0x6a0] sm:$0xf] }
 0x81e   :  { %11796 = vmatmul.msk.bf16.vlgmr.msrb.gmra.mxu2 %vm4810_vm6, %v16590_v34 }
 0x81f   :  { %5844 = vmatpush.bf16.msra.mxu2 %v11867_v6  ;;  %v14666_v6 = vld [vmem:[#allocation20 + $0x56c] sm:$0xf0] }
 0x820   :  { %v11979_v19 = vor.u32 %v14666_v6, %v11978_v39  ;;  %v12012_v39 = vld [vmem:[#allocation20 + $0x5b0] sm:$0xf0]  ;;  %v11826_v6 = vld [vmem:[#allocation20 + $0x428] sm:$0xf] }
 0x823   :  { %5845 = vmatpush.bf16.msra.mxu2 %v11851_v49  ;;  %v14647_v49 = vld [vmem:[#allocation20 + $0x4d4] sm:$0xf0] }
 0x824   :  { %v11907_v8 = vor.u32 %v14647_v49, %v11906_v15  ;;  %v12267_v15 = vor.u32 %v14738_v17, %v12266_v4  ;;  %v12122_v49 = vld [vmem:[#allocation20 + $0x680] sm:$0xf] }
 0x827   :  { %5846 = vmatpush.bf16.msra.mxu2 %v11835_v32  ;;  %v14662_v32 = vld [vmem:[#allocation20 + $0x54c] sm:$0xf0] }
 0x828   :  { %v11963_v13 = vor.u32 %v14662_v32, %v11962_v41  ;;  %v14702_v41 = vld [vmem:[#allocation20 + $0x68c] sm:$0xf0]  ;;  %v12250_v32 = vld [vmem:[#allocation20 + $0x780] sm:$0xf] }
 0x82b   :  { %5847 = vmatpush.bf16.msra.mxu2 %v11819_v48  ;;  %v14643_v48 = vld [vmem:[#allocation20 + $0x4b4] sm:$0xf0] }
 0x82c   :  { %v11891_v44 = vor.u32 %v14643_v48, %v11890_v46  ;;  %v14668_v48 = vld [vmem:[#allocation20 + $0x584] sm:$0xf] }
 0x82f   :  { %5848 = vmatpush.bf16.msra.mxu2 %v11803_v45 }
 0x832   :  { %5849 = vmatmul.bf16.vlgmr.msra.gmra.mxu2 %v16582_v11  ;;  %v16595_v22 = vpop.permute.xlu0 %4788 }
 0x833   :  { %5893 = vmatpush.bf16.msrb.mxu2 %v11919_v59  ;;  %v4793_v58 = vsel %vm514_vm0, %v15155_v52, %v16595_v22  ;;  %v12010_v52 = vld [vmem:[#allocation20 + $0x5a0] sm:$0xf] }
 0x834   :  { %v4802_v21 = vmax.f32 %v16563_v26, %v4793_v58  ;;  %v11836_v26 = vld [vmem:[#allocation20 + $0x450] sm:$0xf0]  ;;  %v12011_v57 = vor.u32 %v14674_v23, %v12010_v52  ;;  %v11930_v58 = vld [vmem:[#allocation20 + $0x500] sm:$0xf]  ;;  %v14676_v23 = vld [vmem:[#allocation20 + $0x5c4] sm:$0xf] }
 0x835   :  { %v11839_v33 = vor.u32 %v14628_v62, %v11836_v26  ;;  %v11931_v38 = vor.u32 %v14654_v18, %v11930_v58  ;;  %v12047_v62 = vor.u32 %v14680_v60, %v12044_v40  ;;  %v14710_v26 = vld [vmem:[#allocation20 + $0x6cc] sm:$0xf0]  ;;  %v12031_v5 = vor.u32 %v14676_v23, %v12028_v47  ;;  %v14664_v18 = vld [vmem:[#allocation20 + $0x564] sm:$0xf]  ;;  %v12090_v40 = vld [vmem:[#allocation20 + $0x640] sm:$0xf] }
 0x836   :  { %v16600_v31 = vpack.c.bf16 %v4802_v21, %v4802_v21  ;;  %v14730_v58 = vld [vmem:[#allocation20 + $0x76c] sm:$0xf0]  ;;  %v12202_v47 = vld [vmem:[#allocation20 + $0x720] sm:$0xf] }
 0x837   :  { %5894 = vmatpush.bf16.msrb.mxu2 %v11903_v9  ;;  %v11874_v9 = vld [vmem:[#allocation20 + $0x488] sm:$0xf]  ;;  %v14690_v23 = vld [vmem:[#allocation20 + $0x62c] sm:$0xf0] }
 0x838   :  { %v4819_v37 = vsel %vm4814_vm5, %v16600_v31, 0 }
 0x839   :  { %4847 = vmatpush.bf16.msrb.mxu3 %v4819_v37 }
 0x83b   :  { %5895 = vmatpush.bf16.msrb.mxu2 %v11887_v55  ;;  %v14639_v55 = vld [vmem:[#allocation20 + $0x494] sm:$0xf0] }
 0x83c   :  { %11793 = vmatmul.msk.bf16.vlgmr.msrb.gmra.mxu3 %vm4810_vm6, %v16586_v63 }
 0x83d   :  { %4908 = vmatpush.bf16.msra.mxu3 %v4819_v37  ;;  %v11858_v37 = vld [vmem:[#allocation20 + $0x468] sm:$0xf] }
 0x83f   :  { %5896 = vmatpush.bf16.msrb.mxu2 %v11871_v30 }
 0x841   :  { %5854 = vmatpush.bf16.msrb.mxu3 %v12043_v53  ;;  %v14635_v53 = vld [vmem:[#allocation20 + $0x474] sm:$0xf0] }
 0x842   :  { %v11859_v52 = vor.u32 %v14635_v53, %v11858_v37  ;;  %v14726_v37 = vld [vmem:[#allocation20 + $0x74c] sm:$0xf0]  ;;  %v14660_v53 = vld [vmem:[#allocation20 + $0x544] sm:$0xf] }
 0x843   :  { %5897 = vmatpush.bf16.msrb.mxu2 %v11855_v42 }
 0x845   :  { %5855 = vmatpush.bf16.msrb.mxu3 %v12027_v28  ;;  %v12282_v28 = vld [vmem:[#allocation20 + $0x7c0] sm:$0xf] }
 0x847   :  { %5898 = vmatpush.bf16.msrb.mxu2 %v11839_v33  ;;  %v14742_v33 = vld [vmem:[#allocation20 + $0x7cc] sm:$0xf0] }
 0x848   :  { %v12283_v1 = vor.u32 %v14742_v33, %v12282_v28 }
 0x849   :  { %5856 = vmatpush.bf16.msrb.mxu3 %v12011_v57  ;;  %v14631_v57 = vld [vmem:[#allocation20 + $0x454] sm:$0xf0] }
 0x84b   :  { %5899 = vmatpush.bf16.msrb.mxu2 %v11823_v43  ;;  %v12155_v43 = vor.u32 %v14710_v26, %v12154_v61  ;;  %v11892_v26 = vld [vmem:[#allocation20 + $0x4b8] sm:$0xf0] }
 0x84c   :  { %11797 = vmatmul.msk.bf16.vlgmr.msra.gmra.mxu3 %vm4810_vm6, %v16590_v34 }
 0x84d   :  { %5857 = vmatpush.bf16.msrb.mxu3 %v11995_v24  ;;  %v11843_v24 = vor.u32 %v14631_v57, %v11842_v3  ;;  %v14722_v3 = vld [vmem:[#allocation20 + $0x72c] sm:$0xf0]  ;;  %v14656_v57 = vld [vmem:[#allocation20 + $0x524] sm:$0xf] }
 0x84e   :  { %v12203_v4 = vor.u32 %v14722_v3, %v12202_v47  ;;  %v14671_v47 = vld [vmem:[#allocation20 + $0x594] sm:$0xf0] }
 0x84f   :  { %5900 = vmatpush.bf16.msrb.mxu2 %v11807_v50  ;;  %v14672_v50 = vld [vmem:[#allocation20 + $0x5a4] sm:$0xf] }
 0x850   :  { %v4791_v45 = vpop.permute.xlu1 %4790 }
 0x851   :  { %5858 = vmatpush.bf16.msrb.mxu3 %v11979_v19  ;;  %v4794_v59 = vsel %vm514_vm0, %v16595_v22, %v4791_v45  ;;  %v4800_v36 = vsel %vm514_vm0, %v4791_v45, %v15154_v12  ;;  %v14714_v22 = vld [vmem:[#allocation20 + $0x6ec] sm:$0xf0]  ;;  %v11875_v12 = vor.u32 %v14639_v55, %v11874_v9  ;;  %v12015_v19 = vor.u32 %v14672_v50, %v12012_v39  ;;  %v12106_v9 = vld [vmem:[#allocation20 + $0x660] sm:$0xf] }
 0x852   :  { %5901 = vmatmul.bf16.vlgmr.msrb.gmra.mxu2 %v16582_v11  ;;  %v4803_v20 = vmax.f32 %v16567_v16, %v4794_v59  ;;  %v4804_v7 = vmax.f32 %v16571_v27, %v4800_v36  ;;  %v12171_v42 = vor.u32 %v14714_v22, %v12170_v29  ;;  %v14649_v59 = vld [vmem:[#allocation20 + $0x4ec] sm:$0xf]  ;;  %v11924_v36 = vld [vmem:[#allocation20 + $0x4f8] sm:$0xf0]  ;;  %v11811_v55 = vor.u32 %v14623_v54, %v11810_v56  ;;  %v11980_v29 = vld [vmem:[#allocation20 + $0x570] sm:$0xf0] }
 0x853   :  { %5945 = vmatpush.bf16.msra.mxu2 %v11923_v10  ;;  %v12139_v10 = vor.u32 %v14706_v35, %v12138_v2  ;;  %v11927_v22 = vor.u32 %v14649_v59, %v11924_v36  ;;  %v11983_v60 = vor.u32 %v14664_v18, %v11980_v29  ;;  %v14637_v2 = vld [vmem:[#allocation20 + $0x48c] sm:$0xf]  ;;  %v12058_v35 = vld [vmem:[#allocation20 + $0x600] sm:$0xf]  ;;  %v14718_v39 = vld [vmem:[#allocation20 + $0x70c] sm:$0xf0] }
 0x854   :  { %v16616_v21 = vpack.c.bf16 %v4803_v20, %v4803_v20  ;;  %v16618_v30 = vpack.c.bf16 %v4804_v7, %v4804_v7  ;;  %v14698_v20 = vld [vmem:[#allocation20 + $0x66c] sm:$0xf0]  ;;  %v12234_v7 = vld [vmem:[#allocation20 + $0x760] sm:$0xf]  ;;  %v14708_v59 = vld [vmem:[#allocation20 + $0x6c4] sm:$0xf] }
 0x855   :  { %5859 = vmatpush.bf16.msrb.mxu3 %v11963_v13  ;;  %v11996_v13 = vld [vmem:[#allocation20 + $0x590] sm:$0xf0]  ;;  %v12107_v51 = vor.u32 %v14698_v20, %v12106_v9  ;;  %v12186_v50 = vld [vmem:[#allocation20 + $0x700] sm:$0xf]  ;;  %v14740_v9 = vld [vmem:[#allocation20 + $0x7c4] sm:$0xf] }
 0x856   :  { %v4822_v16 = vsel %vm4814_vm5, %v16616_v21, 0  ;;  %v4825_v27 = vsel %vm4814_vm5, %v16618_v30, 0  ;;  %v12284_v20 = vld [vmem:[#allocation20 + $0x7d0] sm:$0xf0] }
 0x857   :  { %5946 = vmatpush.bf16.msra.mxu2 %v11907_v8  ;;  %4860 = vmatpush.bf16.msra.mxu0 %v4822_v16  ;;  %v14734_v8 = vld [vmem:[#allocation20 + $0x78c] sm:$0xf0]  ;;  %v12287_v29 = vor.u32 %v14740_v9, %v12284_v20  ;;  %v14688_v20 = vld [vmem:[#allocation20 + $0x624] sm:$0xf] }
 0x858   :  { %4873 = vmatpush.bf16.msra.mxu1 %v4825_v27  ;;  %v12251_v45 = vor.u32 %v14734_v8, %v12250_v32  ;;  %v12050_v8 = vld [vmem:[#allocation20 + $0x5e8] sm:$0xf] }
 0x859   :  { %5860 = vmatpush.bf16.msrb.mxu3 %v11947_v0  ;;  %v11999_v0 = vor.u32 %v14668_v48, %v11996_v13  ;;  %v12187_v48 = vor.u32 %v14718_v39, %v12186_v50  ;;  %v12236_v50 = vld [vmem:[#allocation20 + $0x770] sm:$0xf0]  ;;  %v11986_v39 = vld [vmem:[#allocation20 + $0x568] sm:$0xf] }
 0x85a   :  { %11794 = vmatmul.msk.bf16.vlgmr.msra.gmra.mxu0 %vm4810_vm6, %v16586_v63 }
 0x85b   :  { %5947 = vmatpush.bf16.msra.mxu2 %v11891_v44  ;;  %4921 = vmatpush.bf16.msrb.mxu0 %v4822_v16  ;;  %v12123_v44 = vor.u32 %v14702_v41, %v12122_v49  ;;  %v14694_v16 = vld [vmem:[#allocation20 + $0x64c] sm:$0xf0]  ;;  %v14744_v49 = vld [vmem:[#allocation20 + $0x7e4] sm:$0xf] }
 0x85c   :  { %4934 = vmatpush.bf16.msrb.mxu1 %v4825_v27  ;;  %v12218_v27 = vld [vmem:[#allocation20 + $0x740] sm:$0xf]  ;;  %v12091_v61 = vor.u32 %v14694_v16, %v12090_v40  ;;  %v12268_v40 = vld [vmem:[#allocation20 + $0x7b0] sm:$0xf0]  ;;  %v12018_v16 = vld [vmem:[#allocation20 + $0x5a8] sm:$0xf] }
 0x85d   :  { %5861 = vmatpush.bf16.msrb.mxu3 %v11931_v38  ;;  %11795 = vmatmul.msk.bf16.vlgmr.msra.gmra.mxu1 %vm4810_vm6, %v16586_v63  ;;  %v14627_v63 = vld [vmem:[#allocation20 + $0x434] sm:$0xf0]  ;;  %v12235_v38 = vor.u32 %v14730_v58, %v12234_v7  ;;  %v12219_v28 = vor.u32 %v14726_v37, %v12218_v27  ;;  %v12034_v7 = vld [vmem:[#allocation20 + $0x5c8] sm:$0xf] }
 0x85e   :  { %v11827_v46 = vor.u32 %v14627_v63, %v11826_v6  ;;  %v14652_v6 = vld [vmem:[#allocation20 + $0x504] sm:$0xf]  ;;  %v11932_v63 = vld [vmem:[#allocation20 + $0x510] sm:$0xf0]  ;;  %v14675_v27 = vld [vmem:[#allocation20 + $0x5b4] sm:$0xf0] }
 0x85f   :  { %5948 = vmatpush.bf16.msra.mxu2 %v11875_v12  ;;  %5867 = vmatpush.bf16.msra.mxu0 %v12171_v42  ;;  %v11908_v12 = vld [vmem:[#allocation20 + $0x4d8] sm:$0xf0]  ;;  %v11964_v42 = vld [vmem:[#allocation20 + $0x550] sm:$0xf0]  ;;  %v11935_v13 = vor.u32 %v14652_v6, %v11932_v63  ;;  %v14667_v6 = vld [vmem:[#allocation20 + $0x574] sm:$0xf0] }
 0x860   :  { %5880 = vmatpush.bf16.msra.mxu1 %v12299_v14  ;;  %5862 = vmatmul.bf16.vlgmr.msrb.gmra.mxu3 %v16600_v31  ;;  %v11911_v14 = vor.u32 %v14645_v25, %v11908_v12  ;;  %v11967_v33 = vor.u32 %v14660_v53, %v11964_v42  ;;  %v14704_v25 = vld [vmem:[#allocation20 + $0x6a4] sm:$0xf] }
 0x861   :  { %5906 = vmatpush.bf16.msra.mxu3 %v12047_v62  ;;  %v14641_v62 = vld [vmem:[#allocation20 + $0x4ac] sm:$0xf] }
 0x863   :  { %5949 = vmatpush.bf16.msra.mxu2 %v11859_v52  ;;  %5868 = vmatpush.bf16.msra.mxu0 %v12155_v43  ;;  %v12074_v52 = vld [vmem:[#allocation20 + $0x620] sm:$0xf]  ;;  %v11948_v43 = vld [vmem:[#allocation20 + $0x530] sm:$0xf0] }
 0x864   :  { %5881 = vmatpush.bf16.msra.mxu1 %v12283_v1  ;;  %v12075_v1 = vor.u32 %v14690_v23, %v12074_v52  ;;  %v11951_v17 = vor.u32 %v14656_v57, %v11948_v43  ;;  %v12252_v52 = vld [vmem:[#allocation20 + $0x790] sm:$0xf0]  ;;  %v12002_v23 = vld [vmem:[#allocation20 + $0x588] sm:$0xf]  ;;  %v14621_v57 = vld [vmem:[#allocation20 + $0x40c] sm:$0xf] }
 0x865   :  { %5907 = vmatpush.bf16.msra.mxu3 %v12031_v5  ;;  %v11876_v5 = vld [vmem:[#allocation20 + $0x498] sm:$0xf0] }
 0x866   :  { %v11879_v41 = vor.u32 %v14637_v2, %v11876_v5  ;;  %v12426_v2 = vld [vmem:[#allocation20 + $0xe0] sm:$0xf]  ;;  %v14522_v5 = vld [vmem:[#allocation20 + $0xec] sm:$0xf0] }
 0x867   :  { %5950 = vmatpush.bf16.msra.mxu2 %v11843_v24  ;;  %5869 = vmatpush.bf16.msra.mxu0 %v12139_v10  ;;  %v14686_v24 = vld [vmem:[#allocation20 + $0x60c] sm:$0xf0]  ;;  %v14712_v10 = vld [vmem:[#allocation20 + $0x6e4] sm:$0xf] }
 0x868   :  { %5882 = vmatpush.bf16.msra.mxu1 %v12267_v15  ;;  %v12172_v15 = vld [vmem:[#allocation20 + $0x6f0] sm:$0xf0]  ;;  %v12059_v32 = vor.u32 %v14686_v24, %v12058_v35  ;;  %v12003_v35 = vor.u32 %v14671_v47, %v12002_v23  ;;  %v14728_v24 = vld [vmem:[#allocation20 + $0x764] sm:$0xf] }
 0x869   :  { %5908 = vmatpush.bf16.msra.mxu3 %v12015_v19  ;;  %v12300_v19 = vld [vmem:[#allocation20 + $0x7f0] sm:$0xf0]  ;;  %v12175_v56 = vor.u32 %v14712_v10, %v12172_v15  ;;  %v12427_v10 = vor.u32 %v14522_v5, %v12426_v2  ;;  %v12162_v2 = vld [vmem:[#allocation20 + $0x6c8] sm:$0xf] }
 0x86a   :  { %11798 = vmatmul.msk.bf16.vlgmr.msrb.gmra.mxu0 %vm4810_vm6, %v16590_v34  ;;  %v12303_v54 = vor.u32 %v14744_v49, %v12300_v19  ;;  %v12410_v49 = vld [vmem:[#allocation20 + $0xc0] sm:$0xf]  ;;  %v14518_v19 = vld [vmem:[#allocation20 + $0xcc] sm:$0xf0] }
 0x86b   :  { %5951 = vmatpush.bf16.msra.mxu2 %v11827_v46  ;;  %5870 = vmatpush.bf16.msra.mxu0 %v12123_v44  ;;  %v14683_v46 = vld [vmem:[#allocation20 + $0x5f4] sm:$0xf0]  ;;  %v14633_v44 = vld [vmem:[#allocation20 + $0x46c] sm:$0xf] }
 0x86c   :  { %5883 = vmatpush.bf16.msra.mxu1 %v12251_v45  ;;  %v11860_v45 = vld [vmem:[#allocation20 + $0x478] sm:$0xf0]  ;;  %v12051_v36 = vor.u32 %v14683_v46, %v12050_v8  ;;  %v14692_v8 = vld [vmem:[#allocation20 + $0x644] sm:$0xf]  ;;  %v12092_v46 = vld [vmem:[#allocation20 + $0x650] sm:$0xf0] }
 0x86d   :  { %5909 = vmatpush.bf16.msra.mxu3 %v11999_v0  ;;  %11799 = vmatmul.msk.bf16.vlgmr.msrb.gmra.mxu1 %vm4810_vm6, %v16590_v34  ;;  %v11895_v34 = vor.u32 %v14641_v62, %v11892_v26  ;;  %v12156_v0 = vld [vmem:[#allocation20 + $0x6d0] sm:$0xf0]  ;;  %v11863_v58 = vor.u32 %v14633_v44, %v11860_v45  ;;  %v14700_v62 = vld [vmem:[#allocation20 + $0x684] sm:$0xf]  ;;  %v12019_v26 = vor.u32 %v14675_v27, %v12018_v16 }
 0x86e   :  { %v12159_v18 = vor.u32 %v14708_v59, %v12156_v0  ;;  %v12411_v44 = vor.u32 %v14518_v19, %v12410_v49  ;;  %v12095_v45 = vor.u32 %v14692_v8, %v12092_v46  ;;  %v12394_v59 = vld [vmem:[#allocation20 + $0xa0] sm:$0xf]  ;;  %v12060_v16 = vld [vmem:[#allocation20 + $0x610] sm:$0xf0]  ;;  %v14716_v27 = vld [vmem:[#allocation20 + $0x704] sm:$0xf] }
 0x86f   :  { %5952 = vmatpush.bf16.msra.mxu2 %v11811_v55  ;;  %5871 = vmatpush.bf16.msra.mxu0 %v12107_v51  ;;  %v14679_v55 = vld [vmem:[#allocation20 + $0x5d4] sm:$0xf0]  ;;  %v11844_v51 = vld [vmem:[#allocation20 + $0x458] sm:$0xf0]  ;;  %v12146_v49 = vld [vmem:[#allocation20 + $0x6a8] sm:$0xf] }
 0x870   :  { %5884 = vmatpush.bf16.msra.mxu1 %v12235_v38  ;;  %v12035_v12 = vor.u32 %v14679_v55, %v12034_v7  ;;  %v12140_v38 = vld [vmem:[#allocation20 + $0x6b0] sm:$0xf0]  ;;  %v14720_v55 = vld [vmem:[#allocation20 + $0x724] sm:$0xf]  ;;  %v14739_v8 = vld [vmem:[#allocation20 + $0x7b4] sm:$0xf0] }
 0x871   :  { %5910 = vmatpush.bf16.msra.mxu3 %v11983_v60  ;;  %v14736_v60 = vld [vmem:[#allocation20 + $0x7a4] sm:$0xf]  ;;  %v12143_v53 = vor.u32 %v14704_v25, %v12140_v38  ;;  %v12076_v7 = vld [vmem:[#allocation20 + $0x630] sm:$0xf0]  ;;  %v12378_v25 = vld [vmem:[#allocation20 + $0x80] sm:$0xf] }
 0x872   :  { %5953 = vmatmul.bf16.vlgmr.msra.gmra.mxu2 %v16582_v11  ;;  %v12271_v42 = vor.u32 %v14736_v60, %v12268_v40  ;;  %v14684_v38 = vld [vmem:[#allocation20 + $0x604] sm:$0xf]  ;;  %v14673_v46 = vld [vmem:[#allocation20 + $0x5ac] sm:$0xf] }
 0x873   :  { %5997 = vmatpush.bf16.msrb.mxu2 %v11927_v22  ;;  %5872 = vmatpush.bf16.msra.mxu0 %v12091_v61  ;;  %v14629_v22 = vld [vmem:[#allocation20 + $0x44c] sm:$0xf]  ;;  %v11828_v61 = vld [vmem:[#allocation20 + $0x438] sm:$0xf0] }
 0x874   :  { %5885 = vmatpush.bf16.msra.mxu1 %v12219_v28  ;;  %v11847_v37 = vor.u32 %v14629_v22, %v11844_v51  ;;  %v12124_v28 = vld [vmem:[#allocation20 + $0x690] sm:$0xf0]  ;;  %v12079_v51 = vor.u32 %v14688_v20, %v12076_v7  ;;  %v12258_v20 = vld [vmem:[#allocation20 + $0x788] sm:$0xf]  ;;  %v14735_v7 = vld [vmem:[#allocation20 + $0x794] sm:$0xf0] }
 0x875   :  { %5911 = vmatpush.bf16.msra.mxu3 %v11967_v33  ;;  %v14732_v33 = vld [vmem:[#allocation20 + $0x784] sm:$0xf]  ;;  %v12127_v43 = vor.u32 %v14700_v62, %v12124_v28  ;;  %v14747_v62 = vld [vmem:[#allocation20 + $0x7f4] sm:$0xf0]  ;;  %v12063_v28 = vor.u32 %v14684_v38, %v12060_v16  ;;  %v12428_v38 = vld [vmem:[#allocation20 + $0xf0] sm:$0xf0] }
 0x876   :  { %v14699_v16 = vld [vmem:[#allocation20 + $0x674] sm:$0xf0] }
 0x877   :  { %5998 = vmatpush.bf16.msrb.mxu2 %v11911_v14  ;;  %5873 = vmatpush.bf16.msra.mxu0 %v12075_v1  ;;  %v14625_v14 = vld [vmem:[#allocation20 + $0x42c] sm:$0xf]  ;;  %v11812_v1 = vld [vmem:[#allocation20 + $0x418] sm:$0xf0] }
 0x878   :  { %5886 = vmatpush.bf16.msra.mxu1 %v12203_v4  ;;  %v11831_v3 = vor.u32 %v14625_v14, %v11828_v61  ;;  %v14696_v4 = vld [vmem:[#allocation20 + $0x664] sm:$0xf]  ;;  %v11815_v63 = vor.u32 %v14621_v57, %v11812_v1  ;;  %v14715_v14 = vld [vmem:[#allocation20 + $0x6f4] sm:$0xf0]  ;;  %v12306_v61 = vld [vmem:[#allocation20 + $0x7e8] sm:$0xf] }
 0x879   :  { %5912 = vmatpush.bf16.msra.mxu3 %v11951_v17  ;;  %v12108_v17 = vld [vmem:[#allocation20 + $0x670] sm:$0xf0]  ;;  %v14506_v1 = vld [vmem:[#allocation20 + $0x6c] sm:$0xf0] }
 0x87a   :  { %v12111_v15 = vor.u32 %v14696_v4, %v12108_v17  ;;  %v12290_v4 = vld [vmem:[#allocation20 + $0x7c8] sm:$0xf]  ;;  %v14743_v17 = vld [vmem:[#allocation20 + $0x7d4] sm:$0xf0] }
 0x87b   :  { %5999 = vmatpush.bf16.msrb.mxu2 %v11895_v34  ;;  %5874 = vmatpush.bf16.msra.mxu0 %v12059_v32  ;;  %v12255_v34 = vor.u32 %v14732_v33, %v12252_v52  ;;  %v11987_v32 = vor.u32 %v14667_v6, %v11986_v39  ;;  %v14681_v33 = vld [vmem:[#allocation20 + $0x5ec] sm:$0xf]  ;;  %v12052_v52 = vld [vmem:[#allocation20 + $0x5f8] sm:$0xf0] }
 0x87c   :  { %5887 = vmatpush.bf16.msra.mxu1 %v12187_v48  ;;  %v14724_v48 = vld [vmem:[#allocation20 + $0x744] sm:$0xf]  ;;  %v12055_v5 = vor.u32 %v14681_v33, %v12052_v52 }
 0x87d   :  { %5913 = vmatpush.bf16.msra.mxu3 %v11935_v13  ;;  %v12220_v13 = vld [vmem:[#allocation20 + $0x750] sm:$0xf0] }
 0x87e   :  { %5875 = vmatmul.bf16.vlgmr.msra.gmra.mxu0 %v16616_v21  ;;  %v12223_v0 = vor.u32 %v14724_v48, %v12220_v13  ;;  %v12020_v48 = vld [vmem:[#allocation20 + $0x5b8] sm:$0xf0] }
 0x87f   :  { %6000 = vmatpush.bf16.msrb.mxu2 %v11879_v41  ;;  %5919 = vmatpush.bf16.msrb.mxu0 %v12175_v56  ;;  %v12239_v41 = vor.u32 %v14728_v24, %v12236_v50  ;;  %v11970_v56 = vld [vmem:[#allocation20 + $0x548] sm:$0xf]  ;;  %v14677_v24 = vld [vmem:[#allocation20 + $0x5cc] sm:$0xf]  ;;  %v12036_v50 = vld [vmem:[#allocation20 + $0x5d8] sm:$0xf0] }
 0x880   :  { %5932 = vmatpush.bf16.msrb.mxu1 %v12303_v54  ;;  %5914 = vmatmul.bf16.vlgmr.msra.gmra.mxu3 %v16600_v31  ;;  %v14663_v54 = vld [vmem:[#allocation20 + $0x554] sm:$0xf0]  ;;  %v12039_v19 = vor.u32 %v14677_v24, %v12036_v50 }
 0x881   :  { %5958 = vmatpush.bf16.msrb.mxu3 %v12051_v36  ;;  %5888 = vmatmul.bf16.vlgmr.msra.gmra.mxu1 %v16618_v30  ;;  %v14514_v36 = vld [vmem:[#allocation20 + $0xac] sm:$0xf0]  ;;  %v11971_v9 = vor.u32 %v14663_v54, %v11970_v56 }
 0x882   :  { %v12395_v22 = vor.u32 %v14514_v36, %v12394_v59  ;;  %v14498_v59 = vld [vmem:[#allocation20 + $0x2c] sm:$0xf0]  ;;  %v12130_v36 = vld [vmem:[#allocation20 + $0x688] sm:$0xf] }
 0x883   :  { %6001 = vmatpush.bf16.msrb.mxu2 %v11863_v58  ;;  %5920 = vmatpush.bf16.msrb.mxu0 %v12159_v18  ;;  %v12204_v58 = vld [vmem:[#allocation20 + $0x730] sm:$0xf0]  ;;  %v11954_v18 = vld [vmem:[#allocation20 + $0x528] sm:$0xf] }
 0x884   :  { %5933 = vmatpush.bf16.msrb.mxu1 %v12287_v29  ;;  %v14659_v29 = vld [vmem:[#allocation20 + $0x534] sm:$0xf0]  ;;  %v12207_v60 = vor.u32 %v14720_v55, %v12204_v58  ;;  %v14669_v55 = vld [vmem:[#allocation20 + $0x58c] sm:$0xf]  ;;  %v12004_v58 = vld [vmem:[#allocation20 + $0x598] sm:$0xf0] }
 0x885   :  { %5959 = vmatpush.bf16.msrb.mxu3 %v12035_v12  ;;  %v14510_v12 = vld [vmem:[#allocation20 + $0x8c] sm:$0xf0]  ;;  %v11955_v40 = vor.u32 %v14659_v29, %v11954_v18  ;;  %v12314_v29 = vld [vmem:[#allocation20] sm:$0xf] }
 0x887   :  { %6002 = vmatpush.bf16.msrb.mxu2 %v11847_v37  ;;  %5921 = vmatpush.bf16.msrb.mxu0 %v12143_v53  ;;  %v12188_v37 = vld [vmem:[#allocation20 + $0x710] sm:$0xf0]  ;;  %v11938_v53 = vld [vmem:[#allocation20 + $0x508] sm:$0xf] }
 0x888   :  { %5934 = vmatpush.bf16.msrb.mxu1 %v12271_v42  ;;  %v14655_v42 = vld [vmem:[#allocation20 + $0x514] sm:$0xf0]  ;;  %v12191_v23 = vor.u32 %v14716_v27, %v12188_v37  ;;  %v12242_v27 = vld [vmem:[#allocation20 + $0x768] sm:$0xf] }
 0x889   :  { %5960 = vmatpush.bf16.msrb.mxu3 %v12019_v26  ;;  %v12379_v26 = vor.u32 %v14510_v12, %v12378_v25  ;;  %v11939_v47 = vor.u32 %v14655_v42, %v11938_v53  ;;  %v14494_v25 = vld [vmem:[#allocation20 + $0xc] sm:$0xf0]  ;;  %v14520_v12 = vld [vmem:[#allocation20 + $0xe4] sm:$0xf]  ;;  %v14731_v37 = vld [vmem:[#allocation20 + $0x774] sm:$0xf0] }
 0x88a   :  { %v14665_v53 = vld [vmem:[#allocation20 + $0x56c] sm:$0xf]  ;;  %v11988_v42 = vld [vmem:[#allocation20 + $0x578] sm:$0xf0]  ;;  %v12243_v33 = vor.u32 %v14731_v37, %v12242_v27 }
 0x88b   :  { %6003 = vmatpush.bf16.msrb.mxu2 %v11831_v3  ;;  %5922 = vmatpush.bf16.msrb.mxu0 %v12127_v43  ;;  %v12307_v43 = vor.u32 %v14747_v62, %v12306_v61  ;;  %v11991_v52 = vor.u32 %v14665_v53, %v11988_v42  ;;  %v14741_v27 = vld [vmem:[#allocation20 + $0x7cc] sm:$0xf]  ;;  %v12292_v37 = vld [vmem:[#allocation20 + $0x7d8] sm:$0xf0]  ;;  %v12538_v42 = vld [vmem:[#allocation20 + $0x1c0] sm:$0xf] }
 0x88c   :  { %5935 = vmatpush.bf16.msrb.mxu1 %v12255_v34  ;;  %v12362_v34 = vld [vmem:[#allocation20 + $0x60] sm:$0xf] }
 0x88d   :  { %5961 = vmatpush.bf16.msrb.mxu3 %v12003_v35  ;;  %v14711_v35 = vld [vmem:[#allocation20 + $0x6d4] sm:$0xf0]  ;;  %v12363_v39 = vor.u32 %v14506_v1, %v12362_v34  ;;  %v14661_v1 = vld [vmem:[#allocation20 + $0x54c] sm:$0xf] }
 0x88e   :  { %v12163_v6 = vor.u32 %v14711_v35, %v12162_v2  ;;  %v14727_v34 = vld [vmem:[#allocation20 + $0x754] sm:$0xf0]  ;;  %v11972_v2 = vld [vmem:[#allocation20 + $0x558] sm:$0xf0] }
 0x88f   :  { %6004 = vmatpush.bf16.msrb.mxu2 %v11815_v63  ;;  %5923 = vmatpush.bf16.msrb.mxu0 %v12111_v15  ;;  %v12291_v63 = vor.u32 %v14743_v17, %v12290_v4  ;;  %v14502_v15 = vld [vmem:[#allocation20 + $0x4c] sm:$0xf0]  ;;  %v14512_v4 = vld [vmem:[#allocation20 + $0xa4] sm:$0xf]  ;;  %v12396_v17 = vld [vmem:[#allocation20 + $0xb0] sm:$0xf0]  ;;  %v11975_v50 = vor.u32 %v14661_v1, %v11972_v2 }
 0x890   :  { %5936 = vmatpush.bf16.msrb.mxu1 %v12239_v41  ;;  %v14707_v41 = vld [vmem:[#allocation20 + $0x6b4] sm:$0xf0]  ;;  %v12522_v1 = vld [vmem:[#allocation20 + $0x1a0] sm:$0xf]  ;;  %v14546_v2 = vld [vmem:[#allocation20 + $0x1ac] sm:$0xf0] }
 0x891   :  { %5962 = vmatpush.bf16.msrb.mxu3 %v11987_v32  ;;  %v16638_v3 = vpop.f32.mrf.mxu2  ;;  %v12274_v32 = vld [vmem:[#allocation20 + $0x7a8] sm:$0xf]  ;;  %v12147_v54 = vor.u32 %v14707_v41, %v12146_v49  ;;  %v12399_v49 = vor.u32 %v14512_v4, %v12396_v17  ;;  %v14496_v17 = vld [vmem:[#allocation20 + $0x24] sm:$0xf] }
 0x892   :  { %6005 = vmatmul.bf16.vlgmr.msrb.gmra.mxu2 %v16582_v11  ;;  %v12178_v11 = vld [vmem:[#allocation20 + $0x6e8] sm:$0xf] }
 0x893   :  { %6689 = vmatpush.bf16.msra.mxu2 %v12427_v10  ;;  %5924 = vmatpush.bf16.msrb.mxu0 %v12095_v45  ;;  %v12179_v57 = vor.u32 %v14715_v14, %v12178_v11  ;;  %v12346_v10 = vld [vmem:[#allocation20 + $0x40] sm:$0xf]  ;;  %v12315_v11 = vor.u32 %v14494_v25, %v12314_v29  ;;  %v12431_v14 = vor.u32 %v14520_v12, %v12428_v38  ;;  %v14504_v12 = vld [vmem:[#allocation20 + $0x64] sm:$0xf]  ;;  %v12364_v38 = vld [vmem:[#allocation20 + $0x70] sm:$0xf0] }
 0x894   :  { %5937 = vmatpush.bf16.msrb.mxu1 %v12223_v0  ;;  %v12347_v13 = vor.u32 %v14502_v15, %v12346_v10  ;;  %v12330_v45 = vld [vmem:[#allocation20 + $0x20] sm:$0xf]  ;;  %v12023_v0 = vor.u32 %v14673_v46, %v12020_v48  ;;  %v14657_v10 = vld [vmem:[#allocation20 + $0x52c] sm:$0xf]  ;;  %v11956_v15 = vld [vmem:[#allocation20 + $0x538] sm:$0xf0] }
 0x895   :  { %5963 = vmatpush.bf16.msrb.mxu3 %v11971_v9  ;;  %v14703_v9 = vld [vmem:[#allocation20 + $0x694] sm:$0xf0]  ;;  %v12331_v18 = vor.u32 %v14498_v59, %v12330_v45  ;;  %v12066_v46 = vld [vmem:[#allocation20 + $0x608] sm:$0xf]  ;;  %v14653_v45 = vld [vmem:[#allocation20 + $0x50c] sm:$0xf] }
 0x896   :  { %v11940_v59 = vld [vmem:[#allocation20 + $0x518] sm:$0xf0] }
 0x897   :  { %6690 = vmatpush.bf16.msra.mxu2 %v12411_v44  ;;  %5925 = vmatpush.bf16.msrb.mxu0 %v12079_v51  ;;  %v12275_v44 = vor.u32 %v14739_v8, %v12274_v32  ;;  %v12259_v51 = vor.u32 %v14735_v7, %v12258_v20  ;;  %v14508_v32 = vld [vmem:[#allocation20 + $0x84] sm:$0xf]  ;;  %v12380_v8 = vld [vmem:[#allocation20 + $0x90] sm:$0xf0]  ;;  %v12308_v20 = vld [vmem:[#allocation20 + $0x7f8] sm:$0xf0] }
 0x898   :  { %5938 = vmatpush.bf16.msrb.mxu1 %v12207_v60  ;;  %v12007_v60 = vor.u32 %v14669_v55, %v12004_v58  ;;  %v12383_v7 = vor.u32 %v14508_v32, %v12380_v8  ;;  %v12554_v58 = vld [vmem:[#allocation20 + $0x1e0] sm:$0xf]  ;;  %v12316_v8 = vld [vmem:[#allocation20 + $0x10] sm:$0xf0] }
 0x899   :  { %5964 = vmatpush.bf16.msrb.mxu3 %v11955_v40  ;;  %v4838_v56 = vpop.f32.mrf.mxu2  ;;  %v12114_v40 = vld [vmem:[#allocation20 + $0x668] sm:$0xf] }
 0x89a   :  { %v12115_v62 = vor.u32 %v14699_v16, %v12114_v40  ;;  %v14687_v56 = vld [vmem:[#allocation20 + $0x614] sm:$0xf0]  ;;  %v12164_v16 = vld [vmem:[#allocation20 + $0x6d8] sm:$0xf0] }
 0x89b   :  { %6691 = vmatpush.bf16.msra.mxu2 %v12395_v22  ;;  %5926 = vmatpush.bf16.msrb.mxu0 %v12063_v28  ;;  %v12131_v22 = vor.u32 %v14703_v9, %v12130_v36  ;;  %v12412_v28 = vld [vmem:[#allocation20 + $0xd0] sm:$0xf0]  ;;  %v14713_v36 = vld [vmem:[#allocation20 + $0x6ec] sm:$0xf]  ;;  %v12067_v55 = vor.u32 %v14687_v56, %v12066_v46  ;;  %v12434_v46 = vld [vmem:[#allocation20 + $0xe8] sm:$0xf] }
 0x89c   :  { %5939 = vmatpush.bf16.msrb.mxu1 %v12191_v23  ;;  %v12098_v23 = vld [vmem:[#allocation20 + $0x648] sm:$0xf]  ;;  %v14745_v9 = vld [vmem:[#allocation20 + $0x7ec] sm:$0xf] }
 0x89d   :  { %5965 = vmatpush.bf16.msrb.mxu3 %v11939_v47  ;;  %v14695_v47 = vld [vmem:[#allocation20 + $0x654] sm:$0xf0]  ;;  %v12311_v25 = vor.u32 %v14745_v9, %v12308_v20  ;;  %v14697_v56 = vld [vmem:[#allocation20 + $0x66c] sm:$0xf] }
 0x89e   :  { %5927 = vmatmul.bf16.vlgmr.msrb.gmra.mxu0 %v16616_v21  ;;  %v12099_v35 = vor.u32 %v14695_v47, %v12098_v23  ;;  %v12148_v47 = vld [vmem:[#allocation20 + $0x6b8] sm:$0xf0] }
 0x89f   :  { %6692 = vmatpush.bf16.msra.mxu2 %v12379_v26  ;;  %5971 = vmatpush.bf16.msra.mxu0 %v12179_v57  ;;  %v14516_v26 = vld [vmem:[#allocation20 + $0xc4] sm:$0xf]  ;;  %v12226_v57 = vld [vmem:[#allocation20 + $0x748] sm:$0xf] }
 0x8a0   :  { %5984 = vmatpush.bf16.msra.mxu1 %v12307_v43  ;;  %5966 = vmatmul.bf16.vlgmr.msrb.gmra.mxu3 %v16600_v31  ;;  %v16647_v43 = vpack.c.bf16 %v16638_v3, %v16638_v3  ;;  %v12227_v24 = vor.u32 %v14727_v34, %v12226_v57  ;;  %v14723_v3 = vld [vmem:[#allocation20 + $0x734] sm:$0xf0]  ;;  %v14737_v57 = vld [vmem:[#allocation20 + $0x7ac] sm:$0xf]  ;;  %v12276_v34 = vld [vmem:[#allocation20 + $0x7b8] sm:$0xf0] }
 0x8a1   :  { %6010 = vmatpush.bf16.msra.mxu3 %v12055_v5  ;;  %5940 = vmatmul.bf16.vlgmr.msrb.gmra.mxu1 %v16618_v30  ;;  %v16643_v61 = vpop.f32.mrf.mxu2  ;;  %v12415_v5 = vor.u32 %v14516_v26, %v12412_v28  ;;  %v12295_v26 = vor.u32 %v14741_v27, %v12292_v37  ;;  %v14500_v28 = vld [vmem:[#allocation20 + $0x44] sm:$0xf]  ;;  %v12279_v4 = vor.u32 %v14737_v57, %v12276_v34  ;;  %v12402_v27 = vld [vmem:[#allocation20 + $0xa8] sm:$0xf]  ;;  %v14515_v37 = vld [vmem:[#allocation20 + $0xb4] sm:$0xf0] }
 0x8a2   :  { %v12386_v34 = vld [vmem:[#allocation20 + $0x88] sm:$0xf] }
 0x8a3   :  { %6693 = vmatpush.bf16.msra.mxu2 %v12363_v39  ;;  %5972 = vmatpush.bf16.msra.mxu0 %v12163_v6  ;;  %v12082_v39 = vld [vmem:[#allocation20 + $0x628] sm:$0xf]  ;;  %v14691_v6 = vld [vmem:[#allocation20 + $0x634] sm:$0xf0] }
 0x8a4   :  { %5985 = vmatpush.bf16.msra.mxu1 %v12291_v63  ;;  %v12210_v63 = vld [vmem:[#allocation20 + $0x728] sm:$0xf]  ;;  %v12083_v41 = vor.u32 %v14691_v6, %v12082_v39  ;;  %v12523_v39 = vor.u32 %v14546_v2, %v12522_v1  ;;  %v12132_v6 = vld [vmem:[#allocation20 + $0x698] sm:$0xf0]  ;;  %v14511_v1 = vld [vmem:[#allocation20 + $0x94] sm:$0xf0] }
 0x8a5   :  { %6011 = vmatpush.bf16.msra.mxu3 %v12039_v19  ;;  %v12211_v48 = vor.u32 %v14723_v3, %v12210_v63  ;;  %v14733_v63 = vld [vmem:[#allocation20 + $0x78c] sm:$0xf]  ;;  %v12260_v3 = vld [vmem:[#allocation20 + $0x798] sm:$0xf0] }
 0x8a6   :  { %v12263_v32 = vor.u32 %v14733_v63, %v12260_v3  ;;  %v14685_v2 = vld [vmem:[#allocation20 + $0x60c] sm:$0xf]  ;;  %v14586_v63 = vld [vmem:[#allocation20 + $0x2ec] sm:$0xf0]  ;;  %v12810_v3 = vld [vmem:[#allocation20 + $0x3e0] sm:$0xf] }
 0x8a7   :  { %6694 = vmatpush.bf16.msra.mxu2 %v12347_v13  ;;  %5973 = vmatpush.bf16.msra.mxu0 %v12147_v54  ;;  %v11959_v13 = vor.u32 %v14657_v10, %v11956_v15  ;;  %v12194_v54 = vld [vmem:[#allocation20 + $0x708] sm:$0xf]  ;;  %v12506_v15 = vld [vmem:[#allocation20 + $0x180] sm:$0xf] }
 0x8a8   :  { %5986 = vmatpush.bf16.msra.mxu1 %v12275_v44  ;;  %v14719_v44 = vld [vmem:[#allocation20 + $0x714] sm:$0xf0] }
 0x8a9   :  { %6012 = vmatpush.bf16.msra.mxu3 %v12023_v0  ;;  %v4899_v19 = vpop.f32.mrf.mxu2  ;;  %v12180_v0 = vld [vmem:[#allocation20 + $0x6f8] sm:$0xf0]  ;;  %v12195_v29 = vor.u32 %v14719_v44, %v12194_v54  ;;  %v14729_v44 = vld [vmem:[#allocation20 + $0x76c] sm:$0xf] }
 0x8aa   :  { %v14492_v19 = vld [vmem:[#allocation20 + $0x4] sm:$0xf]  ;;  %v12116_v54 = vld [vmem:[#allocation20 + $0x678] sm:$0xf0] }
 0x8ab   :  { %6695 = vmatpush.bf16.msra.mxu2 %v12331_v18  ;;  %5974 = vmatpush.bf16.msra.mxu0 %v12131_v22  ;;  %v14554_v18 = vld [vmem:[#allocation20 + $0x1ec] sm:$0xf0]  ;;  %v11943_v22 = vor.u32 %v14653_v45, %v11940_v59  ;;  %v12244_v59 = vld [vmem:[#allocation20 + $0x778] sm:$0xf0]  ;;  %v12319_v9 = vor.u32 %v14492_v19, %v12316_v8  ;;  %v12556_v19 = vld [vmem:[#allocation20 + $0x1f0] sm:$0xf0] }
 0x8ac   :  { %5987 = vmatpush.bf16.msra.mxu1 %v12259_v51  ;;  %v12183_v51 = vor.u32 %v14713_v36, %v12180_v0  ;;  %v12555_v40 = vor.u32 %v14554_v18, %v12554_v58  ;;  %v12490_v36 = vld [vmem:[#allocation20 + $0x160] sm:$0xf]  ;;  %v14538_v0 = vld [vmem:[#allocation20 + $0x16c] sm:$0xf0]  ;;  %v14519_v58 = vld [vmem:[#allocation20 + $0xd4] sm:$0xf0]  ;;  %v12247_v18 = vor.u32 %v14729_v44, %v12244_v59 }
 0x8ad   :  { %6013 = vmatpush.bf16.msra.mxu3 %v12007_v60  ;;  %v14709_v60 = vld [vmem:[#allocation20 + $0x6cc] sm:$0xf] }
 0x8af   :  { %6696 = vmatpush.bf16.msra.mxu2 %v12315_v11  ;;  %5975 = vmatpush.bf16.msra.mxu0 %v12115_v62  ;;  %v14550_v11 = vld [vmem:[#allocation20 + $0x1cc] sm:$0xf0]  ;;  %v12167_v62 = vor.u32 %v14709_v60, %v12164_v16 }
 0x8b0   :  { %5988 = vmatpush.bf16.msra.mxu1 %v12243_v33  ;;  %v12348_v33 = vld [vmem:[#allocation20 + $0x50] sm:$0xf0]  ;;  %v12539_v23 = vor.u32 %v14550_v11, %v12538_v42  ;;  %v14534_v60 = vld [vmem:[#allocation20 + $0x14c] sm:$0xf0] }
 0x8b1   :  { %6014 = vmatpush.bf16.msra.mxu3 %v11991_v52  ;;  %v14705_v52 = vld [vmem:[#allocation20 + $0x6ac] sm:$0xf] }
 0x8b2   :  { %6697 = vmatmul.bf16.vlgmr.msra.gmra.mxu2 %v16647_v43 }
 0x8b3   :  { %6741 = vmatpush.bf16.msrb.mxu2 %v12431_v14  ;;  %5976 = vmatpush.bf16.msra.mxu0 %v12099_v35  ;;  %v12367_v14 = vor.u32 %v14504_v12, %v12364_v38  ;;  %v12151_v35 = vor.u32 %v14705_v52, %v12148_v47  ;;  %v12228_v12 = vld [vmem:[#allocation20 + $0x758] sm:$0xf0]  ;;  %v12474_v38 = vld [vmem:[#allocation20 + $0x140] sm:$0xf]  ;;  %v12403_v47 = vor.u32 %v14515_v37, %v12402_v27 }
 0x8b4   :  { %5989 = vmatpush.bf16.msra.mxu1 %v12227_v24  ;;  %v12332_v24 = vld [vmem:[#allocation20 + $0x30] sm:$0xf0]  ;;  %v12475_v11 = vor.u32 %v14534_v60, %v12474_v38  ;;  %v12458_v52 = vld [vmem:[#allocation20 + $0x120] sm:$0xf]  ;;  %v14610_v60 = vld [vmem:[#allocation20 + $0x3ac] sm:$0xf0] }
 0x8b5   :  { %6015 = vmatpush.bf16.msra.mxu3 %v11975_v50  ;;  %v16650_v53 = vpop.f32.mrf.mxu2  ;;  %v14701_v50 = vld [vmem:[#allocation20 + $0x68c] sm:$0xf]  ;;  %v12778_v38 = vld [vmem:[#allocation20 + $0x3a0] sm:$0xf] }
 0x8b7   :  { %6742 = vmatpush.bf16.msrb.mxu2 %v12415_v5  ;;  %5977 = vmatpush.bf16.msra.mxu0 %v12083_v41  ;;  %v12351_v5 = vor.u32 %v14500_v28, %v12348_v33  ;;  %v12135_v41 = vor.u32 %v14701_v50, %v12132_v6  ;;  %v12212_v33 = vld [vmem:[#allocation20 + $0x738] sm:$0xf0]  ;;  %v12442_v50 = vld [vmem:[#allocation20 + $0x100] sm:$0xf] }
 0x8b8   :  { %5990 = vmatpush.bf16.msra.mxu1 %v12211_v48  ;;  %v14523_v48 = vld [vmem:[#allocation20 + $0xf4] sm:$0xf0]  ;;  %v12682_v6 = vld [vmem:[#allocation20 + $0x2e0] sm:$0xf] }
 0x8b9   :  { %6016 = vmatpush.bf16.msra.mxu3 %v11959_v13  ;;  %v12435_v20 = vor.u32 %v14523_v48, %v12434_v46  ;;  %v12683_v8 = vor.u32 %v14586_v63, %v12682_v6  ;;  %v14570_v6 = vld [vmem:[#allocation20 + $0x26c] sm:$0xf0]  ;;  %v12746_v63 = vld [vmem:[#allocation20 + $0x360] sm:$0xf] }
 0x8bb   :  { %6743 = vmatpush.bf16.msrb.mxu2 %v12399_v49  ;;  %5978 = vmatpush.bf16.msra.mxu0 %v12067_v55  ;;  %v14542_v49 = vld [vmem:[#allocation20 + $0x18c] sm:$0xf0]  ;;  %v12418_v55 = vld [vmem:[#allocation20 + $0xc8] sm:$0xf] }
 0x8bc   :  { %5991 = vmatpush.bf16.msra.mxu1 %v12195_v29  ;;  %v12507_v13 = vor.u32 %v14542_v49, %v12506_v15  ;;  %v12491_v29 = vor.u32 %v14538_v0, %v12490_v36  ;;  %v12387_v15 = vor.u32 %v14511_v1, %v12386_v34  ;;  %v14582_v36 = vld [vmem:[#allocation20 + $0x2cc] sm:$0xf0]  ;;  %v12794_v0 = vld [vmem:[#allocation20 + $0x3c0] sm:$0xf]  ;;  %v12508_v34 = vld [vmem:[#allocation20 + $0x190] sm:$0xf0] }
 0x8bd   :  { %6017 = vmatpush.bf16.msra.mxu3 %v11943_v22  ;;  %v5852_v10 = vpop.f32.mrf.mxu2  ;;  %v14693_v22 = vld [vmem:[#allocation20 + $0x64c] sm:$0xf] }
 0x8be   :  { %5979 = vmatmul.bf16.vlgmr.msra.gmra.mxu0 %v16616_v21  ;;  %v14618_v10 = vld [vmem:[#allocation20 + $0x3ec] sm:$0xf0] }
 0x8bf   :  { %6744 = vmatpush.bf16.msrb.mxu2 %v12383_v7  ;;  %6023 = vmatpush.bf16.msrb.mxu0 %v12183_v51  ;;  %v16655_v45 = vpop.f32.mrf.mxu3  ;;  %v12119_v7 = vor.u32 %v14697_v56, %v12116_v54  ;;  %v12100_v51 = vld [vmem:[#allocation20 + $0x658] sm:$0xf0]  ;;  %v12811_v46 = vor.u32 %v14618_v10, %v12810_v3  ;;  %v14507_v56 = vld [vmem:[#allocation20 + $0x74] sm:$0xf0]  ;;  %v12666_v54 = vld [vmem:[#allocation20 + $0x2c0] sm:$0xf] }
 0x8c0   :  { %6036 = vmatpush.bf16.msrb.mxu1 %v12311_v25  ;;  %6018 = vmatmul.bf16.vlgmr.msra.gmra.mxu3 %v16600_v31  ;;  %v12335_v31 = vor.u32 %v14496_v17, %v12332_v24  ;;  %v14725_v25 = vld [vmem:[#allocation20 + $0x74c] sm:$0xf]  ;;  %v12103_v16 = vor.u32 %v14693_v22, %v12100_v51  ;;  %v12196_v24 = vld [vmem:[#allocation20 + $0x718] sm:$0xf0]  ;;  %v12354_v22 = vld [vmem:[#allocation20 + $0x48] sm:$0xf] }
 0x8c1   :  { %6702 = vmatpush.bf16.msrb.mxu3 %v12555_v40  ;;  %5992 = vmatmul.bf16.vlgmr.msra.gmra.mxu1 %v16618_v30  ;;  %v12419_v40 = vor.u32 %v14519_v58, %v12418_v55  ;;  %v12231_v42 = vor.u32 %v14725_v25, %v12228_v12  ;;  %v14717_v17 = vld [vmem:[#allocation20 + $0x70c] sm:$0xf]  ;;  %v12540_v55 = vld [vmem:[#allocation20 + $0x1d0] sm:$0xf0]  ;;  %v14503_v51 = vld [vmem:[#allocation20 + $0x54] sm:$0xf0] }
 0x8c2   :  { %v12650_v25 = vld [vmem:[#allocation20 + $0x2a0] sm:$0xf]  ;;  %v12355_v27 = vor.u32 %v14503_v51, %v12354_v22  ;;  %v14602_v3 = vld [vmem:[#allocation20 + $0x36c] sm:$0xf0]  ;;  %v14536_v10 = vld [vmem:[#allocation20 + $0x164] sm:$0xf] }
 0x8c3   :  { %6745 = vmatpush.bf16.msrb.mxu2 %v12367_v14  ;;  %6024 = vmatpush.bf16.msrb.mxu0 %v12167_v62  ;;  %v14689_v14 = vld [vmem:[#allocation20 + $0x62c] sm:$0xf]  ;;  %v12084_v62 = vld [vmem:[#allocation20 + $0x638] sm:$0xf0] }
 0x8c4   :  { %6037 = vmatpush.bf16.msrb.mxu1 %v12295_v26  ;;  %v14721_v26 = vld [vmem:[#allocation20 + $0x72c] sm:$0xf]  ;;  %v12087_v57 = vor.u32 %v14689_v14, %v12084_v62  ;;  %v12338_v14 = vld [vmem:[#allocation20 + $0x28] sm:$0xf]  ;;  %v14499_v62 = vld [vmem:[#allocation20 + $0x34] sm:$0xf0] }
 0x8c5   :  { %6703 = vmatpush.bf16.msrb.mxu3 %v12539_v23  ;;  %v14530_v23 = vld [vmem:[#allocation20 + $0x12c] sm:$0xf0]  ;;  %v12339_v1 = vor.u32 %v14499_v62, %v12338_v14  ;;  %v14513_v22 = vld [vmem:[#allocation20 + $0xac] sm:$0xf]  ;;  %v12404_v51 = vld [vmem:[#allocation20 + $0xb8] sm:$0xf0] }
 0x8c6   :  { %v14509_v62 = vld [vmem:[#allocation20 + $0x8c] sm:$0xf] }
 0x8c7   :  { %6746 = vmatpush.bf16.msrb.mxu2 %v12351_v5  ;;  %6025 = vmatpush.bf16.msrb.mxu0 %v12151_v35  ;;  %v4851_v28 = vpop.f32.mrf.mxu3  ;;  %v12215_v5 = vor.u32 %v14721_v26, %v12212_v33  ;;  %v12459_v35 = vor.u32 %v14530_v23, %v12458_v52  ;;  %v12634_v26 = vld [vmem:[#allocation20 + $0x280] sm:$0xf]  ;;  %v14574_v52 = vld [vmem:[#allocation20 + $0x28c] sm:$0xf0] }
 0x8c8   :  { %6038 = vmatpush.bf16.msrb.mxu1 %v12279_v4  ;;  %v12068_v4 = vld [vmem:[#allocation20 + $0x618] sm:$0xf0]  ;;  %v12762_v23 = vld [vmem:[#allocation20 + $0x380] sm:$0xf] }
 0x8c9   :  { %6704 = vmatpush.bf16.msrb.mxu3 %v12523_v39  ;;  %v14526_v39 = vld [vmem:[#allocation20 + $0x10c] sm:$0xf0]  ;;  %v12071_v49 = vor.u32 %v14685_v2, %v12068_v4  ;;  %v12322_v2 = vld [vmem:[#allocation20 + $0x8] sm:$0xf]  ;;  %v14495_v4 = vld [vmem:[#allocation20 + $0x14] sm:$0xf0] }
 0x8cb   :  { %6747 = vmatpush.bf16.msrb.mxu2 %v12335_v31  ;;  %6026 = vmatpush.bf16.msrb.mxu0 %v12135_v41  ;;  %v14552_v31 = vld [vmem:[#allocation20 + $0x1e4] sm:$0xf]  ;;  %v12199_v41 = vor.u32 %v14717_v17, %v12196_v24  ;;  %v14521_v17 = vld [vmem:[#allocation20 + $0xec] sm:$0xf]  ;;  %v12436_v24 = vld [vmem:[#allocation20 + $0xf8] sm:$0xf0] }
 0x8cc   :  { %6039 = vmatpush.bf16.msrb.mxu1 %v12263_v32  ;;  %v12443_v32 = vor.u32 %v14526_v39, %v12442_v50  ;;  %v12559_v44 = vor.u32 %v14552_v31, %v12556_v19  ;;  %v12618_v39 = vld [vmem:[#allocation20 + $0x260] sm:$0xf]  ;;  %v12439_v31 = vor.u32 %v14521_v17, %v12436_v24 }
 0x8cd   :  { %6705 = vmatpush.bf16.msrb.mxu3 %v12507_v13  ;;  %v12370_v13 = vld [vmem:[#allocation20 + $0x68] sm:$0xf] }
 0x8ce   :  { %v12371_v58 = vor.u32 %v14507_v56, %v12370_v13  ;;  %v12747_v13 = vor.u32 %v14602_v3, %v12746_v63 }
 0x8cf   :  { %6748 = vmatpush.bf16.msrb.mxu2 %v12319_v9  ;;  %6027 = vmatpush.bf16.msrb.mxu0 %v12119_v7  ;;  %v16658_v48 = vpop.f32.mrf.mxu3  ;;  %v14614_v9 = vld [vmem:[#allocation20 + $0x3cc] sm:$0xf0]  ;;  %v14548_v7 = vld [vmem:[#allocation20 + $0x1c4] sm:$0xf] }
 0x8d0   :  { %6040 = vmatpush.bf16.msrb.mxu1 %v12247_v18  ;;  %v12667_v18 = vor.u32 %v14582_v36, %v12666_v54  ;;  %v12543_v12 = vor.u32 %v14548_v7, %v12540_v55  ;;  %v14566_v36 = vld [vmem:[#allocation20 + $0x24c] sm:$0xf0]  ;;  %v14532_v55 = vld [vmem:[#allocation20 + $0x144] sm:$0xf] }
 0x8d1   :  { %6706 = vmatpush.bf16.msrb.mxu3 %v12491_v29  ;;  %v12795_v29 = vor.u32 %v14614_v9, %v12794_v0  ;;  %v12730_v0 = vld [vmem:[#allocation20 + $0x340] sm:$0xf]  ;;  %v14598_v7 = vld [vmem:[#allocation20 + $0x34c] sm:$0xf0] }
 0x8d2   :  { %6749 = vmatmul.bf16.vlgmr.msrb.gmra.mxu2 %v16647_v43 }
 0x8d3   :  { %6793 = vmatpush.bf16.msra.mxu2 %v12435_v20  ;;  %6028 = vmatpush.bf16.msrb.mxu0 %v12103_v16  ;;  %v16664_v20 = vpack.c.bf16 %v16655_v45, %v16655_v45  ;;  %v14578_v45 = vld [vmem:[#allocation20 + $0x2ac] sm:$0xf0]  ;;  %v12524_v16 = vld [vmem:[#allocation20 + $0x1b0] sm:$0xf0] }
 0x8d4   :  { %6041 = vmatpush.bf16.msrb.mxu1 %v12231_v42 }
 0x8d5   :  { %6707 = vmatpush.bf16.msrb.mxu3 %v12475_v11  ;;  %v16660_v59 = vpop.f32.mrf.mxu2  ;;  %v12651_v11 = vor.u32 %v14578_v45, %v12650_v25  ;;  %v12731_v25 = vor.u32 %v14598_v7, %v12730_v0  ;;  %v12586_v45 = vld [vmem:[#allocation20 + $0x220] sm:$0xf] }
 0x8d7   :  { %6794 = vmatpush.bf16.msra.mxu2 %v12419_v40  ;;  %6029 = vmatpush.bf16.msrb.mxu0 %v12087_v57  ;;  %v14544_v40 = vld [vmem:[#allocation20 + $0x1a4] sm:$0xf]  ;;  %v16669_v37 = vpop.f32.mrf.mxu0 }
 0x8d8   :  { %6042 = vmatpush.bf16.msrb.mxu1 %v12215_v5  ;;  %v12527_v28 = vor.u32 %v14544_v40, %v12524_v16  ;;  %v14540_v57 = vld [vmem:[#allocation20 + $0x184] sm:$0xf]  ;;  %v12635_v5 = vor.u32 %v14574_v52, %v12634_v26  ;;  %v12460_v16 = vld [vmem:[#allocation20 + $0x130] sm:$0xf0]  ;;  %v12388_v26 = vld [vmem:[#allocation20 + $0x98] sm:$0xf0] }
 0x8d9   :  { %6708 = vmatpush.bf16.msrb.mxu3 %v12459_v35  ;;  %v12511_v50 = vor.u32 %v14540_v57, %v12508_v34  ;;  %v14528_v40 = vld [vmem:[#allocation20 + $0x124] sm:$0xf]  ;;  %v14590_v57 = vld [vmem:[#allocation20 + $0x30c] sm:$0xf0]  ;;  %v12391_v17 = vor.u32 %v14509_v62, %v12388_v26  ;;  %v12636_v62 = vld [vmem:[#allocation20 + $0x290] sm:$0xf0] }
 0x8da   :  { %v16671_v42 = vpop.f32.mrf.mxu1  ;;  %v14524_v34 = vld [vmem:[#allocation20 + $0x104] sm:$0xf] }
 0x8db   :  { %6795 = vmatpush.bf16.msra.mxu2 %v12403_v47  ;;  %6030 = vmatpush.bf16.msrb.mxu0 %v12071_v49  ;;  %v14606_v47 = vld [vmem:[#allocation20 + $0x38c] sm:$0xf0]  ;;  %v12323_v49 = vor.u32 %v14495_v4, %v12322_v2  ;;  %v14584_v2 = vld [vmem:[#allocation20 + $0x2e4] sm:$0xf]  ;;  %v12812_v4 = vld [vmem:[#allocation20 + $0x3f0] sm:$0xf0]  ;;  %v16689_v7 = vpack.c.bf16 %v16671_v42, %v16671_v42 }
 0x8dc   :  { %6043 = vmatpush.bf16.msrb.mxu1 %v12199_v41  ;;  %v12763_v35 = vor.u32 %v14606_v47, %v12762_v23  ;;  %v14558_v23 = vld [vmem:[#allocation20 + $0x20c] sm:$0xf0]  ;;  %v12698_v47 = vld [vmem:[#allocation20 + $0x300] sm:$0xf]  ;;  %v12530_v42 = vld [vmem:[#allocation20 + $0x1a8] sm:$0xf] }
 0x8dd   :  { %6709 = vmatpush.bf16.msrb.mxu3 %v12443_v32  ;;  %v5904_v33 = vpop.f32.mrf.mxu2  ;;  %v12619_v32 = vor.u32 %v14570_v6, %v12618_v39  ;;  %v14555_v39 = vld [vmem:[#allocation20 + $0x1f4] sm:$0xf0]  ;;  %v12699_v6 = vor.u32 %v14590_v57, %v12698_v47  ;;  %v14604_v26 = vld [vmem:[#allocation20 + $0x384] sm:$0xf] }
 0x8de   :  { %6031 = vmatmul.bf16.vlgmr.msrb.gmra.mxu0 %v16616_v21  ;;  %v12779_v21 = vor.u32 %v14610_v60, %v12778_v38  ;;  %v14562_v38 = vld [vmem:[#allocation20 + $0x22c] sm:$0xf0]  ;;  %v12714_v60 = vld [vmem:[#allocation20 + $0x320] sm:$0xf]  ;;  %v12463_v33 = vor.u32 %v14528_v40, %v12460_v16  ;;  %v14497_v40 = vld [vmem:[#allocation20 + $0x2c] sm:$0xf] }
 0x8df   :  { %6796 = vmatpush.bf16.msra.mxu2 %v12387_v15  ;;  %6715 = vmatpush.bf16.msra.mxu0 %v12683_v8  ;;  %v12492_v15 = vld [vmem:[#allocation20 + $0x170] sm:$0xf0]  ;;  %v4864_v19 = vpop.f32.mrf.mxu0  ;;  %v14517_v8 = vld [vmem:[#allocation20 + $0xcc] sm:$0xf]  ;;  %v12587_v14 = vor.u32 %v14562_v38, %v12586_v45  ;;  %v14547_v45 = vld [vmem:[#allocation20 + $0x1b4] sm:$0xf0] }
 0x8e0   :  { %6728 = vmatpush.bf16.msra.mxu1 %v12811_v46  ;;  %6710 = vmatmul.bf16.vlgmr.msrb.gmra.mxu3 %v16664_v20  ;;  %v12420_v46 = vld [vmem:[#allocation20 + $0xd8] sm:$0xf0]  ;;  %v12495_v56 = vor.u32 %v14536_v10, %v12492_v15  ;;  %v14505_v15 = vld [vmem:[#allocation20 + $0x6c] sm:$0xf] }
 0x8e1   :  { %6754 = vmatpush.bf16.msra.mxu3 %v12559_v44  ;;  %6044 = vmatmul.bf16.vlgmr.msrb.gmra.mxu1 %v16618_v30  ;;  %v4912_v30 = vpop.f32.mrf.mxu3  ;;  %v12602_v44 = vld [vmem:[#allocation20 + $0x240] sm:$0xf]  ;;  %v12340_v16 = vld [vmem:[#allocation20 + $0x38] sm:$0xf0] }
 0x8e2   :  { %v4877_v41 = vpop.f32.mrf.mxu1 }
 0x8e3   :  { %6797 = vmatpush.bf16.msra.mxu2 %v12371_v58  ;;  %6716 = vmatpush.bf16.msra.mxu0 %v12667_v18  ;;  %v12476_v58 = vld [vmem:[#allocation20 + $0x150] sm:$0xf0]  ;;  %v12423_v18 = vor.u32 %v14517_v8, %v12420_v46 }
 0x8e4   :  { %6729 = vmatpush.bf16.msra.mxu1 %v12795_v29  ;;  %v12603_v29 = vor.u32 %v14566_v36, %v12602_v44  ;;  %v12668_v41 = vld [vmem:[#allocation20 + $0x2d0] sm:$0xf0]  ;;  %v16683_v44 = vpack.c.bf16 %v16669_v37, %v16669_v37 }
 0x8e5   :  { %6755 = vmatpush.bf16.msra.mxu3 %v12543_v12  ;;  %v12479_v12 = vor.u32 %v14532_v55, %v12476_v58  ;;  %v12796_v8 = vld [vmem:[#allocation20 + $0x3d0] sm:$0xf0] }
 0x8e7   :  { %6798 = vmatpush.bf16.msra.mxu2 %v12355_v27  ;;  %6717 = vmatpush.bf16.msra.mxu0 %v12651_v11  ;;  %v12407_v27 = vor.u32 %v14513_v22, %v12404_v51  ;;  %v16677_v11 = vpop.f32.mrf.mxu0  ;;  %v14576_v22 = vld [vmem:[#allocation20 + $0x2a4] sm:$0xf]  ;;  %v12652_v51 = vld [vmem:[#allocation20 + $0x2b0] sm:$0xf0] }
 0x8e8   :  { %6730 = vmatpush.bf16.msra.mxu1 %v12779_v21 }
 0x8e9   :  { %6756 = vmatpush.bf16.msra.mxu3 %v12527_v28  ;;  %v5863_v54 = vpop.f32.mrf.mxu3  ;;  %v12570_v28 = vld [vmem:[#allocation20 + $0x200] sm:$0xf] }
 0x8ea   :  { %v16674_v9 = vadd.f32 %v5863_v54, %v16650_v53  ;;  %v14594_v53 = vld [vmem:[#allocation20 + $0x32c] sm:$0xf0]  ;;  %v16679_v21 = vpop.f32.mrf.mxu1  ;;  %v12571_v24 = vor.u32 %v14558_v23, %v12570_v28  ;;  %v14551_v54 = vld [vmem:[#allocation20 + $0x1d4] sm:$0xf0]  ;;  %v12764_v28 = vld [vmem:[#allocation20 + $0x390] sm:$0xf0]  ;;  %v12343_v23 = vor.u32 %v14497_v40, %v12340_v16 }
 0x8eb   :  { %6799 = vmatpush.bf16.msra.mxu2 %v12339_v1  ;;  %6718 = vmatpush.bf16.msra.mxu0 %v12635_v5  ;;  %v12715_v30 = vor.u32 %v14594_v53, %v12714_v60  ;;  %v12444_v1 = vld [vmem:[#allocation20 + $0x110] sm:$0xf0]  ;;  %v12655_v60 = vor.u32 %v14576_v22, %v12652_v51  ;;  %v12466_v40 = vld [vmem:[#allocation20 + $0x128] sm:$0xf]  ;;  %v14531_v16 = vld [vmem:[#allocation20 + $0x134] sm:$0xf0] }
 0x8ec   :  { %6731 = vmatpush.bf16.msra.mxu1 %v12763_v35  ;;  %v12684_v5 = vld [vmem:[#allocation20 + $0x2f0] sm:$0xf0]  ;;  %v14616_v35 = vld [vmem:[#allocation20 + $0x3e4] sm:$0xf]  ;;  %v12447_v63 = vor.u32 %v14524_v34, %v12444_v1  ;;  %v14493_v1 = vld [vmem:[#allocation20 + $0xc] sm:$0xf] }
 0x8ed   :  { %6757 = vmatpush.bf16.msra.mxu3 %v12511_v50  ;;  %v12562_v50 = vld [vmem:[#allocation20 + $0x1e8] sm:$0xf]  ;;  %v12687_v3 = vor.u32 %v14584_v2, %v12684_v5  ;;  %v12815_v10 = vor.u32 %v14616_v35, %v12812_v4  ;;  %v12767_v5 = vor.u32 %v14604_v26, %v12764_v28  ;;  %v12324_v35 = vld [vmem:[#allocation20 + $0x18] sm:$0xf0]  ;;  %v12938_v4 = vld [vmem:[#allocation20 + $0x8e0] sm:$0xf] }
 0x8ee   :  { %v12563_v19 = vor.u32 %v14555_v39, %v12562_v50  ;;  %v14568_v39 = vld [vmem:[#allocation20 + $0x264] sm:$0xf]  ;;  %v14766_v26 = vld [vmem:[#allocation20 + $0x88c] sm:$0xf0] }
 0x8ef   :  { %6800 = vmatpush.bf16.msra.mxu2 %v12323_v49  ;;  %6719 = vmatpush.bf16.msra.mxu0 %v12619_v32  ;;  %v12372_v49 = vld [vmem:[#allocation20 + $0x78] sm:$0xf0]  ;;  %v14612_v32 = vld [vmem:[#allocation20 + $0x3c4] sm:$0xf]  ;;  %v4925_v46 = vpop.f32.mrf.mxu0 }
 0x8f0   :  { %6732 = vmatpush.bf16.msra.mxu1 %v12747_v13  ;;  %v12375_v36 = vor.u32 %v14505_v15, %v12372_v49  ;;  %v12799_v58 = vor.u32 %v14612_v32, %v12796_v8  ;;  %v12327_v15 = vor.u32 %v14493_v1, %v12324_v35  ;;  %v14556_v28 = vld [vmem:[#allocation20 + $0x204] sm:$0xf]  ;;  %v12690_v1 = vld [vmem:[#allocation20 + $0x2e8] sm:$0xf]  ;;  %v14619_v35 = vld [vmem:[#allocation20 + $0x3f4] sm:$0xf0] }
 0x8f1   :  { %6758 = vmatpush.bf16.msra.mxu3 %v12495_v56  ;;  %v5865_v52 = vpop.f32.mrf.mxu3  ;;  %v12546_v56 = vld [vmem:[#allocation20 + $0x1c8] sm:$0xf] }
 0x8f2   :  { %6801 = vmatmul.bf16.vlgmr.msra.gmra.mxu2 %v16647_v43  ;;  %v4938_v13 = vpop.f32.mrf.mxu1  ;;  %v12547_v37 = vor.u32 %v14551_v54, %v12546_v56  ;;  %v14543_v52 = vld [vmem:[#allocation20 + $0x194] sm:$0xf0]  ;;  %v12604_v56 = vld [vmem:[#allocation20 + $0x250] sm:$0xf0]  ;;  %v14596_v54 = vld [vmem:[#allocation20 + $0x344] sm:$0xf] }
 0x8f3   :  { %6845 = vmatpush.bf16.msrb.mxu2 %v12439_v31  ;;  %6720 = vmatpush.bf16.msra.mxu0 %v12603_v29  ;;  %v14580_v31 = vld [vmem:[#allocation20 + $0x2c4] sm:$0xf]  ;;  %v12356_v29 = vld [vmem:[#allocation20 + $0x58] sm:$0xf0] }
 0x8f4   :  { %6733 = vmatpush.bf16.msra.mxu1 %v12731_v25  ;;  %v12671_v55 = vor.u32 %v14580_v31, %v12668_v41  ;;  %v14608_v25 = vld [vmem:[#allocation20 + $0x3a4] sm:$0xf]  ;;  %v14774_v41 = vld [vmem:[#allocation20 + $0x8cc] sm:$0xf0] }
 0x8f5   :  { %6759 = vmatpush.bf16.msra.mxu3 %v12479_v12  ;;  %v16685_v0 = vpop.f32.mrf.mxu2  ;;  %v12780_v12 = vld [vmem:[#allocation20 + $0x3b0] sm:$0xf0]  ;;  %v14564_v13 = vld [vmem:[#allocation20 + $0x244] sm:$0xf] }
 0x8f6   :  { %v12783_v53 = vor.u32 %v14608_v25, %v12780_v12  ;;  %v12607_v51 = vor.u32 %v14564_v13, %v12604_v56  ;;  %v12906_v25 = vld [vmem:[#allocation20 + $0x8a0] sm:$0xf]  ;;  %v14770_v12 = vld [vmem:[#allocation20 + $0x8ac] sm:$0xf0] }
 0x8f7   :  { %6846 = vmatpush.bf16.msrb.mxu2 %v12423_v18  ;;  %6721 = vmatpush.bf16.msra.mxu0 %v12587_v14  ;;  %v14501_v18 = vld [vmem:[#allocation20 + $0x4c] sm:$0xf]  ;;  %v12531_v14 = vor.u32 %v14547_v45, %v12530_v42 }
 0x8f8   :  { %6734 = vmatpush.bf16.msra.mxu1 %v12715_v30  ;;  %v12359_v38 = vor.u32 %v14501_v18, %v12356_v29  ;;  %v12482_v18 = vld [vmem:[#allocation20 + $0x148] sm:$0xf]  ;;  %v14535_v29 = vld [vmem:[#allocation20 + $0x154] sm:$0xf0] }
 0x8f9   :  { %6760 = vmatpush.bf16.msra.mxu3 %v12463_v33  ;;  %v12514_v33 = vld [vmem:[#allocation20 + $0x188] sm:$0xf]  ;;  %v12483_v45 = vor.u32 %v14535_v29, %v12482_v18  ;;  %v14758_v18 = vld [vmem:[#allocation20 + $0x84c] sm:$0xf0] }
 0x8fa   :  { %v12515_v50 = vor.u32 %v14543_v52, %v12514_v33  ;;  %v12467_v33 = vor.u32 %v14531_v16, %v12466_v40  ;;  %v12658_v29 = vld [vmem:[#allocation20 + $0x2a8] sm:$0xf] }
 0x8fb   :  { %6847 = vmatpush.bf16.msrb.mxu2 %v12407_v27  ;;  %6722 = vmatpush.bf16.msra.mxu0 %v12571_v24  ;;  %v14572_v27 = vld [vmem:[#allocation20 + $0x284] sm:$0xf]  ;;  %v5876_v30 = vpop.f32.mrf.mxu0  ;;  %v12642_v40 = vld [vmem:[#allocation20 + $0x288] sm:$0xf] }
 0x8fc   :  { %6735 = vmatpush.bf16.msra.mxu1 %v12699_v6  ;;  %v5877_v47 = vadd.f32 %v5876_v30, %v16674_v9  ;;  %v12639_v2 = vor.u32 %v14572_v27, %v12636_v62  ;;  %v12620_v6 = vld [vmem:[#allocation20 + $0x270] sm:$0xf0]  ;;  %v14539_v9 = vld [vmem:[#allocation20 + $0x174] sm:$0xf0]  ;;  %v12907_v27 = vor.u32 %v14770_v12, %v12906_v25  ;;  %v12890_v62 = vld [vmem:[#allocation20 + $0x880] sm:$0xf] }
 0x8fd   :  { %6761 = vmatpush.bf16.msra.mxu3 %v12447_v63  ;;  %v5956_v34 = vpop.f32.mrf.mxu2  ;;  %v14600_v63 = vld [vmem:[#allocation20 + $0x364] sm:$0xf]  ;;  %v12623_v31 = vor.u32 %v14568_v39, %v12620_v6  ;;  %v12564_v39 = vld [vmem:[#allocation20 + $0x1f8] sm:$0xf0]  ;;  %v14611_v25 = vld [vmem:[#allocation20 + $0x3b4] sm:$0xf0] }
 0x8fe   :  { %6723 = vmatmul.bf16.vlgmr.msra.gmra.mxu0 %v16683_v44  ;;  %v5889_v57 = vpop.f32.mrf.mxu1  ;;  %v12450_v34 = vld [vmem:[#allocation20 + $0x108] sm:$0xf]  ;;  %v14545_v12 = vld [vmem:[#allocation20 + $0x1ac] sm:$0xf] }
 0x8ff   :  { %6848 = vmatpush.bf16.msrb.mxu2 %v12391_v17  ;;  %6767 = vmatpush.bf16.msrb.mxu0 %v12687_v3  ;;  %v14778_v17 = vld [vmem:[#allocation20 + $0x8ec] sm:$0xf0]  ;;  %v16695_v24 = vadd.f32 %v5889_v57, %v5877_v47  ;;  %v12748_v3 = vld [vmem:[#allocation20 + $0x370] sm:$0xf0]  ;;  %v14588_v47 = vld [vmem:[#allocation20 + $0x304] sm:$0xf] }
 0x900   :  { %6780 = vmatpush.bf16.msrb.mxu1 %v12815_v10  ;;  %6762 = vmatmul.bf16.vlgmr.msra.gmra.mxu3 %v16664_v20  ;;  %v12498_v10 = vld [vmem:[#allocation20 + $0x168] sm:$0xf]  ;;  %v12939_v49 = vor.u32 %v14778_v17, %v12938_v4  ;;  %v12751_v32 = vor.u32 %v14600_v63, %v12748_v3  ;;  %v12700_v57 = vld [vmem:[#allocation20 + $0x310] sm:$0xf0]  ;;  %v12891_v4 = vor.u32 %v14766_v26, %v12890_v62  ;;  %v14607_v62 = vld [vmem:[#allocation20 + $0x394] sm:$0xf0] }
 0x901   :  { %6806 = vmatpush.bf16.msrb.mxu3 %v12563_v19  ;;  %6736 = vmatmul.bf16.vlgmr.msra.gmra.mxu1 %v16689_v7  ;;  %v12922_v19 = vld [vmem:[#allocation20 + $0x8c0] sm:$0xf]  ;;  %v12499_v8 = vor.u32 %v14539_v9, %v12498_v10  ;;  %v12703_v6 = vor.u32 %v14588_v47, %v12700_v57 }
 0x902   :  { %v12874_v9 = vld [vmem:[#allocation20 + $0x860] sm:$0xf] }
 0x903   :  { %6849 = vmatpush.bf16.msrb.mxu2 %v12375_v36  ;;  %6768 = vmatpush.bf16.msrb.mxu0 %v12671_v55  ;;  %v5915_v46 = vpop.f32.mrf.mxu3  ;;  %v5878_v55 = vpop.f32.mrf.mxu0  ;;  %v12826_v57 = vld [vmem:[#allocation20 + $0x800] sm:$0xf] }
 0x904   :  { %6781 = vmatpush.bf16.msrb.mxu1 %v12799_v58  ;;  %v16698_v36 = vadd.f32 %v5915_v46, %v16660_v59  ;;  %v12732_v58 = vld [vmem:[#allocation20 + $0x350] sm:$0xf0]  ;;  %v14592_v59 = vld [vmem:[#allocation20 + $0x324] sm:$0xf]  ;;  %v12548_v46 = vld [vmem:[#allocation20 + $0x1d8] sm:$0xf0] }
 0x905   :  { %6807 = vmatpush.bf16.msrb.mxu3 %v12547_v37  ;;  %v12923_v37 = vor.u32 %v14774_v41, %v12922_v19  ;;  %v12735_v42 = vor.u32 %v14596_v54, %v12732_v58  ;;  %v14583_v19 = vld [vmem:[#allocation20 + $0x2d4] sm:$0xf0]  ;;  %v12802_v41 = vld [vmem:[#allocation20 + $0x3c8] sm:$0xf]  ;;  %v12858_v58 = vld [vmem:[#allocation20 + $0x840] sm:$0xf] }
 0x906   :  { %v5891_v22 = vpop.f32.mrf.mxu1 }
 0x907   :  { %6850 = vmatpush.bf16.msrb.mxu2 %v12359_v38  ;;  %6769 = vmatpush.bf16.msrb.mxu0 %v12655_v60  ;;  %v14560_v38 = vld [vmem:[#allocation20 + $0x224] sm:$0xf]  ;;  %v12588_v60 = vld [vmem:[#allocation20 + $0x230] sm:$0xf0] }
 0x908   :  { %6782 = vmatpush.bf16.msrb.mxu1 %v12783_v53  ;;  %v12716_v53 = vld [vmem:[#allocation20 + $0x330] sm:$0xf0] }
 0x909   :  { %6808 = vmatpush.bf16.msrb.mxu3 %v12531_v14  ;;  %v12591_v14 = vor.u32 %v14560_v38, %v12588_v60  ;;  %v12719_v30 = vor.u32 %v14592_v59, %v12716_v53  ;;  %v12842_v59 = vld [vmem:[#allocation20 + $0x820] sm:$0xf]  ;;  %v14754_v53 = vld [vmem:[#allocation20 + $0x82c] sm:$0xf0] }
 0x90b   :  { %6851 = vmatpush.bf16.msrb.mxu2 %v12343_v23  ;;  %6770 = vmatpush.bf16.msrb.mxu0 %v12639_v2  ;;  %v5917_v52 = vpop.f32.mrf.mxu3  ;;  %v12572_v23 = vld [vmem:[#allocation20 + $0x210] sm:$0xf0]  ;;  %v14587_v2 = vld [vmem:[#allocation20 + $0x2f4] sm:$0xf0] }
 0x90c   :  { %6783 = vmatpush.bf16.msrb.mxu1 %v12767_v5  ;;  %v12818_v5 = vld [vmem:[#allocation20 + $0x3e8] sm:$0xf]  ;;  %v12575_v17 = vor.u32 %v14556_v28, %v12572_v23  ;;  %v12691_v3 = vor.u32 %v14587_v2, %v12690_v1  ;;  %v14541_v28 = vld [vmem:[#allocation20 + $0x18c] sm:$0xf]  ;;  %v14750_v1 = vld [vmem:[#allocation20 + $0x80c] sm:$0xf0] }
 0x90d   :  { %6809 = vmatpush.bf16.msrb.mxu3 %v12515_v50  ;;  %v14553_v50 = vld [vmem:[#allocation20 + $0x1ec] sm:$0xf]  ;;  %v12819_v10 = vor.u32 %v14619_v35, %v12818_v5  ;;  %v14776_v2 = vld [vmem:[#allocation20 + $0x8e4] sm:$0xf]  ;;  %v12940_v5 = vld [vmem:[#allocation20 + $0x8f0] sm:$0xf0] }
 0x90f   :  { %6852 = vmatpush.bf16.msrb.mxu2 %v12327_v15  ;;  %6771 = vmatpush.bf16.msrb.mxu0 %v12623_v31  ;;  %v14762_v15 = vld [vmem:[#allocation20 + $0x86c] sm:$0xf0]  ;;  %v12567_v31 = vor.u32 %v14553_v50, %v12564_v39  ;;  %v14571_v50 = vld [vmem:[#allocation20 + $0x274] sm:$0xf0]  ;;  %v12754_v39 = vld [vmem:[#allocation20 + $0x368] sm:$0xf] }
 0x910   :  { %6784 = vmatpush.bf16.msrb.mxu1 %v12751_v32  ;;  %v14615_v32 = vld [vmem:[#allocation20 + $0x3d4] sm:$0xf0]  ;;  %v12875_v13 = vor.u32 %v14762_v15, %v12874_v9  ;;  %v14772_v15 = vld [vmem:[#allocation20 + $0x8c4] sm:$0xf] }
 0x911   :  { %6810 = vmatpush.bf16.msrb.mxu3 %v12499_v8  ;;  %v14549_v8 = vld [vmem:[#allocation20 + $0x1cc] sm:$0xf]  ;;  %v12803_v55 = vor.u32 %v14615_v32, %v12802_v41  ;;  %v12610_v32 = vld [vmem:[#allocation20 + $0x248] sm:$0xf] }
 0x912   :  { %6853 = vmatmul.bf16.vlgmr.msrb.gmra.mxu2 %v16647_v43  ;;  %v14527_v43 = vld [vmem:[#allocation20 + $0x114] sm:$0xf0]  ;;  %v12551_v22 = vor.u32 %v14549_v8, %v12548_v46  ;;  %v12738_v46 = vld [vmem:[#allocation20 + $0x348] sm:$0xf] }
 0x913   :  { %7666 = vmatpush.bf16.msra.mxu2 %v12939_v49  ;;  %6772 = vmatpush.bf16.msrb.mxu0 %v12607_v51  ;;  %v12451_v63 = vor.u32 %v14527_v43, %v12450_v34  ;;  %v12674_v49 = vld [vmem:[#allocation20 + $0x2c8] sm:$0xf]  ;;  %v14567_v8 = vld [vmem:[#allocation20 + $0x254] sm:$0xf0] }
 0x914   :  { %6785 = vmatpush.bf16.msrb.mxu1 %v12735_v42  ;;  %v12675_v54 = vor.u32 %v14583_v19, %v12674_v49  ;;  %v12786_v51 = vld [vmem:[#allocation20 + $0x3a8] sm:$0xf]  ;;  %v12532_v42 = vld [vmem:[#allocation20 + $0x1b8] sm:$0xf0]  ;;  %v12924_v49 = vld [vmem:[#allocation20 + $0x8d0] sm:$0xf0] }
 0x915   :  { %6811 = vmatpush.bf16.msrb.mxu3 %v12483_v45  ;;  %v16701_v56 = vpop.f32.mrf.mxu2  ;;  %v12859_v45 = vor.u32 %v14758_v18, %v12858_v58  ;;  %v12787_v60 = vor.u32 %v14611_v25, %v12786_v51  ;;  %v12535_v16 = vor.u32 %v14545_v12, %v12532_v42  ;;  %v14533_v58 = vld [vmem:[#allocation20 + $0x14c] sm:$0xf]  ;;  %v12484_v18 = vld [vmem:[#allocation20 + $0x158] sm:$0xf0]  ;;  %v12611_v51 = vor.u32 %v14567_v8, %v12610_v32  ;;  %v14768_v25 = vld [vmem:[#allocation20 + $0x8a4] sm:$0xf] }
 0x916   :  { %v12908_v12 = vld [vmem:[#allocation20 + $0x8b0] sm:$0xf0]  ;;  %v12487_v42 = vor.u32 %v14533_v58, %v12484_v18  ;;  %v14806_v32 = vld [vmem:[#allocation20 + $0x9cc] sm:$0xf0]  ;;  %v14756_v18 = vld [vmem:[#allocation20 + $0x844] sm:$0xf] }
 0x917   :  { %7667 = vmatpush.bf16.msra.mxu2 %v12923_v37  ;;  %6773 = vmatpush.bf16.msrb.mxu0 %v12591_v14  ;;  %v14579_v37 = vld [vmem:[#allocation20 + $0x2b4] sm:$0xf0]  ;;  %v12770_v14 = vld [vmem:[#allocation20 + $0x388] sm:$0xf] }
 0x918   :  { %6786 = vmatpush.bf16.msrb.mxu1 %v12719_v30  ;;  %v12659_v38 = vor.u32 %v14579_v37, %v12658_v29  ;;  %v12516_v30 = vld [vmem:[#allocation20 + $0x198] sm:$0xf0]  ;;  %v12771_v43 = vor.u32 %v14607_v62, %v12770_v14  ;;  %v12927_v37 = vor.u32 %v14772_v15, %v12924_v49  ;;  %v12892_v14 = vld [vmem:[#allocation20 + $0x890] sm:$0xf0]  ;;  %v12578_v62 = vld [vmem:[#allocation20 + $0x208] sm:$0xf] }
 0x919   :  { %6812 = vmatpush.bf16.msrb.mxu3 %v12467_v33  ;;  %v12843_v33 = vor.u32 %v14754_v53, %v12842_v59  ;;  %v14595_v59 = vld [vmem:[#allocation20 + $0x334] sm:$0xf0]  ;;  %v14529_v53 = vld [vmem:[#allocation20 + $0x12c] sm:$0xf]  ;;  %v12676_v49 = vld [vmem:[#allocation20 + $0x2d8] sm:$0xf0] }
 0x91b   :  { %7668 = vmatpush.bf16.msra.mxu2 %v12907_v27  ;;  %6774 = vmatpush.bf16.msrb.mxu0 %v12575_v17  ;;  %v14575_v27 = vld [vmem:[#allocation20 + $0x294] sm:$0xf0]  ;;  %v5928_v26 = vpop.f32.mrf.mxu0  ;;  %v12626_v17 = vld [vmem:[#allocation20 + $0x268] sm:$0xf] }
 0x91c   :  { %6787 = vmatpush.bf16.msrb.mxu1 %v12703_v6  ;;  %v5929_v52 = vadd.f32 %v5928_v26, %v16698_v36  ;;  %v12643_v34 = vor.u32 %v14575_v27, %v12642_v40  ;;  %v14603_v6 = vld [vmem:[#allocation20 + $0x374] sm:$0xf0]  ;;  %v12500_v36 = vld [vmem:[#allocation20 + $0x178] sm:$0xf0]  ;;  %v12627_v9 = vor.u32 %v14571_v50, %v12626_v17  ;;  %v14764_v27 = vld [vmem:[#allocation20 + $0x884] sm:$0xf] }
 0x91d   :  { %6813 = vmatpush.bf16.msrb.mxu3 %v12451_v63  ;;  %v6008_v47 = vpop.f32.mrf.mxu2  ;;  %v14537_v63 = vld [vmem:[#allocation20 + $0x16c] sm:$0xf]  ;;  %v12468_v40 = vld [vmem:[#allocation20 + $0x138] sm:$0xf0]  ;;  %v13066_v17 = vld [vmem:[#allocation20 + $0x9e0] sm:$0xf] }
 0x91e   :  { %6775 = vmatmul.bf16.vlgmr.msrb.gmra.mxu0 %v16683_v44  ;;  %v5941_v23 = vpop.f32.mrf.mxu1  ;;  %v12503_v19 = vor.u32 %v14537_v63, %v12500_v36  ;;  %v14525_v47 = vld [vmem:[#allocation20 + $0x10c] sm:$0xf]  ;;  %v14810_v50 = vld [vmem:[#allocation20 + $0x9ec] sm:$0xf0] }
 0x91f   :  { %7669 = vmatpush.bf16.msra.mxu2 %v12891_v4  ;;  %6819 = vmatpush.bf16.msra.mxu0 %v12691_v3  ;;  %v16707_v35 = vadd.f32 %v5941_v23, %v5929_v52  ;;  %v12519_v4 = vor.u32 %v14541_v28, %v12516_v30  ;;  %v12827_v3 = vor.u32 %v14750_v1, %v12826_v57  ;;  %v12706_v52 = vld [vmem:[#allocation20 + $0x308] sm:$0xf]  ;;  %v14591_v23 = vld [vmem:[#allocation20 + $0x314] sm:$0xf0]  ;;  %v12452_v57 = vld [vmem:[#allocation20 + $0x118] sm:$0xf0] }
 0x920   :  { %6832 = vmatpush.bf16.msra.mxu1 %v12819_v10  ;;  %6814 = vmatmul.bf16.vlgmr.msrb.gmra.mxu3 %v16664_v20  ;;  %v12943_v10 = vor.u32 %v14776_v2, %v12940_v5  ;;  %v12471_v28 = vor.u32 %v14529_v53, %v12468_v40  ;;  %v14617_v1 = vld [vmem:[#allocation20 + $0x3ec] sm:$0xf]  ;;  %v12820_v2 = vld [vmem:[#allocation20 + $0x3f8] sm:$0xf0]  ;;  %v12895_v5 = vor.u32 %v14764_v27, %v12892_v14  ;;  %v12844_v53 = vld [vmem:[#allocation20 + $0x830] sm:$0xf0] }
 0x921   :  { %6858 = vmatpush.bf16.msra.mxu3 %v12567_v31  ;;  %6788 = vmatmul.bf16.vlgmr.msrb.gmra.mxu1 %v16689_v7  ;;  %v12755_v31 = vor.u32 %v14603_v6, %v12754_v39  ;;  %v12707_v39 = vor.u32 %v14591_v23, %v12706_v52  ;;  %v12455_v6 = vor.u32 %v14525_v47, %v12452_v57  ;;  %v14573_v40 = vld [vmem:[#allocation20 + $0x28c] sm:$0xf]  ;;  %v12772_v14 = vld [vmem:[#allocation20 + $0x398] sm:$0xf0]  ;;  %v14748_v52 = vld [vmem:[#allocation20 + $0x804] sm:$0xf] }
 0x922   :  { %v12823_v36 = vor.u32 %v14617_v1, %v12820_v2  ;;  %v13067_v15 = vor.u32 %v14810_v50, %v13066_v17  ;;  %v14605_v27 = vld [vmem:[#allocation20 + $0x38c] sm:$0xf]  ;;  %v14779_v1 = vld [vmem:[#allocation20 + $0x8f4] sm:$0xf0]  ;;  %v12628_v17 = vld [vmem:[#allocation20 + $0x278] sm:$0xf0] }
 0x923   :  { %7670 = vmatpush.bf16.msra.mxu2 %v12875_v13  ;;  %6820 = vmatpush.bf16.msra.mxu0 %v12675_v54  ;;  %v5967_v41 = vpop.f32.mrf.mxu3  ;;  %v5930_v54 = vpop.f32.mrf.mxu0  ;;  %v12775_v57 = vor.u32 %v14605_v27, %v12772_v14  ;;  %v14601_v50 = vld [vmem:[#allocation20 + $0x36c] sm:$0xf] }
 0x924   :  { %6833 = vmatpush.bf16.msra.mxu1 %v12803_v55  ;;  %v16710_v13 = vadd.f32 %v5967_v41, %v16685_v0  ;;  %v14599_v55 = vld [vmem:[#allocation20 + $0x354] sm:$0xf0]  ;;  %v13050_v41 = vld [vmem:[#allocation20 + $0x9c0] sm:$0xf]  ;;  %v14557_v27 = vld [vmem:[#allocation20 + $0x20c] sm:$0xf] }
 0x925   :  { %6859 = vmatpush.bf16.msra.mxu3 %v12551_v22  ;;  %v16714_v22 = vpack.c.bf16 %v16643_v61, %v16643_v61  ;;  %v12739_v0 = vor.u32 %v14599_v55, %v12738_v46  ;;  %v12911_v61 = vor.u32 %v14768_v25, %v12908_v12  ;;  %v12660_v25 = vld [vmem:[#allocation20 + $0x2b8] sm:$0xf0]  ;;  %v14609_v12 = vld [vmem:[#allocation20 + $0x3ac] sm:$0xf] }
 0x926   :  { %v5943_v29 = vpop.f32.mrf.mxu1 }
 0x927   :  { %7671 = vmatpush.bf16.msra.mxu2 %v12859_v45  ;;  %6821 = vmatpush.bf16.msra.mxu0 %v12659_v38  ;;  %v12594_v45 = vld [vmem:[#allocation20 + $0x228] sm:$0xf]  ;;  %v14563_v38 = vld [vmem:[#allocation20 + $0x234] sm:$0xf0]  ;;  %v12860_v29 = vld [vmem:[#allocation20 + $0x850] sm:$0xf0] }
 0x928   :  { %6834 = vmatpush.bf16.msra.mxu1 %v12787_v60  ;;  %v12722_v60 = vld [vmem:[#allocation20 + $0x328] sm:$0xf] }
 0x929   :  { %6860 = vmatpush.bf16.msra.mxu3 %v12535_v16  ;;  %v12595_v16 = vor.u32 %v14563_v38, %v12594_v45  ;;  %v12723_v26 = vor.u32 %v14595_v59, %v12722_v60  ;;  %v14802_v45 = vld [vmem:[#allocation20 + $0x9ac] sm:$0xf0]  ;;  %v14752_v59 = vld [vmem:[#allocation20 + $0x824] sm:$0xf] }
 0x92b   :  { %7672 = vmatpush.bf16.msra.mxu2 %v12843_v33  ;;  %6822 = vmatpush.bf16.msra.mxu0 %v12643_v34  ;;  %v5969_v30 = vpop.f32.mrf.mxu3  ;;  %v14559_v33 = vld [vmem:[#allocation20 + $0x214] sm:$0xf0]  ;;  %v14585_v34 = vld [vmem:[#allocation20 + $0x2ec] sm:$0xf] }
 0x92c   :  { %6835 = vmatpush.bf16.msra.mxu1 %v12771_v43  ;;  %v12692_v43 = vld [vmem:[#allocation20 + $0x2f8] sm:$0xf0] }
 0x92d   :  { %6861 = vmatpush.bf16.msra.mxu3 %v12519_v4  ;;  %v12579_v4 = vor.u32 %v14559_v33, %v12578_v62  ;;  %v12695_v63 = vor.u32 %v14585_v34, %v12692_v43  ;;  %v12828_v34 = vld [vmem:[#allocation20 + $0x810] sm:$0xf0]  ;;  %v12946_v43 = vld [vmem:[#allocation20 + $0x8e8] sm:$0xf] }
 0x92f   :  { %7673 = vmatpush.bf16.msra.mxu2 %v12827_v3  ;;  %6823 = vmatpush.bf16.msra.mxu0 %v12627_v9  ;;  %v14760_v3 = vld [vmem:[#allocation20 + $0x864] sm:$0xf]  ;;  %v14581_v9 = vld [vmem:[#allocation20 + $0x2cc] sm:$0xf] }
 0x930   :  { %6836 = vmatpush.bf16.msra.mxu1 %v12755_v31  ;;  %v14613_v31 = vld [vmem:[#allocation20 + $0x3cc] sm:$0xf]  ;;  %v12679_v55 = vor.u32 %v14581_v9, %v12676_v49  ;;  %v14775_v9 = vld [vmem:[#allocation20 + $0x8d4] sm:$0xf0] }
 0x931   :  { %6862 = vmatpush.bf16.msra.mxu3 %v12503_v19  ;;  %v12804_v19 = vld [vmem:[#allocation20 + $0x3d8] sm:$0xf0] }
 0x932   :  { %7674 = vmatmul.bf16.vlgmr.msra.gmra.mxu2 %v16714_v22  ;;  %v12807_v58 = vor.u32 %v14613_v31, %v12804_v19  ;;  %v14565_v19 = vld [vmem:[#allocation20 + $0x24c] sm:$0xf] }
 0x933   :  { %7718 = vmatpush.bf16.msrb.mxu2 %v12943_v10  ;;  %6824 = vmatpush.bf16.msra.mxu0 %v12611_v51  ;;  %v12876_v10 = vld [vmem:[#allocation20 + $0x870] sm:$0xf0]  ;;  %v13051_v51 = vor.u32 %v14806_v32, %v13050_v41  ;;  %v12612_v41 = vld [vmem:[#allocation20 + $0x258] sm:$0xf0]  ;;  %v14597_v32 = vld [vmem:[#allocation20 + $0x34c] sm:$0xf] }
 0x934   :  { %6837 = vmatpush.bf16.msra.mxu1 %v12739_v0  ;;  %v12879_v8 = vor.u32 %v14760_v3, %v12876_v10  ;;  %v12788_v0 = vld [vmem:[#allocation20 + $0x3b8] sm:$0xf0]  ;;  %v12930_v10 = vld [vmem:[#allocation20 + $0x8c8] sm:$0xf] }
 0x935   :  { %6863 = vmatpush.bf16.msra.mxu3 %v12487_v42  ;;  %v6698_v46 = vpop.f32.mrf.mxu2  ;;  %v13034_v42 = vld [vmem:[#allocation20 + $0x9a0] sm:$0xf]  ;;  %v12791_v60 = vor.u32 %v14609_v12, %v12788_v0  ;;  %v14771_v12 = vld [vmem:[#allocation20 + $0x8b4] sm:$0xf0] }
 0x936   :  { %v16718_v54 = vadd.f32 %v6698_v46, %v16695_v24  ;;  %v12863_v24 = vor.u32 %v14756_v18, %v12860_v29  ;;  %v14790_v18 = vld [vmem:[#allocation20 + $0x94c] sm:$0xf0] }
 0x937   :  { %7719 = vmatpush.bf16.msrb.mxu2 %v12927_v37  ;;  %6825 = vmatpush.bf16.msra.mxu0 %v12595_v16  ;;  %v14577_v37 = vld [vmem:[#allocation20 + $0x2ac] sm:$0xf]  ;;  %v12644_v16 = vld [vmem:[#allocation20 + $0x298] sm:$0xf0] }
 0x938   :  { %6838 = vmatpush.bf16.msra.mxu1 %v12723_v26  ;;  %v12663_v38 = vor.u32 %v14577_v37, %v12660_v25  ;;  %v13018_v26 = vld [vmem:[#allocation20 + $0x980] sm:$0xf]  ;;  %v12647_v47 = vor.u32 %v14573_v40, %v12644_v16  ;;  %v12931_v37 = vor.u32 %v14775_v9, %v12930_v10  ;;  %v12914_v25 = vld [vmem:[#allocation20 + $0x8a8] sm:$0xf]  ;;  %v14767_v16 = vld [vmem:[#allocation20 + $0x894] sm:$0xf0] }
 0x939   :  { %6864 = vmatpush.bf16.msra.mxu3 %v12471_v28  ;;  %v14798_v28 = vld [vmem:[#allocation20 + $0x98c] sm:$0xf0]  ;;  %v13306_v9 = vld [vmem:[#allocation20 + $0xbc0] sm:$0xf] }
 0x93a   :  { %v14838_v10 = vld [vmem:[#allocation20 + $0xacc] sm:$0xf0] }
 0x93b   :  { %7720 = vmatpush.bf16.msrb.mxu2 %v12911_v61  ;;  %6826 = vmatpush.bf16.msra.mxu0 %v12579_v4  ;;  %v13035_v61 = vor.u32 %v14802_v45, %v13034_v42  ;;  %v5980_v62 = vpop.f32.mrf.mxu0  ;;  %v14569_v4 = vld [vmem:[#allocation20 + $0x26c] sm:$0xf] }
 0x93c   :  { %6839 = vmatpush.bf16.msra.mxu1 %v12707_v39  ;;  %v5981_v30 = vadd.f32 %v5980_v62, %v16710_v13  ;;  %v12756_v39 = vld [vmem:[#allocation20 + $0x378] sm:$0xf0]  ;;  %v14794_v13 = vld [vmem:[#allocation20 + $0x96c] sm:$0xf0]  ;;  %v12631_v3 = vor.u32 %v14569_v4, %v12628_v17  ;;  %v14561_v45 = vld [vmem:[#allocation20 + $0x22c] sm:$0xf] }
 0x93d   :  { %6865 = vmatpush.bf16.msra.mxu3 %v12455_v6  ;;  %v6700_v23 = vpop.f32.mrf.mxu2  ;;  %v13002_v6 = vld [vmem:[#allocation20 + $0x960] sm:$0xf]  ;;  %v13068_v4 = vld [vmem:[#allocation20 + $0x9f0] sm:$0xf0] }
 0x93e   :  { %6827 = vmatmul.bf16.vlgmr.msra.gmra.mxu0 %v16683_v44  ;;  %v5993_v33 = vpop.f32.mrf.mxu1  ;;  %v13003_v49 = vor.u32 %v14794_v13, %v13002_v6  ;;  %v13194_v23 = vld [vmem:[#allocation20 + $0xae0] sm:$0xf]  ;;  %v12882_v13 = vld [vmem:[#allocation20 + $0x868] sm:$0xf] }
 0x93f   :  { %7721 = vmatpush.bf16.msrb.mxu2 %v12895_v5  ;;  %6871 = vmatpush.bf16.msrb.mxu0 %v12695_v63  ;;  %v16724_v2 = vadd.f32 %v5993_v33, %v5981_v30  ;;  %v13019_v5 = vor.u32 %v14798_v28, %v13018_v26  ;;  %v12831_v63 = vor.u32 %v14748_v52, %v12828_v34  ;;  %v12580_v28 = vld [vmem:[#allocation20 + $0x218] sm:$0xf0]  ;;  %v12954_v33 = vld [vmem:[#allocation20 + $0x900] sm:$0xf]  ;;  %v14782_v52 = vld [vmem:[#allocation20 + $0x90c] sm:$0xf0] }
 0x940   :  { %6884 = vmatpush.bf16.msrb.mxu1 %v12823_v36  ;;  %6866 = vmatmul.bf16.vlgmr.msra.gmra.mxu3 %v16664_v20  ;;  %v12847_v20 = vor.u32 %v14752_v59, %v12844_v53  ;;  %v12947_v36 = vor.u32 %v14779_v1, %v12946_v43  ;;  %v14786_v59 = vld [vmem:[#allocation20 + $0x92c] sm:$0xf0]  ;;  %v12915_v53 = vor.u32 %v14771_v12, %v12914_v25  ;;  %v12708_v30 = vld [vmem:[#allocation20 + $0x318] sm:$0xf0]  ;;  %v13290_v25 = vld [vmem:[#allocation20 + $0xba0] sm:$0xf] }
 0x941   :  { %7679 = vmatpush.bf16.msrb.mxu3 %v13067_v15  ;;  %6840 = vmatmul.bf16.vlgmr.msra.gmra.mxu1 %v16689_v7  ;;  %v12759_v15 = vor.u32 %v14601_v50, %v12756_v39  ;;  %v14874_v34 = vld [vmem:[#allocation20 + $0xbec] sm:$0xf0]  ;;  %v12583_v1 = vor.u32 %v14557_v27, %v12580_v28  ;;  %v12955_v50 = vor.u32 %v14782_v52, %v12954_v33  ;;  %v14751_v33 = vld [vmem:[#allocation20 + $0x814] sm:$0xf0]  ;;  %v14777_v52 = vld [vmem:[#allocation20 + $0x8ec] sm:$0xf] }
 0x942   :  { %v14866_v12 = vld [vmem:[#allocation20 + $0xbac] sm:$0xf0] }
 0x943   :  { %7722 = vmatpush.bf16.msrb.mxu2 %v12879_v8  ;;  %6872 = vmatpush.bf16.msrb.mxu0 %v12679_v55  ;;  %v6019_v31 = vpop.f32.mrf.mxu3  ;;  %v5982_v46 = vpop.f32.mrf.mxu0  ;;  %v12740_v55 = vld [vmem:[#allocation20 + $0x358] sm:$0xf0] }
 0x944   :  { %6885 = vmatpush.bf16.msrb.mxu1 %v12807_v58  ;;  %v16727_v8 = vadd.f32 %v6019_v31, %v16701_v56  ;;  %v12986_v58 = vld [vmem:[#allocation20 + $0x940] sm:$0xf]  ;;  %v12743_v0 = vor.u32 %v14597_v32, %v12740_v55  ;;  %v14593_v56 = vld [vmem:[#allocation20 + $0x32c] sm:$0xf]  ;;  %v13052_v31 = vld [vmem:[#allocation20 + $0x9d0] sm:$0xf0] }
 0x945   :  { %7680 = vmatpush.bf16.msrb.mxu3 %v13051_v51  ;;  %v12615_v51 = vor.u32 %v14565_v19, %v12612_v41  ;;  %v12987_v42 = vor.u32 %v14790_v18, %v12986_v58  ;;  %v16732_v19 = vpack.c.bf16 %v16658_v48, %v16658_v48  ;;  %v12866_v18 = vld [vmem:[#allocation20 + $0x848] sm:$0xf]  ;;  %v14834_v48 = vld [vmem:[#allocation20 + $0xaac] sm:$0xf0] }
 0x946   :  { %v5995_v29 = vpop.f32.mrf.mxu1 }
 0x947   :  { %7723 = vmatpush.bf16.msrb.mxu2 %v12863_v24  ;;  %6873 = vmatpush.bf16.msrb.mxu0 %v12663_v38  ;;  %v12596_v24 = vld [vmem:[#allocation20 + $0x238] sm:$0xf0]  ;;  %v14759_v29 = vld [vmem:[#allocation20 + $0x854] sm:$0xf0] }
 0x948   :  { %6886 = vmatpush.bf16.msrb.mxu1 %v12791_v60  ;;  %v12724_v38 = vld [vmem:[#allocation20 + $0x338] sm:$0xf0]  ;;  %v12970_v60 = vld [vmem:[#allocation20 + $0x920] sm:$0xf]  ;;  %v12599_v40 = vor.u32 %v14561_v45, %v12596_v24  ;;  %v13291_v24 = vor.u32 %v14866_v12, %v13290_v25 }
 0x949   :  { %7681 = vmatpush.bf16.msrb.mxu3 %v13035_v61  ;;  %v12898_v61 = vld [vmem:[#allocation20 + $0x888] sm:$0xf]  ;;  %v12727_v14 = vor.u32 %v14593_v56, %v12724_v38  ;;  %v12971_v62 = vor.u32 %v14786_v59, %v12970_v60  ;;  %v14755_v38 = vld [vmem:[#allocation20 + $0x834] sm:$0xf0]  ;;  %v13146_v60 = vld [vmem:[#allocation20 + $0xa80] sm:$0xf] }
 0x94a   :  { %v12899_v43 = vor.u32 %v14767_v16, %v12898_v61  ;;  %v12850_v56 = vld [vmem:[#allocation20 + $0x828] sm:$0xf]  ;;  %v14830_v59 = vld [vmem:[#allocation20 + $0xa8c] sm:$0xf0]  ;;  %v13020_v16 = vld [vmem:[#allocation20 + $0x990] sm:$0xf0] }
 0x94b   :  { %7724 = vmatpush.bf16.msrb.mxu2 %v12847_v20  ;;  %6874 = vmatpush.bf16.msrb.mxu0 %v12647_v47  ;;  %v6021_v26 = vpop.f32.mrf.mxu3  ;;  %v14589_v20 = vld [vmem:[#allocation20 + $0x30c] sm:$0xf]  ;;  %v14842_v47 = vld [vmem:[#allocation20 + $0xaec] sm:$0xf0]  ;;  %v12851_v27 = vor.u32 %v14755_v38, %v12850_v56  ;;  %v13098_v12 = vld [vmem:[#allocation20 + $0xa20] sm:$0xf] }
 0x94c   :  { %6887 = vmatpush.bf16.msrb.mxu1 %v12775_v57  ;;  %v13322_v57 = vld [vmem:[#allocation20 + $0xbe0] sm:$0xf]  ;;  %v12711_v17 = vor.u32 %v14589_v20, %v12708_v30  ;;  %v13195_v39 = vor.u32 %v14842_v47, %v13194_v23  ;;  %v12834_v26 = vld [vmem:[#allocation20 + $0x808] sm:$0xf]  ;;  %v13147_v20 = vor.u32 %v14830_v59, %v13146_v60  ;;  %v12948_v23 = vld [vmem:[#allocation20 + $0x8f8] sm:$0xf0] }
 0x94d   :  { %7682 = vmatpush.bf16.msrb.mxu3 %v13019_v5  ;;  %v14808_v5 = vld [vmem:[#allocation20 + $0x9e4] sm:$0xf]  ;;  %v13323_v6 = vor.u32 %v14874_v34, %v13322_v57  ;;  %v13130_v34 = vld [vmem:[#allocation20 + $0xa60] sm:$0xf]  ;;  %v14765_v38 = vld [vmem:[#allocation20 + $0x88c] sm:$0xf] }
 0x94e   :  { %v12900_v60 = vld [vmem:[#allocation20 + $0x898] sm:$0xf0] }
 0x94f   :  { %7725 = vmatpush.bf16.msrb.mxu2 %v12831_v63  ;;  %6875 = vmatpush.bf16.msrb.mxu0 %v12631_v3  ;;  %v14763_v63 = vld [vmem:[#allocation20 + $0x874] sm:$0xf0]  ;;  %v13071_v3 = vor.u32 %v14808_v5, %v13068_v4  ;;  %v14858_v5 = vld [vmem:[#allocation20 + $0xb6c] sm:$0xf0]  ;;  %v14792_v4 = vld [vmem:[#allocation20 + $0x964] sm:$0xf] }
 0x950   :  { %6888 = vmatpush.bf16.msrb.mxu1 %v12759_v15  ;;  %v14870_v15 = vld [vmem:[#allocation20 + $0xbcc] sm:$0xf0]  ;;  %v12883_v41 = vor.u32 %v14763_v63, %v12882_v13  ;;  %v12932_v13 = vld [vmem:[#allocation20 + $0x8d8] sm:$0xf0] }
 0x951   :  { %7683 = vmatpush.bf16.msrb.mxu3 %v13003_v49  ;;  %v14804_v49 = vld [vmem:[#allocation20 + $0x9c4] sm:$0xf]  ;;  %v13307_v58 = vor.u32 %v14870_v15, %v13306_v9  ;;  %v14822_v9 = vld [vmem:[#allocation20 + $0xa4c] sm:$0xf0]  ;;  %v13242_v15 = vld [vmem:[#allocation20 + $0xb40] sm:$0xf] }
 0x952   :  { %7726 = vmatmul.bf16.vlgmr.msrb.gmra.mxu2 %v16714_v22 }
 0x953   :  { %7770 = vmatpush.bf16.msra.mxu2 %v12947_v36  ;;  %6876 = vmatpush.bf16.msrb.mxu0 %v12615_v51  ;;  %v13178_v36 = vld [vmem:[#allocation20 + $0xac0] sm:$0xf]  ;;  %v13055_v51 = vor.u32 %v14804_v49, %v13052_v31 }
 0x954   :  { %6889 = vmatpush.bf16.msrb.mxu1 %v12743_v0  ;;  %v13179_v55 = vor.u32 %v14838_v10, %v13178_v36  ;;  %v14800_v0 = vld [vmem:[#allocation20 + $0x9a4] sm:$0xf]  ;;  %v13114_v10 = vld [vmem:[#allocation20 + $0xa40] sm:$0xf] }
 0x955   :  { %7684 = vmatpush.bf16.msrb.mxu3 %v12987_v42  ;;  %v6750_v32 = vpop.f32.mrf.mxu2  ;;  %v13036_v42 = vld [vmem:[#allocation20 + $0x9b0] sm:$0xf0] }
 0x956   :  { %v16735_v46 = vadd.f32 %v6750_v32, %v16707_v35  ;;  %v12867_v35 = vor.u32 %v14759_v29, %v12866_v18  ;;  %v14788_v32 = vld [vmem:[#allocation20 + $0x944] sm:$0xf]  ;;  %v13115_v29 = vor.u32 %v14822_v9, %v13114_v10 }
 0x957   :  { %7771 = vmatpush.bf16.msra.mxu2 %v12931_v37  ;;  %6877 = vmatpush.bf16.msrb.mxu0 %v12599_v40  ;;  %v13162_v37 = vld [vmem:[#allocation20 + $0xaa0] sm:$0xf]  ;;  %v14862_v40 = vld [vmem:[#allocation20 + $0xb8c] sm:$0xf0] }
 0x958   :  { %6890 = vmatpush.bf16.msrb.mxu1 %v12727_v14  ;;  %v13163_v45 = vor.u32 %v14834_v48, %v13162_v37  ;;  %v14769_v37 = vld [vmem:[#allocation20 + $0x8ac] sm:$0xf] }
 0x959   :  { %7685 = vmatpush.bf16.msrb.mxu3 %v12971_v62 }
 0x95b   :  { %7772 = vmatpush.bf16.msra.mxu2 %v12915_v53  ;;  %6878 = vmatpush.bf16.msrb.mxu0 %v12583_v1  ;;  %v13274_v53 = vld [vmem:[#allocation20 + $0xb80] sm:$0xf]  ;;  %v6032_v61 = vpop.f32.mrf.mxu0 }
 0x95c   :  { %6891 = vmatpush.bf16.msrb.mxu1 %v12711_v17  ;;  %v6033_v14 = vadd.f32 %v6032_v61, %v16727_v8  ;;  %v13275_v30 = vor.u32 %v14862_v40, %v13274_v53  ;;  %v13258_v1 = vld [vmem:[#allocation20 + $0xb60] sm:$0xf]  ;;  %v13004_v8 = vld [vmem:[#allocation20 + $0x970] sm:$0xf0]  ;;  %v12835_v17 = vor.u32 %v14751_v33, %v12834_v26  ;;  %v14814_v61 = vld [vmem:[#allocation20 + $0xa0c] sm:$0xf0] }
 0x95d   :  { %7686 = vmatpush.bf16.msrb.mxu3 %v12955_v50  ;;  %v6752_v28 = vpop.f32.mrf.mxu2  ;;  %v12951_v50 = vor.u32 %v14777_v52, %v12948_v23  ;;  %v13259_v63 = vor.u32 %v14858_v5, %v13258_v1  ;;  %v13007_v36 = vor.u32 %v14792_v4, %v13004_v8  ;;  %v13196_v26 = vld [vmem:[#allocation20 + $0xaf0] sm:$0xf0]  ;;  %v13074_v52 = vld [vmem:[#allocation20 + $0x9e8] sm:$0xf]  ;;  %v14811_v23 = vld [vmem:[#allocation20 + $0x9f4] sm:$0xf0] }
 0x95e   :  { %6879 = vmatmul.bf16.vlgmr.msrb.gmra.mxu0 %v16683_v44  ;;  %v13039_v44 = vor.u32 %v14800_v0, %v13036_v42  ;;  %v6045_v62 = vpop.f32.mrf.mxu1  ;;  %v14818_v0 = vld [vmem:[#allocation20 + $0xa2c] sm:$0xf0]  ;;  %v14872_v28 = vld [vmem:[#allocation20 + $0xbe4] sm:$0xf]  ;;  %v14761_v5 = vld [vmem:[#allocation20 + $0x86c] sm:$0xf] }
 0x95f   :  { %7773 = vmatpush.bf16.msra.mxu2 %v12899_v43  ;;  %7692 = vmatpush.bf16.msra.mxu0 %v13195_v39  ;;  %v16741_v47 = vadd.f32 %v6045_v62, %v6033_v14  ;;  %v14826_v43 = vld [vmem:[#allocation20 + $0xa6c] sm:$0xf0]  ;;  %v13099_v56 = vor.u32 %v14818_v0, %v13098_v12  ;;  %v12956_v14 = vld [vmem:[#allocation20 + $0x910] sm:$0xf0]  ;;  %v14840_v62 = vld [vmem:[#allocation20 + $0xae4] sm:$0xf] }
 0x960   :  { %7705 = vmatpush.bf16.msra.mxu1 %v13323_v6  ;;  %7687 = vmatmul.bf16.vlgmr.msrb.gmra.mxu3 %v16732_v19  ;;  %v13131_v39 = vor.u32 %v14826_v43, %v13130_v34  ;;  %v14773_v6 = vld [vmem:[#allocation20 + $0x8cc] sm:$0xf]  ;;  %v14850_v42 = vld [vmem:[#allocation20 + $0xb2c] sm:$0xf0]  ;;  %v13199_v43 = vor.u32 %v14840_v62, %v13196_v26  ;;  %v12884_v4 = vld [vmem:[#allocation20 + $0x878] sm:$0xf0] }
 0x961   :  { %7731 = vmatpush.bf16.msra.mxu3 %v13071_v3  ;;  %6892 = vmatmul.bf16.vlgmr.msrb.gmra.mxu1 %v16689_v7  ;;  %v14796_v7 = vld [vmem:[#allocation20 + $0x984] sm:$0xf]  ;;  %v12935_v18 = vor.u32 %v14773_v6, %v12932_v13  ;;  %v13308_v6 = vld [vmem:[#allocation20 + $0xbd0] sm:$0xf0]  ;;  %v13058_v13 = vld [vmem:[#allocation20 + $0x9c8] sm:$0xf]  ;;  %v12887_v10 = vor.u32 %v14761_v5, %v12884_v4 }
 0x962   :  { %v13023_v57 = vor.u32 %v14796_v7, %v13020_v16  ;;  %v13210_v7 = vld [vmem:[#allocation20 + $0xb00] sm:$0xf]  ;;  %v14846_v16 = vld [vmem:[#allocation20 + $0xb0c] sm:$0xf0]  ;;  %v14836_v8 = vld [vmem:[#allocation20 + $0xac4] sm:$0xf] }
 0x963   :  { %7774 = vmatpush.bf16.msra.mxu2 %v12883_v41  ;;  %7693 = vmatpush.bf16.msra.mxu0 %v13179_v55  ;;  %v6711_v3 = vpop.f32.mrf.mxu3  ;;  %v6034_v31 = vpop.f32.mrf.mxu0  ;;  %v14854_v41 = vld [vmem:[#allocation20 + $0xb4c] sm:$0xf0]  ;;  %v12988_v55 = vld [vmem:[#allocation20 + $0x950] sm:$0xf0]  ;;  %v14753_v12 = vld [vmem:[#allocation20 + $0x82c] sm:$0xf] }
 0x964   :  { %7706 = vmatpush.bf16.msra.mxu1 %v13307_v58  ;;  %v16744_v49 = vadd.f32 %v6711_v3, %v16718_v54  ;;  %v13243_v48 = vor.u32 %v14854_v41, %v13242_v15  ;;  %v12991_v25 = vor.u32 %v14788_v32, %v12988_v55  ;;  %v13226_v54 = vld [vmem:[#allocation20 + $0xb20] sm:$0xf]  ;;  %v16753_v3 = vpack.c.bf16 %v16679_v21, %v16679_v21  ;;  %v14757_v32 = vld [vmem:[#allocation20 + $0x84c] sm:$0xf]  ;;  %v12868_v55 = vld [vmem:[#allocation20 + $0x858] sm:$0xf0] }
 0x965   :  { %7732 = vmatpush.bf16.msra.mxu3 %v13055_v51  ;;  %v12916_v51 = vld [vmem:[#allocation20 + $0x8b8] sm:$0xf0]  ;;  %v13227_v59 = vor.u32 %v14850_v42, %v13226_v54  ;;  %v13164_v21 = vld [vmem:[#allocation20 + $0xab0] sm:$0xf0]  ;;  %v14828_v54 = vld [vmem:[#allocation20 + $0xa84] sm:$0xf] }
 0x966   :  { %v6047_v58 = vpop.f32.mrf.mxu1  ;;  %v12852_v0 = vld [vmem:[#allocation20 + $0x838] sm:$0xf0]  ;;  %v13116_v5 = vld [vmem:[#allocation20 + $0xa50] sm:$0xf0]  ;;  %v14852_v4 = vld [vmem:[#allocation20 + $0xb44] sm:$0xf] }
 0x967   :  { %7775 = vmatpush.bf16.msra.mxu2 %v12867_v35  ;;  %7694 = vmatpush.bf16.msra.mxu0 %v13163_v45  ;;  %v14784_v35 = vld [vmem:[#allocation20 + $0x924] sm:$0xf]  ;;  %v12972_v45 = vld [vmem:[#allocation20 + $0x930] sm:$0xf0] }
 0x968   :  { %7707 = vmatpush.bf16.msra.mxu1 %v13291_v24  ;;  %v12919_v24 = vor.u32 %v14769_v37, %v12916_v51  ;;  %v12975_v53 = vor.u32 %v14784_v35, %v12972_v45  ;;  %v14832_v58 = vld [vmem:[#allocation20 + $0xaa4] sm:$0xf]  ;;  %v13042_v37 = vld [vmem:[#allocation20 + $0x9a8] sm:$0xf]  ;;  %v14803_v51 = vld [vmem:[#allocation20 + $0x9b4] sm:$0xf0] }
 0x969   :  { %7733 = vmatpush.bf16.msra.mxu3 %v13039_v44  ;;  %v13082_v44 = vld [vmem:[#allocation20 + $0xa00] sm:$0xf]  ;;  %v13043_v42 = vor.u32 %v14803_v51, %v13042_v37  ;;  %v13148_v35 = vld [vmem:[#allocation20 + $0xa90] sm:$0xf0]  ;;  %v14860_v45 = vld [vmem:[#allocation20 + $0xb84] sm:$0xf] }
 0x96a   :  { %v13083_v33 = vor.u32 %v14814_v61, %v13082_v44  ;;  %v12855_v44 = vor.u32 %v14753_v12, %v12852_v0  ;;  %v13151_v61 = vor.u32 %v14828_v54, %v13148_v35  ;;  %v14844_v37 = vld [vmem:[#allocation20 + $0xb04] sm:$0xf]  ;;  %v14783_v12 = vld [vmem:[#allocation20 + $0x914] sm:$0xf0]  ;;  %v13202_v0 = vld [vmem:[#allocation20 + $0xae8] sm:$0xf] }
 0x96b   :  { %7776 = vmatpush.bf16.msra.mxu2 %v12851_v27  ;;  %7695 = vmatpush.bf16.msra.mxu0 %v13147_v20  ;;  %v6713_v40 = vpop.f32.mrf.mxu3  ;;  %v14780_v27 = vld [vmem:[#allocation20 + $0x904] sm:$0xf]  ;;  %v13324_v20 = vld [vmem:[#allocation20 + $0xbf0] sm:$0xf0]  ;;  %v14843_v54 = vld [vmem:[#allocation20 + $0xaf4] sm:$0xf0] }
 0x96c   :  { %7708 = vmatpush.bf16.msra.mxu1 %v13275_v30  ;;  %v12903_v30 = vor.u32 %v14765_v38, %v12900_v60  ;;  %v12959_v34 = vor.u32 %v14780_v27, %v12956_v14  ;;  %v13327_v1 = vor.u32 %v14872_v28, %v13324_v20  ;;  %v13026_v38 = vld [vmem:[#allocation20 + $0x988] sm:$0xf]  ;;  %v14799_v60 = vld [vmem:[#allocation20 + $0x994] sm:$0xf0]  ;;  %v12836_v27 = vld [vmem:[#allocation20 + $0x818] sm:$0xf0] }
 0x96d   :  { %7734 = vmatpush.bf16.msra.mxu3 %v13023_v57  ;;  %v13211_v57 = vor.u32 %v14846_v16, %v13210_v7  ;;  %v14749_v16 = vld [vmem:[#allocation20 + $0x80c] sm:$0xf]  ;;  %v14824_v14 = vld [vmem:[#allocation20 + $0xa64] sm:$0xf]  ;;  %v13027_v26 = vor.u32 %v14799_v60, %v13026_v38  ;;  %v13132_v28 = vld [vmem:[#allocation20 + $0xa70] sm:$0xf0]  ;;  %v13203_v60 = vor.u32 %v14843_v54, %v13202_v0 }
 0x96e   :  { %v14856_v20 = vld [vmem:[#allocation20 + $0xb64] sm:$0xf]  ;;  %v14875_v35 = vld [vmem:[#allocation20 + $0xbf4] sm:$0xf0]  ;;  %v14789_v54 = vld [vmem:[#allocation20 + $0x94c] sm:$0xf] }
 0x96f   :  { %7777 = vmatpush.bf16.msra.mxu2 %v12835_v17  ;;  %7696 = vmatpush.bf16.msra.mxu0 %v13131_v39  ;;  %v13075_v17 = vor.u32 %v14811_v23, %v13074_v52  ;;  %v14868_v39 = vld [vmem:[#allocation20 + $0xbc4] sm:$0xf]  ;;  %v14795_v52 = vld [vmem:[#allocation20 + $0x974] sm:$0xf0]  ;;  %v13135_v23 = vor.u32 %v14824_v14, %v13132_v28 }
 0x970   :  { %7709 = vmatpush.bf16.msra.mxu1 %v13259_v63  ;;  %v14807_v63 = vld [vmem:[#allocation20 + $0x9d4] sm:$0xf0]  ;;  %v13311_v41 = vor.u32 %v14868_v39, %v13308_v6  ;;  %v12994_v39 = vld [vmem:[#allocation20 + $0x948] sm:$0xf] }
 0x971   :  { %7735 = vmatpush.bf16.msra.mxu3 %v13007_v36  ;;  %v16749_v36 = vpack.c.bf16 %v16677_v11, %v16677_v11  ;;  %v13059_v11 = vor.u32 %v14807_v63, %v13058_v13  ;;  %v14791_v6 = vld [vmem:[#allocation20 + $0x954] sm:$0xf0] }
 0x972   :  { %7778 = vmatmul.bf16.vlgmr.msra.gmra.mxu2 %v16714_v22  ;;  %v14855_v0 = vld [vmem:[#allocation20 + $0xb54] sm:$0xf0] }
 0x973   :  { %7822 = vmatpush.bf16.msrb.mxu2 %v12951_v50  ;;  %7697 = vmatpush.bf16.msra.mxu0 %v13115_v29  ;;  %v13180_v50 = vld [vmem:[#allocation20 + $0xad0] sm:$0xf0] }
 0x974   :  { %7710 = vmatpush.bf16.msra.mxu1 %v13243_v48  ;;  %v13183_v31 = vor.u32 %v14836_v8, %v13180_v50  ;;  %v13292_v29 = vld [vmem:[#allocation20 + $0xbb0] sm:$0xf0]  ;;  %v13167_v48 = vor.u32 %v14832_v58, %v13164_v21  ;;  %v12978_v58 = vld [vmem:[#allocation20 + $0x928] sm:$0xf] }
 0x975   :  { %7736 = vmatpush.bf16.msra.mxu3 %v12991_v25  ;;  %v6802_v9 = vpop.f32.mrf.mxu2  ;;  %v13244_v8 = vld [vmem:[#allocation20 + $0xb50] sm:$0xf0] }
 0x976   :  { %v16756_v15 = vadd.f32 %v6802_v9, %v16724_v2  ;;  %v12871_v2 = vor.u32 %v14757_v32, %v12868_v55  ;;  %v14816_v9 = vld [vmem:[#allocation20 + $0xa24] sm:$0xf]  ;;  %v13228_v55 = vld [vmem:[#allocation20 + $0xb30] sm:$0xf0] }
 0x977   :  { %7823 = vmatpush.bf16.msrb.mxu2 %v12935_v18  ;;  %7698 = vmatpush.bf16.msra.mxu0 %v13099_v56  ;;  %v14864_v18 = vld [vmem:[#allocation20 + $0xba4] sm:$0xf] }
 0x978   :  { %7711 = vmatpush.bf16.msra.mxu1 %v13227_v59  ;;  %v13295_v25 = vor.u32 %v14864_v18, %v13292_v29  ;;  %v14848_v32 = vld [vmem:[#allocation20 + $0xb24] sm:$0xf]  ;;  %v13084_v29 = vld [vmem:[#allocation20 + $0xa10] sm:$0xf0] }
 0x979   :  { %7737 = vmatpush.bf16.msra.mxu3 %v12975_v53  ;;  %v13231_v21 = vor.u32 %v14848_v32, %v13228_v55  ;;  %v14812_v18 = vld [vmem:[#allocation20 + $0xa04] sm:$0xf]  ;;  %v13138_v55 = vld [vmem:[#allocation20 + $0xa68] sm:$0xf] }
 0x97b   :  { %7824 = vmatpush.bf16.msrb.mxu2 %v12919_v24  ;;  %7699 = vmatpush.bf16.msra.mxu0 %v13083_v33  ;;  %v13276_v24 = vld [vmem:[#allocation20 + $0xb90] sm:$0xf0]  ;;  %v6724_v56 = vpop.f32.mrf.mxu0  ;;  %v13010_v33 = vld [vmem:[#allocation20 + $0x968] sm:$0xf] }
 0x97c   :  { %7712 = vmatpush.bf16.msra.mxu1 %v13211_v57  ;;  %v6725_v59 = vadd.f32 %v6724_v56, %v16744_v49  ;;  %v13279_v7 = vor.u32 %v14860_v45, %v13276_v24  ;;  %v12839_v49 = vor.u32 %v14749_v16, %v12836_v27  ;;  %v13076_v45 = vld [vmem:[#allocation20 + $0x9f8] sm:$0xf0]  ;;  %v13087_v24 = vor.u32 %v14812_v18, %v13084_v29  ;;  %v14805_v16 = vld [vmem:[#allocation20 + $0x9cc] sm:$0xf] }
 0x97d   :  { %7738 = vmatpush.bf16.msra.mxu3 %v12959_v34  ;;  %v6804_v40 = vpop.f32.mrf.mxu2  ;;  %v14820_v34 = vld [vmem:[#allocation20 + $0xa44] sm:$0xf]  ;;  %v13060_v27 = vld [vmem:[#allocation20 + $0x9d8] sm:$0xf0]  ;;  %v14793_v18 = vld [vmem:[#allocation20 + $0x96c] sm:$0xf] }
 0x97e   :  { %7700 = vmatmul.bf16.vlgmr.msra.gmra.mxu0 %v16749_v36  ;;  %v6737_v53 = vpop.f32.mrf.mxu1  ;;  %v13119_v63 = vor.u32 %v14820_v34, %v13116_v5  ;;  %v14839_v40 = vld [vmem:[#allocation20 + $0xad4] sm:$0xf0]  ;;  %v13044_v34 = vld [vmem:[#allocation20 + $0x9b8] sm:$0xf0]  ;;  %v13154_v5 = vld [vmem:[#allocation20 + $0xa88] sm:$0xf] }
 0x97f   :  { %7825 = vmatpush.bf16.msrb.mxu2 %v12903_v30  ;;  %7744 = vmatpush.bf16.msrb.mxu0 %v13199_v43  ;;  %v16762_v62 = vadd.f32 %v6737_v53, %v6725_v59  ;;  %v13260_v30 = vld [vmem:[#allocation20 + $0xb70] sm:$0xf0]  ;;  %v13011_v43 = vor.u32 %v14795_v52, %v13010_v33  ;;  %v13186_v53 = vld [vmem:[#allocation20 + $0xac8] sm:$0xf]  ;;  %v14835_v52 = vld [vmem:[#allocation20 + $0xab4] sm:$0xf0] }
 0x980   :  { %7757 = vmatpush.bf16.msrb.mxu1 %v13327_v1  ;;  %7739 = vmatmul.bf16.vlgmr.msra.gmra.mxu3 %v16732_v19  ;;  %v13263_v57 = vor.u32 %v14856_v20, %v13260_v30  ;;  %v13063_v30 = vor.u32 %v14805_v16, %v13060_v27  ;;  %v13170_v33 = vld [vmem:[#allocation20 + $0xaa8] sm:$0xf]  ;;  %v13012_v29 = vld [vmem:[#allocation20 + $0x978] sm:$0xf0] }
 0x981   :  { %7783 = vmatpush.bf16.msrb.mxu3 %v13075_v17  ;;  %7713 = vmatmul.bf16.vlgmr.msra.gmra.mxu1 %v16753_v3  ;;  %v13090_v16 = vld [vmem:[#allocation20 + $0xa08] sm:$0xf] }
 0x983   :  { %7826 = vmatpush.bf16.msrb.mxu2 %v12887_v10  ;;  %7745 = vmatpush.bf16.msrb.mxu0 %v13183_v31  ;;  %v6763_v1 = vpop.f32.mrf.mxu3  ;;  %v6726_v50 = vpop.f32.mrf.mxu0  ;;  %v13247_v10 = vor.u32 %v14852_v4, %v13244_v8  ;;  %v12995_v31 = vor.u32 %v14791_v6, %v12994_v39  ;;  %v14831_v4 = vld [vmem:[#allocation20 + $0xa94] sm:$0xf0]  ;;  %v13282_v8 = vld [vmem:[#allocation20 + $0xb88] sm:$0xf]  ;;  %v14797_v39 = vld [vmem:[#allocation20 + $0x98c] sm:$0xf] }
 0x984   :  { %7758 = vmatpush.bf16.msrb.mxu1 %v13311_v41  ;;  %v16765_v17 = vadd.f32 %v6763_v1, %v16735_v46  ;;  %v13100_v41 = vld [vmem:[#allocation20 + $0xa30] sm:$0xf0]  ;;  %v14787_v46 = vld [vmem:[#allocation20 + $0x934] sm:$0xf0]  ;;  %v13028_v6 = vld [vmem:[#allocation20 + $0x998] sm:$0xf0] }
 0x985   :  { %7784 = vmatpush.bf16.msrb.mxu3 %v13059_v11  ;;  %v13103_v11 = vor.u32 %v14816_v9, %v13100_v41  ;;  %v12979_v51 = vor.u32 %v14787_v46, %v12978_v58  ;;  %v14863_v50 = vld [vmem:[#allocation20 + $0xb94] sm:$0xf0]  ;;  %v13031_v32 = vor.u32 %v14797_v39, %v13028_v6  ;;  %v13266_v46 = vld [vmem:[#allocation20 + $0xb68] sm:$0xf]  ;;  %v14869_v39 = vld [vmem:[#allocation20 + $0xbcc] sm:$0xf] }
 0x986   :  { %v6739_v13 = vpop.f32.mrf.mxu1  ;;  %v13283_v41 = vor.u32 %v14863_v50, %v13282_v8  ;;  %v14827_v58 = vld [vmem:[#allocation20 + $0xa74] sm:$0xf0]  ;;  %v14837_v8 = vld [vmem:[#allocation20 + $0xacc] sm:$0xf]  ;;  %v13188_v50 = vld [vmem:[#allocation20 + $0xad8] sm:$0xf0] }
 0x987   :  { %7827 = vmatpush.bf16.msrb.mxu2 %v12871_v2  ;;  %7746 = vmatpush.bf16.msrb.mxu0 %v13167_v48  ;;  %v13212_v48 = vld [vmem:[#allocation20 + $0xb10] sm:$0xf0]  ;;  %v13316_v6 = vld [vmem:[#allocation20 + $0xbd8] sm:$0xf0] }
 0x988   :  { %7759 = vmatpush.bf16.msrb.mxu1 %v13295_v25  ;;  %v12962_v25 = vld [vmem:[#allocation20 + $0x908] sm:$0xf]  ;;  %v13215_v56 = vor.u32 %v14844_v37, %v13212_v48  ;;  %v13139_v37 = vor.u32 %v14827_v58, %v13138_v55  ;;  %v14823_v48 = vld [vmem:[#allocation20 + $0xa54] sm:$0xf0] }
 0x989   :  { %7785 = vmatpush.bf16.msrb.mxu3 %v13043_v42  ;;  %v13330_v42 = vld [vmem:[#allocation20 + $0xbe8] sm:$0xf]  ;;  %v12963_v38 = vor.u32 %v14783_v12, %v12962_v25 }
 0x98a   :  { %v13250_v25 = vld [vmem:[#allocation20 + $0xb48] sm:$0xf] }
 0x98b   :  { %7828 = vmatpush.bf16.msrb.mxu2 %v12855_v44  ;;  %7747 = vmatpush.bf16.msrb.mxu0 %v13151_v61  ;;  %v6765_v2 = vpop.f32.mrf.mxu3  ;;  %v13331_v44 = vor.u32 %v14875_v35, %v13330_v42  ;;  %v13314_v61 = vld [vmem:[#allocation20 + $0xbc8] sm:$0xf]  ;;  %v12996_v42 = vld [vmem:[#allocation20 + $0x958] sm:$0xf0] }
 0x98c   :  { %7760 = vmatpush.bf16.msrb.mxu1 %v13279_v7  ;;  %v14871_v7 = vld [vmem:[#allocation20 + $0xbd4] sm:$0xf0]  ;;  %v13122_v2 = vld [vmem:[#allocation20 + $0xa48] sm:$0xf] }
 0x98d   :  { %7786 = vmatpush.bf16.msrb.mxu3 %v13027_v26  ;;  %v13187_v26 = vor.u32 %v14839_v40, %v13186_v53  ;;  %v13315_v20 = vor.u32 %v14871_v7, %v13314_v61  ;;  %v14851_v53 = vld [vmem:[#allocation20 + $0xb34] sm:$0xf0]  ;;  %v14785_v40 = vld [vmem:[#allocation20 + $0x92c] sm:$0xf]  ;;  %v12980_v61 = vld [vmem:[#allocation20 + $0x938] sm:$0xf0] }
 0x98e   :  { %v12983_v27 = vor.u32 %v14785_v40, %v12980_v61 }
 0x98f   :  { %7829 = vmatpush.bf16.msrb.mxu2 %v12839_v49  ;;  %7748 = vmatpush.bf16.msrb.mxu0 %v13135_v23  ;;  %v13298_v49 = vld [vmem:[#allocation20 + $0xba8] sm:$0xf]  ;;  %v14867_v23 = vld [vmem:[#allocation20 + $0xbb4] sm:$0xf0] }
 0x990   :  { %7761 = vmatpush.bf16.msrb.mxu1 %v13263_v57  ;;  %v14801_v57 = vld [vmem:[#allocation20 + $0x9ac] sm:$0xf] }
 0x991   :  { %7787 = vmatpush.bf16.msrb.mxu3 %v13011_v43  ;;  %v13171_v43 = vor.u32 %v14835_v52, %v13170_v33  ;;  %v13047_v1 = vor.u32 %v14801_v57, %v13044_v34  ;;  %v14781_v33 = vld [vmem:[#allocation20 + $0x90c] sm:$0xf]  ;;  %v12964_v52 = vld [vmem:[#allocation20 + $0x918] sm:$0xf0] }
 0x992   :  { %7830 = vmatmul.bf16.vlgmr.msrb.gmra.mxu2 %v16714_v22  ;;  %v14809_v22 = vld [vmem:[#allocation20 + $0x9ec] sm:$0xf]  ;;  %v13332_v34 = vld [vmem:[#allocation20 + $0xbf8] sm:$0xf0] }
 0x993   :  { %7749 = vmatpush.bf16.msrb.mxu0 %v13119_v63  ;;  %v13079_v59 = vor.u32 %v14809_v22, %v13076_v45  ;;  %v14873_v57 = vld [vmem:[#allocation20 + $0xbec] sm:$0xf] }
 0x994   :  { %7762 = vmatpush.bf16.msrb.mxu1 %v13247_v10 }
 0x995   :  { %7788 = vmatpush.bf16.msrb.mxu3 %v12995_v31  ;;  %v6854_v14 = vpop.f32.mrf.mxu2  ;;  %v13155_v31 = vor.u32 %v14831_v4, %v13154_v5  ;;  %v13335_v4 = vor.u32 %v14873_v57, %v13332_v34 }
 0x996   :  { %v16769_v28 = vadd.f32 %v6854_v14, %v16741_v47  ;;  %v13299_v47 = vor.u32 %v14867_v23, %v13298_v49  ;;  %v14815_v14 = vld [vmem:[#allocation20 + $0xa14] sm:$0xf0]  ;;  %v14841_v49 = vld [vmem:[#allocation20 + $0xaec] sm:$0xf]  ;;  %v13204_v23 = vld [vmem:[#allocation20 + $0xaf8] sm:$0xf0] }
 0x997   :  { %7750 = vmatpush.bf16.msrb.mxu0 %v13103_v11  ;;  %v13207_v5 = vor.u32 %v14841_v49, %v13204_v23 }
 0x998   :  { %7763 = vmatpush.bf16.msrb.mxu1 %v13231_v21  ;;  %v14859_v21 = vld [vmem:[#allocation20 + $0xb74] sm:$0xf0] }
 0x999   :  { %7789 = vmatpush.bf16.msrb.mxu3 %v12979_v51  ;;  %v13015_v51 = vor.u32 %v14793_v18, %v13012_v29  ;;  %v14861_v18 = vld [vmem:[#allocation20 + $0xb8c] sm:$0xf]  ;;  %v13284_v29 = vld [vmem:[#allocation20 + $0xb98] sm:$0xf0] }
 0x99b   :  { %7751 = vmatpush.bf16.msrb.mxu0 %v13087_v24  ;;  %v6776_v13 = vpop.f32.mrf.mxu0  ;;  %v13123_v24 = vor.u32 %v14823_v48, %v13122_v2 }
 0x99c   :  { %7764 = vmatpush.bf16.msrb.mxu1 %v13215_v56  ;;  %v6777_v63 = vadd.f32 %v6776_v13, %v16765_v17  ;;  %v13267_v17 = vor.u32 %v14859_v21, %v13266_v46  ;;  %v13251_v56 = vor.u32 %v14855_v0, %v13250_v25  ;;  %v14829_v46 = vld [vmem:[#allocation20 + $0xa8c] sm:$0xf]  ;;  %v13156_v21 = vld [vmem:[#allocation20 + $0xa98] sm:$0xf0]  ;;  %v13287_v25 = vor.u32 %v14861_v18, %v13284_v29 }
 0x99d   :  { %7790 = vmatpush.bf16.msrb.mxu3 %v12963_v38  ;;  %v6856_v9 = vpop.f32.mrf.mxu2  ;;  %v12999_v38 = vor.u32 %v14789_v54, %v12996_v42  ;;  %v13159_v48 = vor.u32 %v14829_v46, %v13156_v21  ;;  %v13140_v0 = vld [vmem:[#allocation20 + $0xa78] sm:$0xf0] }
 0x99e   :  { %7752 = vmatmul.bf16.vlgmr.msrb.gmra.mxu0 %v16749_v36  ;;  %v6789_v10 = vpop.f32.mrf.mxu1  ;;  %v14833_v9 = vld [vmem:[#allocation20 + $0xaac] sm:$0xf]  ;;  %v13268_v54 = vld [vmem:[#allocation20 + $0xb78] sm:$0xf0] }
 0x99f   :  { %7796 = vmatpush.bf16.msra.mxu0 %v13203_v60  ;;  %7765 = vmatmul.bf16.vlgmr.msrb.gmra.mxu1 %v16753_v3  ;;  %v16775_v11 = vadd.f32 %v6789_v10, %v6777_v63  ;;  %v13106_v60 = vld [vmem:[#allocation20 + $0xa28] sm:$0xf]  ;;  %v13191_v63 = vor.u32 %v14837_v8, %v13188_v50  ;;  %v13319_v10 = vor.u32 %v14869_v39, %v13316_v6 }
 0x9a0   :  { %7809 = vmatpush.bf16.msra.mxu1 %v13331_v44  ;;  %7791 = vmatmul.bf16.vlgmr.msrb.gmra.mxu3 %v16732_v19  ;;  %v14819_v44 = vld [vmem:[#allocation20 + $0xa34] sm:$0xf0] }
 0x9a1   :  { %7835 = vmatpush.bf16.msra.mxu3 %v13079_v59  ;;  %v13234_v59 = vld [vmem:[#allocation20 + $0xb28] sm:$0xf]  ;;  %v13107_v7 = vor.u32 %v14819_v44, %v13106_v60  ;;  %v13252_v60 = vld [vmem:[#allocation20 + $0xb58] sm:$0xf0] }
 0x9a3   :  { %7797 = vmatpush.bf16.msra.mxu0 %v13187_v26  ;;  %v6815_v12 = vpop.f32.mrf.mxu3  ;;  %v6778_v22 = vpop.f32.mrf.mxu0  ;;  %v13218_v26 = vld [vmem:[#allocation20 + $0xb08] sm:$0xf] }
 0x9a4   :  { %7810 = vmatpush.bf16.msra.mxu1 %v13315_v20  ;;  %v16778_v35 = vadd.f32 %v6815_v12, %v16756_v15  ;;  %v13235_v15 = vor.u32 %v14851_v53, %v13234_v59  ;;  %v14847_v20 = vld [vmem:[#allocation20 + $0xb14] sm:$0xf0]  ;;  %v14825_v12 = vld [vmem:[#allocation20 + $0xa6c] sm:$0xf] }
 0x9a5   :  { %7836 = vmatpush.bf16.msra.mxu3 %v13063_v30  ;;  %v13143_v22 = vor.u32 %v14825_v12, %v13140_v0 }
 0x9a6   :  { %v6791_v45 = vpop.f32.mrf.mxu1 }
 0x9a7   :  { %7798 = vmatpush.bf16.msra.mxu0 %v13171_v43  ;;  %v13091_v43 = vor.u32 %v14815_v14, %v13090_v16  ;;  %v13108_v16 = vld [vmem:[#allocation20 + $0xa38] sm:$0xf0] }
 0x9a8   :  { %7811 = vmatpush.bf16.msra.mxu1 %v13299_v47  ;;  %v13219_v47 = vor.u32 %v14847_v20, %v13218_v26  ;;  %v14813_v20 = vld [vmem:[#allocation20 + $0xa0c] sm:$0xf] }
 0x9a9   :  { %7837 = vmatpush.bf16.msra.mxu3 %v13047_v1  ;;  %v12967_v1 = vor.u32 %v14781_v33, %v12964_v52  ;;  %v14845_v33 = vld [vmem:[#allocation20 + $0xb0c] sm:$0xf]  ;;  %v13220_v52 = vld [vmem:[#allocation20 + $0xb18] sm:$0xf0] }
 0x9aa   :  { %v13223_v23 = vor.u32 %v14845_v33, %v13220_v52 }
 0x9ab   :  { %7799 = vmatpush.bf16.msra.mxu0 %v13155_v31  ;;  %v6817_v30 = vpop.f32.mrf.mxu3  ;;  %v13172_v31 = vld [vmem:[#allocation20 + $0xab8] sm:$0xf0] }
 0x9ac   :  { %7812 = vmatpush.bf16.msra.mxu1 %v13283_v41  ;;  %v14865_v41 = vld [vmem:[#allocation20 + $0xbac] sm:$0xf]  ;;  %v13175_v55 = vor.u32 %v14833_v9, %v13172_v31  ;;  %v13092_v30 = vld [vmem:[#allocation20 + $0xa18] sm:$0xf0]  ;;  %v16794_v9 = vld [vmem:[#allocation21] sm:$0xf] }
 0x9ad   :  { %7838 = vmatpush.bf16.msra.mxu3 %v13031_v32  ;;  %v13300_v32 = vld [vmem:[#allocation20 + $0xbb8] sm:$0xf0] }
 0x9ae   :  { %v13303_v58 = vor.u32 %v14865_v41, %v13300_v32  ;;  %v7880_v32 = vperm.slane %v16794_v9, 0 }
 0x9af   :  { %7800 = vmatpush.bf16.msra.mxu0 %v13139_v37 }
 0x9b0   :  { %7813 = vmatpush.bf16.msra.mxu1 %v13267_v17 }
 0x9b1   :  { %7839 = vmatpush.bf16.msra.mxu3 %v13015_v51 }
 0x9b3   :  { %7801 = vmatpush.bf16.msra.mxu0 %v13123_v24  ;;  %v14821_v24 = vld [vmem:[#allocation20 + $0xa4c] sm:$0xf] }
 0x9b4   :  { %7814 = vmatpush.bf16.msra.mxu1 %v13251_v56  ;;  %v13124_v56 = vld [vmem:[#allocation20 + $0xa58] sm:$0xf0] }
 0x9b5   :  { %7840 = vmatpush.bf16.msra.mxu3 %v12999_v38  ;;  %v16780_v13 = vpop.f32.mrf.mxu2  ;;  %v14853_v38 = vld [vmem:[#allocation20 + $0xb4c] sm:$0xf]  ;;  %v13127_v40 = vor.u32 %v14821_v24, %v13124_v56 }
 0x9b6   :  { %v13255_v61 = vor.u32 %v14853_v38, %v13252_v60 }
 0x9b7   :  { %7802 = vmatpush.bf16.msra.mxu0 %v13107_v7  ;;  %v14817_v7 = vld [vmem:[#allocation20 + $0xa2c] sm:$0xf] }
 0x9b8   :  { %7815 = vmatpush.bf16.msra.mxu1 %v13235_v15  ;;  %v14849_v15 = vld [vmem:[#allocation20 + $0xb2c] sm:$0xf]  ;;  %v13111_v14 = vor.u32 %v14817_v7, %v13108_v16 }
 0x9b9   :  { %7841 = vmatpush.bf16.msra.mxu3 %v12983_v27  ;;  %v13236_v27 = vld [vmem:[#allocation20 + $0xb38] sm:$0xf0] }
 0x9ba   :  { %v13239_v26 = vor.u32 %v14849_v15, %v13236_v27 }
 0x9bb   :  { %7803 = vmatpush.bf16.msra.mxu0 %v13091_v43  ;;  %v6828_v37 = vpop.f32.mrf.mxu0 }
 0x9bc   :  { %7816 = vmatpush.bf16.msra.mxu1 %v13219_v47  ;;  %v6829_v17 = vadd.f32 %v6828_v37, %v16778_v35 }
 0x9bd   :  { %7842 = vmatpush.bf16.msra.mxu3 %v12967_v1  ;;  %v7677_v2 = vpop.f32.mrf.mxu2 }
 0x9be   :  { %7804 = vmatmul.bf16.vlgmr.msra.gmra.mxu0 %v16749_v36  ;;  %v6841_v51 = vpop.f32.mrf.mxu1 }
 0x9bf   :  { %7848 = vmatpush.bf16.msrb.mxu0 %v13207_v5  ;;  %7817 = vmatmul.bf16.vlgmr.msra.gmra.mxu1 %v16753_v3  ;;  %v16786_v42 = vadd.f32 %v6841_v51, %v6829_v17 }
 0x9c0   :  { %7861 = vmatpush.bf16.msrb.mxu1 %v13335_v4  ;;  %7843 = vmatmul.bf16.vlgmr.msra.gmra.mxu3 %v16732_v19  ;;  %v14857_v19 = vld [vmem:[#allocation20 + $0xb6c] sm:$0xf] }
 0x9c1   :  { %v13271_v45 = vor.u32 %v14857_v19, %v13268_v54  ;;  %v7969_v19 = vld [vmem:[#allocation23 + $0x2] sm:$0x3] }
 0x9c3   :  { %7849 = vmatpush.bf16.msrb.mxu0 %v13191_v63  ;;  %v6867_v44 = vpop.f32.mrf.mxu3  ;;  %v6830_v59 = vpop.f32.mrf.mxu0 }
 0x9c4   :  { %7862 = vmatpush.bf16.msrb.mxu1 %v13319_v10  ;;  %v6868_v35 = vadd.f32 %v6867_v44, %v16769_v28  ;;  %v13095_v28 = vor.u32 %v14813_v20, %v13092_v30 }
 0x9c6   :  { %v6843_v53 = vpop.f32.mrf.mxu1 }
 0x9c7   :  { %7850 = vmatpush.bf16.msrb.mxu0 %v13175_v55 }
 0x9c8   :  { %7863 = vmatpush.bf16.msrb.mxu1 %v13303_v58 }
 0x9cb   :  { %7851 = vmatpush.bf16.msrb.mxu0 %v13159_v48  ;;  %v6869_v49 = vpop.f32.mrf.mxu3 }
 0x9cc   :  { %7864 = vmatpush.bf16.msrb.mxu1 %v13287_v25 }
 0x9cf   :  { %7852 = vmatpush.bf16.msrb.mxu0 %v13143_v22  ;;  %v7881_v22 = vperm.slane %v16794_v9, 1 }
 0x9d0   :  { %7865 = vmatpush.bf16.msrb.mxu1 %v13271_v45 }
 0x9d3   :  { %7853 = vmatpush.bf16.msrb.mxu0 %v13127_v40 }
 0x9d4   :  { %7866 = vmatpush.bf16.msrb.mxu1 %v13255_v61 }
 0x9d5   :  { %v7727_v57 = vpop.f32.mrf.mxu2 }
 0x9d7   :  { %7854 = vmatpush.bf16.msrb.mxu0 %v13111_v14 }
 0x9d8   :  { %7867 = vmatpush.bf16.msrb.mxu1 %v13239_v26 }
 0x9db   :  { %7855 = vmatpush.bf16.msrb.mxu0 %v13095_v28  ;;  %v6880_v34 = vpop.f32.mrf.mxu0 }
 0x9dc   :  { %7868 = vmatpush.bf16.msrb.mxu1 %v13223_v23  ;;  %v6881_v43 = vadd.f32 %v6880_v34, %v6868_v35 }
 0x9dd   :  { %v7729_v1 = vpop.f32.mrf.mxu2 }
 0x9de   :  { %7856 = vmatmul.bf16.vlgmr.msrb.gmra.mxu0 %v16749_v36  ;;  %v6893_v47 = vpop.f32.mrf.mxu1 }
 0x9df   :  { %7869 = vmatmul.bf16.vlgmr.msrb.gmra.mxu1 %v16753_v3  ;;  %v16791_v5 = vadd.f32 %v6893_v47, %v6881_v43 }
 0x9e3   :  { %v7688_v4 = vpop.f32.mrf.mxu3  ;;  %v6882_v8 = vpop.f32.mrf.mxu0 }
 0x9e4   :  { %v7689_v63 = vadd.f32 %v7688_v4, %v16780_v13  ;;  %v7900_v13 = vld [vmem:[#allocation23] sm:$0x3] }
 0x9e6   :  { %v6895_v50 = vpop.f32.mrf.mxu1 }
 0x9eb   :  { %v7690_v39 = vpop.f32.mrf.mxu3 }
 0x9f5   :  { %v7779_v6 = vpop.f32.mrf.mxu2 }
 0x9fb   :  { %v7701_v10 = vpop.f32.mrf.mxu0 }
 0x9fc   :  { %v7702_v31 = vadd.f32 %v7701_v10, %v7689_v63 }
 0x9fd   :  { %v7781_v41 = vpop.f32.mrf.mxu2 }
 0x9fe   :  { %v7714_v36 = vpop.f32.mrf.mxu1 }
 0x9ff   :  { %v7715_v3 = vadd.f32 %v7714_v36, %v7702_v31 }
 0xa01   :  { %v7874_v55 = vadd.f32 %v7715_v3, %v16762_v62 }
 0xa03   :  { %v7888_v58 = vadd.f32 %v7880_v32, %v7874_v55  ;;  %v7740_v46 = vpop.f32.mrf.mxu3  ;;  %v7703_v21 = vpop.f32.mrf.mxu0 }
 0xa04   :  { %v7741_v48 = vadd.f32 %v7740_v46, %v7727_v57 }
 0xa05   :  { %v7892_v18 = vmax.f32 %v7888_v58, 0.0 }
 0xa06   :  { %v7716_v29 = vpop.f32.mrf.mxu1 }
 0xa07   :  { %v7896_v37 = vpack.c.bf16 %v7892_v18, %v7892_v18  ;;  %v16817_v29 = vld [vmem:[#allocation24] sm:$0x3] }
 0xa09   :  { %v7905_v17 = vsel %vm4814_vm5, %v7896_v37, 0  ;;  %v14915_v37 = vld [vmem:[#allocation26 + $0x138] sm:$0xff] }
 0xa0a   :  { %7923 = vmatpush.bf16.msra.mxu2 %v7905_v17 }
 0xa0b   :  { %v7742_v51 = vpop.f32.mrf.mxu3 }
 0xa0d   :  { %13336 = vmatmul.msk.bf16.vlgmr.msra.gmra.mxu2 %vm4810_vm6, %v7900_v13 }
 0xa0e   :  { %7980 = vmatpush.bf16.msrb.mxu2 %v7905_v17 }
 0xa15   :  { %v7831_v2 = vpop.f32.mrf.mxu2 }
 0xa1b   :  { %v7753_v25 = vpop.f32.mrf.mxu0 }
 0xa1c   :  { %v7766_v12 = vpop.f32.mrf.mxu1  ;;  %v7754_v0 = vadd.f32 %v7753_v25, %v7741_v48  ;;  %v14912_v48 = vld [vmem:[#allocation26 + $0x120] sm:$0xff] }
 0xa1d   :  { %v7833_v62 = vpop.f32.mrf.mxu2  ;;  %13340 = vmatmul.msk.bf16.vlgmr.msrb.gmra.mxu2 %vm4810_vm6, %v7969_v19 }
 0xa1e   :  { %v7767_v54 = vadd.f32 %v7766_v12, %v7754_v0  ;;  %v16821_v0 = vld [vmem:[#allocation24 + $0x2] sm:$0x3] }
 0xa1f   :  { %v14911_v62 = vld [vmem:[#allocation26 + $0x118] sm:$0xff] }
 0xa20   :  { %v7875_v45 = vadd.f32 %v7767_v54, %v16775_v11  ;;  %v7882_v11 = vperm.slane %v16794_v9, 2 }
 0xa22   :  { %v7889_v24 = vadd.f32 %v7881_v22, %v7875_v45  ;;  %v14910_v22 = vld [vmem:[#allocation26 + $0x110] sm:$0xff] }
 0xa23   :  { %v7792_v56 = vpop.f32.mrf.mxu3  ;;  %v7755_v38 = vpop.f32.mrf.mxu0 }
 0xa24   :  { %v7768_v60 = vpop.f32.mrf.mxu1  ;;  %v7893_v44 = vmax.f32 %v7889_v24, 0.0  ;;  %v7793_v40 = vadd.f32 %v7792_v56, %v7779_v6  ;;  %v14923_v24 = vld [vmem:[#allocation26 + $0x178] sm:$0xff]  ;;  %v14909_v38 = vld [vmem:[#allocation26 + $0x108] sm:$0xff] }
 0xa25   :  { %v14922_v60 = vld [vmem:[#allocation26 + $0x170] sm:$0xff] }
 0xa26   :  { %v7897_v35 = vpack.c.bf16 %v7893_v44, %v7893_v44  ;;  %v14908_v44 = vld [vmem:[#allocation26 + $0x100] sm:$0xff] }
 0xa28   :  { %v7908_v59 = vsel %vm4814_vm5, %v7897_v35, 0 }
 0xa29   :  { %7936 = vmatpush.bf16.msrb.mxu3 %v7908_v59 }
 0xa2b   :  { %v7794_v53 = vpop.f32.mrf.mxu3 }
 0xa2c   :  { %13337 = vmatmul.msk.bf16.vlgmr.msrb.gmra.mxu3 %vm4810_vm6, %v7900_v13  ;;  %v14920_v53 = vld [vmem:[#allocation26 + $0x160] sm:$0xff] }
 0xa2d   :  { %7993 = vmatpush.bf16.msra.mxu3 %v7908_v59  ;;  %v14921_v59 = vld [vmem:[#allocation26 + $0x168] sm:$0xff] }
 0xa3b   :  { %v7805_v61 = vpop.f32.mrf.mxu0 }
 0xa3c   :  { %v7806_v7 = vadd.f32 %v7805_v61, %v7793_v40  ;;  %v7818_v16 = vpop.f32.mrf.mxu1  ;;  %13341 = vmatmul.msk.bf16.vlgmr.msra.gmra.mxu3 %vm4810_vm6, %v7969_v19  ;;  %v14919_v61 = vld [vmem:[#allocation26 + $0x158] sm:$0xff] }
 0xa3e   :  { %v7819_v15 = vadd.f32 %v7818_v16, %v7806_v7  ;;  %v14918_v7 = vld [vmem:[#allocation26 + $0x150] sm:$0xff] }
 0xa40   :  { %v7876_v27 = vadd.f32 %v7819_v15, %v16786_v42  ;;  %v7883_v42 = vperm.slane %v16794_v9, 3 }
 0xa42   :  { %v7890_v14 = vadd.f32 %v7882_v11, %v7876_v27  ;;  %v14917_v11 = vld [vmem:[#allocation26 + $0x148] sm:$0xff] }
 0xa43   :  { %v7844_v26 = vpop.f32.mrf.mxu3  ;;  %v7807_v20 = vpop.f32.mrf.mxu0 }
 0xa44   :  { %v7894_v30 = vmax.f32 %v7890_v14, 0.0  ;;  %v7820_v33 = vpop.f32.mrf.mxu1  ;;  %v7845_v23 = vadd.f32 %v7844_v26, %v7831_v2  ;;  %v14913_v2 = vld [vmem:[#allocation26 + $0x128] sm:$0xff] }
 0xa46   :  { %v7898_v52 = vpack.c.bf16 %v7894_v30, %v7894_v30  ;;  %v14916_v30 = vld [vmem:[#allocation26 + $0x140] sm:$0xff] }
 0xa48   :  { %v7911_v49 = vsel %vm4814_vm5, %v7898_v52, 0 }
 0xa49   :  { %7949 = vmatpush.bf16.msra.mxu0 %v7911_v49 }
 0xa4b   :  { %v7846_v28 = vpop.f32.mrf.mxu3 }
 0xa4c   :  { %13338 = vmatmul.msk.bf16.vlgmr.msra.gmra.mxu0 %vm4810_vm6, %v7900_v13  ;;  %v14931_v28 = vld [vmem:[#allocation26 + $0x1b8] sm:$0xff] }
 0xa4d   :  { %8006 = vmatpush.bf16.msrb.mxu0 %v7911_v49 }
 0xa5b   :  { %v7857_v57 = vpop.f32.mrf.mxu0 }
 0xa5c   :  { %v7870_v34 = vpop.f32.mrf.mxu1  ;;  %v7858_v43 = vadd.f32 %v7857_v57, %v7845_v23  ;;  %13342 = vmatmul.msk.bf16.vlgmr.msrb.gmra.mxu0 %vm4810_vm6, %v7969_v19  ;;  %v14939_v23 = vld [vmem:[#allocation26 + $0x1f8] sm:$0xff] }
 0xa5d   :  { %v14883_v57 = vld [vmem:[#allocation26 + $0x38] sm:$0xff] }
 0xa5e   :  { %v7871_v47 = vadd.f32 %v7870_v34, %v7858_v43  ;;  %v14930_v34 = vld [vmem:[#allocation26 + $0x1b0] sm:$0xff] }
 0xa5f   :  { %v14938_v43 = vld [vmem:[#allocation26 + $0x1f0] sm:$0xff] }
 0xa60   :  { %v7877_v1 = vadd.f32 %v7871_v47, %v16791_v5  ;;  %v14891_v47 = vld [vmem:[#allocation26 + $0x78] sm:$0xff] }
 0xa62   :  { %v7891_v4 = vadd.f32 %v7883_v42, %v7877_v1  ;;  %v14882_v42 = vld [vmem:[#allocation26 + $0x30] sm:$0xff] }
 0xa63   :  { %v7859_v8 = vpop.f32.mrf.mxu0  ;;  %v14890_v1 = vld [vmem:[#allocation26 + $0x70] sm:$0xff] }
 0xa64   :  { %v7872_v50 = vpop.f32.mrf.mxu1  ;;  %v7895_v39 = vmax.f32 %v7891_v4, 0.0  ;;  %v14929_v4 = vld [vmem:[#allocation26 + $0x1a8] sm:$0xff] }
 0xa65   :  { %v14937_v8 = vld [vmem:[#allocation26 + $0x1e8] sm:$0xff] }
 0xa66   :  { %v7899_v6 = vpack.c.bf16 %v7895_v39, %v7895_v39  ;;  %v14881_v50 = vld [vmem:[#allocation26 + $0x28] sm:$0xff] }
 0xa67   :  { %v14889_v39 = vld [vmem:[#allocation26 + $0x68] sm:$0xff] }
 0xa68   :  { %v7914_v63 = vsel %vm4814_vm5, %v7899_v6, 0  ;;  %v14928_v6 = vld [vmem:[#allocation26 + $0x1a0] sm:$0xff] }
 0xa69   :  { %7962 = vmatpush.bf16.msra.mxu1 %v7914_v63 }
 0xa6c   :  { %13339 = vmatmul.msk.bf16.vlgmr.msra.gmra.mxu1 %vm4810_vm6, %v7900_v13  ;;  %v14914_v13 = vld [vmem:[#allocation26 + $0x130] sm:$0xff] }
 0xa6d   :  { %8019 = vmatpush.bf16.msrb.mxu1 %v7914_v63  ;;  %v14936_v63 = vld [vmem:[#allocation26 + $0x1e0] sm:$0xff] }
 0xa7c   :  { %13343 = vmatmul.msk.bf16.vlgmr.msrb.gmra.mxu1 %vm4810_vm6, %v7969_v19 }
 0xa90   :  { %v7925_v10 = vpop.f32.mrf.mxu2 }
 0xa98   :  { %v7927_v31 = vpop.f32.mrf.mxu2 }
 0xa99   :  { %v14927_v31 = vld [vmem:[#allocation26 + $0x198] sm:$0xff] }
 0xaa0   :  { %v7982_v9 = vpop.f32.mrf.mxu2 }
 0xaa1   :  { %v8025_v5 = vmax.f32 %v7925_v10, %v7982_v9  ;;  %v14880_v10 = vld [vmem:[#allocation26 + $0x20] sm:$0xff]  ;;  %v14935_v9 = vld [vmem:[#allocation26 + $0x1d8] sm:$0xff] }
 0xaa8   :  { %v7984_v36 = vpop.f32.mrf.mxu2 }
 0xaa9   :  { %v14879_v36 = vld [vmem:[#allocation26 + $0x18] sm:$0xff] }
 0xaaf   :  { %v7938_v41 = vpop.f32.mrf.mxu3 }
 0xab7   :  { %v7940_v3 = vpop.f32.mrf.mxu3 }
 0xab8   :  { %v14934_v3 = vld [vmem:[#allocation26 + $0x1d0] sm:$0xff] }
 0xabf   :  { %v7995_v32 = vpop.f32.mrf.mxu3 }
 0xac0   :  { %v8026_v55 = vmax.f32 %v7938_v41, %v7995_v32  ;;  %v14926_v41 = vld [vmem:[#allocation26 + $0x190] sm:$0xff]  ;;  %v14925_v32 = vld [vmem:[#allocation26 + $0x188] sm:$0xff] }
 0xac2   :  { %v8029_v58 = vmax.f32 %v8025_v5, %v8026_v55 }
 0xac4   :  { %v8033_v46 = vpack.c.bf16 %v8029_v58, %v8029_v58  ;;  %v14877_v58 = vld [vmem:[#allocation26 + $0x8] sm:$0xff] }
 0xac6   :  { %v8044_v18 = vsel %vm8042_vm7, %v8033_v46, 0 }
 0xac7   :  { %8062 = vmatpush.bf16.msra.mxu2 %v8044_v18  ;;  %v7997_v17 = vpop.f32.mrf.mxu3 }
 0xac8   :  { %v14899_v17 = vld [vmem:[#allocation26 + $0xb8] sm:$0xff] }
 0xac9   :  { %v7951_v21 = vpop.f32.mrf.mxu0 }
 0xaca   :  { %13344 = vmatmul.msk.bf16.vlgmr.msra.gmra.mxu2 %vm8038_vm8, %v16817_v29 }
 0xacb   :  { %8123 = vmatpush.bf16.msrb.mxu2 %v8044_v18  ;;  %v14876_v18 = vld [vmem:[#allocation26] sm:$0xff] }
 0xacf   :  { %8493 = vmatpush.bf16.msra.mxu2 %v14915_v37  ;;  %v14887_v37 = vld [vmem:[#allocation26 + $0x58] sm:$0xff] }
 0xad1   :  { %v7953_v51 = vpop.f32.mrf.mxu0 }
 0xad2   :  { %v14886_v51 = vld [vmem:[#allocation26 + $0x50] sm:$0xff] }
 0xad3   :  { %8494 = vmatpush.bf16.msra.mxu2 %v14914_v13  ;;  %v14907_v13 = vld [vmem:[#allocation26 + $0xf8] sm:$0xff] }
 0xad7   :  { %8495 = vmatpush.bf16.msra.mxu2 %v14913_v2  ;;  %v14898_v2 = vld [vmem:[#allocation26 + $0xb0] sm:$0xff] }
 0xad9   :  { %v8008_v25 = vpop.f32.mrf.mxu0 }
 0xada   :  { %v8027_v12 = vmax.f32 %v7951_v21, %v8008_v25  ;;  %13348 = vmatmul.msk.bf16.vlgmr.msrb.gmra.mxu2 %vm8038_vm8, %v16821_v0  ;;  %v14932_v21 = vld [vmem:[#allocation26 + $0x1c0] sm:$0xff]  ;;  %v14885_v25 = vld [vmem:[#allocation26 + $0x48] sm:$0xff] }
 0xadb   :  { %8496 = vmatpush.bf16.msra.mxu2 %v14912_v48  ;;  %v14906_v48 = vld [vmem:[#allocation26 + $0xf0] sm:$0xff] }
 0xadc   :  { %v8030_v19 = vmax.f32 %v8026_v55, %v8027_v12  ;;  %v14933_v55 = vld [vmem:[#allocation26 + $0x1c8] sm:$0xff] }
 0xade   :  { %v8034_v54 = vpack.c.bf16 %v8030_v19, %v8030_v19  ;;  %v14896_v19 = vld [vmem:[#allocation26 + $0xa0] sm:$0xff] }
 0xadf   :  { %8497 = vmatpush.bf16.msra.mxu2 %v14911_v62  ;;  %v14884_v62 = vld [vmem:[#allocation26 + $0x40] sm:$0xff] }
 0xae0   :  { %v8047_v45 = vsel %vm8042_vm7, %v8034_v54, 0 }
 0xae1   :  { %8075 = vmatpush.bf16.msrb.mxu3 %v8047_v45  ;;  %v8010_v56 = vpop.f32.mrf.mxu0 }
 0xae2   :  { %v14903_v56 = vld [vmem:[#allocation26 + $0xd8] sm:$0xff] }
 0xae3   :  { %8498 = vmatpush.bf16.msra.mxu2 %v14910_v22  ;;  %v14947_v22 = vld [vmem:[#allocation26 + $0x238] sm:$0xff] }
 0xae4   :  { %13345 = vmatmul.msk.bf16.vlgmr.msrb.gmra.mxu3 %vm8038_vm8, %v16817_v29 }
 0xae5   :  { %8136 = vmatpush.bf16.msra.mxu3 %v8047_v45  ;;  %v14955_v45 = vld [vmem:[#allocation26 + $0x278] sm:$0xff] }
 0xae7   :  { %8499 = vmatpush.bf16.msra.mxu2 %v14909_v38  ;;  %v14946_v38 = vld [vmem:[#allocation26 + $0x230] sm:$0xff] }
 0xae9   :  { %8506 = vmatpush.bf16.msrb.mxu3 %v14923_v24  ;;  %v7964_v35 = vpop.f32.mrf.mxu1  ;;  %v14895_v24 = vld [vmem:[#allocation26 + $0x98] sm:$0xff] }
 0xaeb   :  { %8500 = vmatpush.bf16.msra.mxu2 %v14908_v44  ;;  %v14894_v44 = vld [vmem:[#allocation26 + $0x90] sm:$0xff] }
 0xaed   :  { %8507 = vmatpush.bf16.msrb.mxu3 %v14922_v60  ;;  %v14954_v60 = vld [vmem:[#allocation26 + $0x270] sm:$0xff] }
 0xaee   :  { %8501 = vmatmul.bf16.vlgmr.msra.gmra.mxu2 %v8033_v46  ;;  %v14924_v46 = vld [vmem:[#allocation26 + $0x180] sm:$0xff] }
 0xaef   :  { %8737 = vmatpush.bf16.msrb.mxu2 %v14883_v57 }
 0xaf1   :  { %8508 = vmatpush.bf16.msrb.mxu3 %v14921_v59  ;;  %v7966_v40 = vpop.f32.mrf.mxu1  ;;  %v14945_v59 = vld [vmem:[#allocation26 + $0x228] sm:$0xff] }
 0xaf2   :  { %v14893_v40 = vld [vmem:[#allocation26 + $0x88] sm:$0xff] }
 0xaf3   :  { %8738 = vmatpush.bf16.msrb.mxu2 %v14882_v42  ;;  %v14969_v42 = vld [vmem:[#allocation26 + $0x2e8] sm:$0xff] }
 0xaf4   :  { %13349 = vmatmul.msk.bf16.vlgmr.msra.gmra.mxu3 %vm8038_vm8, %v16821_v0 }
 0xaf5   :  { %8509 = vmatpush.bf16.msrb.mxu3 %v14920_v53  ;;  %v14953_v53 = vld [vmem:[#allocation26 + $0x268] sm:$0xff] }
 0xaf7   :  { %8739 = vmatpush.bf16.msrb.mxu2 %v14881_v50  ;;  %v14968_v50 = vld [vmem:[#allocation26 + $0x2e0] sm:$0xff] }
 0xaf9   :  { %8510 = vmatpush.bf16.msrb.mxu3 %v14919_v61  ;;  %v8021_v16 = vpop.f32.mrf.mxu1  ;;  %v14901_v61 = vld [vmem:[#allocation26 + $0xc8] sm:$0xff] }
 0xafa   :  { %v8028_v15 = vmax.f32 %v7964_v35, %v8021_v16  ;;  %v14902_v35 = vld [vmem:[#allocation26 + $0xd0] sm:$0xff]  ;;  %v14952_v16 = vld [vmem:[#allocation26 + $0x260] sm:$0xff] }
 0xafb   :  { %8740 = vmatpush.bf16.msrb.mxu2 %v14880_v10  ;;  %v14967_v10 = vld [vmem:[#allocation26 + $0x2d8] sm:$0xff] }
 0xafc   :  { %v8031_v27 = vmax.f32 %v8027_v12, %v8028_v15  ;;  %v8032_v14 = vmax.f32 %v8028_v15, %v8025_v5  ;;  %v14878_v5 = vld [vmem:[#allocation26 + $0x10] sm:$0xff]  ;;  %v14897_v12 = vld [vmem:[#allocation26 + $0xa8] sm:$0xff] }
 0xafd   :  { %8511 = vmatpush.bf16.msrb.mxu3 %v14918_v7  ;;  %v14944_v7 = vld [vmem:[#allocation26 + $0x220] sm:$0xff] }
 0xafe   :  { %v16830_v26 = vpack.c.bf16 %v8031_v27, %v8031_v27  ;;  %v16832_v20 = vpack.c.bf16 %v8032_v14, %v8032_v14  ;;  %v14900_v27 = vld [vmem:[#allocation26 + $0xc0] sm:$0xff]  ;;  %v14943_v14 = vld [vmem:[#allocation26 + $0x218] sm:$0xff] }
 0xaff   :  { %8741 = vmatpush.bf16.msrb.mxu2 %v14879_v36 }
 0xb00   :  { %v8050_v33 = vsel %vm8042_vm7, %v16830_v26, 0  ;;  %v8053_v52 = vsel %vm8042_vm7, %v16832_v20, 0 }
 0xb01   :  { %8512 = vmatpush.bf16.msrb.mxu3 %v14917_v11  ;;  %v8023_v49 = vpop.f32.mrf.mxu1  ;;  %8088 = vmatpush.bf16.msra.mxu0 %v8050_v33  ;;  %v14892_v11 = vld [vmem:[#allocation26 + $0x80] sm:$0xff] }
 0xb02   :  { %8101 = vmatpush.bf16.msra.mxu1 %v8053_v52  ;;  %v14950_v49 = vld [vmem:[#allocation26 + $0x250] sm:$0xff] }
 0xb03   :  { %8742 = vmatpush.bf16.msrb.mxu2 %v14878_v5  ;;  %v14957_v5 = vld [vmem:[#allocation26 + $0x288] sm:$0xff] }
 0xb04   :  { %13346 = vmatmul.msk.bf16.vlgmr.msra.gmra.mxu0 %vm8038_vm8, %v16817_v29 }
 0xb05   :  { %8149 = vmatpush.bf16.msrb.mxu0 %v8050_v33  ;;  %8513 = vmatpush.bf16.msrb.mxu3 %v14916_v30  ;;  %v14963_v30 = vld [vmem:[#allocation26 + $0x2b8] sm:$0xff] }
 0xb06   :  { %8162 = vmatpush.bf16.msrb.mxu1 %v8053_v52  ;;  %v14971_v33 = vld [vmem:[#allocation26 + $0x2f8] sm:$0xff]  ;;  %v14942_v52 = vld [vmem:[#allocation26 + $0x210] sm:$0xff] }
 0xb07   :  { %13347 = vmatmul.msk.bf16.vlgmr.msra.gmra.mxu1 %vm8038_vm8, %v16817_v29  ;;  %8743 = vmatpush.bf16.msrb.mxu2 %v14877_v58  ;;  %v14888_v29 = vld [vmem:[#allocation26 + $0x60] sm:$0xff] }
 0xb08   :  { %8514 = vmatmul.bf16.vlgmr.msrb.gmra.mxu3 %v8034_v54  ;;  %v14904_v54 = vld [vmem:[#allocation26 + $0xe0] sm:$0xff] }
 0xb09   :  { %8519 = vmatpush.bf16.msra.mxu0 %v14931_v28  ;;  %8750 = vmatpush.bf16.msra.mxu3 %v14891_v47  ;;  %v14962_v28 = vld [vmem:[#allocation26 + $0x2b0] sm:$0xff]  ;;  %v14961_v47 = vld [vmem:[#allocation26 + $0x2a8] sm:$0xff]  ;;  %v14964_v58 = vld [vmem:[#allocation26 + $0x2c0] sm:$0xff] }
 0xb0a   :  { %8532 = vmatpush.bf16.msra.mxu1 %v14939_v23  ;;  %v14970_v23 = vld [vmem:[#allocation26 + $0x2f0] sm:$0xff] }
 0xb0b   :  { %8744 = vmatpush.bf16.msrb.mxu2 %v14876_v18 }
 0xb0d   :  { %8520 = vmatpush.bf16.msra.mxu0 %v14930_v34  ;;  %8751 = vmatpush.bf16.msra.mxu3 %v14890_v1  ;;  %v14941_v34 = vld [vmem:[#allocation26 + $0x208] sm:$0xff]  ;;  %v14940_v1 = vld [vmem:[#allocation26 + $0x200] sm:$0xff] }
 0xb0e   :  { %8533 = vmatpush.bf16.msra.mxu1 %v14938_v43  ;;  %v14949_v43 = vld [vmem:[#allocation26 + $0x248] sm:$0xff] }
 0xb0f   :  { %9046 = vmatpush.bf16.msra.mxu2 %v14947_v22 }
 0xb11   :  { %8521 = vmatpush.bf16.msra.mxu0 %v14929_v4  ;;  %8752 = vmatpush.bf16.msra.mxu3 %v14889_v39  ;;  %v14948_v4 = vld [vmem:[#allocation26 + $0x240] sm:$0xff] }
 0xb12   :  { %8534 = vmatpush.bf16.msra.mxu1 %v14937_v8  ;;  %v14960_v8 = vld [vmem:[#allocation26 + $0x2a0] sm:$0xff] }
 0xb13   :  { %9047 = vmatpush.bf16.msra.mxu2 %v14946_v38 }
 0xb14   :  { %13350 = vmatmul.msk.bf16.vlgmr.msrb.gmra.mxu0 %vm8038_vm8, %v16821_v0 }
 0xb15   :  { %8522 = vmatpush.bf16.msra.mxu0 %v14928_v6  ;;  %8753 = vmatpush.bf16.msra.mxu3 %v14888_v29 }
 0xb16   :  { %8535 = vmatpush.bf16.msra.mxu1 %v14936_v63  ;;  %v14959_v63 = vld [vmem:[#allocation26 + $0x298] sm:$0xff] }
 0xb17   :  { %13351 = vmatmul.msk.bf16.vlgmr.msrb.gmra.mxu1 %vm8038_vm8, %v16821_v0  ;;  %v14905_v0 = vld [vmem:[#allocation26 + $0xe8] sm:$0xff]  ;;  %9048 = vmatpush.bf16.msra.mxu2 %v14945_v59 }
 0xb19   :  { %8523 = vmatpush.bf16.msra.mxu0 %v14927_v31  ;;  %8754 = vmatpush.bf16.msra.mxu3 %v14887_v37  ;;  %v14958_v31 = vld [vmem:[#allocation26 + $0x290] sm:$0xff] }
 0xb1a   :  { %8536 = vmatpush.bf16.msra.mxu1 %v14935_v9  ;;  %v14966_v9 = vld [vmem:[#allocation26 + $0x2d0] sm:$0xff] }
 0xb1b   :  { %9049 = vmatpush.bf16.msra.mxu2 %v14944_v7 }
 0xb1d   :  { %8524 = vmatpush.bf16.msra.mxu0 %v14926_v41  ;;  %8755 = vmatpush.bf16.msra.mxu3 %v14886_v51 }
 0xb1e   :  { %8537 = vmatpush.bf16.msra.mxu1 %v14934_v3 }
 0xb1f   :  { %9050 = vmatpush.bf16.msra.mxu2 %v14943_v14  ;;  %v14984_v14 = vld [vmem:[%s16940_s26 + $0x60] sm:$0xff] }
 0xb21   :  { %8525 = vmatpush.bf16.msra.mxu0 %v14925_v32  ;;  %8756 = vmatpush.bf16.msra.mxu3 %v14885_v25  ;;  %v14965_v32 = vld [vmem:[#allocation26 + $0x2c8] sm:$0xff] }
 0xb22   :  { %8538 = vmatpush.bf16.msra.mxu1 %v14933_v55  ;;  %v14956_v55 = vld [vmem:[#allocation26 + $0x280] sm:$0xff] }
 0xb23   :  { %9051 = vmatpush.bf16.msra.mxu2 %v14942_v52  ;;  %v14981_v52 = vld [vmem:[%s16940_s26 + $0x48] sm:$0xff] }
 0xb25   :  { %8526 = vmatpush.bf16.msra.mxu0 %v14924_v46  ;;  %8757 = vmatpush.bf16.msra.mxu3 %v14884_v62 }
 0xb26   :  { %8539 = vmatpush.bf16.msra.mxu1 %v14932_v21 }
 0xb27   :  { %9052 = vmatpush.bf16.msra.mxu2 %v14941_v34 }
 0xb28   :  { %8527 = vmatmul.bf16.vlgmr.msra.gmra.mxu0 %v16830_v26 }
 0xb29   :  { %8540 = vmatmul.bf16.vlgmr.msra.gmra.mxu1 %v16832_v20  ;;  %8763 = vmatpush.bf16.msrb.mxu0 %v14899_v17  ;;  %v14951_v20 = vld [vmem:[#allocation26 + $0x258] sm:$0xff] }
 0xb2a   :  { %8776 = vmatpush.bf16.msrb.mxu1 %v14907_v13  ;;  %9059 = vmatpush.bf16.msrb.mxu3 %v14955_v45 }
 0xb2b   :  { %9053 = vmatpush.bf16.msra.mxu2 %v14940_v1  ;;  %v14977_v1 = vld [vmem:[%s16940_s26 + $0x28] sm:$0xff] }
 0xb2d   :  { %8764 = vmatpush.bf16.msrb.mxu0 %v14898_v2 }
 0xb2e   :  { %8777 = vmatpush.bf16.msrb.mxu1 %v14906_v48  ;;  %9060 = vmatpush.bf16.msrb.mxu3 %v14954_v60 }
 0xb31   :  { %8765 = vmatpush.bf16.msrb.mxu0 %v14897_v12 }
 0xb32   :  { %8778 = vmatpush.bf16.msrb.mxu1 %v14905_v0  ;;  %9061 = vmatpush.bf16.msrb.mxu3 %v14953_v53 }
 0xb35   :  { %8766 = vmatpush.bf16.msrb.mxu0 %v14896_v19 }
 0xb36   :  { %8779 = vmatpush.bf16.msrb.mxu1 %v14904_v54  ;;  %9062 = vmatpush.bf16.msrb.mxu3 %v14952_v16 }
 0xb39   :  { %8767 = vmatpush.bf16.msrb.mxu0 %v14895_v24 }
 0xb3a   :  { %8780 = vmatpush.bf16.msrb.mxu1 %v14903_v56  ;;  %9063 = vmatpush.bf16.msrb.mxu3 %v14951_v20 }
 0xb3d   :  { %8768 = vmatpush.bf16.msrb.mxu0 %v14894_v44 }
 0xb3e   :  { %8781 = vmatpush.bf16.msrb.mxu1 %v14902_v35  ;;  %9064 = vmatpush.bf16.msrb.mxu3 %v14950_v49 }
 0xb41   :  { %8769 = vmatpush.bf16.msrb.mxu0 %v14893_v40 }
 0xb42   :  { %8782 = vmatpush.bf16.msrb.mxu1 %v14901_v61  ;;  %9065 = vmatpush.bf16.msrb.mxu3 %v14949_v43  ;;  %v14987_v61 = vld [vmem:[%s16940_s26 + $0x78] sm:$0xff] }
 0xb43   :  { %v14979_v43 = vld [vmem:[%s16940_s26 + $0x38] sm:$0xff] }
 0xb45   :  { %8770 = vmatpush.bf16.msrb.mxu0 %v14892_v11  ;;  %v14985_v11 = vld [vmem:[%s16940_s26 + $0x68] sm:$0xff] }
 0xb46   :  { %8783 = vmatpush.bf16.msrb.mxu1 %v14900_v27  ;;  %9066 = vmatpush.bf16.msrb.mxu3 %v14948_v4 }
 0xb49   :  { %9072 = vmatpush.bf16.msra.mxu0 %v14963_v30 }
 0xb4a   :  { %9085 = vmatpush.bf16.msra.mxu1 %v14971_v33  ;;  %v14982_v33 = vld [vmem:[%s16940_s26 + $0x50] sm:$0xff] }
 0xb4d   :  { %v8064_v15 = vpop.f32.mrf.mxu2  ;;  %9073 = vmatpush.bf16.msra.mxu0 %v14962_v28  ;;  %v14980_v28 = vld [vmem:[%s16940_s26 + $0x40] sm:$0xff] }
 0xb4e   :  { %v8107_v26 = vpack.c.bf16 %v8064_v15, %v8064_v15  ;;  %9086 = vmatpush.bf16.msra.mxu1 %v14970_v23  ;;  %v14986_v15 = vld [vmem:[%s16940_s26 + $0x70] sm:$0xff] }
 0xb50   :  { %8745 = vmatmul.bf16.vlgmr.msrb.gmra.mxu2 %v8107_v26  ;;  %v14983_v26 = vld [vmem:[%s16940_s26 + $0x58] sm:$0xff] }
 0xb51   :  { %9074 = vmatpush.bf16.msra.mxu0 %v14961_v47  ;;  %v14978_v47 = vld [vmem:[%s16940_s26 + $0x30] sm:$0xff] }
 0xb52   :  { %9087 = vmatpush.bf16.msra.mxu1 %v14969_v42 }
 0xb55   :  { %v8066_v57 = vpop.f32.mrf.mxu2  ;;  %9075 = vmatpush.bf16.msra.mxu0 %v14960_v8 }
 0xb56   :  { %9088 = vmatpush.bf16.msra.mxu1 %v14968_v50 }
 0xb59   :  { %9076 = vmatpush.bf16.msra.mxu0 %v14959_v63 }
 0xb5a   :  { %9089 = vmatpush.bf16.msra.mxu1 %v14967_v10 }
 0xb5d   :  { %v8125_v39 = vpop.f32.mrf.mxu2  ;;  %9077 = vmatpush.bf16.msra.mxu0 %v14958_v31  ;;  %v14975_v31 = vld [vmem:[%s16940_s26 + $0x18] sm:$0xff] }
 0xb5e   :  { %v8168_v6 = vpack.c.bf16 %v8125_v39, %v8125_v39  ;;  %9090 = vmatpush.bf16.msra.mxu1 %v14966_v9  ;;  %v14976_v39 = vld [vmem:[%s16940_s26 + $0x20] sm:$0xff] }
 0xb60   :  { %9054 = vmatmul.bf16.vlgmr.msra.gmra.mxu2 %v8168_v6 }
 0xb61   :  { %9078 = vmatpush.bf16.msra.mxu0 %v14957_v5 }
 0xb62   :  { %9091 = vmatpush.bf16.msra.mxu1 %v14965_v32  ;;  %v15158_v32 = vld [vmem:[#allocation27] ss:$0 sm:$0xff] }
 0xb65   :  { %v8127_v3 = vpop.f32.mrf.mxu2  ;;  %9079 = vmatpush.bf16.msra.mxu0 %v14956_v55 }
 0xb66   :  { %9092 = vmatpush.bf16.msra.mxu1 %v14964_v58 }
 0xb67   :  { %v8077_v36 = vpop.f32.mrf.mxu3 }
 0xb68   :  { %v8108_v41 = vpack.c.bf16 %v8077_v36, %v8077_v36 }
 0xb6a   :  { %8758 = vmatmul.bf16.vlgmr.msra.gmra.mxu3 %v8108_v41 }
 0xb6f   :  { %v8079_v46 = vpop.f32.mrf.mxu3 }
 0xb71   :  { %v8502_v21 = vpop.f32.mrf.mxu2 }
 0xb77   :  { %v8138_v18 = vpop.f32.mrf.mxu3 }
 0xb78   :  { %v8169_v29 = vpack.c.bf16 %v8138_v18, %v8138_v18 }
 0xb79   :  { %v8504_v37 = vpop.f32.mrf.mxu2 }
 0xb7a   :  { %9067 = vmatmul.bf16.vlgmr.msrb.gmra.mxu3 %v8169_v29  ;;  %v14995_v37 = vld [vmem:[%s16940_s26 + $0xb8] sm:$0xff] }
 0xb7f   :  { %v8140_v48 = vpop.f32.mrf.mxu3 }
 0xb80   :  { %v14993_v48 = vld [vmem:[%s16940_s26 + $0xa8] sm:$0xff] }
 0xb81   :  { %v8090_v17 = vpop.f32.mrf.mxu0 }
 0xb82   :  { %v8109_v51 = vpack.c.bf16 %v8090_v17, %v8090_v17 }
 0xb84   :  { %v8103_v13 = vpop.f32.mrf.mxu1  ;;  %8771 = vmatmul.bf16.vlgmr.msrb.gmra.mxu0 %v8109_v51  ;;  %v9128_v51 = vld [vmem:[#allocation29 + $0x2] sm:$0x3] }
 0xb85   :  { %v8110_v2 = vpack.c.bf16 %v8103_v13, %v8103_v13  ;;  %9227 = vmatpush.bf16.msrb.mxu0 %v14987_v61  ;;  %v9106_v13 = vld [vmem:[#allocation29] sm:$0x3]  ;;  %v15856_v61 = vmov 0  }
 0xb86   :  { %15156 = vset.pattern.permute.xlu2 %v15856_v61  ;;  %15157 = vset.pattern.permute.xlu0 %v15856_v61 }
 0xb87   :  { %8784 = vmatmul.bf16.vlgmr.msrb.gmra.mxu1 %v8110_v2  ;;  %v14994_v2 = vld [vmem:[%s16940_s26 + $0xb0] sm:$0xff] }
 0xb88   :  { %9288 = vmatpush.bf16.msrb.mxu1 %v14979_v43  ;;  %v14999_v43 = vld [vmem:[#allocation33 + $0x18] sm:$0xff] }
 0xb89   :  { %v8092_v25 = vpop.f32.mrf.mxu0  ;;  %9228 = vmatpush.bf16.msrb.mxu0 %v14986_v15 }
 0xb8a   :  { %v14992_v25 = vld [vmem:[%s16940_s26 + $0xa0] sm:$0xff] }
 0xb8b   :  { %v8515_v0 = vpop.f32.mrf.mxu3 }
 0xb8c   :  { %v8105_v12 = vpop.f32.mrf.mxu1  ;;  %v8516_v62 = vadd.f32 %v8515_v0, %v8502_v21  ;;  %9289 = vmatpush.bf16.msrb.mxu1 %v14978_v47  ;;  %v14974_v0 = vld [vmem:[%s16940_s26 + $0x10] sm:$0xff] }
 0xb8d   :  { %9229 = vmatpush.bf16.msrb.mxu0 %v14985_v11  ;;  %v14991_v12 = vld [vmem:[%s16940_s26 + $0x98] sm:$0xff] }
 0xb90   :  { %9290 = vmatpush.bf16.msrb.mxu1 %v14977_v1  ;;  %v9388_v1 = vld [vmem:[#allocation32] sm:$0x1] }
 0xb91   :  { %v8151_v19 = vpop.f32.mrf.mxu0  ;;  %9230 = vmatpush.bf16.msrb.mxu0 %v14984_v14  ;;  %v15007_v14 = vld [vmem:[#allocation35 + $0x18] sm:$0xff] }
 0xb92   :  { %v8170_v22 = vpack.c.bf16 %v8151_v19, %v8151_v19  ;;  %v14973_v19 = vld [vmem:[%s16940_s26 + $0x8] sm:$0xff] }
 0xb93   :  { %v8517_v24 = vpop.f32.mrf.mxu3 }
 0xb94   :  { %v8164_v54 = vpop.f32.mrf.mxu1  ;;  %9080 = vmatmul.bf16.vlgmr.msra.gmra.mxu0 %v8170_v22  ;;  %9291 = vmatpush.bf16.msrb.mxu1 %v14976_v39  ;;  %v14972_v22 = vld [vmem:[%s16940_s26] sm:$0xff] }
 0xb95   :  { %v8171_v45 = vpack.c.bf16 %v8164_v54, %v8164_v54  ;;  %9231 = vmatpush.bf16.msrb.mxu0 %v14983_v26  ;;  %v14989_v54 = vld [vmem:[%s16940_s26 + $0x88] sm:$0xff]  ;;  %v15006_v26 = vld [vmem:[#allocation35 + $0x10] sm:$0xff] }
 0xb96   :  { %v15002_v39 = vld [vmem:[#allocation33 + $0x30] sm:$0xff] }
 0xb97   :  { %9093 = vmatmul.bf16.vlgmr.msra.gmra.mxu1 %v8171_v45  ;;  %v14988_v45 = vld [vmem:[%s16940_s26 + $0x80] sm:$0xff] }
 0xb98   :  { %9292 = vmatpush.bf16.msrb.mxu1 %v14975_v31 }
 0xb99   :  { %v8153_v56 = vpop.f32.mrf.mxu0  ;;  %9232 = vmatpush.bf16.msrb.mxu0 %v14982_v33  ;;  %v15159_v33 = vld [vmem:[#allocation30] ss:$0 sm:$0xff] }
 0xb9c   :  { %v8166_v38 = vpop.f32.mrf.mxu1  ;;  %9293 = vmatpush.bf16.msrb.mxu1 %v14974_v0  ;;  %v15019_v0 = vld [vmem:[#allocation38 + $0x54] sm:$0xf0] }
 0xb9d   :  { %9233 = vmatpush.bf16.msrb.mxu0 %v14981_v52 }
 0xba0   :  { %9294 = vmatpush.bf16.msrb.mxu1 %v14973_v19  ;;  %v13964_v19 = vld [vmem:[#allocation38 + $0x58] sm:$0xf0] }
 0xba1   :  { %9234 = vmatpush.bf16.msrb.mxu0 %v14980_v28 }
 0xba4   :  { %9295 = vmatpush.bf16.msrb.mxu1 %v14972_v22 }
 0xba5   :  { %v8528_v60 = vpop.f32.mrf.mxu0 }
 0xba6   :  { %v8541_v44 = vpop.f32.mrf.mxu1  ;;  %v8529_v35 = vadd.f32 %v8528_v60, %v8516_v62  ;;  %v14990_v62 = vld [vmem:[%s16940_s26 + $0x90] sm:$0xff] }
 0xba8   :  { %v8542_v59 = vadd.f32 %v8541_v44, %v8529_v35 }
 0xbad   :  { %v8530_v53 = vpop.f32.mrf.mxu0 }
 0xbae   :  { %v8543_v40 = vpop.f32.mrf.mxu1 }
 0xbaf   :  { %v9530_v40 = vld [vmem:[%s16941_s14] sm:$0x3] }
 0xbb0   :  { %9534 = vperm.xlu2 %15156, %v9530_v40   ;;  %v13948_v40 = vld [vmem:[#allocation38 + $0x38] sm:$0xf0] }
 0xbd3   :  { %v8746_v7 = vpop.f32.mrf.mxu2 }
 0xbd4   :  { %v8747_v50 = vadd.f32 %v8746_v7, %v8542_v59  ;;  %v9548_v7 = vld [vmem:[#allocation35 + $0x20] sm:$0xf] }
 0xbdb   :  { %v8748_v16 = vpop.f32.mrf.mxu2 }
 0xbdc   :  { %v9566_v16 = vunpack.c.l.b16 %v9548_v7 }
 0xbde   :  { %v9571_v15 = vpack.c.b16 %v9566_v16, %v9566_v16 }
 0xbe0   :  { %v9581_v11 = vsel %vm4814_vm5, %v9571_v15, 0 }
 0xbe3   :  { %v9055_v27 = vpop.f32.mrf.mxu2 }
 0xbeb   :  { %v9057_v30 = vpop.f32.mrf.mxu2 }
 0xbed   :  { %v8759_v20 = vpop.f32.mrf.mxu3 }
 0xbee   :  { %v8760_v6 = vadd.f32 %v8759_v20, %v8747_v50  ;;  %v14997_v50 = vld [vmem:[#allocation33 + $0x8] sm:$0xff] }
 0xbf5   :  { %v8761_v49 = vpop.f32.mrf.mxu3 }
 0xbfd   :  { %v9068_v23 = vpop.f32.mrf.mxu3 }
 0xbfe   :  { %v9069_v63 = vadd.f32 %v9068_v23, %v9055_v27  ;;  %v15003_v27 = vld [vmem:[#allocation33 + $0x38] sm:$0xff] }
 0xbff   :  { %9520 = vmatpush.bf16.msra.mxu1 %v15003_v27 }
 0xc01   :  { %v8772_v57 = vpop.f32.mrf.mxu0 }
 0xc02   :  { %v8773_v10 = vadd.f32 %v8772_v57, %v8760_v6  ;;  %v15005_v6 = vld [vmem:[#allocation35 + $0x8] sm:$0xff] }
 0xc03   :  { %9521 = vmatpush.bf16.msra.mxu1 %v15002_v39  ;;  %v15008_v39 = vld [vmem:[#allocation38 + $0x4] sm:$0xf] }
 0xc04   :  { %v8785_v34 = vpop.f32.mrf.mxu1 }
 0xc05   :  { %v9070_v42 = vpop.f32.mrf.mxu3  ;;  %v8786_v3 = vadd.f32 %v8785_v34, %v8773_v10 }
 0xc09   :  { %v8774_v4 = vpop.f32.mrf.mxu0 }
 0xc0a   :  { %v9462_v4 = vld [vmem:[#allocation32 + $0x1] sm:$0x1]  ;;  %v9535_v31 = vpop.permute.xlu2 %9534 }
 0xc0c   :  { %v8787_v8 = vpop.f32.mrf.mxu1 }
 0xc0d   :  { %v14998_v8 = vld [vmem:[#allocation33 + $0x10] sm:$0xff] }
 0xc11   :  { %v9081_v9 = vpop.f32.mrf.mxu0 }
 0xc12   :  { %v9082_v41 = vadd.f32 %v9081_v9, %v9069_v63  ;;  %v9531_v63 = vlaneseq  ;;  %v15001_v9 = vld [vmem:[#allocation33 + $0x28] sm:$0xff] }
 0xc13   :  { %9522 = vmatpush.bf16.msra.mxu1 %v15001_v9  ;;  %v15031_v9 = vld [vmem:[%s16002_s5 + $0x38] sm:$0xff] }
 0xc14   :  { %v9094_v36 = vpop.f32.mrf.mxu1  ;;  %v9532_v10 = vand.u32 127, %v9531_v63  ;;  %v13924_v63 = vld [vmem:[#allocation38 + $0x8] sm:$0xf0] }
 0xc15   :  { %v9095_v5 = vadd.f32 %v9094_v36, %v9082_v41  ;;  %v15004_v36 = vld [vmem:[#allocation35] sm:$0xff]  ;;  %v15857_v41 = vmov 0.0  }
 0xc16   :  { %vm9536_vm9 = vcmp.eq.s32.totalorder %v9532_v10, %v9535_v31  ;;  %v13927_v10 = vor.u32 %v15008_v39, %v13924_v63  ;;  %v15039_v31 = vld [vmem:[%s16002_s5 + $0x78] sm:$0xff] }
 0xc17   :  { %v9098_v55 = vadd.f32 %v9095_v5, %v8786_v3  ;;  %v13902_v3 = vsel %vm9536_vm9, 1.0, %v15857_v41  ;;  %v15030_v41 = vld [vmem:[%s16002_s5 + $0x30] sm:$0xff] }
 0xc18   :  { %v9539_v5 = vpack.c.bf16 %v13902_v3, %v13902_v3  ;;  %v15037_v3 = vld [vmem:[%s16002_s5 + $0x68] sm:$0xff] }
 0xc19   :  { %v9103_v58 = vadd.f32 %v15158_v32, %v9098_v55  ;;  %v9083_v46 = vpop.f32.mrf.mxu0  ;;  %v14996_v32 = vld [vmem:[#allocation33] sm:$0xff] }
 0xc1a   :  { %v15000_v55 = vld [vmem:[#allocation33 + $0x20] sm:$0xff] }
 0xc1b   :  { %v9104_v18 = vmax.f32 %v9103_v58, 0.0  ;;  %9523 = vmatpush.bf16.msra.mxu1 %v15000_v55  ;;  %v13978_v58 = vld [vmem:[#allocation38 + $0x70] sm:$0xf]  ;;  %v15023_v46 = vld [vmem:[#allocation38 + $0x74] sm:$0xf0] }
 0xc1c   :  { %v9096_v21 = vpop.f32.mrf.mxu1  ;;  %v15036_v55 = vld [vmem:[%s16002_s5 + $0x60] sm:$0xff] }
 0xc1d   :  { %v9105_v29 = vpack.c.bf16 %v9104_v18, %v9104_v18  ;;  %v15022_v21 = vld [vmem:[#allocation38 + $0x74] sm:$0xf]  ;;  %v13979_v18 = vor.u32 %v15023_v46, %v13978_v58  ;;  %v15028_v58 = vld [vmem:[%s16002_s5 + $0x20] sm:$0xff]  ;;  %v15035_v46 = vld [vmem:[%s16002_s5 + $0x58] sm:$0xff] }
 0xc1f   :  { %9235 = vmatmul.bf16.vlgmr.msrb.gmra.mxu0 %v9105_v29  ;;  %v9111_v17 = vsel %vm8042_vm7, %v9105_v29, 0  ;;  %v13980_v29 = vld [vmem:[#allocation38 + $0x78] sm:$0xf0] }
 0xc20   :  { %9120 = vmatpush.bf16.msrb.mxu2 %v9111_v17  ;;  %9139 = vmatpush.bf16.msra.mxu3 %v9111_v17  ;;  %v15021_v17 = vld [vmem:[#allocation38 + $0x64] sm:$0xf0] }
 0xc23   :  { %13736 = vmatmul.msk.bf16.vlgmr.msrb.gmra.mxu2 %vm8038_vm8, %v9106_v13  ;;  %13737 = vmatmul.msk.bf16.vlgmr.msra.gmra.mxu3 %vm8038_vm8, %v9128_v51  ;;  %v13983_v13 = vor.u32 %v15022_v21, %v13980_v29  ;;  %v15020_v51 = vld [vmem:[#allocation38 + $0x64] sm:$0xf]  ;;  %v15160_v29 = vld [vmem:[#allocation36] ss:$0 sm:$0xff] }
 0xc24   :  { %9366 = vmatpush.bf16.msra.mxu2 %v14995_v37  ;;  %v13970_v37 = vld [vmem:[#allocation38 + $0x60] sm:$0xf] }
 0xc25   :  { %v15027_v21 = vld [vmem:[%s16002_s5 + $0x18] sm:$0xff] }
 0xc28   :  { %9367 = vmatpush.bf16.msra.mxu2 %v14994_v2  ;;  %v13972_v2 = vld [vmem:[#allocation38 + $0x68] sm:$0xf0] }
 0xc2c   :  { %9368 = vmatpush.bf16.msra.mxu2 %v14993_v48  ;;  %v13971_v48 = vor.u32 %v15021_v17, %v13970_v37  ;;  %v15034_v37 = vld [vmem:[%s16002_s5 + $0x50] sm:$0xff] }
 0xc30   :  { %9369 = vmatpush.bf16.msra.mxu2 %v14992_v25  ;;  %v13975_v25 = vor.u32 %v15020_v51, %v13972_v2 }
 0xc34   :  { %9370 = vmatpush.bf16.msra.mxu2 %v14991_v12  ;;  %v13962_v12 = vld [vmem:[#allocation38 + $0x50] sm:$0xf] }
 0xc38   :  { %9371 = vmatpush.bf16.msra.mxu2 %v14990_v62  ;;  %v15018_v62 = vld [vmem:[#allocation38 + $0x54] sm:$0xf] }
 0xc39   :  { %v13967_v22 = vor.u32 %v15018_v62, %v13964_v19  ;;  %v15026_v62 = vld [vmem:[%s16002_s5 + $0x10] sm:$0xff]  ;;  %v15032_v19 = vld [vmem:[%s16002_s5 + $0x40] sm:$0xff] }
 0xc3c   :  { %9372 = vmatpush.bf16.msra.mxu2 %v14989_v54  ;;  %v13963_v54 = vor.u32 %v15019_v0, %v13962_v12  ;;  %v15033_v0 = vld [vmem:[%s16002_s5 + $0x48] sm:$0xff] }
 0xc40   :  { %9373 = vmatpush.bf16.msra.mxu2 %v14988_v45  ;;  %v13954_v45 = vld [vmem:[#allocation38 + $0x40] sm:$0xf] }
 0xc44   :  { %9586 = vmatpush.bf16.msrb.mxu2 %v9581_v11 }
 0xc48   :  { %9587 = vmatpush.bf16.msrb.mxu2 %v15007_v14 }
 0xc4c   :  { %9588 = vmatpush.bf16.msrb.mxu2 %v15006_v26 }
 0xc50   :  { %9589 = vmatpush.bf16.msrb.mxu2 %v15005_v6 }
 0xc54   :  { %9590 = vmatpush.bf16.msrb.mxu2 %v15004_v36  ;;  %v15038_v36 = vld [vmem:[%s16002_s5 + $0x70] sm:$0xff] }
 0xc9c   :  { %v9236_v24 = vpop.f32.mrf.mxu0 }
 0xca4   :  { %v9238_v56 = vpop.f32.mrf.mxu0 }
 0xca5   :  { %v15016_v56 = vld [vmem:[#allocation38 + $0x44] sm:$0xf] }
 0xca6   :  { %v9122_v38 = vpop.f32.mrf.mxu2  ;;  %v9141_v60 = vpop.f32.mrf.mxu3 }
 0xca7   :  { %v9126_v44 = vpack.c.bf16 %v9122_v38, %v9122_v38  ;;  %v9145_v35 = vpack.c.bf16 %v9141_v60, %v9141_v60  ;;  %v13956_v38 = vld [vmem:[#allocation38 + $0x48] sm:$0xf0] }
 0xca9   :  { %9296 = vmatmul.bf16.vlgmr.msrb.gmra.mxu1 %v9126_v44  ;;  %9374 = vmatmul.bf16.vlgmr.msra.gmra.mxu2 %v9145_v35  ;;  %v13959_v44 = vor.u32 %v15016_v56, %v13956_v38  ;;  %v13946_v35 = vld [vmem:[#allocation38 + $0x30] sm:$0xf] }
 0xcaa   :  { %9876 = vmatpush.bf16.msra.mxu2 %v15039_v31  ;;  %9863 = vmatpush.bf16.msrb.mxu1 %v15031_v9 }
 0xcae   :  { %v9124_v59 = vpop.f32.mrf.mxu2  ;;  %v9143_v53 = vpop.f32.mrf.mxu3  ;;  %9877 = vmatpush.bf16.msra.mxu2 %v15038_v36  ;;  %9864 = vmatpush.bf16.msrb.mxu1 %v15030_v41 }
 0xcaf   :  { %v15015_v59 = vld [vmem:[#allocation38 + $0x34] sm:$0xf0]  ;;  %v15014_v53 = vld [vmem:[#allocation38 + $0x34] sm:$0xf] }
 0xcb0   :  { %v13947_v61 = vor.u32 %v15015_v59, %v13946_v35  ;;  %v13951_v7 = vor.u32 %v15014_v53, %v13948_v40 }
 0xcb2   :  { %9878 = vmatpush.bf16.msra.mxu2 %v15037_v3 }
 0xcb6   :  { %9879 = vmatpush.bf16.msra.mxu2 %v15036_v55 }
 0xcb9   :  { %13919 = vmatmul.msk.bf16.vlgmr.msrb.gmra.mxu2 %vm9576_vm10, %v9539_v5  ;;  %v15029_v5 = vld [vmem:[%s16002_s5 + $0x28] sm:$0xff] }
 0xcba   :  { %9865 = vmatpush.bf16.msrb.mxu1 %v15029_v5  ;;  %9880 = vmatpush.bf16.msra.mxu2 %v15035_v46 }
 0xcbe   :  { %9866 = vmatpush.bf16.msrb.mxu1 %v15028_v58  ;;  %9881 = vmatpush.bf16.msra.mxu2 %v15034_v37 }
 0xcc2   :  { %9867 = vmatpush.bf16.msrb.mxu1 %v15027_v21  ;;  %9882 = vmatpush.bf16.msra.mxu2 %v15033_v0 }
 0xcc6   :  { %9868 = vmatpush.bf16.msrb.mxu1 %v15026_v62  ;;  %9883 = vmatpush.bf16.msra.mxu2 %v15032_v19 }
 0xd26   :  { %v9297_v20 = vpop.f32.mrf.mxu1 }
 0xd27   :  { %v9298_v30 = vadd.f32 %v9297_v20, %v9236_v24  ;;  %v15017_v24 = vld [vmem:[#allocation38 + $0x44] sm:$0xf0] }
 0xd28   :  { %v13955_v60 = vor.u32 %v15017_v24, %v13954_v45  ;;  %v9615_v45 = vld [vmem:[#allocation39] sm:$0x3] }
 0xd29   :  { %v9618_v24 = vperm.slane %v9615_v45, 1 }
 0xd2c   :  { %v9375_v52 = vpop.f32.mrf.mxu2 }
 0xd2d   :  { %v9379_v49 = vadd.f32 %v9375_v52, %v9298_v30  ;;  %v13938_v30 = vld [vmem:[#allocation38 + $0x20] sm:$0xf]  ;;  %v15012_v52 = vld [vmem:[#allocation38 + $0x24] sm:$0xf] }
 0xd2e   :  { %v9299_v28 = vpop.f32.mrf.mxu1 }
 0xd2f   :  { %v9384_v23 = vadd.f32 %v15159_v33, %v9379_v49  ;;  %v15013_v33 = vld [vmem:[#allocation38 + $0x24] sm:$0xf0]  ;;  %v13940_v28 = vld [vmem:[#allocation38 + $0x28] sm:$0xf0] }
 0xd30   :  { %v13939_v49 = vor.u32 %v15013_v33, %v13938_v30 }
 0xd31   :  { %v9385_v57 = vmax.f32 %v9384_v23, 0.0  ;;  %v13943_v23 = vor.u32 %v15012_v52, %v13940_v28 }
 0xd33   :  { %v9386_v34 = vpack.c.bf16 %v9385_v57, %v9385_v57  ;;  %v13930_v57 = vld [vmem:[#allocation38 + $0x10] sm:$0xf] }
 0xd34   :  { %v9377_v47 = vpop.f32.mrf.mxu2 }
 0xd35   :  { %v9393_v42 = vsel %vm8042_vm7, %v9386_v34, 0  ;;  %v15011_v34 = vld [vmem:[#allocation38 + $0x14] sm:$0xf0] }
 0xd36   :  { %9402 = vmatpush.bf16.msrb.mxu3 %v9393_v42  ;;  %9473 = vmatpush.bf16.msra.mxu0 %v9393_v42  ;;  %v13931_v47 = vor.u32 %v15011_v34, %v13930_v57  ;;  %v13932_v42 = vld [vmem:[#allocation38 + $0x18] sm:$0xf0] }
 0xd39   :  { %13866 = vmatmul.msk.bf16.vlgmr.msrb.gmra.mxu3 %vm8038_vm8, %v9388_v1  ;;  %13884 = vmatmul.msk.bf16.vlgmr.msra.gmra.mxu0 %vm8038_vm8, %v9462_v4 }
 0xd3a   :  { %9448 = vmatpush.bf16.msra.mxu3 %v14999_v43  ;;  %9714 = vmatpush.bf16.msrb.mxu0 %v13983_v13  ;;  %v15010_v43 = vld [vmem:[#allocation38 + $0x14] sm:$0xf] }
 0xd3b   :  { %v13935_v1 = vor.u32 %v15010_v43, %v13932_v42 }
 0xd3c   :  { %v9592_v20 = vpop.f32.mrf.mxu2 }
 0xd3e   :  { %9449 = vmatpush.bf16.msra.mxu3 %v14998_v8  ;;  %9715 = vmatpush.bf16.msrb.mxu0 %v13975_v25  ;;  %v13922_v8 = vld [vmem:[#allocation38] sm:$0xf] }
 0xd42   :  { %9450 = vmatpush.bf16.msra.mxu3 %v14997_v50  ;;  %9716 = vmatpush.bf16.msrb.mxu0 %v13967_v22  ;;  %v15009_v50 = vld [vmem:[#allocation38 + $0x4] sm:$0xf0] }
 0xd43   :  { %v13923_v6 = vor.u32 %v15009_v50, %v13922_v8  ;;  %v15024_v22 = vld [vmem:[%s16002_s5] sm:$0xff] }
 0xd44   :  { %v9594_v4 = vpop.f32.mrf.mxu2 }
 0xd46   :  { %9451 = vmatpush.bf16.msra.mxu3 %v14996_v32  ;;  %9717 = vmatpush.bf16.msrb.mxu0 %v13959_v44  ;;  %v9617_v44 = vperm.slane %v9615_v45, 0 }
 0xd4a   :  { %9701 = vmatpush.bf16.msrb.mxu3 %v13979_v18  ;;  %9718 = vmatpush.bf16.msrb.mxu0 %v13951_v7 }
 0xd4e   :  { %9702 = vmatpush.bf16.msrb.mxu3 %v13971_v48  ;;  %9719 = vmatpush.bf16.msrb.mxu0 %v13943_v23 }
 0xd52   :  { %9703 = vmatpush.bf16.msrb.mxu3 %v13963_v54  ;;  %9720 = vmatpush.bf16.msrb.mxu0 %v13935_v1  ;;  %v15025_v54 = vld [vmem:[%s16002_s5 + $0x8] sm:$0xff]  ;;  %s15858_s5 = smov [#allocation41]  }
 0xd53   :  { %9869 = vmatpush.bf16.msrb.mxu1 %v15025_v54  ;;  %s9904_s0 = sshll.u32 %s15858_s5, 4  ;;  %s9905_s0 = int_to_ptr.vmem [resolvable:$true] %s9904_s0 }
 0xd56   :  { %9704 = vmatpush.bf16.msrb.mxu3 %v13955_v60  ;;  %9721 = vmatpush.bf16.msrb.mxu0 %v13927_v10 }
 0xd57   :  { %9870 = vmatpush.bf16.msrb.mxu1 %v15024_v22 }
 0xd5a   :  { %9705 = vmatpush.bf16.msrb.mxu3 %v13947_v61 }
 0xd5e   :  { %9706 = vmatpush.bf16.msrb.mxu3 %v13939_v49 }
 0xd62   :  { %9707 = vmatpush.bf16.msrb.mxu3 %v13931_v47 }
 0xd66   :  { %9708 = vmatpush.bf16.msrb.mxu3 %v13923_v6 }
 0xdb6   :  { %v9475_v16 = vpop.f32.mrf.mxu0 }
 0xdb7   :  { %v9479_v15 = vpack.c.bf16 %v9475_v16, %v9475_v16 }
 0xdb9   :  { %13901 = vmatmul.msk.bf16.vlgmr.msra.gmra.mxu1 %vm514_vm0, %v9479_v15 }
 0xdbc   :  { %v9404_v11 = vpop.f32.mrf.mxu3 }
 0xdbd   :  { %v9408_v27 = vpack.c.bf16 %v9404_v11, %v9404_v11 }
 0xdbe   :  { %v9477_v14 = vpop.f32.mrf.mxu0 }
 0xdbf   :  { %13883 = vmatmul.msk.bf16.vlgmr.msra.gmra.mxu3 %vm514_vm0, %v9408_v27 }
 0xdc4   :  { %v9406_v26 = vpop.f32.mrf.mxu3 }
 0xe36   :  { %v9525_v32 = vpop.f32.mrf.mxu1 }
 0xe3e   :  { %v9527_v18 = vpop.f32.mrf.mxu1 }
 0xe42   :  { %v9453_v17 = vpop.f32.mrf.mxu3 }
 0xe43   :  { %v9460_v13 = vadd.f32 %v15160_v29, %v9453_v17 }
 0xe45   :  { %v9529_v51 = vadd.f32 %v9525_v32, %v9460_v13 }
 0xe47   :  { %v9596_v2 = vadd.f32 %v9592_v20, %v9529_v51 }
 0xe49   :  { %v9597_v48 = vmax.f32 %v9596_v2, 0.0 }
 0xe4a   :  { %v9455_v25 = vpop.f32.mrf.mxu3 }
 0xe4b   :  { %v9598_v12 = vpack.c.bf16 %v9597_v48, %v9597_v48 }
 0xe4d   :  { %9709 = vmatmul.bf16.vlgmr.msrb.gmra.mxu3 %v9598_v12  ;;  %9722 = vmatmul.bf16.vlgmr.msrb.gmra.mxu0 %v9598_v12 }
 0xeca   :  { %v9723_v56 = vpop.f32.mrf.mxu0 }
 0xecb   :  { %v9724_v38 = vadd.f32 %v9723_v56, %v9618_v24 }
 0xecd   :  { %v9728_v60 = vmax.f32 %v9724_v38, 0.0 }
 0xecf   :  { %v9730_v35 = vpack.c.bf16 %v9728_v60, %v9728_v60  ;;  %v9893_v61 = vrot.slane %v9728_v60, 6 }
 0xed0   :  { %v9710_v59 = vpop.f32.mrf.mxu3 }
 0xed1   :  { %v9711_v53 = vadd.f32 %v9710_v59, %v9617_v44  ;;  %9884 = vmatmul.bf16.vlgmr.msra.gmra.mxu2 %v9730_v35 }
 0xed2   :  { %v9725_v40 = vpop.f32.mrf.mxu0 }
 0xed3   :  { %v9727_v7 = vmax.f32 %v9711_v53, 0.0 }
 0xed5   :  { %v9729_v16 = vpack.c.bf16 %v9727_v7, %v9727_v7  ;;  %v9894_v15 = vsel %vm8042_vm7, %v9727_v7, %v9893_v61 }
 0xed6   :  { %9896 = vst [vmem:[#allocation41] sm:$0xf] %v9894_v15 }
 0xed7   :  { %9871 = vmatmul.bf16.vlgmr.msrb.gmra.mxu1 %v9729_v16 }
 0xed8   :  { %v9712_v11 = vpop.f32.mrf.mxu3 }
 0xed9   :  { %15761 = shalt.err (!%p15758_p12)
}
 0xeda   :  { %9909 = dma.vmem_to_hbm [thread:$0]  %s9905_s0, 64, %s9907_s10, [#allocation5]   ;;  %v15161_v27 = vld [vmem:[#allocation2] ss:$0 sm:$0xff]  ;;  %vm9889_vm11 = vcmask 1024  }
 0xf54   :  { %v9872_v14 = vpop.f32.mrf.mxu1  ;;  %v9885_v26 = vpop.f32.mrf.mxu2 }
 0xf55   :  { %v9873_v20 = vadd.f32 %v15161_v27, %v9872_v14 }
 0xf57   :  { %v9886_v30 = vadd.f32 %v9885_v26, %v9873_v20 }
 0xf59   :  { %9890 = vst.msk [vmem:[%s16010_s12] sm:$0x3] %vm9889_vm11, %v9886_v30 }
 0xf5c   :  { %v9874_v33 = vpop.f32.mrf.mxu1  ;;  %v9887_v52 = vpop.f32.mrf.mxu2 }
 0xf5d   :  { %15788 = dma.done.wait [#allocation5], 64  }
 0xf5e   :  { %15789 = vsyncadd [#allocation5], 4294967232 }
 0xf5f   :  { %9916 = vsyncpa [#allocation4], 1 }
 0xf60   :  { %9917 = vsyncpa [#allocation7], 1 }
 0xf61   :  { %9918 = vsyncpa [#allocation10], 1 }
 0xf62   :  { %9919 = vsyncpa [#allocation13], 1 }
 0xf63   :  { %9920 = vsyncpa [#allocation16], 1 }
 0xf64   :  { %9921 = vsyncpa [#allocation19], 1 }
 0xf65   :  { %9922 = vsyncpa [#allocation22], 1 }
 0xf66   :  { %9923 = vsyncpa [#allocation25], 1 }
 0xf67   :  { %9924 = vsyncpa [#allocation28], 1 }
 0xf68   :  { %9925 = vsyncpa [#allocation31], 1 }
 0xf69   :  { %9926 = vsyncpa [#allocation34], 1 }
 0xf6a   :  { %9927 = vsyncpa [#allocation37], 1 }
 0xf6b   :  { %9928 = vsyncpa [#allocation40], 1 }
 0xf6c   :  { %9929 = vsyncpa [#allocation5], 1 }

</bundles_post_ra>
